<compile_context>
chip_gen: v7x
topology: tpu7x:2x2x1
jax: 0.10.0
libtpu: 0.0.40
codegen_flags: <defaults>
</compile_context>

<pallas_src>
import jax
import jax.numpy as jnp
from jax import lax
from jax.experimental import pallas as pl
from jax.experimental.pallas import tpu as pltpu

NF = 64
IN_FEATURES = 3
OUT_FEATURES = 8
BN_EPS = 1e-5


def _relu(x):
    return jnp.maximum(x, 0.0)


def _round_up(v, m):
    return ((v + m - 1) // m) * m


def _tpu_mem_config():
    """(max_point_tile, vmem_limit_bytes), generation-aware."""
    cap = 128 * 1024 * 1024
    try:
        info = pltpu.get_tpu_info()
        cap = int(getattr(info, "vmem_capacity_bytes", cap))
    except Exception:
        pass
    if cap <= 64 * 1024 * 1024:          # v7x-class: 64 MiB physical VMEM
        return 2048, min(cap - 16 * 1024 * 1024, 48 * 1024 * 1024)
    return 4096, 96 * 1024 * 1024        # v5e/v6e: 128 MiB physical VMEM


# ------------------------------- kernels ------------------------------------


def _make_backbone_kernel(relu_last, per_batch_w1, n_valid, tile_n):
    """Conv chain + running max-pool over grid=(B, num_point_tiles)."""
    need_mask = (n_valid % tile_n) != 0

    def kernel(x_ref, w1, t1, w2, t2, w3, t3, g_ref, mx_ref):
        n = pl.program_id(1)

        @pl.when(n == 0)
        def _init():
            mx_ref[...] = jnp.full(mx_ref.shape, -jnp.inf, dtype=mx_ref.dtype)

        x = x_ref[0]                                       # (TN, Cin) f32
        w1v = w1[0] if per_batch_w1 else w1[...]           # (Cin, 64), BN scale folded

        # conv1 (tiny K, f32); conv2/conv3 bf16 operands, f32 MXU accumulation.
        h = _relu(jnp.dot(x, w1v, preferred_element_type=jnp.float32) + t1[...])
        h = _relu(jnp.dot(h.astype(w2.dtype), w2[...],
                          preferred_element_type=jnp.float32) + t2[...])
        z = jnp.dot(h.astype(w3.dtype), w3[...],
                    preferred_element_type=jnp.float32)    # (TN, C3); shift/relu hoisted

        if need_mask:
            row = lax.broadcasted_iota(jnp.int32, (tile_n, 1), 0) + n * tile_n
            z = jnp.where(row < n_valid, z, -jnp.inf)      # padded rows never win the max

        # Running max: reduce across vregs (VPU elementwise) into the (8, C3) scratch;
        # the cross-sublane 8->1 reduce (XLU) is deferred to the finalize step.
        zr = z.reshape(tile_n // 8, 8, z.shape[-1])
        mx_ref[...] = jnp.maximum(mx_ref[...], jnp.max(zr, axis=0))

        @pl.when(n == pl.num_programs(1) - 1)
        def _finalize():
            # max(z + t3) == max(z) + t3 ; max(relu(z + t3)) == relu(max(z) + t3)
            pooled = jnp.max(mx_ref[...], axis=0, keepdims=True) + t3[...]
            if relu_last:
                pooled = _relu(pooled)
            g_ref[0] = pooled

    return kernel


def _head_kernel(g_ref, w1, t1, w2, t2, w3, b3, out_ref):
    """Batched MLP head: [B, C] -> [B, out] in a single grid step (f32).

    nn.Dropout between fc2 and its norm is identity in eval mode.
    # TODO(synk): training-mode dropout / batch-statistics BatchNorm not implemented.
    """
    g = g_ref[...]
    h = _relu(jnp.dot(g, w1[...], preferred_element_type=jnp.float32) + t1[...])
    h = _relu(jnp.dot(h, w2[...], preferred_element_type=jnp.float32) + t2[...])
    out_ref[...] = jnp.dot(h, w3[...], preferred_element_type=jnp.float32) + b3[...]


# --------------------------- wrapper / glue ----------------------------------


def pointnet_encoder_forward(x, params):
    """x: [B, npoints, in_features] -> [B, out_features] (matches the PyTorch forward)."""
    B, N, C = x.shape
    max_tile, vmem_limit = _tpu_mem_config()

    TN = min(max_tile, _round_up(max(N, 8), 8))
    N_pad = _round_up(N, TN)
    NT = N_pad // TN
    if N_pad != N:
        x = jnp.pad(x, ((0, 0), (0, N_pad - N), (0, 0)))

    stn_bb = params["stn_backbone"]      # [w1, t1, w2, t2, w3, t3]
    stn_head = params["stn_head"]        # [w1, t1, w2, t2, w3, b3]
    feat_bb = params["feat_backbone"]
    enc_head = params["enc_head"]

    c3_stn = stn_bb[4].shape[1]          # 1024
    c3_feat = feat_bb[4].shape[1]        # 16 * nf
    out_features = enc_head[4].shape[1]

    bb_cparams = pltpu.CompilerParams(
        dimension_semantics=("parallel", "arbitrary"),
        vmem_limit_bytes=vmem_limit)
    head_cparams = pltpu.CompilerParams(
        dimension_semantics=("arbitrary",),
        vmem_limit_bytes=vmem_limit)

    def _weight_spec(p):                 # full block, grid=(B, NT)
        nd = p.ndim
        return pl.BlockSpec(p.shape, lambda b, n, _nd=nd: (0,) * _nd)

    def _full_spec(p):                   # full block, grid=(1,)
        nd = p.ndim
        return pl.BlockSpec(p.shape, lambda i, _nd=nd: (0,) * _nd)

    # ---- STN backbone: x -> pooled feature g_stn [B, 1, 1024] ----
    g_stn = pl.pallas_call(
        _make_backbone_kernel(relu_last=True, per_batch_w1=False,
                              n_valid=N, tile_n=TN),
        out_shape=jax.ShapeDtypeStruct((B, 1, c3_stn), jnp.float32),
        grid=(B, NT),
        in_specs=[pl.BlockSpec((1, TN, C), lambda b, n: (b, n, 0))]
        + [_weight_spec(p) for p in stn_bb],
        out_specs=pl.BlockSpec((1, 1, c3_stn), lambda b, n: (b, 0, 0)),
        scratch_shapes=[pltpu.VMEM((8, c3_stn), jnp.float32)],
        compiler_params=bb_cparams,
    )(x, *stn_bb)

    # ---- STN head (batched over B): [B,1024] -> t9 [B,9] (identity folded into bias) ----
    g_stn2 = g_stn.reshape(B, c3_stn)
    t9 = pl.pallas_call(
        _head_kernel,
        out_shape=jax.ShapeDtypeStruct((B, 9), jnp.float32),
        grid=(1,),
        in_specs=[_full_spec(g_stn2)] + [_full_spec(p) for p in stn_head],
        out_specs=pl.BlockSpec((B, 9), lambda i: (0, 0)),
        compiler_params=head_cparams,
    )(g_stn2, *stn_head)

    trans = t9.reshape(B, 3, 3)          # glue: x.view(-1, 3, 3)

    # Fold the learned 3x3 transform into the first feat conv weight once per batch
    # (tiny XLA einsum): (x @ trans) @ W1 == x @ (trans @ W1).  W1 already has the
    # eval-mode BN scale folded in.
    w1_fused = jnp.einsum('bij,jo->bio', trans, feat_bb[0])      # (B, 3, nf)

    # ---- feat backbone (fused conv1 weight): x -> g_feat [B, 1, 16*nf] ----
    g_feat = pl.pallas_call(
        _make_backbone_kernel(relu_last=False, per_batch_w1=True,
                              n_valid=N, tile_n=TN),
        out_shape=jax.ShapeDtypeStruct((B, 1, c3_feat), jnp.float32),
        grid=(B, NT),
        in_specs=[pl.BlockSpec((1, TN, C), lambda b, n: (b, n, 0)),
                  pl.BlockSpec((1, 3, feat_bb[0].shape[1]), lambda b, n: (b, 0, 0))]
        + [_weight_spec(p) for p in feat_bb[1:]],
        out_specs=pl.BlockSpec((1, 1, c3_feat), lambda b, n: (b, 0, 0)),
        scratch_shapes=[pltpu.VMEM((8, c3_feat), jnp.float32)],
        compiler_params=bb_cparams,
    )(x, w1_fused, *feat_bb[1:])

    # ---- encoder head (batched over B): [B,1024] -> [B,out_features] ----
    g_feat2 = g_feat.reshape(B, c3_feat)
    out = pl.pallas_call(
        _head_kernel,
        out_shape=jax.ShapeDtypeStruct((B, out_features), jnp.float32),
        grid=(1,),
        in_specs=[_full_spec(g_feat2)] + [_full_spec(p) for p in enc_head],
        out_specs=pl.BlockSpec((B, out_features), lambda i: (0, 0)),
        compiler_params=head_cparams,
    )(g_feat2, *enc_head)

    return out


# ----------------------- deterministic parameter init ------------------------


def _init_conv_bn(key, cin, cout, w_dtype=jnp.float32):
    """Conv1d(cin,cout,1) + eval-mode BatchNorm1d(cout) folded into (W*scale, shift)."""
    kw, kb, kg, kbe = jax.random.split(key, 4)
    w = 0.1 * jax.random.normal(kw, (cin, cout), jnp.float32)     # conv weight, transposed
    b = 0.1 * jax.random.normal(kb, (cout,), jnp.float32)         # conv bias
    gamma = 1.0 + 0.1 * jax.random.normal(kg, (cout,), jnp.float32)
    beta = 0.1 * jax.random.normal(kbe, (cout,), jnp.float32)
    running_mean = jnp.zeros((cout,), jnp.float32)
    running_var = jnp.ones((cout,), jnp.float32)
    scale = gamma / jnp.sqrt(running_var + BN_EPS)
    w_folded = (w * scale[None, :]).astype(w_dtype)               # exact eval-mode fold
    shift = beta + scale * (b - running_mean)
    return w_folded, shift.reshape(1, cout)


def _init_conv(key, cin, cout):
    kw, kb = jax.random.split(key)
    w = 0.1 * jax.random.normal(kw, (cin, cout), jnp.float32)
    b = 0.1 * jax.random.normal(kb, (cout,), jnp.float32)
    return w, b.reshape(1, cout)


def init_params(key, nf=NF, in_features=IN_FEATURES, out_features=OUT_FEATURES):
    keys = jax.random.split(key, 12)
    bf16 = jnp.bfloat16

    # STN3d: 3 -> 64 -> 128 -> 1024 backbone, 1024 -> 512 -> 256 -> 9 head.
    stn_backbone = []
    stn_backbone += list(_init_conv_bn(keys[0], 3, 64))
    stn_backbone += list(_init_conv_bn(keys[1], 64, 128, w_dtype=bf16))
    stn_backbone += list(_init_conv_bn(keys[2], 128, 1024, w_dtype=bf16))

    stn_head = []
    stn_head += list(_init_conv_bn(keys[3], 1024, 512))
    stn_head += list(_init_conv_bn(keys[4], 512, 256))
    w, b = _init_conv(keys[5], 256, 9)
    iden = jnp.array([1, 0, 0, 0, 1, 0, 0, 0, 1], jnp.float32).reshape(1, 9)
    stn_head += [w, b + iden]                 # identity folded into the fc3 bias

    # PointNetfeat backbone + PointNetEncoder head.
    feat_backbone = []
    feat_backbone += list(_init_conv_bn(keys[6], in_features, nf))
    feat_backbone += list(_init_conv_bn(keys[7], nf, 2 * nf, w_dtype=bf16))
    feat_backbone += list(_init_conv_bn(keys[8], 2 * nf, 16 * nf, w_dtype=bf16))

    enc_head = []
    enc_head += list(_init_conv_bn(keys[9], 16 * nf, 8 * nf))
    enc_head += list(_init_conv_bn(keys[10], 8 * nf, 4 * nf))
    w, b = _init_conv(keys[11], 4 * nf, out_features)
    enc_head += [w, b]

    return {"stn_backbone": stn_backbone, "stn_head": stn_head,
            "feat_backbone": feat_backbone, "enc_head": enc_head}


# ---------------------------- pure-JAX reference ------------------------------


def reference_forward(x, params):
    sb = params["stn_backbone"]
    sh = params["stn_head"]
    fb = params["feat_backbone"]
    eh = params["enc_head"]

    def lin(h, w, t):
        return h @ w.astype(jnp.float32) + t

    h = _relu(lin(x, sb[0], sb[1]))
    h = _relu(lin(h, sb[2], sb[3]))
    h = _relu(lin(h, sb[4], sb[5]))
    g = jnp.max(h, axis=1, keepdims=True)
    g = _relu(lin(g, sh[0], sh[1]))
    g = _relu(lin(g, sh[2], sh[3]))
    t9 = g @ sh[4] + sh[5]
    trans = t9.reshape(-1, 3, 3)
    xt = jnp.einsum('bnc,bcd->bnd', x, trans)

    h = _relu(lin(xt, fb[0], fb[1]))
    h = _relu(lin(h, fb[2], fb[3]))
    h = lin(h, fb[4], fb[5])
    g = jnp.max(h, axis=1, keepdims=True)
    g = _relu(lin(g, eh[0], eh[1]))
    g = _relu(lin(g, eh[2], eh[3]))
    out = g @ eh[4] + eh[5]
    return out[:, 0, :]


# ----------------------------------- main -------------------------------------


if __name__ == "__main__":
    key = jax.random.PRNGKey(0)
    kx, kp = jax.random.split(key)
    B, N = 2, 16                               # batch=2, npoints=16, in_features=3
    x = jax.random.normal(kx, (B, N, IN_FEATURES), jnp.float32)
    params = init_params(kp)

    fwd = jax.jit(pointnet_encoder_forward)
    out = jax.block_until_ready(fwd(x, params))

    ref = reference_forward(x, params)
    assert out.shape == (B, OUT_FEATURES), out.shape
    assert bool(jnp.all(jnp.isfinite(out)))
    # bf16 operands on the big backbone matmuls vs a plain-f32 reference:
    # validate with a scale-normalized max error (<= 2% of the output scale).
    rel_err = float(jnp.max(jnp.abs(out - ref)) / (jnp.max(jnp.abs(ref)) + 1e-6))
    assert rel_err < 2e-2, (rel_err, out, ref)
    print("KERNEL_OK")
</pallas_src>

<mosaic_0001>
module attributes {stable_mosaic.version = 11 : i64} {
  func.func @kernel(%arg0: i32, %arg1: i32, %arg2: memref<1x16x3xf32, #tpu.memory_space<vmem>>, %arg3: memref<3x64xf32, #tpu.memory_space<vmem>>, %arg4: memref<1x64xf32, #tpu.memory_space<vmem>>, %arg5: memref<64x128xbf16, #tpu.memory_space<vmem>>, %arg6: memref<1x128xf32, #tpu.memory_space<vmem>>, %arg7: memref<128x1024xbf16, #tpu.memory_space<vmem>>, %arg8: memref<1x1024xf32, #tpu.memory_space<vmem>>, %arg9: memref<1x1x1024xf32, #tpu.memory_space<vmem>>, %arg10: memref<8x1024xf32, #tpu.memory_space<vmem>>) attributes {dimension_semantics = [#tpu.dimension_semantics<parallel>, #tpu.dimension_semantics<arbitrary>], iteration_bounds = array<i64: 2, 1>, scalar_prefetch = 0 : i64, scratch_operands = 1 : i64, tpu.core_type = #tpu.core_type<tc>, window_params = [{transform_indices = @transform_0, window_bounds = array<i64: 1, 16, 3>}, {pipeline_mode = #tpu.pipeline_mode<synchronous>, transform_indices = @transform_1, window_bounds = array<i64: 3, 64>}, {pipeline_mode = #tpu.pipeline_mode<synchronous>, transform_indices = @transform_2, window_bounds = array<i64: 1, 64>}, {pipeline_mode = #tpu.pipeline_mode<synchronous>, transform_indices = @transform_3, window_bounds = array<i64: 64, 128>}, {pipeline_mode = #tpu.pipeline_mode<synchronous>, transform_indices = @transform_4, window_bounds = array<i64: 1, 128>}, {pipeline_mode = #tpu.pipeline_mode<synchronous>, transform_indices = @transform_5, window_bounds = array<i64: 128, 1024>}, {pipeline_mode = #tpu.pipeline_mode<synchronous>, transform_indices = @transform_6, window_bounds = array<i64: 1, 1024>}, {transform_indices = @transform_7, window_bounds = array<i64: 1, 1, 1024>}]} {
    %c0_i32 = arith.constant 0 : i32
    %0 = arith.cmpi eq, %arg1, %c0_i32 : i32
    %1 = arith.extui %0 : i1 to i32
    %c0_i32_0 = arith.constant 0 : i32
    %2 = arith.cmpi ne, %1, %c0_i32_0 : i32
    scf.if %2 {
      %cst_24 = arith.constant 0xFF800000 : f32
      %31 = vector.broadcast %cst_24 : f32 to vector<8x1024xf32>
      %c0_25 = arith.constant 0 : index
      %c0_26 = arith.constant 0 : index
      %32 = vector.load %arg10[%c0_25, %c0_26] : memref<8x1024xf32, #tpu.memory_space<vmem>>, vector<8x1024xf32>
      tpu.vector_store %arg10[%c0_25, %c0_26], %31 {strides = array<i32>} : memref<8x1024xf32, #tpu.memory_space<vmem>>, vector<8x1024xf32>,
    } else {
    }
    %c0 = arith.constant 0 : index
    %c0_1 = arith.constant 0 : index
    %c0_2 = arith.constant 0 : index
    %3 = vector.load %arg2[%c0, %c0_1, %c0_2] : memref<1x16x3xf32, #tpu.memory_space<vmem>>, vector<1x16x3xf32>
    %4 = vector.shape_cast %3 : vector<1x16x3xf32> to vector<16x3xf32>
    %c0_3 = arith.constant 0 : index
    %c0_4 = arith.constant 0 : index
    %5 = vector.load %arg3[%c0_3, %c0_4] : memref<3x64xf32, #tpu.memory_space<vmem>>, vector<3x64xf32>
    %cst = arith.constant dense<0.000000e+00> : vector<16x64xf32>
    %6 = tpu.matmul %4, %5, %cst {dimension_numbers = #tpu.dot_dimension_numbers<[1], [0], [0], [1], [0, 0, 1, 1], [], []>} : vector<16x3xf32>, vector<3x64xf32>, vector<16x64xf32> -> vector<16x64xf32>
    %c0_5 = arith.constant 0 : index
    %c0_6 = arith.constant 0 : index
    %7 = vector.load %arg4[%c0_5, %c0_6] : memref<1x64xf32, #tpu.memory_space<vmem>>, vector<1x64xf32>
    %8 = vector.broadcast %7 : vector<1x64xf32> to vector<16x64xf32>
    %9 = arith.addf %6, %8 : vector<16x64xf32>
    %cst_7 = arith.constant 0.000000e+00 : f32
    %10 = vector.broadcast %cst_7 : f32 to vector<16x64xf32>
    %11 = arith.maximumf %9, %10 : vector<16x64xf32>
    %12 = arith.truncf %11 : vector<16x64xf32> to vector<16x64xbf16>
    %c0_8 = arith.constant 0 : index
    %c0_9 = arith.constant 0 : index
    %13 = vector.load %arg5[%c0_8, %c0_9] : memref<64x128xbf16, #tpu.memory_space<vmem>>, vector<64x128xbf16>
    %cst_10 = arith.constant dense<0.000000e+00> : vector<16x128xf32>
    %14 = tpu.matmul %12, %13, %cst_10 {dimension_numbers = #tpu.dot_dimension_numbers<[1], [0], [0], [1], [0, 0, 1, 1], [], []>} : vector<16x64xbf16>, vector<64x128xbf16>, vector<16x128xf32> -> vector<16x128xf32>
    %c0_11 = arith.constant 0 : index
    %c0_12 = arith.constant 0 : index
    %15 = vector.load %arg6[%c0_11, %c0_12] : memref<1x128xf32, #tpu.memory_space<vmem>>, vector<1x128xf32>
    %16 = vector.broadcast %15 : vector<1x128xf32> to vector<16x128xf32>
    %17 = arith.addf %14, %16 : vector<16x128xf32>
    %cst_13 = arith.constant 0.000000e+00 : f32
    %18 = vector.broadcast %cst_13 : f32 to vector<16x128xf32>
    %19 = arith.maximumf %17, %18 : vector<16x128xf32>
    %20 = arith.truncf %19 : vector<16x128xf32> to vector<16x128xbf16>
    %c0_14 = arith.constant 0 : index
    %c0_15 = arith.constant 0 : index
    %21 = vector.load %arg7[%c0_14, %c0_15] : memref<128x1024xbf16, #tpu.memory_space<vmem>>, vector<128x1024xbf16>
    %cst_16 = arith.constant dense<0.000000e+00> : vector<16x1024xf32>
    %22 = tpu.matmul %20, %21, %cst_16 {dimension_numbers = #tpu.dot_dimension_numbers<[1], [0], [0], [1], [0, 0, 1, 1], [], []>} : vector<16x128xbf16>, vector<128x1024xbf16>, vector<16x1024xf32> -> vector<16x1024xf32>
    %23 = vector.shape_cast %22 : vector<16x1024xf32> to vector<2x8x1024xf32>
    %c0_17 = arith.constant 0 : index
    %c0_18 = arith.constant 0 : index
    %24 = vector.load %arg10[%c0_17, %c0_18] : memref<8x1024xf32, #tpu.memory_space<vmem>>, vector<8x1024xf32>
    %cst_19 = arith.constant dense<0xFF800000> : vector<8x1024xf32>
    %25 = vector.multi_reduction <maximumf>, %23, %cst_19 [0] : vector<2x8x1024xf32> to vector<8x1024xf32>
    %26 = arith.maximumf %24, %25 : vector<8x1024xf32>
    %c0_20 = arith.constant 0 : index
    %c0_21 = arith.constant 0 : index
    %27 = vector.load %arg10[%c0_20, %c0_21] : memref<8x1024xf32, #tpu.memory_space<vmem>>, vector<8x1024xf32>
    tpu.vector_store %arg10[%c0_20, %c0_21], %26 {strides = array<i32>} : memref<8x1024xf32, #tpu.memory_space<vmem>>, vector<8x1024xf32>,
    %c0_i32_22 = arith.constant 0 : i32
    %28 = arith.cmpi eq, %arg1, %c0_i32_22 : i32
    %29 = arith.extui %28 : i1 to i32
    %c0_i32_23 = arith.constant 0 : i32
    %30 = arith.cmpi ne, %29, %c0_i32_23 : i32
    scf.if %30 {
      %c0_24 = arith.constant 0 : index
      %c0_25 = arith.constant 0 : index
      %31 = vector.load %arg10[%c0_24, %c0_25] : memref<8x1024xf32, #tpu.memory_space<vmem>>, vector<8x1024xf32>
      %cst_26 = arith.constant dense<0xFF800000> : vector<1024xf32>
      %32 = vector.multi_reduction <maximumf>, %31, %cst_26 [0] : vector<8x1024xf32> to vector<1024xf32>
      %33 = vector.shape_cast %32 : vector<1024xf32> to vector<1x1024xf32>
      %c0_27 = arith.constant 0 : index
      %c0_28 = arith.constant 0 : index
      %34 = vector.load %arg8[%c0_27, %c0_28] : memref<1x1024xf32, #tpu.memory_space<vmem>>, vector<1x1024xf32>
      %35 = arith.addf %33, %34 : vector<1x1024xf32>
      %cst_29 = arith.constant 0.000000e+00 : f32
      %36 = vector.broadcast %cst_29 : f32 to vector<1x1024xf32>
      %37 = arith.maximumf %35, %36 : vector<1x1024xf32>
      %c0_30 = arith.constant 0 : index
      %c0_31 = arith.constant 0 : index
      %c0_32 = arith.constant 0 : index
      %38 = vector.load %arg9[%c0_30, %c0_31, %c0_32] : memref<1x1x1024xf32, #tpu.memory_space<vmem>>, vector<1x1x1024xf32>
      %39 = vector.shape_cast %38 : vector<1x1x1024xf32> to vector<1x1024xf32>
      %40 = vector.shape_cast %37 : vector<1x1024xf32> to vector<1x1x1024xf32>
      tpu.vector_store %arg9[%c0_30, %c0_31, %c0_32], %40 {strides = array<i32>} : memref<1x1x1024xf32, #tpu.memory_space<vmem>>, vector<1x1x1024xf32>,
    } else {
    }
    return
  }
  func.func @transform_0(%arg0: i32, %arg1: i32) -> (i32, i32, i32) {
    %c0_i32 = arith.constant 0 : i32
    %c0_i32_0 = arith.constant 0 : i32
    return %arg0, %arg1, %c0_i32 : i32, i32, i32
  }
  func.func @transform_1(%arg0: i32, %arg1: i32) -> (i32, i32) {
    %c0_i32 = arith.constant 0 : i32
    %c0_i32_0 = arith.constant 0 : i32
    %c0_i32_1 = arith.constant 0 : i32
    return %c0_i32, %c0_i32_0 : i32, i32
  }
  func.func @transform_2(%arg0: i32, %arg1: i32) -> (i32, i32) {
    %c0_i32 = arith.constant 0 : i32
    %c0_i32_0 = arith.constant 0 : i32
    %c0_i32_1 = arith.constant 0 : i32
    return %c0_i32, %c0_i32_0 : i32, i32
  }
  func.func @transform_3(%arg0: i32, %arg1: i32) -> (i32, i32) {
    %c0_i32 = arith.constant 0 : i32
    %c0_i32_0 = arith.constant 0 : i32
    %c0_i32_1 = arith.constant 0 : i32
    return %c0_i32, %c0_i32_0 : i32, i32
  }
  func.func @transform_4(%arg0: i32, %arg1: i32) -> (i32, i32) {
    %c0_i32 = arith.constant 0 : i32
    %c0_i32_0 = arith.constant 0 : i32
    %c0_i32_1 = arith.constant 0 : i32
    return %c0_i32, %c0_i32_0 : i32, i32
  }
  func.func @transform_5(%arg0: i32, %arg1: i32) -> (i32, i32) {
    %c0_i32 = arith.constant 0 : i32
    %c0_i32_0 = arith.constant 0 : i32
    %c0_i32_1 = arith.constant 0 : i32
    return %c0_i32, %c0_i32_0 : i32, i32
  }
  func.func @transform_6(%arg0: i32, %arg1: i32) -> (i32, i32) {
    %c0_i32 = arith.constant 0 : i32
    %c0_i32_0 = arith.constant 0 : i32
    %c0_i32_1 = arith.constant 0 : i32
    return %c0_i32, %c0_i32_0 : i32, i32
  }
  func.func @transform_7(%arg0: i32, %arg1: i32) -> (i32, i32, i32) {
    %c0_i32 = arith.constant 0 : i32
    %c0_i32_0 = arith.constant 0 : i32
    %c0_i32_1 = arith.constant 0 : i32
    return %arg0, %c0_i32, %c0_i32_0 : i32, i32, i32
  }
}

module attributes {stable_mosaic.version = 11 : i64} {
  func.func @_head_kernel(%arg0: i32, %arg1: memref<2x1024xf32, #tpu.memory_space<vmem>>, %arg2: memref<1024x512xf32, #tpu.memory_space<vmem>>, %arg3: memref<1x512xf32, #tpu.memory_space<vmem>>, %arg4: memref<512x256xf32, #tpu.memory_space<vmem>>, %arg5: memref<1x256xf32, #tpu.memory_space<vmem>>, %arg6: memref<256x9xf32, #tpu.memory_space<vmem>>, %arg7: memref<1x9xf32, #tpu.memory_space<vmem>>, %arg8: memref<2x9xf32, #tpu.memory_space<vmem>>) attributes {dimension_semantics = [#tpu.dimension_semantics<arbitrary>], iteration_bounds = array<i64: 1>, scalar_prefetch = 0 : i64, scratch_operands = 0 : i64, tpu.core_type = #tpu.core_type<tc>, window_params = [{pipeline_mode = #tpu.pipeline_mode<synchronous>, transform_indices = @transform_0, window_bounds = array<i64: 2, 1024>}, {pipeline_mode = #tpu.pipeline_mode<synchronous>, transform_indices = @transform_1, window_bounds = array<i64: 1024, 512>}, {pipeline_mode = #tpu.pipeline_mode<synchronous>, transform_indices = @transform_2, window_bounds = array<i64: 1, 512>}, {pipeline_mode = #tpu.pipeline_mode<synchronous>, transform_indices = @transform_3, window_bounds = array<i64: 512, 256>}, {pipeline_mode = #tpu.pipeline_mode<synchronous>, transform_indices = @transform_4, window_bounds = array<i64: 1, 256>}, {pipeline_mode = #tpu.pipeline_mode<synchronous>, transform_indices = @transform_5, window_bounds = array<i64: 256, 9>}, {pipeline_mode = #tpu.pipeline_mode<synchronous>, transform_indices = @transform_6, window_bounds = array<i64: 1, 9>}, {pipeline_mode = #tpu.pipeline_mode<synchronous>, transform_indices = @transform_7, window_bounds = array<i64: 2, 9>}]} {
    %c0 = arith.constant 0 : index
    %c0_0 = arith.constant 0 : index
    %0 = vector.load %arg1[%c0, %c0_0] : memref<2x1024xf32, #tpu.memory_space<vmem>>, vector<2x1024xf32>
    %c0_1 = arith.constant 0 : index
    %c0_2 = arith.constant 0 : index
    %1 = vector.load %arg2[%c0_1, %c0_2] : memref<1024x512xf32, #tpu.memory_space<vmem>>, vector<1024x512xf32>
    %cst = arith.constant dense<0.000000e+00> : vector<2x512xf32>
    %2 = tpu.matmul %0, %1, %cst {dimension_numbers = #tpu.dot_dimension_numbers<[1], [0], [0], [1], [0, 0, 1, 1], [], []>} : vector<2x1024xf32>, vector<1024x512xf32>, vector<2x512xf32> -> vector<2x512xf32>
    %c0_3 = arith.constant 0 : index
    %c0_4 = arith.constant 0 : index
    %3 = vector.load %arg3[%c0_3, %c0_4] : memref<1x512xf32, #tpu.memory_space<vmem>>, vector<1x512xf32>
    %4 = vector.broadcast %3 : vector<1x512xf32> to vector<2x512xf32>
    %5 = arith.addf %2, %4 : vector<2x512xf32>
    %cst_5 = arith.constant 0.000000e+00 : f32
    %6 = vector.broadcast %cst_5 : f32 to vector<2x512xf32>
    %7 = arith.maximumf %5, %6 : vector<2x512xf32>
    %c0_6 = arith.constant 0 : index
    %c0_7 = arith.constant 0 : index
    %8 = vector.load %arg4[%c0_6, %c0_7] : memref<512x256xf32, #tpu.memory_space<vmem>>, vector<512x256xf32>
    %cst_8 = arith.constant dense<0.000000e+00> : vector<2x256xf32>
    %9 = tpu.matmul %7, %8, %cst_8 {dimension_numbers = #tpu.dot_dimension_numbers<[1], [0], [0], [1], [0, 0, 1, 1], [], []>} : vector<2x512xf32>, vector<512x256xf32>, vector<2x256xf32> -> vector<2x256xf32>
    %c0_9 = arith.constant 0 : index
    %c0_10 = arith.constant 0 : index
    %10 = vector.load %arg5[%c0_9, %c0_10] : memref<1x256xf32, #tpu.memory_space<vmem>>, vector<1x256xf32>
    %11 = vector.broadcast %10 : vector<1x256xf32> to vector<2x256xf32>
    %12 = arith.addf %9, %11 : vector<2x256xf32>
    %cst_11 = arith.constant 0.000000e+00 : f32
    %13 = vector.broadcast %cst_11 : f32 to vector<2x256xf32>
    %14 = arith.maximumf %12, %13 : vector<2x256xf32>
    %c0_12 = arith.constant 0 : index
    %c0_13 = arith.constant 0 : index
    %15 = vector.load %arg6[%c0_12, %c0_13] : memref<256x9xf32, #tpu.memory_space<vmem>>, vector<256x9xf32>
    %cst_14 = arith.constant dense<0.000000e+00> : vector<2x9xf32>
    %16 = tpu.matmul %14, %15, %cst_14 {dimension_numbers = #tpu.dot_dimension_numbers<[1], [0], [0], [1], [0, 0, 1, 1], [], []>} : vector<2x256xf32>, vector<256x9xf32>, vector<2x9xf32> -> vector<2x9xf32>
    %c0_15 = arith.constant 0 : index
    %c0_16 = arith.constant 0 : index
    %17 = vector.load %arg7[%c0_15, %c0_16] : memref<1x9xf32, #tpu.memory_space<vmem>>, vector<1x9xf32>
    %18 = vector.broadcast %17 : vector<1x9xf32> to vector<2x9xf32>
    %19 = arith.addf %16, %18 : vector<2x9xf32>
    %c0_17 = arith.constant 0 : index
    %c0_18 = arith.constant 0 : index
    %20 = vector.load %arg8[%c0_17, %c0_18] : memref<2x9xf32, #tpu.memory_space<vmem>>, vector<2x9xf32>
    tpu.vector_store %arg8[%c0_17, %c0_18], %19 {strides = array<i32>} : memref<2x9xf32, #tpu.memory_space<vmem>>, vector<2x9xf32>,
    return
  }
  func.func @transform_0(%arg0: i32) -> (i32, i32) {
    %c0_i32 = arith.constant 0 : i32
    %c0_i32_0 = arith.constant 0 : i32
    %c0_i32_1 = arith.constant 0 : i32
    return %c0_i32, %c0_i32_0 : i32, i32
  }
  func.func @transform_1(%arg0: i32) -> (i32, i32) {
    %c0_i32 = arith.constant 0 : i32
    %c0_i32_0 = arith.constant 0 : i32
    %c0_i32_1 = arith.constant 0 : i32
    return %c0_i32, %c0_i32_0 : i32, i32
  }
  func.func @transform_2(%arg0: i32) -> (i32, i32) {
    %c0_i32 = arith.constant 0 : i32
    %c0_i32_0 = arith.constant 0 : i32
    %c0_i32_1 = arith.constant 0 : i32
    return %c0_i32, %c0_i32_0 : i32, i32
  }
  func.func @transform_3(%arg0: i32) -> (i32, i32) {
    %c0_i32 = arith.constant 0 : i32
    %c0_i32_0 = arith.constant 0 : i32
    %c0_i32_1 = arith.constant 0 : i32
    return %c0_i32, %c0_i32_0 : i32, i32
  }
  func.func @transform_4(%arg0: i32) -> (i32, i32) {
    %c0_i32 = arith.constant 0 : i32
    %c0_i32_0 = arith.constant 0 : i32
    %c0_i32_1 = arith.constant 0 : i32
    return %c0_i32, %c0_i32_0 : i32, i32
  }
  func.func @transform_5(%arg0: i32) -> (i32, i32) {
    %c0_i32 = arith.constant 0 : i32
    %c0_i32_0 = arith.constant 0 : i32
    %c0_i32_1 = arith.constant 0 : i32
    return %c0_i32, %c0_i32_0 : i32, i32
  }
  func.func @transform_6(%arg0: i32) -> (i32, i32) {
    %c0_i32 = arith.constant 0 : i32
    %c0_i32_0 = arith.constant 0 : i32
    %c0_i32_1 = arith.constant 0 : i32
    return %c0_i32, %c0_i32_0 : i32, i32
  }
  func.func @transform_7(%arg0: i32) -> (i32, i32) {
    %c0_i32 = arith.constant 0 : i32
    %c0_i32_0 = arith.constant 0 : i32
    %c0_i32_1 = arith.constant 0 : i32
    return %c0_i32, %c0_i32_0 : i32, i32
  }
}

module attributes {stable_mosaic.version = 11 : i64} {
  func.func @_head_kernel(%arg0: i32, %arg1: memref<2x1024xf32, #tpu.memory_space<vmem>>, %arg2: memref<1024x512xf32, #tpu.memory_space<vmem>>, %arg3: memref<1x512xf32, #tpu.memory_space<vmem>>, %arg4: memref<512x256xf32, #tpu.memory_space<vmem>>, %arg5: memref<1x256xf32, #tpu.memory_space<vmem>>, %arg6: memref<256x8xf32, #tpu.memory_space<vmem>>, %arg7: memref<1x8xf32, #tpu.memory_space<vmem>>, %arg8: memref<2x8xf32, #tpu.memory_space<vmem>>) attributes {dimension_semantics = [#tpu.dimension_semantics<arbitrary>], iteration_bounds = array<i64: 1>, scalar_prefetch = 0 : i64, scratch_operands = 0 : i64, tpu.core_type = #tpu.core_type<tc>, window_params = [{pipeline_mode = #tpu.pipeline_mode<synchronous>, transform_indices = @transform_0, window_bounds = array<i64: 2, 1024>}, {pipeline_mode = #tpu.pipeline_mode<synchronous>, transform_indices = @transform_1, window_bounds = array<i64: 1024, 512>}, {pipeline_mode = #tpu.pipeline_mode<synchronous>, transform_indices = @transform_2, window_bounds = array<i64: 1, 512>}, {pipeline_mode = #tpu.pipeline_mode<synchronous>, transform_indices = @transform_3, window_bounds = array<i64: 512, 256>}, {pipeline_mode = #tpu.pipeline_mode<synchronous>, transform_indices = @transform_4, window_bounds = array<i64: 1, 256>}, {pipeline_mode = #tpu.pipeline_mode<synchronous>, transform_indices = @transform_5, window_bounds = array<i64: 256, 8>}, {pipeline_mode = #tpu.pipeline_mode<synchronous>, transform_indices = @transform_6, window_bounds = array<i64: 1, 8>}, {pipeline_mode = #tpu.pipeline_mode<synchronous>, transform_indices = @transform_7, window_bounds = array<i64: 2, 8>}]} {
    %c0 = arith.constant 0 : index
    %c0_0 = arith.constant 0 : index
    %0 = vector.load %arg1[%c0, %c0_0] : memref<2x1024xf32, #tpu.memory_space<vmem>>, vector<2x1024xf32>
    %c0_1 = arith.constant 0 : index
    %c0_2 = arith.constant 0 : index
    %1 = vector.load %arg2[%c0_1, %c0_2] : memref<1024x512xf32, #tpu.memory_space<vmem>>, vector<1024x512xf32>
    %cst = arith.constant dense<0.000000e+00> : vector<2x512xf32>
    %2 = tpu.matmul %0, %1, %cst {dimension_numbers = #tpu.dot_dimension_numbers<[1], [0], [0], [1], [0, 0, 1, 1], [], []>} : vector<2x1024xf32>, vector<1024x512xf32>, vector<2x512xf32> -> vector<2x512xf32>
    %c0_3 = arith.constant 0 : index
    %c0_4 = arith.constant 0 : index
    %3 = vector.load %arg3[%c0_3, %c0_4] : memref<1x512xf32, #tpu.memory_space<vmem>>, vector<1x512xf32>
    %4 = vector.broadcast %3 : vector<1x512xf32> to vector<2x512xf32>
    %5 = arith.addf %2, %4 : vector<2x512xf32>
    %cst_5 = arith.constant 0.000000e+00 : f32
    %6 = vector.broadcast %cst_5 : f32 to vector<2x512xf32>
    %7 = arith.maximumf %5, %6 : vector<2x512xf32>
    %c0_6 = arith.constant 0 : index
    %c0_7 = arith.constant 0 : index
    %8 = vector.load %arg4[%c0_6, %c0_7] : memref<512x256xf32, #tpu.memory_space<vmem>>, vector<512x256xf32>
    %cst_8 = arith.constant dense<0.000000e+00> : vector<2x256xf32>
    %9 = tpu.matmul %7, %8, %cst_8 {dimension_numbers = #tpu.dot_dimension_numbers<[1], [0], [0], [1], [0, 0, 1, 1], [], []>} : vector<2x512xf32>, vector<512x256xf32>, vector<2x256xf32> -> vector<2x256xf32>
    %c0_9 = arith.constant 0 : index
    %c0_10 = arith.constant 0 : index
    %10 = vector.load %arg5[%c0_9, %c0_10] : memref<1x256xf32, #tpu.memory_space<vmem>>, vector<1x256xf32>
    %11 = vector.broadcast %10 : vector<1x256xf32> to vector<2x256xf32>
    %12 = arith.addf %9, %11 : vector<2x256xf32>
    %cst_11 = arith.constant 0.000000e+00 : f32
    %13 = vector.broadcast %cst_11 : f32 to vector<2x256xf32>
    %14 = arith.maximumf %12, %13 : vector<2x256xf32>
    %c0_12 = arith.constant 0 : index
    %c0_13 = arith.constant 0 : index
    %15 = vector.load %arg6[%c0_12, %c0_13] : memref<256x8xf32, #tpu.memory_space<vmem>>, vector<256x8xf32>
    %cst_14 = arith.constant dense<0.000000e+00> : vector<2x8xf32>
    %16 = tpu.matmul %14, %15, %cst_14 {dimension_numbers = #tpu.dot_dimension_numbers<[1], [0], [0], [1], [0, 0, 1, 1], [], []>} : vector<2x256xf32>, vector<256x8xf32>, vector<2x8xf32> -> vector<2x8xf32>
    %c0_15 = arith.constant 0 : index
    %c0_16 = arith.constant 0 : index
    %17 = vector.load %arg7[%c0_15, %c0_16] : memref<1x8xf32, #tpu.memory_space<vmem>>, vector<1x8xf32>
    %18 = vector.broadcast %17 : vector<1x8xf32> to vector<2x8xf32>
    %19 = arith.addf %16, %18 : vector<2x8xf32>
    %c0_17 = arith.constant 0 : index
    %c0_18 = arith.constant 0 : index
    %20 = vector.load %arg8[%c0_17, %c0_18] : memref<2x8xf32, #tpu.memory_space<vmem>>, vector<2x8xf32>
    tpu.vector_store %arg8[%c0_17, %c0_18], %19 {strides = array<i32>} : memref<2x8xf32, #tpu.memory_space<vmem>>, vector<2x8xf32>,
    return
  }
  func.func @transform_0(%arg0: i32) -> (i32, i32) {
    %c0_i32 = arith.constant 0 : i32
    %c0_i32_0 = arith.constant 0 : i32
    %c0_i32_1 = arith.constant 0 : i32
    return %c0_i32, %c0_i32_0 : i32, i32
  }
  func.func @transform_1(%arg0: i32) -> (i32, i32) {
    %c0_i32 = arith.constant 0 : i32
    %c0_i32_0 = arith.constant 0 : i32
    %c0_i32_1 = arith.constant 0 : i32
    return %c0_i32, %c0_i32_0 : i32, i32
  }
  func.func @transform_2(%arg0: i32) -> (i32, i32) {
    %c0_i32 = arith.constant 0 : i32
    %c0_i32_0 = arith.constant 0 : i32
    %c0_i32_1 = arith.constant 0 : i32
    return %c0_i32, %c0_i32_0 : i32, i32
  }
  func.func @transform_3(%arg0: i32) -> (i32, i32) {
    %c0_i32 = arith.constant 0 : i32
    %c0_i32_0 = arith.constant 0 : i32
    %c0_i32_1 = arith.constant 0 : i32
    return %c0_i32, %c0_i32_0 : i32, i32
  }
  func.func @transform_4(%arg0: i32) -> (i32, i32) {
    %c0_i32 = arith.constant 0 : i32
    %c0_i32_0 = arith.constant 0 : i32
    %c0_i32_1 = arith.constant 0 : i32
    return %c0_i32, %c0_i32_0 : i32, i32
  }
  func.func @transform_5(%arg0: i32) -> (i32, i32) {
    %c0_i32 = arith.constant 0 : i32
    %c0_i32_0 = arith.constant 0 : i32
    %c0_i32_1 = arith.constant 0 : i32
    return %c0_i32, %c0_i32_0 : i32, i32
  }
  func.func @transform_6(%arg0: i32) -> (i32, i32) {
    %c0_i32 = arith.constant 0 : i32
    %c0_i32_0 = arith.constant 0 : i32
    %c0_i32_1 = arith.constant 0 : i32
    return %c0_i32, %c0_i32_0 : i32, i32
  }
  func.func @transform_7(%arg0: i32) -> (i32, i32) {
    %c0_i32 = arith.constant 0 : i32
    %c0_i32_0 = arith.constant 0 : i32
    %c0_i32_1 = arith.constant 0 : i32
    return %c0_i32, %c0_i32_0 : i32, i32
  }
}

module attributes {stable_mosaic.version = 11 : i64} {
  func.func @kernel(%arg0: i32, %arg1: i32, %arg2: memref<1x16x3xf32, #tpu.memory_space<vmem>>, %arg3: memref<1x3x64xf32, #tpu.memory_space<vmem>>, %arg4: memref<1x64xf32, #tpu.memory_space<vmem>>, %arg5: memref<64x128xbf16, #tpu.memory_space<vmem>>, %arg6: memref<1x128xf32, #tpu.memory_space<vmem>>, %arg7: memref<128x1024xbf16, #tpu.memory_space<vmem>>, %arg8: memref<1x1024xf32, #tpu.memory_space<vmem>>, %arg9: memref<1x1x1024xf32, #tpu.memory_space<vmem>>, %arg10: memref<8x1024xf32, #tpu.memory_space<vmem>>) attributes {dimension_semantics = [#tpu.dimension_semantics<parallel>, #tpu.dimension_semantics<arbitrary>], iteration_bounds = array<i64: 2, 1>, scalar_prefetch = 0 : i64, scratch_operands = 1 : i64, tpu.core_type = #tpu.core_type<tc>, window_params = [{transform_indices = @transform_0, window_bounds = array<i64: 1, 16, 3>}, {transform_indices = @transform_1, window_bounds = array<i64: 1, 3, 64>}, {pipeline_mode = #tpu.pipeline_mode<synchronous>, transform_indices = @transform_2, window_bounds = array<i64: 1, 64>}, {pipeline_mode = #tpu.pipeline_mode<synchronous>, transform_indices = @transform_3, window_bounds = array<i64: 64, 128>}, {pipeline_mode = #tpu.pipeline_mode<synchronous>, transform_indices = @transform_4, window_bounds = array<i64: 1, 128>}, {pipeline_mode = #tpu.pipeline_mode<synchronous>, transform_indices = @transform_5, window_bounds = array<i64: 128, 1024>}, {pipeline_mode = #tpu.pipeline_mode<synchronous>, transform_indices = @transform_6, window_bounds = array<i64: 1, 1024>}, {transform_indices = @transform_7, window_bounds = array<i64: 1, 1, 1024>}]} {
    %c0_i32 = arith.constant 0 : i32
    %0 = arith.cmpi eq, %arg1, %c0_i32 : i32
    %1 = arith.extui %0 : i1 to i32
    %c0_i32_0 = arith.constant 0 : i32
    %2 = arith.cmpi ne, %1, %c0_i32_0 : i32
    scf.if %2 {
      %cst_25 = arith.constant 0xFF800000 : f32
      %32 = vector.broadcast %cst_25 : f32 to vector<8x1024xf32>
      %c0_26 = arith.constant 0 : index
      %c0_27 = arith.constant 0 : index
      %33 = vector.load %arg10[%c0_26, %c0_27] : memref<8x1024xf32, #tpu.memory_space<vmem>>, vector<8x1024xf32>
      tpu.vector_store %arg10[%c0_26, %c0_27], %32 {strides = array<i32>} : memref<8x1024xf32, #tpu.memory_space<vmem>>, vector<8x1024xf32>,
    } else {
    }
    %c0 = arith.constant 0 : index
    %c0_1 = arith.constant 0 : index
    %c0_2 = arith.constant 0 : index
    %3 = vector.load %arg2[%c0, %c0_1, %c0_2] : memref<1x16x3xf32, #tpu.memory_space<vmem>>, vector<1x16x3xf32>
    %4 = vector.shape_cast %3 : vector<1x16x3xf32> to vector<16x3xf32>
    %c0_3 = arith.constant 0 : index
    %c0_4 = arith.constant 0 : index
    %c0_5 = arith.constant 0 : index
    %5 = vector.load %arg3[%c0_3, %c0_4, %c0_5] : memref<1x3x64xf32, #tpu.memory_space<vmem>>, vector<1x3x64xf32>
    %6 = vector.shape_cast %5 : vector<1x3x64xf32> to vector<3x64xf32>
    %cst = arith.constant dense<0.000000e+00> : vector<16x64xf32>
    %7 = tpu.matmul %4, %6, %cst {dimension_numbers = #tpu.dot_dimension_numbers<[1], [0], [0], [1], [0, 0, 1, 1], [], []>} : vector<16x3xf32>, vector<3x64xf32>, vector<16x64xf32> -> vector<16x64xf32>
    %c0_6 = arith.constant 0 : index
    %c0_7 = arith.constant 0 : index
    %8 = vector.load %arg4[%c0_6, %c0_7] : memref<1x64xf32, #tpu.memory_space<vmem>>, vector<1x64xf32>
    %9 = vector.broadcast %8 : vector<1x64xf32> to vector<16x64xf32>
    %10 = arith.addf %7, %9 : vector<16x64xf32>
    %cst_8 = arith.constant 0.000000e+00 : f32
    %11 = vector.broadcast %cst_8 : f32 to vector<16x64xf32>
    %12 = arith.maximumf %10, %11 : vector<16x64xf32>
    %13 = arith.truncf %12 : vector<16x64xf32> to vector<16x64xbf16>
    %c0_9 = arith.constant 0 : index
    %c0_10 = arith.constant 0 : index
    %14 = vector.load %arg5[%c0_9, %c0_10] : memref<64x128xbf16, #tpu.memory_space<vmem>>, vector<64x128xbf16>
    %cst_11 = arith.constant dense<0.000000e+00> : vector<16x128xf32>
    %15 = tpu.matmul %13, %14, %cst_11 {dimension_numbers = #tpu.dot_dimension_numbers<[1], [0], [0], [1], [0, 0, 1, 1], [], []>} : vector<16x64xbf16>, vector<64x128xbf16>, vector<16x128xf32> -> vector<16x128xf32>
    %c0_12 = arith.constant 0 : index
    %c0_13 = arith.constant 0 : index
    %16 = vector.load %arg6[%c0_12, %c0_13] : memref<1x128xf32, #tpu.memory_space<vmem>>, vector<1x128xf32>
    %17 = vector.broadcast %16 : vector<1x128xf32> to vector<16x128xf32>
    %18 = arith.addf %15, %17 : vector<16x128xf32>
    %cst_14 = arith.constant 0.000000e+00 : f32
    %19 = vector.broadcast %cst_14 : f32 to vector<16x128xf32>
    %20 = arith.maximumf %18, %19 : vector<16x128xf32>
    %21 = arith.truncf %20 : vector<16x128xf32> to vector<16x128xbf16>
    %c0_15 = arith.constant 0 : index
    %c0_16 = arith.constant 0 : index
    %22 = vector.load %arg7[%c0_15, %c0_16] : memref<128x1024xbf16, #tpu.memory_space<vmem>>, vector<128x1024xbf16>
    %cst_17 = arith.constant dense<0.000000e+00> : vector<16x1024xf32>
    %23 = tpu.matmul %21, %22, %cst_17 {dimension_numbers = #tpu.dot_dimension_numbers<[1], [0], [0], [1], [0, 0, 1, 1], [], []>} : vector<16x128xbf16>, vector<128x1024xbf16>, vector<16x1024xf32> -> vector<16x1024xf32>
    %24 = vector.shape_cast %23 : vector<16x1024xf32> to vector<2x8x1024xf32>
    %c0_18 = arith.constant 0 : index
    %c0_19 = arith.constant 0 : index
    %25 = vector.load %arg10[%c0_18, %c0_19] : memref<8x1024xf32, #tpu.memory_space<vmem>>, vector<8x1024xf32>
    %cst_20 = arith.constant dense<0xFF800000> : vector<8x1024xf32>
    %26 = vector.multi_reduction <maximumf>, %24, %cst_20 [0] : vector<2x8x1024xf32> to vector<8x1024xf32>
    %27 = arith.maximumf %25, %26 : vector<8x1024xf32>
    %c0_21 = arith.constant 0 : index
    %c0_22 = arith.constant 0 : index
    %28 = vector.load %arg10[%c0_21, %c0_22] : memref<8x1024xf32, #tpu.memory_space<vmem>>, vector<8x1024xf32>
    tpu.vector_store %arg10[%c0_21, %c0_22], %27 {strides = array<i32>} : memref<8x1024xf32, #tpu.memory_space<vmem>>, vector<8x1024xf32>,
    %c0_i32_23 = arith.constant 0 : i32
    %29 = arith.cmpi eq, %arg1, %c0_i32_23 : i32
    %30 = arith.extui %29 : i1 to i32
    %c0_i32_24 = arith.constant 0 : i32
    %31 = arith.cmpi ne, %30, %c0_i32_24 : i32
    scf.if %31 {
      %c0_25 = arith.constant 0 : index
      %c0_26 = arith.constant 0 : index
      %32 = vector.load %arg10[%c0_25, %c0_26] : memref<8x1024xf32, #tpu.memory_space<vmem>>, vector<8x1024xf32>
      %cst_27 = arith.constant dense<0xFF800000> : vector<1024xf32>
      %33 = vector.multi_reduction <maximumf>, %32, %cst_27 [0] : vector<8x1024xf32> to vector<1024xf32>
      %34 = vector.shape_cast %33 : vector<1024xf32> to vector<1x1024xf32>
      %c0_28 = arith.constant 0 : index
      %c0_29 = arith.constant 0 : index
      %35 = vector.load %arg8[%c0_28, %c0_29] : memref<1x1024xf32, #tpu.memory_space<vmem>>, vector<1x1024xf32>
      %36 = arith.addf %34, %35 : vector<1x1024xf32>
      %c0_30 = arith.constant 0 : index
      %c0_31 = arith.constant 0 : index
      %c0_32 = arith.constant 0 : index
      %37 = vector.load %arg9[%c0_30, %c0_31, %c0_32] : memref<1x1x1024xf32, #tpu.memory_space<vmem>>, vector<1x1x1024xf32>
      %38 = vector.shape_cast %37 : vector<1x1x1024xf32> to vector<1x1024xf32>
      %39 = vector.shape_cast %36 : vector<1x1024xf32> to vector<1x1x1024xf32>
      tpu.vector_store %arg9[%c0_30, %c0_31, %c0_32], %39 {strides = array<i32>} : memref<1x1x1024xf32, #tpu.memory_space<vmem>>, vector<1x1x1024xf32>,
    } else {
    }
    return
  }
  func.func @transform_0(%arg0: i32, %arg1: i32) -> (i32, i32, i32) {
    %c0_i32 = arith.constant 0 : i32
    %c0_i32_0 = arith.constant 0 : i32
    return %arg0, %arg1, %c0_i32 : i32, i32, i32
  }
  func.func @transform_1(%arg0: i32, %arg1: i32) -> (i32, i32, i32) {
    %c0_i32 = arith.constant 0 : i32
    %c0_i32_0 = arith.constant 0 : i32
    %c0_i32_1 = arith.constant 0 : i32
    return %arg0, %c0_i32, %c0_i32_0 : i32, i32, i32
  }
  func.func @transform_2(%arg0: i32, %arg1: i32) -> (i32, i32) {
    %c0_i32 = arith.constant 0 : i32
    %c0_i32_0 = arith.constant 0 : i32
    %c0_i32_1 = arith.constant 0 : i32
    return %c0_i32, %c0_i32_0 : i32, i32
  }
  func.func @transform_3(%arg0: i32, %arg1: i32) -> (i32, i32) {
    %c0_i32 = arith.constant 0 : i32
    %c0_i32_0 = arith.constant 0 : i32
    %c0_i32_1 = arith.constant 0 : i32
    return %c0_i32, %c0_i32_0 : i32, i32
  }
  func.func @transform_4(%arg0: i32, %arg1: i32) -> (i32, i32) {
    %c0_i32 = arith.constant 0 : i32
    %c0_i32_0 = arith.constant 0 : i32
    %c0_i32_1 = arith.constant 0 : i32
    return %c0_i32, %c0_i32_0 : i32, i32
  }
  func.func @transform_5(%arg0: i32, %arg1: i32) -> (i32, i32) {
    %c0_i32 = arith.constant 0 : i32
    %c0_i32_0 = arith.constant 0 : i32
    %c0_i32_1 = arith.constant 0 : i32
    return %c0_i32, %c0_i32_0 : i32, i32
  }
  func.func @transform_6(%arg0: i32, %arg1: i32) -> (i32, i32) {
    %c0_i32 = arith.constant 0 : i32
    %c0_i32_0 = arith.constant 0 : i32
    %c0_i32_1 = arith.constant 0 : i32
    return %c0_i32, %c0_i32_0 : i32, i32
  }
  func.func @transform_7(%arg0: i32, %arg1: i32) -> (i32, i32, i32) {
    %c0_i32 = arith.constant 0 : i32
    %c0_i32_0 = arith.constant 0 : i32
    %c0_i32_1 = arith.constant 0 : i32
    return %arg0, %c0_i32, %c0_i32_0 : i32, i32, i32
  }
}

</mosaic_0001>

<bundles_post_ra>
// kernel: pointnet_encoder_forward.4
= control target key start
LH: loop header
LB: loop body
LE: loop exit
PB: predicated region body
PF: predicated region fallthrough
CT: control target
= control target key end

     0   :  { %s2496_s0 = inlined_call_operand.hbm [shape: f32[2,16,3], index: 0, kind: input, shape index: {}]   ;;  %s2497_s1 = inlined_call_operand.hbm [shape: f32[3,64], index: 1, kind: input, shape index: {}]   ;;  %s2498_s2 = inlined_call_operand.hbm [shape: f32[1,64], index: 2, kind: input, shape index: {}]   ;;  %s2499_s3 = inlined_call_operand.hbm [shape: bf16[64,128], index: 3, kind: input, shape index: {}]   ;;  %s2500_s4 = inlined_call_operand.hbm [shape: f32[1,128], index: 4, kind: input, shape index: {}]   ;;  %s2501_s5 = inlined_call_operand.hbm [shape: bf16[128,1024], index: 5, kind: input, shape index: {}]   ;;  %s2502_s6 = inlined_call_operand.hbm [shape: f32[1,1024], index: 6, kind: input, shape index: {}]   ;;  %s2503_s7 = inlined_call_operand.hbm [shape: f32[2,1,1024], index: 7, kind: output, shape index: {}]  }
   0x1   :  { %2510 = sst [smem:[#allocation21_spill]] %s2497_s1 }
   0x2   :  { %2511 = sst [smem:[#allocation22_spill]] %s2499_s3 }
   0x3   :  { %2512 = sst [smem:[#allocation23_spill]] %s2503_s7 }
   0x4   :  { %12 = vsyncpa [#allocation4], 0 }
   0x5   :  { %14 = vsyncpa [#allocation4 + $0x1], 0 }
   0x6   :  { %15 = vsyncpa [#allocation7], 0 }
   0x7   :  { %16 = vsyncpa [#allocation10], 0 }
   0x8   :  { %17 = vsyncpa [#allocation13], 0 }
   0x9   :  { %18 = vsyncpa [#allocation5], 0 }
   0xa   :  { %20 = vsyncpa [#allocation5 + $0x1], 0  ;;  %s2126_s24 = smov 0   ;;  %s2128_s25 = smov 0  }
   0xb   :  { %s2130_s26 = smov 0   ;;  %s2132_s27 = smov 0  }
   0xc   :  { %s2134_s28 = smov 0   ;;  %s2136_s29 = smov 0  }
   0xd LB: > { %s2507_s30 = sadd.s32 4294967295, %s2066_s29   ;;  %p1511_p0 = scmp.ge.s32.totalorder %s2066_s29, 1  ;;  %s2066_s29 = sphi %s2136_s29, %s26_s29   ;;  %s2062_s28 = sphi %s2134_s28, %s2536_s28   ;;  %s2058_s27 = sphi %s2132_s27, %s2535_s27   ;;  %s2054_s26 = sphi %s2130_s26, %s2534_s26   ;;  %s2050_s25 = sphi %s2128_s25, %s2533_s25   ;;  %s2046_s24 = sphi %s2126_s24, %s2532_s24  }
   0xe   : > { %p2160_p1 = scmp.eq.s32.totalorder %s2507_s30, 0  ;;  %p223_p2 = scmp.lt.s32.totalorder %s2066_s29, 3 }
   0xf   : > { %s2068_s10 = smov [#allocation6]   ;;  %s2069_s12 = smov [#allocation9]  }
  0x10   : > { %s2513_s8 = scalar_select %p2160_p1, 1, 0 }
  0x11   : > { %p2165_p3 = pnand %p1511_p0, %p223_p2  ;;  %s236_s11 = sshll.u32 %s2068_s10, 4  ;;  %s237_s11 = int_to_ptr.vmem [resolvable:$true] %s236_s11 }
  0x12   : > { %s257_s13 = sshll.u32 %s2069_s12, 4  ;;  %s2070_s15 = smov [#allocation12]   ;;  %s2178_s13 = int_to_ptr.vmem [resolvable:$true] %s257_s13 }
  0x13   : > { %s2514_s9 = scalar_select %p2165_p3, 1, 0 }
  0x14   : > { %p1665_p5 = pneg %p2165_p3  ;;  %s2180_s16 = sshll.u32 %s2070_s15, 4  ;;  %s282_s16 = int_to_ptr.vmem [resolvable:$true] %s2180_s16 }
  0x15   : > { %s2516_s1 = sld [smem:[#allocation21_spill]] }
  0x16   : > { %p2174_p6 = pnand %p1665_p5, %p2160_p1 }
  0x18   : > { %p2190_p8 = pneg %p2174_p6 }
  0x1b   : > { %s1774_s19 = scalar_lea.hbm %s2516_s1, 64 }
  0x1c   : > { %p1775_p7 = scmp.ne.s32.totalorder %s2516_s1, %s1774_s19  ;;  %p1781_p11 = scmp.lt.u32.totalorder %s1774_s19, %s2516_s1 }
  0x1e   : > { %p1777_p9 = pnand %p2190_p8, %p1775_p7 }
  0x20   : > { %p1778_p10 = pneg %p1777_p9 }
  0x22   : > { %p1783_p12 = pnand %p1781_p11, %p1778_p10 }
  0x24   : > { %1786 = shalt.err (!%p1783_p12)
}
  0x25   : > { %s1787_s12 = scalar_lea.vmem %s237_s11, 64  ;;  %p1795_p5 = scmp.lt.s32.totalorder %s237_s11, %s237_s11 }
  0x26   : > { %p1788_p13 = scmp.ne.s32.totalorder %s237_s11, %s1787_s12  ;;  %p1796_p4 = scmp.lt.s32.totalorder %s1787_s12, %s1787_s12 }
  0x28   : > { %p1790_p0 = pnand %p1788_p13, %p2190_p8  ;;  %p1797_p3 = por %p1796_p4, %p1795_p5 }
  0x2a   : > { %p1791_p2 = pneg %p1790_p0 }
  0x2c   : > { %p1798_p1 = pnand %p1797_p3, %p1791_p2 }
  0x2e   : > { %1801 = shalt.err (!%p1798_p1)
}
  0x2f   : > { %1668 = dma.hbm_to_vmem [thread:$0]  (!%p2174_p6), %s2516_s1, 64, %s237_s11, [#allocation7]  }
  0x30   : > { %s2518_s3 = sld [smem:[#allocation22_spill]] }
  0x36   : > { %s1802_s20 = scalar_lea.hbm %s2518_s3, 512 }
  0x37   : > { %p1803_p7 = scmp.ne.s32.totalorder %s2518_s3, %s1802_s20  ;;  %p1809_p1 = scmp.lt.u32.totalorder %s1802_s20, %s2518_s3 }
  0x39   : > { %p1805_p9 = pnand %p1803_p7, %p2190_p8 }
  0x3b   : > { %p1806_p4 = pneg %p1805_p9 }
  0x3d   : > { %p1811_p3 = pnand %p1809_p1, %p1806_p4 }
  0x3f   : > { %1814 = shalt.err (!%p1811_p3)
}
  0x40   : > { %s1815_s11 = scalar_lea.vmem %s2178_s13, 512  ;;  %p1823_p13 = scmp.lt.s32.totalorder %s2178_s13, %s2178_s13 }
  0x41   : > { %p1816_p10 = scmp.ne.s32.totalorder %s2178_s13, %s1815_s11  ;;  %p1824_p0 = scmp.lt.s32.totalorder %s1815_s11, %s1815_s11 }
  0x43   : > { %p1818_p11 = pnand %p1816_p10, %p2190_p8  ;;  %p1825_p2 = por %p1824_p0, %p1823_p13 }
  0x45   : > { %p1819_p12 = pneg %p1818_p11 }
  0x47   : > { %p1826_p5 = pnand %p1825_p2, %p1819_p12 }
  0x49   : > { %1829 = shalt.err (!%p1826_p5)
}
  0x4a   : > { %s2071_s15 = smov 64   ;;  %s2072_s17 = smov 4  }
  0x4b   : > { %1674 = dma.hbm_to_vmem [thread:$0]  (!%p2174_p6), %s2518_s3, 512, %s2178_s13, [#allocation10], %s2071_s15, %s2071_s15, %s2072_s17  }
  0x4c   : > { %s1830_s23 = scalar_lea.hbm %s2501_s5, 8192 }
  0x4d   : > { %p1831_p7 = scmp.ne.s32.totalorder %s2501_s5, %s1830_s23  ;;  %p1837_p1 = scmp.lt.u32.totalorder %s1830_s23, %s2501_s5 }
  0x4f   : > { %p1833_p9 = pnand %p1831_p7, %p2190_p8 }
  0x51   : > { %p1834_p4 = pneg %p1833_p9 }
  0x53   : > { %p1839_p3 = pnand %p1837_p1, %p1834_p4 }
  0x55   : > { %1842 = shalt.err (!%p1839_p3)
}
  0x56   : > { %s1843_s18 = scalar_lea.vmem %s282_s16, 8192  ;;  %p1851_p13 = scmp.lt.s32.totalorder %s282_s16, %s282_s16 }
  0x57   : > { %p1844_p10 = scmp.ne.s32.totalorder %s282_s16, %s1843_s18  ;;  %p1852_p0 = scmp.lt.s32.totalorder %s1843_s18, %s1843_s18 }
  0x59   : > { %p1846_p11 = pnand %p1844_p10, %p2190_p8  ;;  %p1853_p2 = por %p1852_p0, %p1851_p13 }
  0x5b   : > { %p1847_p12 = pneg %p1846_p11 }
  0x5d   : > { %p1854_p5 = pnand %p1853_p2, %p1847_p12 }
  0x5f   : > { %1857 = shalt.err (!%p1854_p5)
}
  0x60   : > { %s2073_s13 = smov 512   ;;  %s2074_s15 = smov 32  }
  0x61   : > { %1680 = dma.hbm_to_vmem [thread:$0]  (!%p2174_p6), %s2501_s5, 8192, %s282_s16, [#allocation13], %s2073_s13, %s2073_s13, %s2074_s15  }
  0x62   : > { %s2075_s19 = smov [#allocation8]   ;;  %s2076_s21 = smov [#allocation11]  }
  0x63   : > { %s247_s20 = sshll.u32 %s2075_s19, 4  ;;  %s271_s23 = sshll.u32 %s2076_s21, 4  ;;  %s248_s20 = int_to_ptr.vmem [resolvable:$true] %s247_s20  ;;  %s272_s23 = int_to_ptr.vmem [resolvable:$true] %s271_s23 }
  0x64   : > { %s1858_s11 = scalar_lea.hbm %s2498_s2, 16 }
  0x65   : > { %p1859_p7 = scmp.ne.s32.totalorder %s2498_s2, %s1858_s11  ;;  %p1865_p1 = scmp.lt.u32.totalorder %s1858_s11, %s2498_s2 }
  0x67   : > { %p1861_p9 = pnand %p1859_p7, %p2190_p8 }
  0x69   : > { %p1862_p4 = pneg %p1861_p9 }
  0x6b   : > { %p1867_p3 = pnand %p1865_p1, %p1862_p4 }
  0x6d   : > { %1870 = shalt.err (!%p1867_p3)
}
  0x6e   : > { %s1871_s16 = scalar_lea.vmem %s248_s20, 16  ;;  %s1878_s13 = scalar_lea.vmem %s248_s20, 32 }
  0x6f   : > { %p1872_p10 = scmp.ne.s32.totalorder %s248_s20, %s1871_s16  ;;  %p1879_p13 = scmp.lt.s32.totalorder %s248_s20, %s248_s20 }
  0x70   : > { %p1880_p0 = scmp.lt.s32.totalorder %s1878_s13, %s1871_s16 }
  0x71   : > { %p1874_p11 = pnand %p1872_p10, %p2190_p8 }
  0x72   : > { %p1881_p2 = por %p1880_p0, %p1879_p13 }
  0x73   : > { %p1875_p12 = pneg %p1874_p11 }
  0x75   : > { %p1882_p5 = pnand %p1881_p2, %p1875_p12 }
  0x77   : > { %1885 = shalt.err (!%p1882_p5)
}
  0x78   : > { %1671 = dma.hbm_to_vmem [thread:$0]  (!%p2174_p6), %s2498_s2, 16, %s248_s20, [#allocation7]  }
  0x79   : > { %s1886_s30 = scalar_lea.hbm %s2500_s4, 16 }
  0x7a   : > { %p1887_p7 = scmp.ne.s32.totalorder %s2500_s4, %s1886_s30  ;;  %p1893_p1 = scmp.lt.u32.totalorder %s1886_s30, %s2500_s4 }
  0x7c   : > { %p1889_p9 = pnand %p1887_p7, %p2190_p8 }
  0x7e   : > { %p1890_p4 = pneg %p1889_p9 }
  0x80   : > { %p1895_p3 = pnand %p1893_p1, %p1890_p4 }
  0x82   : > { %1898 = shalt.err (!%p1895_p3)
}
  0x83   : > { %s1899_s12 = scalar_lea.vmem %s272_s23, 16  ;;  %s1906_s20 = scalar_lea.vmem %s272_s23, 32 }
  0x84   : > { %p1900_p10 = scmp.ne.s32.totalorder %s272_s23, %s1899_s12  ;;  %p1907_p13 = scmp.lt.s32.totalorder %s272_s23, %s272_s23 }
  0x85   : > { %p1908_p0 = scmp.lt.s32.totalorder %s1906_s20, %s1899_s12 }
  0x86   : > { %p1902_p11 = pnand %p1900_p10, %p2190_p8 }
  0x87   : > { %p1909_p2 = por %p1908_p0, %p1907_p13 }
  0x88   : > { %p1903_p12 = pneg %p1902_p11 }
  0x8a   : > { %p1910_p5 = pnand %p1909_p2, %p1903_p12 }
  0x8c   : > { %1913 = shalt.err (!%p1910_p5)
}
  0x8d   : > { %1677 = dma.hbm_to_vmem [thread:$0]  (!%p2174_p6), %s2500_s4, 16, %s272_s23, [#allocation10]  }
  0x8e   : > { %s2077_s16 = smov [#allocation14]   ;;  %s1914_s3 = scalar_lea.hbm %s2502_s6, 128 }
  0x8f   : > { %s295_s13 = sshll.u32 %s2077_s16, 4  ;;  %p1915_p7 = scmp.ne.s32.totalorder %s2502_s6, %s1914_s3  ;;  %s296_s13 = int_to_ptr.vmem [resolvable:$true] %s295_s13 }
  0x90   : > { %p1921_p1 = scmp.lt.u32.totalorder %s1914_s3, %s2502_s6 }
  0x91   : > { %p1917_p9 = pnand %p1915_p7, %p2190_p8 }
  0x93   : > { %p1918_p4 = pneg %p1917_p9 }
  0x95   : > { %p1923_p3 = pnand %p1921_p1, %p1918_p4 }
  0x97   : > { %1926 = shalt.err (!%p1923_p3)
}
  0x98   : > { %s1927_s23 = scalar_lea.vmem %s296_s13, 128  ;;  %p1935_p13 = scmp.lt.s32.totalorder %s296_s13, %s296_s13 }
  0x99   : > { %p1928_p10 = scmp.ne.s32.totalorder %s296_s13, %s1927_s23  ;;  %p1936_p0 = scmp.lt.s32.totalorder %s1927_s23, %s1927_s23 }
  0x9b   : > { %p1930_p11 = pnand %p1928_p10, %p2190_p8  ;;  %p1937_p2 = por %p1936_p0, %p1935_p13 }
  0x9d   : > { %p1931_p12 = pneg %p1930_p11 }
  0x9f   : > { %p1938_p5 = pnand %p1937_p2, %p1931_p12 }
  0xa1   : > { %1941 = shalt.err (!%p1938_p5)
}
  0xa2   : > { %1683 = dma.hbm_to_vmem [thread:$0]  (!%p2174_p6), %s2502_s6, 128, %s296_s13, [#allocation13]  }
  0xa3   : > { %s1510_s22 = sadd.s32 4294967294, %s2066_s29   ;;  %s38_s12 = sadd.s32 1, %s2062_s28 }
  0xa4   : > { %p40_p8 = scmp.ge.s32.totalorder %s38_s12, 2  ;;  %s47_s14 = sadd.s32 1, %s2054_s26 }
  0xa5   : > { %p54_p7 = scmp.ne.s32.totalorder %s2054_s26, %s2050_s25  ;;  %p55_p9 = scmp.eq.s32.totalorder %s2066_s29, 0 }
  0xa6   : > { %s2538_s12 = smov (%p40_p8, %s38_s12), 0  ;;  %p60_p1 = scmp.ne.s32.totalorder %s2050_s25, %s2046_s24 }
  0xa7   : > { %p2310_p4 = por %p55_p9, %p54_p7  ;;  %s42_s11 = ssub.s32 %s2062_s28, %s2538_s12 }
  0xa8   : > { %s2520_s18 = sadd.s32 4294967295, %s2066_s29   ;;  %p45_p3 = scmp.eq.s32.totalorder %s42_s11, 0 }
  0xa9   : > { %p210_p6 = scmp.eq.s32.totalorder %s2520_s18, 1  ;;  %p2521_p10 = scmp.ne.s32.totalorder %s2513_s8, 0 }
  0xaa   : > { %p216_p13 = scmp.eq.s32.totalorder %s1510_s22, 1  ;;  %p1698_p2 = scmp.lt.s32.totalorder %s2066_s29, 2 }
  0xab   : > { %p2322_p11 = por %p2521_p10, %p60_p1  ;;  %p2326_p12 = por %p210_p6, %p54_p7 }
  0xac   : > { %s2331_s1 = scalar_select %p45_p3, %s2054_s26, %s47_s14  }
  0xad   : > { %s2523_s13 = scalar_select %p2326_p12, 1, 0 }
  0xae   : > { %p2333_p0 = por %p216_p13, %p60_p1  ;;  %s306_s3 = sand.u32 1, %s2054_s26  }
  0xaf   : > { %s1610_s7 = sshll.u32 %s2062_s28, 8  ;;  %s1519_s30 = sshll.u32 %s306_s3, 4 }
  0xb0   : > { %s2524_s15 = scalar_select %p2333_p0, 1, 0 }
  0xb1   : > { %s2343_s23 = scalar_lea.hbm %s2496_s0, %s1610_s7  ;;  %s310_s21 = scalar_lea.vmem [#allocation3], %s1519_s30 }
  0xb2   : > { %s319_s10 = sshll.u32 %s310_s21, 4  ;;  %p2347_p5 = pnand %p1698_p2, %p2310_p4  ;;  %s2351_s10 = int_to_ptr.vmem [resolvable:$true] %s319_s10 }
  0xb3   : > { %s2353_s14 = scalar_lea.sflag [#allocation4], %s306_s3  ;;  %s1942_s11 = scalar_lea.hbm %s2343_s23, 256 }
  0xb4   : > { %p1943_p8 = scmp.ne.s32.totalorder %s2343_s23, %s1942_s11  ;;  %p1944_p7 = pneg %p2347_p5 }
  0xb5   : > { %s1947_s7 = scalar_lea.hbm %s2496_s0, 512  ;;  %p1948_p4 = scmp.lt.u32.totalorder %s2343_s23, %s2496_s0 }
  0xb6   : > { %p1945_p9 = pnand %p1944_p7, %p1943_p8  ;;  %p1949_p6 = scmp.lt.u32.totalorder %s1947_s7, %s1942_s11 }
  0xb7   : > { %p1951_p10 = scmp.lt.u32.totalorder %s1942_s11, %s2343_s23 }
  0xb8   : > { %p1946_p1 = pneg %p1945_p9  ;;  %p1950_p3 = por %p1949_p6, %p1948_p4 }
  0xba   : > { %p1952_p13 = por %p1951_p10, %p1950_p3 }
  0xbc   : > { %p1953_p2 = pnand %p1952_p13, %p1946_p1 }
  0xbe   : > { %1956 = shalt.err (!%p1953_p2)
}
  0xbf   : > { %s1957_s3 = scalar_lea.vmem %s2351_s10, 256  ;;  %s2078_s19 = smov [#allocation3]  }
  0xc0   : > { %p1958_p8 = scmp.ne.s32.totalorder %s2351_s10, %s1957_s3  ;;  %s1962_s21 = sshll.u32 %s2078_s19, 4  ;;  %s1963_s21 = int_to_ptr.vmem [resolvable:$false] %s1962_s21 }
  0xc1   : > { %s1964_s18 = scalar_lea.vmem %s1963_s21, 512  ;;  %p1965_p12 = scmp.lt.s32.totalorder %s2351_s10, %s1963_s21 }
  0xc2   : > { %p1960_p9 = pnand %p1958_p8, %p1944_p7  ;;  %p1966_p4 = scmp.lt.s32.totalorder %s1964_s18, %s1957_s3 }
  0xc4   : > { %p1961_p0 = pneg %p1960_p9  ;;  %p1967_p6 = por %p1966_p4, %p1965_p12 }
  0xc6   : > { %p1968_p3 = pnand %p1967_p6, %p1961_p0 }
  0xc8   : > { %1971 = shalt.err (!%p1968_p3)
}
  0xc9   : > { %s2079_s11 = smov 128   ;;  %s2080_s20 = smov 8  }
  0xca   : > { %1687 = dma.hbm_to_vmem [thread:$0]  (!%p2347_p5), %s2343_s23, 256, %s2351_s10, %s2353_s14, %s2079_s11, %s2079_s11, %s2080_s20  }
  0xcb   : > { %p2526_p7 = scmp.ne.s32.totalorder %s2514_s9, 0 }
  0xcc   : > { %s2384_s7 = sand.u32 (!%p2526_p7), 1, %s2050_s25  }
  0xcd   : > { %331 = sbr.rel (%p2526_p7) target bundleno = 952 (0x3b8), region = 48  ;;  %s1523_s30 = sshll.u32 (!%p2526_p7), %s2384_s7, 4 }
  0xce   : > { %s334_s17 = scalar_lea.sflag (!%p2526_p7), [#allocation4], %s2384_s7  ;;  %s337_s3 = scalar_lea.vmem (!%p2526_p7), [#allocation3], %s1523_s30 }
  0xd4   : > { %2025 = dma.done.wait (%p2322_p11), %s334_s17, 256  }
  0xd5   : > { %2027 = vsyncadd (%p2322_p11), %s334_s17, 4294967040  ;;  %p2527_p12 = scmp.ne.s32.totalorder %s2513_s8, 0 }
  0xd7   : > { %2029 = dma.done.wait (%p2527_p12), [#allocation7], 80  }
  0xd8   : > { %2031 = vsyncadd (%p2527_p12), [#allocation7], 4294967216 }
  0xd9   : > { %2033 = dma.done.wait (%p2527_p12), [#allocation10], 528  }
  0xda   : > { %2035 = vsyncadd (%p2527_p12), [#allocation10], 4294966768 }
  0xdb   : > { %2037 = dma.done.wait (%p2527_p12), [#allocation13], 8320  }
  0xdc   : > { %2039 = vsyncadd (%p2527_p12), [#allocation13], 4294958976  ;;  %v2081_v0 = vmov 0.0   ;;  %vm423_vm0 = vcmask 1042432   ;;  %vm416_vm1 = vcmask 23552   ;;  %v406_v2 = vld [vmem:[%s337_s3] sm:$0xff] }
  0xdd   : > { %1625 = vmatprep.subr.bf16.mxu1 %v2081_v0  ;;  %v408_v1 = vld [vmem:[#allocation6] sm:$0x7]  ;;  %v407_v3 = vld [vmem:[%s337_s3 + $0x8] sm:$0xff]  ;;  %1622 = vmatprep.mubr.msk.f32.mxu0 %vm416_vm1, %v406_v2  ;;  %vm2082_vm2 = vmmov 0   ;;  %v593_v10 = vld [vmem:[#allocation12 + $0x8] sm:$0xff]  ;;  %vm544_vm3 = vcmask 523264  }
  0xde   : > { %1620 = vmatprep.subr.msk.mxu0 %vm423_vm0, %v408_v1  ;;  %v1770_v4 = vld [vmem:[#allocation9] sm:$0xff]   ;;  %v1771_v5 = vld [vmem:[#allocation9 + $0x8] sm:$0xff]   ;;  %v1772_v6 = vld [vmem:[#allocation9 + $0x10] sm:$0xff]   ;;  %1633 = vmatprep.mubr.msk.bf16.mxu1 %vm2082_vm2, %v2081_v0  ;;  %s1530_s8 = sshll.u32 %s2384_s7, 3  ;;  %s1611_s9 = sshll.u32 %s2058_s27, 7 }
  0xdf   : > { %1621 = vmatpush3.msk.msra.mxu0 %vm423_vm0, %v408_v1  ;;  %1626 = vmatpush3.bf16.msra.mxu1 %v1770_v4  ;;  %v1773_v7 = vld [vmem:[#allocation9 + $0x18] sm:$0xff]   ;;  %v592_v8 = vld [vmem:[#allocation12] sm:$0xff]  ;;  %v597_v13 = vld [vmem:[#allocation12 + $0x28] sm:$0xff]  ;;  %s391_s16 = scalar_lea.vmem [#allocation15], %s1530_s8  ;;  %s2528_s14 = sld [smem:[#allocation23_spill]] }
  0xe0   : > { %1623 = vmatmul.mubr.msk.f32.vlgmr.msra.gmra.mrb[0].mxu0 %vm416_vm1, %v407_v3  ;;  %1627 = vmatprep.subr.bf16.mxu1 %v2081_v0  ;;  %v596_v9 = vld [vmem:[#allocation12 + $0x20] sm:$0xff]  ;;  %v1543_v16 = vcombine.low %v593_v10, %v597_v13  ;;  %v1544_v17 = vcombine.high %v593_v10, %v597_v13  ;;  %v1531_v36 = vld [vmem:[#allocation8] ss:$0 sm:$0xff]  ;;  %v601_v42 = vld [vmem:[#allocation12 + $0x48] sm:$0xff]  ;;  %s1371_s23 = sshll.u32 %s391_s16, 4  ;;  %s1357_s27 = scalar_lea.sflag [#allocation5], %s2384_s7  ;;  %s2449_s23 = int_to_ptr.vmem [resolvable:$true] %s1371_s23 }
  0xe1   : > { %v1541_v11 = vcombine.low %v592_v8, %v596_v9  ;;  %v1542_v12 = vcombine.high %v592_v8, %v596_v9  ;;  %v600_v14 = vld [vmem:[#allocation12 + $0x40] sm:$0xff]  ;;  %v605_v43 = vld [vmem:[#allocation12 + $0x68] sm:$0xff]  ;;  %s1972_s21 = scalar_lea.vmem %s2449_s23, 128  ;;  %p2529_p0 = scmp.ne.s32.totalorder %s2523_s13, 0 }
  0xe2   : > { %v604_v15 = vld [vmem:[#allocation12 + $0x60] sm:$0xff]  ;;  %v1552_v46 = vcombine.high %v601_v42, %v605_v43  ;;  %v609_v47 = vld [vmem:[#allocation12 + $0x88] sm:$0xff]  ;;  %v1551_v49 = vcombine.low %v601_v42, %v605_v43  ;;  %v614_v42 = vld [vmem:[#allocation12 + $0xb0] sm:$0xff]  ;;  %p1973_p11 = scmp.ne.s32.totalorder %s2449_s23, %s1972_s21  ;;  %s2085_s18 = smov [#allocation15]  }
  0xe3   : > { %1628 = vmatpush3.bf16.msra.mxu1 %v1771_v5  ;;  %v1550_v18 = vcombine.high %v600_v14, %v604_v15  ;;  %976 = vmatprep.subr.bf16.mxu0 %v1542_v12  ;;  %v1549_v19 = vcombine.low %v600_v14, %v604_v15  ;;  %v608_v20 = vld [vmem:[#allocation12 + $0x80] sm:$0xff]  ;;  %v613_v48 = vld [vmem:[#allocation12 + $0xa8] sm:$0xff]  ;;  %v611_v43 = vld [vmem:[#allocation12 + $0x98] sm:$0xff]  ;;  %s1976_s11 = sshll.u32 %s2085_s18, 4  ;;  %s1977_s11 = int_to_ptr.vmem [resolvable:$false] %s1976_s11 }
  0xe4   : > { %1629 = vmatprep.subr.bf16.mxu1 %v2081_v0  ;;  %977 = vmatpush1.bf16.msra.mxu0 %v1541_v11  ;;  %v612_v21 = vld [vmem:[#allocation12 + $0xa0] sm:$0xff]  ;;  %v1560_v50 = vcombine.high %v609_v47, %v613_v48  ;;  %v617_v51 = vld [vmem:[#allocation12 + $0xc8] sm:$0xff]  ;;  %v1559_v53 = vcombine.low %v609_v47, %v613_v48  ;;  %p1974_p5 = pnand %p1973_p11, %p2529_p0  ;;  %s1978_s20 = scalar_lea.vmem %s1977_s11, 256 }
  0xe5   : > { %978 = vmatprep.subr.bf16.mxu0 %v1550_v18  ;;  %v1558_v22 = vcombine.high %v608_v20, %v612_v21  ;;  %v1557_v23 = vcombine.low %v608_v20, %v612_v21  ;;  %v616_v24 = vld [vmem:[#allocation12 + $0xc0] sm:$0xff]  ;;  %v621_v52 = vld [vmem:[#allocation12 + $0xe8] sm:$0xff]  ;;  %v595_v18 = vld [vmem:[#allocation12 + $0x18] sm:$0xff]  ;;  %s2447_s19 = scalar_lea.hbm %s2528_s14, %s1611_s9  ;;  %p1979_p10 = scmp.lt.s32.totalorder %s2449_s23, %s1977_s11 }
  0xe6   : > { %v620_v25 = vld [vmem:[#allocation12 + $0xe0] sm:$0xff]  ;;  %v1568_v54 = vcombine.high %v617_v51, %v621_v52  ;;  %v625_v55 = vld [vmem:[#allocation12 + $0x108] sm:$0xff]  ;;  %v1567_v57 = vcombine.low %v617_v51, %v621_v52  ;;  %v599_v20 = vld [vmem:[#allocation12 + $0x38] sm:$0xff]  ;;  %p1975_p1 = pneg %p1974_p5  ;;  %p1980_p13 = scmp.lt.s32.totalorder %s1978_s20, %s1972_s21 }
  0xe7   : > { %1630 = vmatpush3.bf16.msra.mxu1 %v1772_v6  ;;  %v1566_v26 = vcombine.high %v616_v24, %v620_v25  ;;  %v1565_v27 = vcombine.low %v616_v24, %v620_v25  ;;  %v624_v28 = vld [vmem:[#allocation12 + $0x100] sm:$0xff]  ;;  %v629_v56 = vld [vmem:[#allocation12 + $0x128] sm:$0xff]  ;;  %v2083_v24 = vmov 0   ;;  %v1535_v25 = vld [vmem:[#allocation11] ss:$0 sm:$0xff] }
  0xe8   : > { %1631 = vmatprep.subr.bf16.mxu1 %v2081_v0  ;;  %979 = vmatpush1.bf16.msra.mxu0 %v1549_v19  ;;  %v628_v29 = vld [vmem:[#allocation12 + $0x120] sm:$0xff]  ;;  %v1576_v58 = vcombine.high %v625_v55, %v629_v56  ;;  %v633_v59 = vld [vmem:[#allocation12 + $0x148] sm:$0xff]  ;;  %v1575_v61 = vcombine.low %v625_v55, %v629_v56  ;;  %v619_v51 = vld [vmem:[#allocation12 + $0xd8] sm:$0xff]  ;;  %p1981_p2 = por %p1980_p13, %p1979_p10 }
  0xe9   : > { %980 = vmatprep.subr.bf16.mxu0 %v1558_v22  ;;  %v1574_v30 = vcombine.high %v624_v28, %v628_v29  ;;  %v1573_v31 = vcombine.low %v624_v28, %v628_v29  ;;  %v632_v32 = vld [vmem:[#allocation12 + $0x140] sm:$0xff]  ;;  %v637_v60 = vld [vmem:[#allocation12 + $0x168] sm:$0xff]  ;;  %v1547_v22 = vcombine.low %v595_v18, %v599_v20  ;;  %1008 = vmatprep.mubr.bf16.mxu0 %v2083_v24  ;;  %v623_v52 = vld [vmem:[#allocation12 + $0xf8] sm:$0xff] }
  0xea   : > { %v636_v33 = vld [vmem:[#allocation12 + $0x160] sm:$0xff]  ;;  %v1584_v62 = vcombine.high %v633_v59, %v637_v60  ;;  %v1583_v63 = vcombine.low %v633_v59, %v637_v60  ;;  %v641_v2 = vld [vmem:[#allocation12 + $0x188] sm:$0xff]  ;;  %v1572_v56 = vcombine.high %v619_v51, %v623_v52  ;;  %v627_v59 = vld [vmem:[#allocation12 + $0x118] sm:$0xff]  ;;  %p1982_p8 = pnand %p1981_p2, %p1975_p1 }
  0xeb   : > { %1632 = vmatpush3.bf16.msra.mxu1 %v1773_v7  ;;  %v1582_v34 = vcombine.high %v632_v32, %v636_v33  ;;  %v1581_v35 = vcombine.low %v632_v32, %v636_v33  ;;  %v640_v0 = vld [vmem:[#allocation12 + $0x180] sm:$0xff]  ;;  %v645_v4 = vld [vmem:[#allocation12 + $0x1a8] sm:$0xff]  ;;  %v602_v32 = vld [vmem:[#allocation12 + $0x50] sm:$0xff] }
  0xec   : > { %1019 = vmatprep.subr.bf16.mxu1 %v1544_v17  ;;  %981 = vmatpush1.bf16.msra.mxu0 %v1557_v23  ;;  %v644_v1 = vld [vmem:[#allocation12 + $0x1a0] sm:$0xff]  ;;  %v1591_v6 = vcombine.low %v641_v2, %v645_v4  ;;  %v1592_v7 = vcombine.high %v641_v2, %v645_v4  ;;  %v649_v10 = vld [vmem:[#allocation12 + $0x1c8] sm:$0xff]  ;;  %v598_v17 = vld [vmem:[#allocation12 + $0x30] sm:$0xff]  ;;  %v1548_v23 = vcombine.high %v595_v18, %v599_v20 }
  0xed   : > { %982 = vmatprep.subr.bf16.mxu0 %v1566_v26  ;;  %v1590_v3 = vcombine.high %v640_v0, %v644_v1  ;;  %v1589_v5 = vcombine.low %v640_v0, %v644_v1  ;;  %v648_v8 = vld [vmem:[#allocation12 + $0x1c0] sm:$0xff]  ;;  %v653_v12 = vld [vmem:[#allocation12 + $0x1e8] sm:$0xff]  ;;  %v606_v33 = vld [vmem:[#allocation12 + $0x70] sm:$0xff] }
  0xee   : > { %v652_v9 = vld [vmem:[#allocation12 + $0x1e0] sm:$0xff]  ;;  %v1599_v14 = vcombine.low %v649_v10, %v653_v12  ;;  %v1600_v15 = vcombine.high %v649_v10, %v653_v12  ;;  %v631_v60 = vld [vmem:[#allocation12 + $0x138] sm:$0xff]  ;;  %v634_v1 = vld [vmem:[#allocation12 + $0x150] sm:$0xff] }
  0xef   : > { %v1598_v11 = vcombine.high %v648_v8, %v652_v9  ;;  %v1597_v13 = vcombine.low %v648_v8, %v652_v9  ;;  %v1580_v0 = vcombine.high %v627_v59, %v631_v60  ;;  %v638_v2 = vld [vmem:[#allocation12 + $0x170] sm:$0xff]  ;;  %v639_v4 = vld [vmem:[#allocation12 + $0x178] sm:$0xff] }
  0xf0   : > { %983 = vmatpush1.bf16.msra.mxu0 %v1565_v27  ;;  %v642_v9 = vld [vmem:[#allocation12 + $0x190] sm:$0xff]  ;;  %v647_v12 = vld [vmem:[#allocation12 + $0x1b8] sm:$0xff] }
  0xf1   : > { %984 = vmatprep.subr.bf16.mxu0 %v1574_v30  ;;  %v646_v10 = vld [vmem:[#allocation12 + $0x1b0] sm:$0xff]  ;;  %v655_v20 = vld [vmem:[#allocation12 + $0x1f8] sm:$0xff] }
  0xf2   : > { %v654_v18 = vld [vmem:[#allocation12 + $0x1f0] sm:$0xff] }
  0xf4   : > { %985 = vmatpush1.bf16.msra.mxu0 %v1573_v31 }
  0xf5   : > { %986 = vmatprep.subr.bf16.mxu0 %v1582_v34  ;;  %v603_v34 = vld [vmem:[#allocation12 + $0x58] sm:$0xff] }
  0xf8   : > { %987 = vmatpush1.bf16.msra.mxu0 %v1581_v35  ;;  %v607_v35 = vld [vmem:[#allocation12 + $0x78] sm:$0xff] }
  0xf9   : > { %988 = vmatprep.subr.bf16.mxu0 %v1590_v3  ;;  %v635_v3 = vld [vmem:[#allocation12 + $0x158] sm:$0xff] }
  0xfa   : > { %v1588_v8 = vcombine.high %v635_v3, %v639_v4 }
  0xfc   : > { %989 = vmatpush1.bf16.msra.mxu0 %v1589_v5 }
  0xfd   : > { %990 = vmatprep.subr.bf16.mxu0 %v1598_v11  ;;  %v643_v11 = vld [vmem:[#allocation12 + $0x198] sm:$0xff] }
 0x100   : > { %991 = vmatpush1.bf16.msra.mxu0 %v1597_v13  ;;  %v1585_v13 = vcombine.low %v634_v1, %v638_v2 }
 0x1b3   : > { %v1624_v37 = vpop.f32.mrb[0].mxu0 }
 0x1b4   : > { %v499_v38 = vadd.f32 %v1624_v37, %v1531_v36  ;;  %v493_v39 = vpop.f32.mrb[1].mxu0 }
 0x1b5   : > { %v494_v40 = vadd.f32 %v1531_v36, %v493_v39  ;;  %v1554_v39 = vcombine.high %v602_v32, %v606_v33 }
 0x1b6   : > { %v503_v41 = vmax.f32 %v499_v38, 0.0 }
 0x1b7   : > { %v502_v44 = vmax.f32 %v494_v40, 0.0  ;;  %v1556_v40 = vcombine.high %v603_v34, %v607_v35 }
 0x1b9   : > { %v504_v45 = vpack.c.bf16 %v503_v41, %v502_v44  ;;  %v610_v41 = vld [vmem:[#allocation12 + $0x90] sm:$0xff]  ;;  %v615_v44 = vld [vmem:[#allocation12 + $0xb8] sm:$0xff] }
 0x1ba   : > { %v1562_v47 = vcombine.high %v610_v41, %v614_v42  ;;  %v1564_v48 = vcombine.high %v611_v43, %v615_v44 }
 0x1bb   : > { %1634 = vmatmul.mubr.msk.bf16.vlgmr.msra.gmra.mrb[0].mxu1 %vm544_vm3, %v504_v45  ;;  %v1553_v45 = vcombine.low %v602_v32, %v606_v33 }
 0x1bc   : > { %1020 = vmatpush1.bf16.msra.mxu1 %v1543_v16  ;;  %v594_v16 = vld [vmem:[#allocation12 + $0x10] sm:$0xff]  ;;  %1051 = vmatprep.mubr.bf16.mxu1 %v2083_v24 }
 0x1bd   : > { %1021 = vmatprep.subr.bf16.mxu1 %v1552_v46  ;;  %v1546_v19 = vcombine.high %v594_v16, %v598_v17  ;;  %v1545_v21 = vcombine.low %v594_v16, %v598_v17  ;;  %v1555_v46 = vcombine.low %v603_v34, %v607_v35  ;;  %v1596_v16 = vcombine.high %v643_v11, %v647_v12  ;;  %v650_v17 = vld [vmem:[#allocation12 + $0x1d0] sm:$0xff] }
 0x1bf   : > { %1062 = vmatprep.subr.bf16.mxu0 %v1546_v19  ;;  %v651_v19 = vld [vmem:[#allocation12 + $0x1d8] sm:$0xff] }
 0x1c0   : > { %1022 = vmatpush1.bf16.msra.mxu1 %v1551_v49  ;;  %v618_v49 = vld [vmem:[#allocation12 + $0xd0] sm:$0xff] }
 0x1c1   : > { %1023 = vmatprep.subr.bf16.mxu1 %v1560_v50  ;;  %v622_v50 = vld [vmem:[#allocation12 + $0xf0] sm:$0xff] }
 0x1c2   : > { %v1570_v55 = vcombine.high %v618_v49, %v622_v50 }
 0x1c4   : > { %1024 = vmatpush1.bf16.msra.mxu1 %v1559_v53  ;;  %v1561_v53 = vcombine.low %v610_v41, %v614_v42 }
 0x1c5   : > { %1025 = vmatprep.subr.bf16.mxu1 %v1568_v54  ;;  %v1563_v54 = vcombine.low %v611_v43, %v615_v44 }
 0x1c8   : > { %1026 = vmatpush1.bf16.msra.mxu1 %v1567_v57  ;;  %v626_v57 = vld [vmem:[#allocation12 + $0x110] sm:$0xff] }
 0x1c9   : > { %1027 = vmatprep.subr.bf16.mxu1 %v1576_v58  ;;  %v630_v58 = vld [vmem:[#allocation12 + $0x130] sm:$0xff] }
 0x1ca   : > { %v1577_v5 = vcombine.low %v626_v57, %v630_v58 }
 0x1cc   : > { %1028 = vmatpush1.bf16.msra.mxu1 %v1575_v61  ;;  %v1569_v61 = vcombine.low %v618_v49, %v622_v50 }
 0x1cd   : > { %1029 = vmatprep.subr.bf16.mxu1 %v1584_v62  ;;  %v1571_v62 = vcombine.low %v619_v51, %v623_v52 }
 0x1d0   : > { %1030 = vmatpush1.bf16.msra.mxu1 %v1583_v63  ;;  %v1578_v63 = vcombine.high %v626_v57, %v630_v58 }
 0x1d1   : > { %1031 = vmatprep.subr.bf16.mxu1 %v1592_v7  ;;  %v1586_v7 = vcombine.high %v634_v1, %v638_v2 }
 0x1d4   : > { %1032 = vmatpush1.bf16.msra.mxu1 %v1591_v6  ;;  %v1579_v6 = vcombine.low %v627_v59, %v631_v60 }
 0x1d5   : > { %1033 = vmatprep.subr.bf16.mxu1 %v1600_v15  ;;  %v1594_v15 = vcombine.high %v642_v9, %v646_v10 }
 0x1d8   : > { %1034 = vmatpush1.bf16.msra.mxu1 %v1599_v14  ;;  %v1587_v14 = vcombine.low %v635_v3, %v639_v4 }
 0x1d9   : > { %1105 = vmatprep.subr.bf16.mxu1 %v1548_v23  ;;  %v1602_v23 = vcombine.high %v650_v17, %v654_v18 }
 0x28e   : > { %v582_v26 = vpop.f32.mrb[0].mxu1 }
 0x28f   : > { %v583_v27 = vadd.f32 %v1535_v25, %v582_v26  ;;  %v1635_v28 = vpop.f32.mrb[1].mxu1  ;;  %v1603_v26 = vcombine.low %v651_v19, %v655_v20 }
 0x290   : > { %v585_v29 = vpop.f32.mrb[2].mxu1 }
 0x291   : > { %v586_v30 = vadd.f32 %v1535_v25, %v585_v29  ;;  %v1636_v31 = vpop.f32.mrb[3].mxu1  ;;  %v589_v36 = vmax.f32 %v583_v27, 0.0  ;;  %v1601_v25 = vcombine.low %v650_v17, %v654_v18  ;;  %v1241_v29 = vlaneseq }
 0x293   : > { %v590_v37 = vmax.f32 %v586_v30, 0.0 }
 0x295   : > { %v2404_v38 = vpack.c.bf16 %v590_v37, %v589_v36 }
 0x297   : > { %1009 = vmatmul.mubr.bf16.vlgmr.msra.gmra.mrb[4].mxu0 %v2404_v38  ;;  %1052 = vmatmul.mubr.bf16.vlgmr.msra.gmra.mrb[4].mxu1 %v2404_v38 }
 0x298   : > { %1063 = vmatpush1.bf16.msra.mxu0 %v1545_v21  ;;  %1106 = vmatpush1.bf16.msra.mxu1 %v1547_v22  ;;  %v1593_v21 = vcombine.low %v642_v9, %v646_v10  ;;  %v1595_v22 = vcombine.low %v643_v11, %v647_v12 }
 0x299   : > { %1064 = vmatprep.subr.bf16.mxu0 %v1554_v39  ;;  %1107 = vmatprep.subr.bf16.mxu1 %v1556_v40  ;;  %v2410_v39 = vshrl.u32 %v1241_v29, 7 }
 0x29a   : > { %1094 = vmatprep.mubr.bf16.mxu0 %v2083_v24  ;;  %1137 = vmatprep.mubr.bf16.mxu1 %v2083_v24  ;;  %v1604_v24 = vcombine.high %v651_v19, %v655_v20 }
 0x29b   : > { %v1251_v52 = vsub.s32 2, %v2410_v39  ;;  %v1255_v57 = vsub.s32 3, %v2410_v39 }
 0x29c   : > { %1065 = vmatpush1.bf16.msra.mxu0 %v1553_v45  ;;  %1108 = vmatpush1.bf16.msra.mxu1 %v1555_v46 }
 0x29d   : > { %1066 = vmatprep.subr.bf16.mxu0 %v1562_v47  ;;  %1109 = vmatprep.subr.bf16.mxu1 %v1564_v48  ;;  %v1243_v47 = vsub.s32 0, %v2410_v39 }
 0x2a0   : > { %1067 = vmatpush1.bf16.msra.mxu0 %v1561_v53  ;;  %1110 = vmatpush1.bf16.msra.mxu1 %v1563_v54  ;;  %v2414_v53 = vld [vmem:[#allocation14] sm:$0xff] }
 0x2a1   : > { %1068 = vmatprep.subr.bf16.mxu0 %v1570_v55  ;;  %1111 = vmatprep.subr.bf16.mxu1 %v1572_v56  ;;  %v1247_v55 = vsub.s32 1, %v2410_v39  ;;  %v1244_v1 = vrot.slane %v2414_v53, %v1243_v47  ;;  %v1252_v3 = vrot.slane %v2414_v53, %v1251_v52 }
 0x2a4   : > { %1069 = vmatpush1.bf16.msra.mxu0 %v1569_v61  ;;  %1112 = vmatpush1.bf16.msra.mxu1 %v1571_v62  ;;  %v2084_v61 = vmov 1966171168  }
 0x2a5   : > { %1070 = vmatprep.subr.bf16.mxu0 %v1578_v63  ;;  %1113 = vmatprep.subr.bf16.mxu1 %v1580_v0  ;;  %v1310_v62 = vunpack.c.l.s4 %v2084_v61 }
 0x2a7   : > { %v1311_v11 = vunpack.c.0.s8 %v1310_v62 }
 0x2a8   : > { %1071 = vmatpush1.bf16.msra.mxu0 %v1577_v5  ;;  %1114 = vmatpush1.bf16.msra.mxu1 %v1579_v6  ;;  %v1248_v5 = vrot.slane %v2414_v53, %v1247_v55 }
 0x2a9   : > { %1072 = vmatprep.subr.bf16.mxu0 %v1586_v7  ;;  %1115 = vmatprep.subr.bf16.mxu1 %v1588_v8  ;;  %v1256_v7 = vrot.slane %v2414_v53, %v1255_v57  ;;  %v2423_v20 = vsub.s32 %v1311_v11, %v2410_v39 }
 0x2ac   : > { %1073 = vmatpush1.bf16.msra.mxu0 %v1585_v13  ;;  %1116 = vmatpush1.bf16.msra.mxu1 %v1587_v14 }
 0x2ad   : > { %1074 = vmatprep.subr.bf16.mxu0 %v1594_v15  ;;  %1117 = vmatprep.subr.bf16.mxu1 %v1596_v16 }
 0x2b0   : > { %1075 = vmatpush1.bf16.msra.mxu0 %v1593_v21  ;;  %1118 = vmatpush1.bf16.msra.mxu1 %v1595_v22 }
 0x2b1   : > { %1076 = vmatprep.subr.bf16.mxu0 %v1602_v23  ;;  %1119 = vmatprep.subr.bf16.mxu1 %v1604_v24 }
 0x2b4   : > { %1077 = vmatpush1.bf16.msra.mxu0 %v1601_v25  ;;  %1120 = vmatpush1.bf16.msra.mxu1 %v1603_v26 }
 0x2b7   : > { %1095 = vmatmul.mubr.bf16.vlgmr.msra.gmra.mrb[8].mxu0 %v2404_v38  ;;  %1138 = vmatmul.mubr.bf16.vlgmr.msra.gmra.mrb[8].mxu1 %v2404_v38 }
 0x36a   : > { %v1010_v27 = vpop.f32.mrb[4].mxu0  ;;  %v1053_v28 = vpop.f32.mrb[4].mxu1 }
 0x36b   : > { %v1012_v30 = vpop.f32.mrb[5].mxu0  ;;  %v1055_v31 = vpop.f32.mrb[5].mxu1 }
 0x36c   : > { %v1014_v32 = vpop.f32.mrb[6].mxu0  ;;  %v1057_v33 = vpop.f32.mrb[6].mxu1 }
 0x36d   : > { %v1156_v34 = vmax.f32 %v1010_v27, %v1014_v32  ;;  %v1158_v35 = vmax.f32 %v1053_v28, %v1057_v33  ;;  %v1016_v36 = vpop.f32.mrb[7].mxu0  ;;  %v1059_v37 = vpop.f32.mrb[7].mxu1 }
 0x36e   : > { %v1157_v40 = vmax.f32 %v1012_v30, %v1016_v36  ;;  %v1159_v41 = vmax.f32 %v1055_v31, %v1059_v37 }
 0x36f   : > { %v1191_v42 = vrot.slane %v1156_v34, 4  ;;  %v1203_v43 = vrot.slane %v1158_v35, 4 }
 0x370   : > { %v1197_v44 = vrot.slane %v1157_v40, 4  ;;  %v1209_v45 = vrot.slane %v1159_v41, 4 }
 0x371   : > { %v1192_v38 = vmax.f32 %v1156_v34, %v1191_v42  ;;  %v1204_v46 = vmax.f32 %v1158_v35, %v1203_v43 }
 0x372   : > { %v1198_v48 = vmax.f32 %v1157_v40, %v1197_v44  ;;  %v1210_v49 = vmax.f32 %v1159_v41, %v1209_v45 }
 0x373   : > { %v1193_v50 = vrot.slane %v1192_v38, 2  ;;  %v1205_v51 = vrot.slane %v1204_v46, 2 }
 0x374   : > { %v1199_v54 = vrot.slane %v1198_v48, 2  ;;  %v1211_v56 = vrot.slane %v1210_v49, 2 }
 0x375   : > { %v1194_v58 = vmax.f32 %v1192_v38, %v1193_v50  ;;  %v1206_v59 = vmax.f32 %v1204_v46, %v1205_v51  ;;  %v1267_v51 = vsub.s32 6, %v2410_v39 }
 0x376   : > { %v1200_v60 = vmax.f32 %v1198_v48, %v1199_v54  ;;  %v1212_v63 = vmax.f32 %v1210_v49, %v1211_v56  ;;  %v1259_v49 = vsub.s32 4, %v2410_v39  ;;  %v1263_v54 = vsub.s32 5, %v2410_v39 }
 0x377   : > { %v1195_v0 = vrot.slane %v1194_v58, 1  ;;  %v1207_v2 = vrot.slane %v1206_v59, 1  ;;  %v1271_v56 = vsub.s32 7, %v2410_v39 }
 0x378   : > { %v1201_v4 = vrot.slane %v1200_v60, 1  ;;  %v1213_v6 = vrot.slane %v1212_v63, 1  ;;  %v1260_v62 = vrot.slane %v2414_v53, %v1259_v49 }
 0x379   : > { %v1196_v8 = vmax.f32 %v1194_v58, %v1195_v0  ;;  %v1208_v9 = vmax.f32 %v1206_v59, %v1207_v2  ;;  %v1268_v0 = vrot.slane %v2414_v53, %v1267_v51  ;;  %v1264_v2 = vrot.slane %v2414_v53, %v1263_v54 }
 0x37a   : > { %v1202_v10 = vmax.f32 %v1200_v60, %v1201_v4  ;;  %v1214_v12 = vmax.f32 %v1212_v63, %v1213_v6  ;;  %v1272_v4 = vrot.slane %v2414_v53, %v1271_v56 }
 0x37b   : > { %v1281_v13 = vadd.f32 %v1244_v1, %v1196_v8  ;;  %v1283_v14 = vadd.f32 %v1252_v3, %v1208_v9 }
 0x37c   : > { %v1282_v15 = vadd.f32 %v1248_v5, %v1202_v10  ;;  %v1284_v16 = vadd.f32 %v1256_v7, %v1214_v12 }
 0x37d   : > { %v1289_v17 = vmax.f32 %v1281_v13, 0.0  ;;  %v1291_v18 = vmax.f32 %v1283_v14, 0.0 }
 0x37e   : > { %v1290_v19 = vmax.f32 %v1282_v15, 0.0  ;;  %v1292_v21 = vmax.f32 %v1284_v16, 0.0 }
 0x380   : > { %v1305_v22 = vcombine.low %v1289_v17, %v1290_v19  ;;  %v1306_v23 = vcombine.low %v1291_v18, %v1292_v21 }
 0x382   : > { %v1315_v24 = vrot.slane %v1305_v22, %v2423_v20  ;;  %v1322_v25 = vrot.slane %v1306_v23, %v2423_v20 }
 0x384   : > { %v2427_v26 = vcombine.low %v1315_v24, %v1322_v25 }
 0x386   : > { %v1345_v21 = vrot.slane %v2427_v26, %v2423_v20 }
 0x38a   : > { %v1096_v27 = vpop.f32.mrb[8].mxu0  ;;  %v1139_v28 = vpop.f32.mrb[8].mxu1 }
 0x38b   : > { %v1098_v29 = vpop.f32.mrb[9].mxu0  ;;  %v1141_v30 = vpop.f32.mrb[9].mxu1 }
 0x38c   : > { %v1100_v31 = vpop.f32.mrb[10].mxu0  ;;  %v1143_v32 = vpop.f32.mrb[10].mxu1 }
 0x38d   : > { %v1160_v33 = vmax.f32 %v1096_v27, %v1100_v31  ;;  %v1162_v34 = vmax.f32 %v1139_v28, %v1143_v32  ;;  %v1102_v35 = vpop.f32.mrb[11].mxu0  ;;  %v1145_v36 = vpop.f32.mrb[11].mxu1 }
 0x38e   : > { %v1161_v37 = vmax.f32 %v1098_v29, %v1102_v35  ;;  %v1163_v40 = vmax.f32 %v1141_v30, %v1145_v36 }
 0x38f   : > { %v1215_v41 = vrot.slane %v1160_v33, 4  ;;  %v1227_v42 = vrot.slane %v1162_v34, 4 }
 0x390   : > { %v1221_v43 = vrot.slane %v1161_v37, 4  ;;  %v1233_v44 = vrot.slane %v1163_v40, 4 }
 0x391   : > { %v1216_v45 = vmax.f32 %v1160_v33, %v1215_v41  ;;  %v1228_v38 = vmax.f32 %v1162_v34, %v1227_v42 }
 0x392   : > { %v1222_v46 = vmax.f32 %v1161_v37, %v1221_v43  ;;  %v1234_v47 = vmax.f32 %v1163_v40, %v1233_v44 }
 0x393   : > { %v1217_v48 = vrot.slane %v1216_v45, 2  ;;  %v1229_v50 = vrot.slane %v1228_v38, 2 }
 0x394   : > { %v1223_v52 = vrot.slane %v1222_v46, 2  ;;  %v1235_v55 = vrot.slane %v1234_v47, 2 }
 0x395   : > { %v1218_v57 = vmax.f32 %v1216_v45, %v1217_v48  ;;  %v1230_v58 = vmax.f32 %v1228_v38, %v1229_v50 }
 0x396   : > { %v1224_v59 = vmax.f32 %v1222_v46, %v1223_v52  ;;  %v1236_v60 = vmax.f32 %v1234_v47, %v1235_v55 }
 0x397   : > { %v1219_v61 = vrot.slane %v1218_v57, 1  ;;  %v1231_v63 = vrot.slane %v1230_v58, 1 }
 0x398   : > { %v1225_v1 = vrot.slane %v1224_v59, 1  ;;  %v1237_v3 = vrot.slane %v1236_v60, 1 }
 0x399   : > { %v1220_v5 = vmax.f32 %v1218_v57, %v1219_v61  ;;  %v1232_v6 = vmax.f32 %v1230_v58, %v1231_v63 }
 0x39a   : > { %v1226_v39 = vmax.f32 %v1224_v59, %v1225_v1  ;;  %v1238_v7 = vmax.f32 %v1236_v60, %v1237_v3 }
 0x39b   : > { %v1285_v8 = vadd.f32 %v1260_v62, %v1220_v5  ;;  %v1287_v9 = vadd.f32 %v1268_v0, %v1232_v6 }
 0x39c   : > { %v1286_v10 = vadd.f32 %v1264_v2, %v1226_v39  ;;  %v1288_v11 = vadd.f32 %v1272_v4, %v1238_v7 }
 0x39d   : > { %v1293_v12 = vmax.f32 %v1285_v8, 0.0  ;;  %v1295_v13 = vmax.f32 %v1287_v9, 0.0 }
 0x39e   : > { %v1294_v14 = vmax.f32 %v1286_v10, 0.0  ;;  %v1296_v15 = vmax.f32 %v1288_v11, 0.0 }
 0x3a0   : > { %v1307_v16 = vcombine.low %v1293_v12, %v1294_v14  ;;  %v1308_v17 = vcombine.low %v1295_v13, %v1296_v15 }
 0x3a2   : > { %v1329_v53 = vrot.slane %v1307_v16, %v2423_v20  ;;  %v1336_v18 = vrot.slane %v1308_v17, %v2423_v20 }
 0x3a4   : > { %v1338_v19 = vcombine.low %v1329_v53, %v1336_v18 }
 0x3a6   : > { %v1352_v22 = vrot.slane %v1338_v19, %v2423_v20 }
 0x3a8   : > { %v1353_v23 = vcombine.low %v1345_v21, %v1352_v22 }
 0x3aa   : > { %1355 = vst [vmem:[%s391_s16] sm:$0xff] %v1353_v23 }
 0x3ab   : > { %1985 = shalt.err (!%p1982_p8)
}
 0x3ac   : > { %s1986_s7 = scalar_lea.hbm %s2447_s19, 128  ;;  %s1990_s3 = scalar_lea.hbm %s2528_s14, 256 }
 0x3ad   : > { %p1987_p9 = scmp.ne.s32.totalorder %s2447_s19, %s1986_s7  ;;  %p1991_p3 = scmp.lt.u32.totalorder %s2447_s19, %s2528_s14 }
 0x3ae   : > { %p1992_p7 = scmp.lt.u32.totalorder %s1990_s3, %s1986_s7  ;;  %p1994_p11 = scmp.lt.u32.totalorder %s1986_s7, %s2447_s19 }
 0x3af   : > { %p1988_p4 = pnand %p1987_p9, %p2529_p0 }
 0x3b0   : > { %p1993_p12 = por %p1992_p7, %p1991_p3 }
 0x3b1   : > { %p1989_p6 = pneg %p1988_p4 }
 0x3b2   : > { %p1995_p5 = por %p1994_p11, %p1993_p12 }
 0x3b4   : > { %p1996_p1 = pnand %p1995_p5, %p1989_p6 }
 0x3b6   : > { %1999 = shalt.err (!%p1996_p1)
}
 0x3b7   : > { %1663 = dma.vmem_to_hbm [thread:$0]  (%p2529_p0), %s2449_s23, 128, %s2447_s19, %s1357_s27  }
 0x3b8 PF: > { %s1383_s16 = sand.u32 1, %s2046_s24   ;;  %p2530_p10 = scmp.ne.s32.totalorder %s2524_s15, 0 }
 0x3b9   : > { %p2531_p13 = scmp.ge.s32.totalorder %s2066_s29, 2  ;;  %s1384_s10 = scalar_lea.sflag [#allocation5], %s1383_s16 }
 0x3bb   : > { %p1689_p2 = pnand %p2531_p13, %p2530_p10 }
 0x3bd   : > { %2041 = dma.done.wait (!%p1689_p2), %s1384_s10, 128  }
 0x3be   : > { %2043 = vsyncadd (!%p1689_p2), %s1384_s10, 4294967168  ;;  %s26_s29 = sadd.s32 1, %s2066_s29   ;;  %s2532_s24 = smov %s2050_s25 }
 0x3bf   : > { %p23_p8 = scmp.ge.s32.totalorder %s26_s29, 4   ;;  %s2533_s25 = smov %s2054_s26 }
 0x3c0   : > { %s2534_s26 = smov %s2331_s1  ;;  %s2535_s27 = smov %s2062_s28 }
 0x3c1   : > { %s2536_s28 = smov %s2538_s12  ;;  %25 = sbr.rel (!%p23_p8) target bundleno = 13 (0xd), region = 125 }
 0x3c8   :  { %1389 = vsyncpa [#allocation4], 1 }
 0x3c9   :  { %1391 = vsyncpa [#allocation4 + $0x1], 1 }
 0x3ca   :  { %1392 = vsyncpa [#allocation7], 1 }
 0x3cb   :  { %1393 = vsyncpa [#allocation10], 1 }
 0x3cc   :  { %1394 = vsyncpa [#allocation13], 1 }
 0x3cd   :  { %1395 = vsyncpa [#allocation5], 1 }
 0x3ce   :  { %1397 = vsyncpa [#allocation5 + $0x1], 1 }

// kernel: pointnet_encoder_forward.6
= control target key start
LH: loop header
LB: loop body
LE: loop exit
PB: predicated region body
PF: predicated region fallthrough
CT: control target
= control target key end

     0   :  { %s2540_s0 = inlined_call_operand.hbm [shape: f32[2,16,3], index: 0, kind: input, shape index: {}]   ;;  %s2541_s1 = inlined_call_operand.hbm [shape: f32[2,3,64], index: 1, kind: input, shape index: {}]   ;;  %s2542_s2 = inlined_call_operand.hbm [shape: f32[1,64], index: 2, kind: input, shape index: {}]   ;;  %s2543_s3 = inlined_call_operand.hbm [shape: bf16[64,128], index: 3, kind: input, shape index: {}]   ;;  %s2544_s4 = inlined_call_operand.hbm [shape: f32[1,128], index: 4, kind: input, shape index: {}]   ;;  %s2545_s5 = inlined_call_operand.hbm [shape: bf16[128,1024], index: 5, kind: input, shape index: {}]   ;;  %s2546_s6 = inlined_call_operand.hbm [shape: f32[1,1024], index: 6, kind: input, shape index: {}]   ;;  %s2547_s7 = inlined_call_operand.hbm [shape: f32[2,1,1024], index: 7, kind: output, shape index: {}]  }
   0x1   :  { %2553 = sst [smem:[#allocation22_spill]] %s2540_s0 }
   0x2   :  { %2554 = sst [smem:[#allocation23_spill]] %s2542_s2 }
   0x3   :  { %2555 = sst [smem:[#allocation24_spill]] %s2543_s3 }
   0x4   :  { %2556 = sst [smem:[#allocation25_spill]] %s2544_s4 }
   0x5   :  { %2557 = sst [smem:[#allocation26_spill]] %s2545_s5 }
   0x6   :  { %2558 = sst [smem:[#allocation27_spill]] %s2546_s6 }
   0x7   :  { %2559 = sst [smem:[#allocation28_spill]] %s2547_s7 }
   0x8   :  { %12 = vsyncpa [#allocation4], 0 }
   0x9   :  { %14 = vsyncpa [#allocation4 + $0x1], 0 }
   0xa   :  { %15 = vsyncpa [#allocation7], 0 }
   0xb   :  { %17 = vsyncpa [#allocation7 + $0x1], 0 }
   0xc   :  { %18 = vsyncpa [#allocation10], 0 }
   0xd   :  { %19 = vsyncpa [#allocation13], 0 }
   0xe   :  { %20 = vsyncpa [#allocation5], 0 }
   0xf   :  { %22 = vsyncpa [#allocation5 + $0x1], 0  ;;  %s2157_s24 = smov 0   ;;  %s2159_s25 = smov 0  }
  0x10   :  { %s2161_s26 = smov 0   ;;  %s2163_s27 = smov 0  }
  0x11   :  { %s2165_s28 = smov 0   ;;  %s2167_s29 = smov 0  }
  0x12 LB: > { %s2188_s30 = sadd.s32 4294967295, %s2097_s29   ;;  %p1540_p0 = scmp.ge.s32.totalorder %s2097_s29, 1  ;;  %s2097_s29 = sphi %s2167_s29, %s28_s29   ;;  %s2093_s28 = sphi %s2165_s28, %s2592_s28   ;;  %s2089_s27 = sphi %s2163_s27, %s2591_s27   ;;  %s2085_s26 = sphi %s2161_s26, %s2590_s26   ;;  %s2081_s25 = sphi %s2159_s25, %s2589_s25   ;;  %s2077_s24 = sphi %s2157_s24, %s2588_s24  }
  0x13   : > { %p2548_p1 = scmp.eq.s32.totalorder %s2188_s30, 0  ;;  %p230_p2 = scmp.lt.s32.totalorder %s2097_s29, 3 }
  0x14   : > { %s2099_s9 = smov [#allocation8]   ;;  %s2100_s11 = smov [#allocation9]  }
  0x15   : > { %p2193_p3 = pnand %p1540_p0, %p230_p2  ;;  %s243_s10 = sshll.u32 %s2099_s9, 4  ;;  %s244_s10 = int_to_ptr.vmem [resolvable:$true] %s243_s10 }
  0x16   : > { %s253_s12 = sshll.u32 %s2100_s11, 4  ;;  %s2101_s14 = smov [#allocation12]   ;;  %s2206_s12 = int_to_ptr.vmem [resolvable:$true] %s253_s12 }
  0x17   : > { %s2560_s8 = scalar_select %p2193_p3, 1, 0 }
  0x18   : > { %p1693_p5 = pneg %p2193_p3  ;;  %s2208_s15 = sshll.u32 %s2101_s14, 4  ;;  %s278_s15 = int_to_ptr.vmem [resolvable:$true] %s2208_s15 }
  0x19   : > { %s2562_s2 = sld [smem:[#allocation23_spill]] }
  0x1a   : > { %p2202_p6 = pnand %p1693_p5, %p2548_p1 }
  0x1c   : > { %p2218_p8 = pneg %p2202_p6 }
  0x1f   : > { %s1799_s18 = scalar_lea.hbm %s2562_s2, 16 }
  0x20   : > { %p1800_p7 = scmp.ne.s32.totalorder %s2562_s2, %s1799_s18  ;;  %p1806_p11 = scmp.lt.u32.totalorder %s1799_s18, %s2562_s2 }
  0x22   : > { %p1802_p9 = pnand %p2218_p8, %p1800_p7 }
  0x24   : > { %p1803_p10 = pneg %p1802_p9 }
  0x26   : > { %p1808_p12 = pnand %p1806_p11, %p1803_p10 }
  0x28   : > { %1811 = shalt.err (!%p1808_p12)
}
  0x29   : > { %s1812_s9 = scalar_lea.vmem %s244_s10, 16  ;;  %s1819_s11 = scalar_lea.vmem %s244_s10, 32 }
  0x2a   : > { %p1813_p13 = scmp.ne.s32.totalorder %s244_s10, %s1812_s9  ;;  %p1820_p5 = scmp.lt.s32.totalorder %s244_s10, %s244_s10 }
  0x2b   : > { %p1821_p4 = scmp.lt.s32.totalorder %s1819_s11, %s1812_s9 }
  0x2c   : > { %p1815_p0 = pnand %p1813_p13, %p2218_p8 }
  0x2d   : > { %p1822_p1 = por %p1821_p4, %p1820_p5 }
  0x2e   : > { %p1816_p2 = pneg %p1815_p0 }
  0x30   : > { %p1823_p3 = pnand %p1822_p1, %p1816_p2 }
  0x32   : > { %1826 = shalt.err (!%p1823_p3)
}
  0x33   : > { %1696 = dma.hbm_to_vmem [thread:$0]  (!%p2202_p6), %s2562_s2, 16, %s244_s10, [#allocation7]  }
  0x34   : > { %s2564_s3 = sld [smem:[#allocation24_spill]] }
  0x3a   : > { %s1827_s19 = scalar_lea.hbm %s2564_s3, 512 }
  0x3b   : > { %p1828_p7 = scmp.ne.s32.totalorder %s2564_s3, %s1827_s19  ;;  %p1834_p1 = scmp.lt.u32.totalorder %s1827_s19, %s2564_s3 }
  0x3d   : > { %p1830_p9 = pnand %p1828_p7, %p2218_p8 }
  0x3f   : > { %p1831_p4 = pneg %p1830_p9 }
  0x41   : > { %p1836_p3 = pnand %p1834_p1, %p1831_p4 }
  0x43   : > { %1839 = shalt.err (!%p1836_p3)
}
  0x44   : > { %s1840_s10 = scalar_lea.vmem %s2206_s12, 512  ;;  %p1848_p13 = scmp.lt.s32.totalorder %s2206_s12, %s2206_s12 }
  0x45   : > { %p1841_p10 = scmp.ne.s32.totalorder %s2206_s12, %s1840_s10  ;;  %p1849_p0 = scmp.lt.s32.totalorder %s1840_s10, %s1840_s10 }
  0x47   : > { %p1843_p11 = pnand %p1841_p10, %p2218_p8  ;;  %p1850_p2 = por %p1849_p0, %p1848_p13 }
  0x49   : > { %p1844_p12 = pneg %p1843_p11 }
  0x4b   : > { %p1851_p5 = pnand %p1850_p2, %p1844_p12 }
  0x4d   : > { %1854 = shalt.err (!%p1851_p5)
}
  0x4e   : > { %s2102_s11 = smov 64   ;;  %s2103_s14 = smov 4  }
  0x4f   : > { %1699 = dma.hbm_to_vmem [thread:$0]  (!%p2202_p6), %s2564_s3, 512, %s2206_s12, [#allocation10], %s2102_s11, %s2102_s11, %s2103_s14  }
  0x50   : > { %s2565_s5 = sld [smem:[#allocation26_spill]] }
  0x56   : > { %s1855_s20 = scalar_lea.hbm %s2565_s5, 8192 }
  0x57   : > { %p1856_p7 = scmp.ne.s32.totalorder %s2565_s5, %s1855_s20  ;;  %p1862_p1 = scmp.lt.u32.totalorder %s1855_s20, %s2565_s5 }
  0x59   : > { %p1858_p9 = pnand %p1856_p7, %p2218_p8 }
  0x5b   : > { %p1859_p4 = pneg %p1858_p9 }
  0x5d   : > { %p1864_p3 = pnand %p1862_p1, %p1859_p4 }
  0x5f   : > { %1867 = shalt.err (!%p1864_p3)
}
  0x60   : > { %s1868_s16 = scalar_lea.vmem %s278_s15, 8192  ;;  %p1876_p13 = scmp.lt.s32.totalorder %s278_s15, %s278_s15 }
  0x61   : > { %p1869_p10 = scmp.ne.s32.totalorder %s278_s15, %s1868_s16  ;;  %p1877_p0 = scmp.lt.s32.totalorder %s1868_s16, %s1868_s16 }
  0x63   : > { %p1871_p11 = pnand %p1869_p10, %p2218_p8  ;;  %p1878_p2 = por %p1877_p0, %p1876_p13 }
  0x65   : > { %p1872_p12 = pneg %p1871_p11 }
  0x67   : > { %p1879_p5 = pnand %p1878_p2, %p1872_p12 }
  0x69   : > { %1882 = shalt.err (!%p1879_p5)
}
  0x6a   : > { %s2104_s12 = smov 512   ;;  %s2105_s11 = smov 32  }
  0x6b   : > { %1705 = dma.hbm_to_vmem [thread:$0]  (!%p2202_p6), %s2565_s5, 8192, %s278_s15, [#allocation13], %s2104_s12, %s2104_s12, %s2105_s11  }
  0x6c   : > { %s2106_s18 = smov [#allocation11]   ;;  %s2107_s20 = smov [#allocation14]  }
  0x6d   : > { %s267_s19 = sshll.u32 %s2106_s18, 4  ;;  %s291_s22 = sshll.u32 %s2107_s20, 4  ;;  %s268_s19 = int_to_ptr.vmem [resolvable:$true] %s267_s19  ;;  %s292_s22 = int_to_ptr.vmem [resolvable:$true] %s291_s22 }
  0x6e   : > { %s2566_s4 = sld [smem:[#allocation25_spill]] }
  0x74   : > { %s1883_s10 = scalar_lea.hbm %s2566_s4, 16 }
  0x75   : > { %p1884_p7 = scmp.ne.s32.totalorder %s2566_s4, %s1883_s10  ;;  %p1890_p1 = scmp.lt.u32.totalorder %s1883_s10, %s2566_s4 }
  0x77   : > { %p1886_p9 = pnand %p1884_p7, %p2218_p8 }
  0x79   : > { %p1887_p4 = pneg %p1886_p9 }
  0x7b   : > { %p1892_p3 = pnand %p1890_p1, %p1887_p4 }
  0x7d   : > { %1895 = shalt.err (!%p1892_p3)
}
  0x7e   : > { %s1896_s15 = scalar_lea.vmem %s268_s19, 16  ;;  %s1903_s12 = scalar_lea.vmem %s268_s19, 32 }
  0x7f   : > { %p1897_p10 = scmp.ne.s32.totalorder %s268_s19, %s1896_s15  ;;  %p1904_p13 = scmp.lt.s32.totalorder %s268_s19, %s268_s19 }
  0x80   : > { %p1905_p0 = scmp.lt.s32.totalorder %s1903_s12, %s1896_s15 }
  0x81   : > { %p1899_p11 = pnand %p1897_p10, %p2218_p8 }
  0x82   : > { %p1906_p2 = por %p1905_p0, %p1904_p13 }
  0x83   : > { %p1900_p12 = pneg %p1899_p11 }
  0x85   : > { %p1907_p5 = pnand %p1906_p2, %p1900_p12 }
  0x87   : > { %1910 = shalt.err (!%p1907_p5)
}
  0x88   : > { %1702 = dma.hbm_to_vmem [thread:$0]  (!%p2202_p6), %s2566_s4, 16, %s268_s19, [#allocation10]  }
  0x89   : > { %s2567_s6 = sld [smem:[#allocation27_spill]] }
  0x8f   : > { %s1911_s14 = scalar_lea.hbm %s2567_s6, 128 }
  0x90   : > { %p1912_p7 = scmp.ne.s32.totalorder %s2567_s6, %s1911_s14  ;;  %p1918_p1 = scmp.lt.u32.totalorder %s1911_s14, %s2567_s6 }
  0x92   : > { %p1914_p9 = pnand %p1912_p7, %p2218_p8 }
  0x94   : > { %p1915_p4 = pneg %p1914_p9 }
  0x96   : > { %p1920_p3 = pnand %p1918_p1, %p1915_p4 }
  0x98   : > { %1923 = shalt.err (!%p1920_p3)
}
  0x99   : > { %s1924_s9 = scalar_lea.vmem %s292_s22, 128  ;;  %p1932_p13 = scmp.lt.s32.totalorder %s292_s22, %s292_s22 }
  0x9a   : > { %p1925_p10 = scmp.ne.s32.totalorder %s292_s22, %s1924_s9  ;;  %p1933_p0 = scmp.lt.s32.totalorder %s1924_s9, %s1924_s9 }
  0x9c   : > { %p1927_p11 = pnand %p1925_p10, %p2218_p8  ;;  %p1934_p2 = por %p1933_p0, %p1932_p13 }
  0x9e   : > { %p1928_p12 = pneg %p1927_p11 }
  0xa0   : > { %p1935_p5 = pnand %p1934_p2, %p1928_p12 }
  0xa2   : > { %1938 = shalt.err (!%p1935_p5)
}
  0xa3   : > { %1708 = dma.hbm_to_vmem [thread:$0]  (!%p2202_p6), %s2567_s6, 128, %s292_s22, [#allocation13]  }
  0xa4   : > { %s1539_s21 = sadd.s32 4294967294, %s2097_s29   ;;  %s40_s16 = sadd.s32 1, %s2093_s28 }
  0xa5   : > { %s49_s13 = sadd.s32 1, %s2085_s26  ;;  %p42_p8 = scmp.ge.s32.totalorder %s40_s16, 2 }
  0xa6   : > { %p56_p7 = scmp.ne.s32.totalorder %s2085_s26, %s2081_s25  ;;  %p57_p9 = scmp.eq.s32.totalorder %s2097_s29, 0 }
  0xa7   : > { %p62_p4 = scmp.ne.s32.totalorder %s2081_s25, %s2077_s24  ;;  %s2594_s16 = smov (%p42_p8, %s40_s16), 0 }
  0xa8   : > { %p2322_p1 = por %p57_p9, %p56_p7  ;;  %p2569_p3 = scmp.eq.s32.totalorder %s2188_s30, 0 }
  0xa9   : > { %s44_s12 = ssub.s32 %s2093_s28, %s2594_s16  ;;  %p217_p10 = scmp.eq.s32.totalorder %s2188_s30, 1 }
  0xaa   : > { %p2328_p6 = por %p2569_p3, %p62_p4  ;;  %p47_p11 = scmp.eq.s32.totalorder %s44_s12, 0 }
  0xab   : > { %p223_p12 = scmp.eq.s32.totalorder %s1539_s21, 1  ;;  %p2335_p13 = por %p217_p10, %p56_p7 }
  0xac   : > { %s2570_s22 = scalar_select %p2328_p6, 1, 0 }
  0xad   : > { %s2571_s2 = scalar_select %p2335_p13, 1, 0 }
  0xae   : > { %p1725_p0 = scmp.lt.s32.totalorder %s2097_s29, 2  ;;  %p2343_p2 = por %p223_p12, %p62_p4 }
  0xaf   : > { %s2341_s11 = scalar_select %p47_p11, %s2085_s26, %s49_s13  }
  0xb0   : > { %s2572_s3 = scalar_select %p2343_p2, 1, 0 }
  0xb1   : > { %s2348_s7 = sand.u32 1, %s2085_s26   ;;  %s1640_s17 = sshll.u32 %s2093_s28, 8 }
  0xb2   : > { %s1547_s14 = sshll.u32 %s2348_s7, 4  ;;  %s2573_s0 = sld [smem:[#allocation22_spill]] }
  0xb3   : > { %s306_s9 = scalar_lea.vmem [#allocation3], %s1547_s14  ;;  %p2361_p5 = pnand %p1725_p0, %p2322_p1 }
  0xb4   : > { %s315_s19 = sshll.u32 %s306_s9, 4  ;;  %s303_s13 = scalar_lea.sflag [#allocation4], %s2348_s7  ;;  %s2357_s19 = int_to_ptr.vmem [resolvable:$true] %s315_s19 }
  0xb5   : > { %p1941_p7 = pneg %p2361_p5 }
  0xb8   : > { %s2355_s23 = scalar_lea.hbm %s2573_s0, %s1640_s17  ;;  %s1944_s15 = scalar_lea.hbm %s2573_s0, 512 }
  0xb9   : > { %s1939_s12 = scalar_lea.hbm %s2355_s23, 256  ;;  %p1945_p1 = scmp.lt.u32.totalorder %s2355_s23, %s2573_s0 }
  0xba   : > { %p1940_p8 = scmp.ne.s32.totalorder %s2355_s23, %s1939_s12  ;;  %p1946_p3 = scmp.lt.u32.totalorder %s1944_s15, %s1939_s12 }
  0xbb   : > { %p1948_p11 = scmp.lt.u32.totalorder %s1939_s12, %s2355_s23 }
  0xbc   : > { %p1942_p9 = pnand %p1941_p7, %p1940_p8  ;;  %p1947_p10 = por %p1946_p3, %p1945_p1 }
  0xbe   : > { %p1943_p4 = pneg %p1942_p9  ;;  %p1949_p12 = por %p1948_p11, %p1947_p10 }
  0xc0   : > { %p1950_p0 = pnand %p1949_p12, %p1943_p4 }
  0xc2   : > { %1953 = shalt.err (!%p1950_p0)
}
  0xc3   : > { %s1954_s9 = scalar_lea.vmem %s2357_s19, 256  ;;  %s2108_s14 = smov [#allocation3]  }
  0xc4   : > { %p1955_p8 = scmp.ne.s32.totalorder %s2357_s19, %s1954_s9  ;;  %s1959_s17 = sshll.u32 %s2108_s14, 4  ;;  %s1960_s17 = int_to_ptr.vmem [resolvable:$false] %s1959_s17 }
  0xc5   : > { %s1961_s18 = scalar_lea.vmem %s1960_s17, 512  ;;  %p1962_p13 = scmp.lt.s32.totalorder %s2357_s19, %s1960_s17 }
  0xc6   : > { %p1957_p9 = pnand %p1955_p8, %p1941_p7  ;;  %p1963_p1 = scmp.lt.s32.totalorder %s1961_s18, %s1954_s9 }
  0xc8   : > { %p1958_p2 = pneg %p1957_p9  ;;  %p1964_p3 = por %p1963_p1, %p1962_p13 }
  0xca   : > { %p1965_p10 = pnand %p1964_p3, %p1958_p2 }
  0xcc   : > { %1968 = shalt.err (!%p1965_p10)
}
  0xcd   : > { %s2109_s12 = smov 128   ;;  %s2110_s15 = smov 8  }
  0xce   : > { %1712 = dma.hbm_to_vmem [thread:$0]  (!%p2361_p5), %s2355_s23, 256, %s2357_s19, %s303_s13, %s2109_s12, %s2109_s12, %s2110_s15  }
  0xcf   : > { %s1550_s20 = sshll.u32 %s2348_s7, 2  ;;  %s1551_s14 = sshll.u32 %s2093_s28, 6 }
  0xd0   : > { %s2399_s18 = scalar_lea.hbm %s2541_s1, %s1551_s14  ;;  %s329_s21 = scalar_lea.vmem [#allocation6], %s1550_s20 }
  0xd1   : > { %s336_s0 = sshll.u32 %s329_s21, 4  ;;  %s2575_s4 = sand.u32 1, %s2097_s29   ;;  %s337_s0 = int_to_ptr.vmem [resolvable:$true] %s336_s0 }
  0xd2   : > { %s326_s5 = scalar_lea.sflag [#allocation7], %s2575_s4  ;;  %s1969_s6 = scalar_lea.hbm %s2399_s18, 64 }
  0xd3   : > { %p1970_p13 = scmp.ne.s32.totalorder %s2399_s18, %s1969_s6  ;;  %s1974_s19 = scalar_lea.hbm %s2541_s1, 128 }
  0xd4   : > { %p1975_p11 = scmp.lt.u32.totalorder %s2399_s18, %s2541_s1  ;;  %p1976_p12 = scmp.lt.u32.totalorder %s1974_s19, %s1969_s6 }
  0xd5   : > { %p1972_p2 = pnand %p1970_p13, %p1941_p7  ;;  %p1978_p8 = scmp.lt.u32.totalorder %s1969_s6, %s2399_s18 }
  0xd6   : > { %p1977_p0 = por %p1976_p12, %p1975_p11 }
  0xd7   : > { %p1973_p4 = pneg %p1972_p2 }
  0xd8   : > { %p1979_p9 = por %p1978_p8, %p1977_p0 }
  0xda   : > { %p1980_p1 = pnand %p1979_p9, %p1973_p4 }
  0xdc   : > { %1983 = shalt.err (!%p1980_p1)
}
  0xdd   : > { %s1984_s4 = scalar_lea.vmem %s337_s0, 64  ;;  %s2111_s21 = smov [#allocation6]  }
  0xde   : > { %p1985_p3 = scmp.ne.s32.totalorder %s337_s0, %s1984_s4  ;;  %s1989_s15 = sshll.u32 %s2111_s21, 4  ;;  %s1990_s15 = int_to_ptr.vmem [resolvable:$false] %s1989_s15 }
  0xdf   : > { %s1991_s20 = scalar_lea.vmem %s1990_s15, 128  ;;  %p1992_p2 = scmp.lt.s32.totalorder %s337_s0, %s1990_s15 }
  0xe0   : > { %p1987_p10 = pnand %p1985_p3, %p1941_p7  ;;  %p1993_p6 = scmp.lt.s32.totalorder %s1991_s20, %s1984_s4 }
  0xe2   : > { %p1988_p13 = pneg %p1987_p10  ;;  %p1994_p11 = por %p1993_p6, %p1992_p2 }
  0xe4   : > { %p1995_p12 = pnand %p1994_p11, %p1988_p13 }
  0xe6   : > { %1998 = shalt.err (!%p1995_p12)
}
  0xe7   : > { %1715 = dma.hbm_to_vmem [thread:$0]  (!%p2361_p5), %s2399_s18, 64, %s337_s0, %s326_s5  }
  0xe8   : > { %p2576_p4 = scmp.ne.s32.totalorder %s2560_s8, 0 }
  0xe9   : > { %s2425_s6 = sand.u32 (!%p2576_p4), 1, %s2081_s25   ;;  %p2577_p7 = scmp.ne.s32.totalorder (!%p2576_p4), %s2570_s22, 0 }
  0xea   : > { %345 = sbr.rel (%p2576_p4) target bundleno = 984 (0x3d8), region = 48  ;;  %s1553_s14 = sshll.u32 (!%p2576_p4), %s2425_s6, 4 }
  0xeb   : > { %s348_s17 = scalar_lea.sflag (!%p2576_p4), [#allocation4], %s2425_s6  ;;  %s351_s9 = scalar_lea.vmem (!%p2576_p4), [#allocation3], %s1553_s14 }
  0xf1   : > { %2052 = dma.done.wait (%p2577_p7), %s348_s17, 256  }
  0xf2   : > { %2054 = vsyncadd (%p2577_p7), %s348_s17, 4294967040  ;;  %s356_s0 = sand.u32 1, %s2188_s30   ;;  %s1554_s5 = sshll.u32 %s2425_s6, 2 }
  0xf3   : > { %s357_s8 = scalar_lea.sflag [#allocation7], %s356_s0  ;;  %s360_s10 = scalar_lea.vmem [#allocation6], %s1554_s5 }
  0xf4   : > { %2056 = dma.done.wait (%p2577_p7), %s357_s8, 64  }
  0xf5   : > { %2058 = vsyncadd (%p2577_p7), %s357_s8, 4294967232  ;;  %p2578_p6 = scmp.eq.s32.totalorder %s2188_s30, 0 }
  0xf7   : > { %2060 = dma.done.wait (%p2578_p6), [#allocation7], 16   ;;  %p2579_p5 = pmov %p2578_p6 }
  0xf9   : > { %2062 = vsyncadd (%p2579_p5), [#allocation7], 4294967280  ;;  %p2580_p0 = pmov %p2579_p5 }
  0xfb   : > { %2064 = dma.done.wait (%p2580_p0), [#allocation10], 528   ;;  %p2581_p8 = pmov %p2580_p0 }
  0xfc   : > { %p2582_p9 = pmov %p2580_p0 }
  0xfd   : > { %2066 = vsyncadd (%p2581_p8), [#allocation10], 4294966768 }
  0xfe   : > { %2068 = dma.done.wait (%p2582_p9), [#allocation13], 8320   ;;  %p2583_p1 = pmov %p2580_p0 }
  0xff   : > { %v2112_v0 = vmov 0.0   ;;  %vm447_vm0 = vcmask 1042432   ;;  %vm440_vm1 = vcmask 23552   ;;  %v432_v1 = vld [vmem:[%s360_s10] sm:$0x7]  ;;  %v431_v3 = vld [vmem:[%s351_s9 + $0x8] sm:$0xff] }
 0x100   : > { %2070 = vsyncadd (%p2583_p1), [#allocation13], 4294958976  ;;  %1655 = vmatprep.subr.bf16.mxu1 %v2112_v0  ;;  %v430_v2 = vld [vmem:[%s351_s9] sm:$0xff]  ;;  %1650 = vmatprep.subr.msk.mxu0 %vm447_vm0, %v432_v1  ;;  %vm2113_vm2 = vmmov 0   ;;  %v1561_v36 = vld [vmem:[#allocation8] ss:$0 sm:$0xff] }
 0x101   : > { %1652 = vmatprep.mubr.msk.f32.mxu0 %vm440_vm1, %v430_v2  ;;  %v1795_v4 = vld [vmem:[#allocation9] sm:$0xff]   ;;  %1651 = vmatpush3.msk.msra.mxu0 %vm447_vm0, %v432_v1  ;;  %v1796_v5 = vld [vmem:[#allocation9 + $0x8] sm:$0xff]   ;;  %v1797_v6 = vld [vmem:[#allocation9 + $0x10] sm:$0xff]   ;;  %vm568_vm3 = vcmask 523264   ;;  %s1560_s30 = sshll.u32 %s2425_s6, 3  ;;  %s1641_s22 = sshll.u32 %s2089_s27, 7 }
 0x102   : > { %1653 = vmatmul.mubr.msk.f32.vlgmr.msra.gmra.mrb[0].mxu0 %vm440_vm1, %v431_v3  ;;  %1656 = vmatpush3.bf16.msra.mxu1 %v1795_v4  ;;  %v1798_v7 = vld [vmem:[#allocation9 + $0x18] sm:$0xff]   ;;  %v616_v8 = vld [vmem:[#allocation12] sm:$0xff]  ;;  %v617_v10 = vld [vmem:[#allocation12 + $0x8] sm:$0xff]  ;;  %s415_s18 = scalar_lea.vmem [#allocation15], %s1560_s30  ;;  %s2584_s13 = sld [smem:[#allocation28_spill]] }
 0x103   : > { %1657 = vmatprep.subr.bf16.mxu1 %v2112_v0  ;;  %1663 = vmatprep.mubr.msk.bf16.mxu1 %vm2113_vm2, %v2112_v0  ;;  %v620_v9 = vld [vmem:[#allocation12 + $0x20] sm:$0xff]  ;;  %v621_v13 = vld [vmem:[#allocation12 + $0x28] sm:$0xff]  ;;  %s1387_s7 = sshll.u32 %s415_s18, 4  ;;  %s1373_s4 = scalar_lea.sflag [#allocation5], %s2425_s6  ;;  %s2493_s7 = int_to_ptr.vmem [resolvable:$true] %s1387_s7 }
 0x104   : > { %v1571_v11 = vcombine.low %v616_v8, %v620_v9  ;;  %v1572_v12 = vcombine.high %v616_v8, %v620_v9  ;;  %v624_v14 = vld [vmem:[#allocation12 + $0x40] sm:$0xff]  ;;  %v1573_v16 = vcombine.low %v617_v10, %v621_v13  ;;  %v1574_v17 = vcombine.high %v617_v10, %v621_v13  ;;  %v625_v42 = vld [vmem:[#allocation12 + $0x48] sm:$0xff]  ;;  %s1999_s27 = scalar_lea.vmem %s2493_s7, 128  ;;  %p2585_p10 = scmp.ne.s32.totalorder %s2571_s2, 0 }
 0x105   : > { %v628_v15 = vld [vmem:[#allocation12 + $0x60] sm:$0xff]  ;;  %v629_v43 = vld [vmem:[#allocation12 + $0x68] sm:$0xff]  ;;  %p2000_p3 = scmp.ne.s32.totalorder %s2493_s7, %s1999_s27  ;;  %s2116_s21 = smov [#allocation15]  }
 0x106   : > { %1658 = vmatpush3.bf16.msra.mxu1 %v1796_v5  ;;  %v1580_v18 = vcombine.high %v624_v14, %v628_v15  ;;  %1000 = vmatprep.subr.bf16.mxu0 %v1572_v12  ;;  %v1579_v19 = vcombine.low %v624_v14, %v628_v15  ;;  %v632_v20 = vld [vmem:[#allocation12 + $0x80] sm:$0xff]  ;;  %v1582_v46 = vcombine.high %v625_v42, %v629_v43  ;;  %v633_v47 = vld [vmem:[#allocation12 + $0x88] sm:$0xff]  ;;  %s2003_s15 = sshll.u32 %s2116_s21, 4  ;;  %s2004_s15 = int_to_ptr.vmem [resolvable:$false] %s2003_s15 }
 0x107   : > { %1659 = vmatprep.subr.bf16.mxu1 %v2112_v0  ;;  %1001 = vmatpush1.bf16.msra.mxu0 %v1571_v11  ;;  %v636_v21 = vld [vmem:[#allocation12 + $0xa0] sm:$0xff]  ;;  %v637_v48 = vld [vmem:[#allocation12 + $0xa8] sm:$0xff]  ;;  %v1581_v49 = vcombine.low %v625_v42, %v629_v43  ;;  %v638_v42 = vld [vmem:[#allocation12 + $0xb0] sm:$0xff]  ;;  %p2001_p13 = pnand %p2000_p3, %p2585_p10  ;;  %s2005_s20 = scalar_lea.vmem %s2004_s15, 256 }
 0x108   : > { %1002 = vmatprep.subr.bf16.mxu0 %v1580_v18  ;;  %v1588_v22 = vcombine.high %v632_v20, %v636_v21  ;;  %v1587_v23 = vcombine.low %v632_v20, %v636_v21  ;;  %v640_v24 = vld [vmem:[#allocation12 + $0xc0] sm:$0xff]  ;;  %v1590_v50 = vcombine.high %v633_v47, %v637_v48  ;;  %v641_v51 = vld [vmem:[#allocation12 + $0xc8] sm:$0xff]  ;;  %v1589_v53 = vcombine.low %v633_v47, %v637_v48  ;;  %v619_v18 = vld [vmem:[#allocation12 + $0x18] sm:$0xff]  ;;  %s2491_s12 = scalar_lea.hbm %s2584_s13, %s1641_s22  ;;  %p2006_p11 = scmp.lt.s32.totalorder %s2493_s7, %s2004_s15 }
 0x109   : > { %v644_v25 = vld [vmem:[#allocation12 + $0xe0] sm:$0xff]  ;;  %v645_v52 = vld [vmem:[#allocation12 + $0xe8] sm:$0xff]  ;;  %v623_v20 = vld [vmem:[#allocation12 + $0x38] sm:$0xff]  ;;  %p2002_p2 = pneg %p2001_p13  ;;  %p2007_p12 = scmp.lt.s32.totalorder %s2005_s20, %s1999_s27 }
 0x10a   : > { %1660 = vmatpush3.bf16.msra.mxu1 %v1797_v6  ;;  %v1596_v26 = vcombine.high %v640_v24, %v644_v25  ;;  %v1595_v27 = vcombine.low %v640_v24, %v644_v25  ;;  %v648_v28 = vld [vmem:[#allocation12 + $0x100] sm:$0xff]  ;;  %v1598_v54 = vcombine.high %v641_v51, %v645_v52  ;;  %v649_v55 = vld [vmem:[#allocation12 + $0x108] sm:$0xff]  ;;  %v1597_v57 = vcombine.low %v641_v51, %v645_v52  ;;  %v1565_v25 = vld [vmem:[#allocation11] ss:$0 sm:$0xff] }
 0x10b   : > { %1661 = vmatprep.subr.bf16.mxu1 %v2112_v0  ;;  %1003 = vmatpush1.bf16.msra.mxu0 %v1579_v19  ;;  %v652_v29 = vld [vmem:[#allocation12 + $0x120] sm:$0xff]  ;;  %v653_v56 = vld [vmem:[#allocation12 + $0x128] sm:$0xff]  ;;  %v2114_v24 = vmov 0   ;;  %v635_v43 = vld [vmem:[#allocation12 + $0x98] sm:$0xff]  ;;  %p2008_p4 = por %p2007_p12, %p2006_p11 }
 0x10c   : > { %1004 = vmatprep.subr.bf16.mxu0 %v1588_v22  ;;  %v1604_v30 = vcombine.high %v648_v28, %v652_v29  ;;  %v1603_v31 = vcombine.low %v648_v28, %v652_v29  ;;  %v656_v32 = vld [vmem:[#allocation12 + $0x140] sm:$0xff]  ;;  %v1606_v58 = vcombine.high %v649_v55, %v653_v56  ;;  %v657_v59 = vld [vmem:[#allocation12 + $0x148] sm:$0xff]  ;;  %v1605_v61 = vcombine.low %v649_v55, %v653_v56  ;;  %v643_v51 = vld [vmem:[#allocation12 + $0xd8] sm:$0xff] }
 0x10d   : > { %v660_v33 = vld [vmem:[#allocation12 + $0x160] sm:$0xff]  ;;  %v661_v60 = vld [vmem:[#allocation12 + $0x168] sm:$0xff]  ;;  %v1577_v22 = vcombine.low %v619_v18, %v623_v20  ;;  %1032 = vmatprep.mubr.bf16.mxu0 %v2114_v24  ;;  %v647_v52 = vld [vmem:[#allocation12 + $0xf8] sm:$0xff]  ;;  %p2009_p7 = pnand %p2008_p4, %p2002_p2 }
 0x10e   : > { %1662 = vmatpush3.bf16.msra.mxu1 %v1798_v7  ;;  %v1612_v34 = vcombine.high %v656_v32, %v660_v33  ;;  %v1611_v35 = vcombine.low %v656_v32, %v660_v33  ;;  %v1614_v62 = vcombine.high %v657_v59, %v661_v60  ;;  %v1613_v63 = vcombine.low %v657_v59, %v661_v60  ;;  %v664_v0 = vld [vmem:[#allocation12 + $0x180] sm:$0xff]  ;;  %v665_v2 = vld [vmem:[#allocation12 + $0x188] sm:$0xff]  ;;  %v626_v32 = vld [vmem:[#allocation12 + $0x50] sm:$0xff] }
 0x10f   : > { %1043 = vmatprep.subr.bf16.mxu1 %v1574_v17  ;;  %1005 = vmatpush1.bf16.msra.mxu0 %v1587_v23  ;;  %v668_v1 = vld [vmem:[#allocation12 + $0x1a0] sm:$0xff]  ;;  %v669_v4 = vld [vmem:[#allocation12 + $0x1a8] sm:$0xff]  ;;  %v622_v17 = vld [vmem:[#allocation12 + $0x30] sm:$0xff]  ;;  %v1578_v23 = vcombine.high %v619_v18, %v623_v20  ;;  %v1602_v56 = vcombine.high %v643_v51, %v647_v52 }
 0x110   : > { %1006 = vmatprep.subr.bf16.mxu0 %v1596_v26  ;;  %v1620_v3 = vcombine.high %v664_v0, %v668_v1  ;;  %v1619_v5 = vcombine.low %v664_v0, %v668_v1  ;;  %v1621_v6 = vcombine.low %v665_v2, %v669_v4  ;;  %v1622_v7 = vcombine.high %v665_v2, %v669_v4  ;;  %v672_v8 = vld [vmem:[#allocation12 + $0x1c0] sm:$0xff]  ;;  %v673_v10 = vld [vmem:[#allocation12 + $0x1c8] sm:$0xff]  ;;  %v630_v33 = vld [vmem:[#allocation12 + $0x70] sm:$0xff] }
 0x111   : > { %v676_v9 = vld [vmem:[#allocation12 + $0x1e0] sm:$0xff]  ;;  %v677_v12 = vld [vmem:[#allocation12 + $0x1e8] sm:$0xff]  ;;  %v651_v59 = vld [vmem:[#allocation12 + $0x118] sm:$0xff] }
 0x112   : > { %v1628_v11 = vcombine.high %v672_v8, %v676_v9  ;;  %v1627_v13 = vcombine.low %v672_v8, %v676_v9  ;;  %v1629_v14 = vcombine.low %v673_v10, %v677_v12  ;;  %v1630_v15 = vcombine.high %v673_v10, %v677_v12  ;;  %v655_v60 = vld [vmem:[#allocation12 + $0x138] sm:$0xff]  ;;  %v658_v1 = vld [vmem:[#allocation12 + $0x150] sm:$0xff] }
 0x113   : > { %1007 = vmatpush1.bf16.msra.mxu0 %v1595_v27  ;;  %v1610_v0 = vcombine.high %v651_v59, %v655_v60  ;;  %v662_v2 = vld [vmem:[#allocation12 + $0x170] sm:$0xff]  ;;  %v663_v4 = vld [vmem:[#allocation12 + $0x178] sm:$0xff] }
 0x114   : > { %1008 = vmatprep.subr.bf16.mxu0 %v1604_v30  ;;  %v666_v9 = vld [vmem:[#allocation12 + $0x190] sm:$0xff]  ;;  %v671_v12 = vld [vmem:[#allocation12 + $0x1b8] sm:$0xff] }
 0x115   : > { %v670_v10 = vld [vmem:[#allocation12 + $0x1b0] sm:$0xff]  ;;  %v679_v20 = vld [vmem:[#allocation12 + $0x1f8] sm:$0xff] }
 0x116   : > { %v678_v18 = vld [vmem:[#allocation12 + $0x1f0] sm:$0xff] }
 0x117   : > { %1009 = vmatpush1.bf16.msra.mxu0 %v1603_v31 }
 0x118   : > { %1010 = vmatprep.subr.bf16.mxu0 %v1612_v34  ;;  %v627_v34 = vld [vmem:[#allocation12 + $0x58] sm:$0xff] }
 0x11b   : > { %1011 = vmatpush1.bf16.msra.mxu0 %v1611_v35  ;;  %v631_v35 = vld [vmem:[#allocation12 + $0x78] sm:$0xff] }
 0x11c   : > { %1012 = vmatprep.subr.bf16.mxu0 %v1620_v3  ;;  %v659_v3 = vld [vmem:[#allocation12 + $0x158] sm:$0xff] }
 0x11d   : > { %v1618_v8 = vcombine.high %v659_v3, %v663_v4 }
 0x11f   : > { %1013 = vmatpush1.bf16.msra.mxu0 %v1619_v5 }
 0x120   : > { %1014 = vmatprep.subr.bf16.mxu0 %v1628_v11  ;;  %v667_v11 = vld [vmem:[#allocation12 + $0x198] sm:$0xff] }
 0x123   : > { %1015 = vmatpush1.bf16.msra.mxu0 %v1627_v13  ;;  %v1615_v13 = vcombine.low %v658_v1, %v662_v2 }
 0x1d5   : > { %v1654_v37 = vpop.f32.mrb[0].mxu0 }
 0x1d6   : > { %v523_v38 = vadd.f32 %v1654_v37, %v1561_v36  ;;  %v517_v39 = vpop.f32.mrb[1].mxu0 }
 0x1d7   : > { %v518_v40 = vadd.f32 %v1561_v36, %v517_v39  ;;  %v1584_v39 = vcombine.high %v626_v32, %v630_v33 }
 0x1d8   : > { %v527_v41 = vmax.f32 %v523_v38, 0.0 }
 0x1d9   : > { %v526_v44 = vmax.f32 %v518_v40, 0.0  ;;  %v1586_v40 = vcombine.high %v627_v34, %v631_v35 }
 0x1db   : > { %v528_v45 = vpack.c.bf16 %v527_v41, %v526_v44  ;;  %v634_v41 = vld [vmem:[#allocation12 + $0x90] sm:$0xff]  ;;  %v639_v44 = vld [vmem:[#allocation12 + $0xb8] sm:$0xff] }
 0x1dc   : > { %v1592_v47 = vcombine.high %v634_v41, %v638_v42  ;;  %v1594_v48 = vcombine.high %v635_v43, %v639_v44 }
 0x1dd   : > { %1664 = vmatmul.mubr.msk.bf16.vlgmr.msra.gmra.mrb[0].mxu1 %vm568_vm3, %v528_v45  ;;  %v1583_v45 = vcombine.low %v626_v32, %v630_v33 }
 0x1de   : > { %1044 = vmatpush1.bf16.msra.mxu1 %v1573_v16  ;;  %v618_v16 = vld [vmem:[#allocation12 + $0x10] sm:$0xff]  ;;  %1075 = vmatprep.mubr.bf16.mxu1 %v2114_v24 }
 0x1df   : > { %1045 = vmatprep.subr.bf16.mxu1 %v1582_v46  ;;  %v1576_v19 = vcombine.high %v618_v16, %v622_v17  ;;  %v1575_v21 = vcombine.low %v618_v16, %v622_v17  ;;  %v1585_v46 = vcombine.low %v627_v34, %v631_v35  ;;  %v1626_v16 = vcombine.high %v667_v11, %v671_v12  ;;  %v674_v17 = vld [vmem:[#allocation12 + $0x1d0] sm:$0xff] }
 0x1e1   : > { %1086 = vmatprep.subr.bf16.mxu0 %v1576_v19  ;;  %v675_v19 = vld [vmem:[#allocation12 + $0x1d8] sm:$0xff] }
 0x1e2   : > { %1046 = vmatpush1.bf16.msra.mxu1 %v1581_v49  ;;  %v642_v49 = vld [vmem:[#allocation12 + $0xd0] sm:$0xff] }
 0x1e3   : > { %1047 = vmatprep.subr.bf16.mxu1 %v1590_v50  ;;  %v646_v50 = vld [vmem:[#allocation12 + $0xf0] sm:$0xff] }
 0x1e4   : > { %v1600_v55 = vcombine.high %v642_v49, %v646_v50 }
 0x1e6   : > { %1048 = vmatpush1.bf16.msra.mxu1 %v1589_v53  ;;  %v1591_v53 = vcombine.low %v634_v41, %v638_v42 }
 0x1e7   : > { %1049 = vmatprep.subr.bf16.mxu1 %v1598_v54  ;;  %v1593_v54 = vcombine.low %v635_v43, %v639_v44 }
 0x1ea   : > { %1050 = vmatpush1.bf16.msra.mxu1 %v1597_v57  ;;  %v650_v57 = vld [vmem:[#allocation12 + $0x110] sm:$0xff] }
 0x1eb   : > { %1051 = vmatprep.subr.bf16.mxu1 %v1606_v58  ;;  %v654_v58 = vld [vmem:[#allocation12 + $0x130] sm:$0xff] }
 0x1ec   : > { %v1607_v5 = vcombine.low %v650_v57, %v654_v58 }
 0x1ee   : > { %1052 = vmatpush1.bf16.msra.mxu1 %v1605_v61  ;;  %v1599_v61 = vcombine.low %v642_v49, %v646_v50 }
 0x1ef   : > { %1053 = vmatprep.subr.bf16.mxu1 %v1614_v62  ;;  %v1601_v62 = vcombine.low %v643_v51, %v647_v52  ;;  %v2460_v51 = vld [vmem:[#allocation14] sm:$0xff] }
 0x1f2   : > { %1054 = vmatpush1.bf16.msra.mxu1 %v1613_v63  ;;  %v1608_v63 = vcombine.high %v650_v57, %v654_v58 }
 0x1f3   : > { %1055 = vmatprep.subr.bf16.mxu1 %v1622_v7  ;;  %v1616_v7 = vcombine.high %v658_v1, %v662_v2 }
 0x1f6   : > { %1056 = vmatpush1.bf16.msra.mxu1 %v1621_v6  ;;  %v1609_v6 = vcombine.low %v651_v59, %v655_v60 }
 0x1f7   : > { %1057 = vmatprep.subr.bf16.mxu1 %v1630_v15  ;;  %v1624_v15 = vcombine.high %v666_v9, %v670_v10 }
 0x1fa   : > { %1058 = vmatpush1.bf16.msra.mxu1 %v1629_v14  ;;  %v1617_v14 = vcombine.low %v659_v3, %v663_v4 }
 0x1fb   : > { %1129 = vmatprep.subr.bf16.mxu1 %v1578_v23  ;;  %v1632_v23 = vcombine.high %v674_v17, %v678_v18 }
 0x2b0   : > { %v606_v26 = vpop.f32.mrb[0].mxu1 }
 0x2b1   : > { %v607_v27 = vadd.f32 %v1565_v25, %v606_v26  ;;  %v1665_v28 = vpop.f32.mrb[1].mxu1  ;;  %v1633_v26 = vcombine.low %v675_v19, %v679_v20 }
 0x2b2   : > { %v609_v29 = vpop.f32.mrb[2].mxu1 }
 0x2b3   : > { %v610_v30 = vadd.f32 %v1565_v25, %v609_v29  ;;  %v1666_v31 = vpop.f32.mrb[3].mxu1  ;;  %v613_v36 = vmax.f32 %v607_v27, 0.0  ;;  %v1631_v25 = vcombine.low %v674_v17, %v678_v18  ;;  %v1265_v29 = vlaneseq }
 0x2b5   : > { %v614_v37 = vmax.f32 %v610_v30, 0.0 }
 0x2b7   : > { %v2451_v38 = vpack.c.bf16 %v614_v37, %v613_v36 }
 0x2b9   : > { %1033 = vmatmul.mubr.bf16.vlgmr.msra.gmra.mrb[4].mxu0 %v2451_v38  ;;  %1076 = vmatmul.mubr.bf16.vlgmr.msra.gmra.mrb[4].mxu1 %v2451_v38 }
 0x2ba   : > { %1087 = vmatpush1.bf16.msra.mxu0 %v1575_v21  ;;  %1130 = vmatpush1.bf16.msra.mxu1 %v1577_v22  ;;  %v1623_v21 = vcombine.low %v666_v9, %v670_v10  ;;  %v1625_v22 = vcombine.low %v667_v11, %v671_v12 }
 0x2bb   : > { %1088 = vmatprep.subr.bf16.mxu0 %v1584_v39  ;;  %1131 = vmatprep.subr.bf16.mxu1 %v1586_v40  ;;  %v2457_v39 = vshrl.u32 %v1265_v29, 7 }
 0x2bc   : > { %1118 = vmatprep.mubr.bf16.mxu0 %v2114_v24  ;;  %1161 = vmatprep.mubr.bf16.mxu1 %v2114_v24  ;;  %v1634_v24 = vcombine.high %v675_v19, %v679_v20 }
 0x2bd   : > { %v1279_v59 = vsub.s32 3, %v2457_v39 }
 0x2be   : > { %1089 = vmatpush1.bf16.msra.mxu0 %v1583_v45  ;;  %1132 = vmatpush1.bf16.msra.mxu1 %v1585_v46 }
 0x2bf   : > { %1090 = vmatprep.subr.bf16.mxu0 %v1592_v47  ;;  %1133 = vmatprep.subr.bf16.mxu1 %v1594_v48  ;;  %v1267_v47 = vsub.s32 0, %v2457_v39 }
 0x2c2   : > { %1091 = vmatpush1.bf16.msra.mxu0 %v1591_v53  ;;  %1134 = vmatpush1.bf16.msra.mxu1 %v1593_v54  ;;  %v1275_v53 = vsub.s32 2, %v2457_v39  ;;  %v1271_v54 = vsub.s32 1, %v2457_v39 }
 0x2c3   : > { %1092 = vmatprep.subr.bf16.mxu0 %v1600_v55  ;;  %1135 = vmatprep.subr.bf16.mxu1 %v1602_v56  ;;  %v2115_v56 = vmov 1966171168  }
 0x2c4   : > { %v1326_v57 = vunpack.c.l.s4 %v2115_v56  ;;  %v1276_v3 = vrot.slane %v2460_v51, %v1275_v53  ;;  %v1272_v4 = vrot.slane %v2460_v51, %v1271_v54 }
 0x2c6   : > { %1093 = vmatpush1.bf16.msra.mxu0 %v1599_v61  ;;  %1136 = vmatpush1.bf16.msra.mxu1 %v1601_v62  ;;  %v1268_v62 = vrot.slane %v2460_v51, %v1267_v47  ;;  %v1291_v47 = vsub.s32 6, %v2457_v39 }
 0x2c7   : > { %1094 = vmatprep.subr.bf16.mxu0 %v1608_v63  ;;  %1137 = vmatprep.subr.bf16.mxu1 %v1610_v0 }
 0x2ca   : > { %1095 = vmatpush1.bf16.msra.mxu0 %v1607_v5  ;;  %1138 = vmatpush1.bf16.msra.mxu1 %v1609_v6  ;;  %v1327_v6 = vunpack.c.0.s8 %v1326_v57 }
 0x2cb   : > { %1096 = vmatprep.subr.bf16.mxu0 %v1616_v7  ;;  %1139 = vmatprep.subr.bf16.mxu1 %v1618_v8  ;;  %v1280_v8 = vrot.slane %v2460_v51, %v1279_v59 }
 0x2ce   : > { %1097 = vmatpush1.bf16.msra.mxu0 %v1615_v13  ;;  %1140 = vmatpush1.bf16.msra.mxu1 %v1617_v14 }
 0x2cf   : > { %1098 = vmatprep.subr.bf16.mxu0 %v1624_v15  ;;  %1141 = vmatprep.subr.bf16.mxu1 %v1626_v16  ;;  %v2470_v16 = vsub.s32 %v1327_v6, %v2457_v39 }
 0x2d2   : > { %1099 = vmatpush1.bf16.msra.mxu0 %v1623_v21  ;;  %1142 = vmatpush1.bf16.msra.mxu1 %v1625_v22 }
 0x2d3   : > { %1100 = vmatprep.subr.bf16.mxu0 %v1632_v23  ;;  %1143 = vmatprep.subr.bf16.mxu1 %v1634_v24 }
 0x2d6   : > { %1101 = vmatpush1.bf16.msra.mxu0 %v1631_v25  ;;  %1144 = vmatpush1.bf16.msra.mxu1 %v1633_v26 }
 0x2d9   : > { %1119 = vmatmul.mubr.bf16.vlgmr.msra.gmra.mrb[8].mxu0 %v2451_v38  ;;  %1162 = vmatmul.mubr.bf16.vlgmr.msra.gmra.mrb[8].mxu1 %v2451_v38 }
 0x38c   : > { %v1034_v27 = vpop.f32.mrb[4].mxu0  ;;  %v1077_v28 = vpop.f32.mrb[4].mxu1 }
 0x38d   : > { %v1036_v30 = vpop.f32.mrb[5].mxu0  ;;  %v1079_v31 = vpop.f32.mrb[5].mxu1 }
 0x38e   : > { %v1038_v32 = vpop.f32.mrb[6].mxu0  ;;  %v1081_v33 = vpop.f32.mrb[6].mxu1 }
 0x38f   : > { %v1180_v34 = vmax.f32 %v1034_v27, %v1038_v32  ;;  %v1182_v35 = vmax.f32 %v1077_v28, %v1081_v33  ;;  %v1040_v36 = vpop.f32.mrb[7].mxu0  ;;  %v1083_v37 = vpop.f32.mrb[7].mxu1 }
 0x390   : > { %v1181_v40 = vmax.f32 %v1036_v30, %v1040_v36  ;;  %v1183_v41 = vmax.f32 %v1079_v31, %v1083_v37 }
 0x391   : > { %v1215_v42 = vrot.slane %v1180_v34, 4  ;;  %v1227_v43 = vrot.slane %v1182_v35, 4 }
 0x392   : > { %v1221_v44 = vrot.slane %v1181_v40, 4  ;;  %v1233_v45 = vrot.slane %v1183_v41, 4 }
 0x393   : > { %v1216_v38 = vmax.f32 %v1180_v34, %v1215_v42  ;;  %v1228_v46 = vmax.f32 %v1182_v35, %v1227_v43 }
 0x394   : > { %v1222_v48 = vmax.f32 %v1181_v40, %v1221_v44  ;;  %v1234_v49 = vmax.f32 %v1183_v41, %v1233_v45 }
 0x395   : > { %v1217_v50 = vrot.slane %v1216_v38, 2  ;;  %v1229_v52 = vrot.slane %v1228_v46, 2 }
 0x396   : > { %v1223_v55 = vrot.slane %v1222_v48, 2  ;;  %v1235_v58 = vrot.slane %v1234_v49, 2 }
 0x397   : > { %v1218_v60 = vmax.f32 %v1216_v38, %v1217_v50  ;;  %v1230_v61 = vmax.f32 %v1228_v46, %v1229_v52  ;;  %v1283_v38 = vsub.s32 4, %v2457_v39  ;;  %v1295_v52 = vsub.s32 7, %v2457_v39 }
 0x398   : > { %v1224_v63 = vmax.f32 %v1222_v48, %v1223_v55  ;;  %v1236_v0 = vmax.f32 %v1234_v49, %v1235_v58  ;;  %v1287_v49 = vsub.s32 5, %v2457_v39 }
 0x399   : > { %v1219_v1 = vrot.slane %v1218_v60, 1  ;;  %v1231_v2 = vrot.slane %v1230_v61, 1  ;;  %v1284_v58 = vrot.slane %v2460_v51, %v1283_v38 }
 0x39a   : > { %v1225_v5 = vrot.slane %v1224_v63, 1  ;;  %v1237_v7 = vrot.slane %v1236_v0, 1 }
 0x39b   : > { %v1220_v9 = vmax.f32 %v1218_v60, %v1219_v1  ;;  %v1232_v10 = vmax.f32 %v1230_v61, %v1231_v2  ;;  %v1292_v60 = vrot.slane %v2460_v51, %v1291_v47 }
 0x39c   : > { %v1226_v11 = vmax.f32 %v1224_v63, %v1225_v5  ;;  %v1238_v12 = vmax.f32 %v1236_v0, %v1237_v7  ;;  %v1296_v0 = vrot.slane %v2460_v51, %v1295_v52 }
 0x39d   : > { %v1305_v13 = vadd.f32 %v1268_v62, %v1220_v9  ;;  %v1307_v14 = vadd.f32 %v1276_v3, %v1232_v10  ;;  %v1288_v62 = vrot.slane %v2460_v51, %v1287_v49 }
 0x39e   : > { %v1306_v15 = vadd.f32 %v1272_v4, %v1226_v11  ;;  %v1308_v17 = vadd.f32 %v1280_v8, %v1238_v12 }
 0x3a0   : > { %v1321_v18 = vcombine.low %v1305_v13, %v1306_v15  ;;  %v1322_v19 = vcombine.low %v1307_v14, %v1308_v17 }
 0x3a2   : > { %v1331_v20 = vrot.slane %v1321_v18, %v2470_v16  ;;  %v1338_v21 = vrot.slane %v1322_v19, %v2470_v16 }
 0x3a4   : > { %v1353_v22 = vcombine.low %v1331_v20, %v1338_v21 }
 0x3a6   : > { %v1361_v51 = vrot.slane %v1353_v22, %v2470_v16 }
 0x3ac   : > { %v1120_v23 = vpop.f32.mrb[8].mxu0  ;;  %v1163_v24 = vpop.f32.mrb[8].mxu1 }
 0x3ad   : > { %v1122_v25 = vpop.f32.mrb[9].mxu0  ;;  %v1165_v26 = vpop.f32.mrb[9].mxu1 }
 0x3ae   : > { %v1124_v27 = vpop.f32.mrb[10].mxu0  ;;  %v1167_v28 = vpop.f32.mrb[10].mxu1 }
 0x3af   : > { %v1184_v29 = vmax.f32 %v1120_v23, %v1124_v27  ;;  %v1186_v30 = vmax.f32 %v1163_v24, %v1167_v28  ;;  %v1126_v31 = vpop.f32.mrb[11].mxu0  ;;  %v1169_v32 = vpop.f32.mrb[11].mxu1 }
 0x3b0   : > { %v1185_v33 = vmax.f32 %v1122_v25, %v1126_v31  ;;  %v1187_v34 = vmax.f32 %v1165_v26, %v1169_v32 }
 0x3b1   : > { %v1239_v35 = vrot.slane %v1184_v29, 4  ;;  %v1251_v36 = vrot.slane %v1186_v30, 4 }
 0x3b2   : > { %v1245_v37 = vrot.slane %v1185_v33, 4  ;;  %v1257_v40 = vrot.slane %v1187_v34, 4 }
 0x3b3   : > { %v1240_v41 = vmax.f32 %v1184_v29, %v1239_v35  ;;  %v1252_v42 = vmax.f32 %v1186_v30, %v1251_v36 }
 0x3b4   : > { %v1246_v43 = vmax.f32 %v1185_v33, %v1245_v37  ;;  %v1258_v44 = vmax.f32 %v1187_v34, %v1257_v40 }
 0x3b5   : > { %v1241_v45 = vrot.slane %v1240_v41, 2  ;;  %v1253_v46 = vrot.slane %v1252_v42, 2 }
 0x3b6   : > { %v1247_v48 = vrot.slane %v1246_v43, 2  ;;  %v1259_v50 = vrot.slane %v1258_v44, 2 }
 0x3b7   : > { %v1242_v53 = vmax.f32 %v1240_v41, %v1241_v45  ;;  %v1254_v54 = vmax.f32 %v1252_v42, %v1253_v46 }
 0x3b8   : > { %v1248_v55 = vmax.f32 %v1246_v43, %v1247_v48  ;;  %v1260_v56 = vmax.f32 %v1258_v44, %v1259_v50 }
 0x3b9   : > { %v1243_v57 = vrot.slane %v1242_v53, 1  ;;  %v1255_v59 = vrot.slane %v1254_v54, 1 }
 0x3ba   : > { %v1249_v61 = vrot.slane %v1248_v55, 1  ;;  %v1261_v63 = vrot.slane %v1260_v56, 1 }
 0x3bb   : > { %v1244_v1 = vmax.f32 %v1242_v53, %v1243_v57  ;;  %v1256_v39 = vmax.f32 %v1254_v54, %v1255_v59 }
 0x3bc   : > { %v1250_v2 = vmax.f32 %v1248_v55, %v1249_v61  ;;  %v1262_v3 = vmax.f32 %v1260_v56, %v1261_v63 }
 0x3bd   : > { %v1309_v4 = vadd.f32 %v1284_v58, %v1244_v1  ;;  %v1311_v5 = vadd.f32 %v1292_v60, %v1256_v39 }
 0x3be   : > { %v1310_v6 = vadd.f32 %v1288_v62, %v1250_v2  ;;  %v1312_v7 = vadd.f32 %v1296_v0, %v1262_v3 }
 0x3c0   : > { %v1323_v8 = vcombine.low %v1309_v4, %v1310_v6  ;;  %v1324_v9 = vcombine.low %v1311_v5, %v1312_v7 }
 0x3c2   : > { %v1345_v10 = vrot.slane %v1323_v8, %v2470_v16  ;;  %v1352_v11 = vrot.slane %v1324_v9, %v2470_v16 }
 0x3c4   : > { %v1354_v12 = vcombine.low %v1345_v10, %v1352_v11 }
 0x3c6   : > { %v1368_v13 = vrot.slane %v1354_v12, %v2470_v16 }
 0x3c8   : > { %v1369_v14 = vcombine.low %v1361_v51, %v1368_v13 }
 0x3ca   : > { %1371 = vst [vmem:[%s415_s18] sm:$0xff] %v1369_v14 }
 0x3cb   : > { %2012 = shalt.err (!%p2009_p7)
}
 0x3cc   : > { %s2013_s6 = scalar_lea.hbm %s2491_s12, 128  ;;  %s2017_s9 = scalar_lea.hbm %s2584_s13, 256 }
 0x3cd   : > { %p2014_p6 = scmp.ne.s32.totalorder %s2491_s12, %s2013_s6  ;;  %p2018_p8 = scmp.lt.u32.totalorder %s2491_s12, %s2584_s13 }
 0x3ce   : > { %p2019_p9 = scmp.lt.u32.totalorder %s2017_s9, %s2013_s6  ;;  %p2021_p3 = scmp.lt.u32.totalorder %s2013_s6, %s2491_s12 }
 0x3cf   : > { %p2015_p5 = pnand %p2014_p6, %p2585_p10 }
 0x3d0   : > { %p2020_p1 = por %p2019_p9, %p2018_p8 }
 0x3d1   : > { %p2016_p0 = pneg %p2015_p5 }
 0x3d2   : > { %p2022_p13 = por %p2021_p3, %p2020_p1 }
 0x3d4   : > { %p2023_p2 = pnand %p2022_p13, %p2016_p0 }
 0x3d6   : > { %2026 = shalt.err (!%p2023_p2)
}
 0x3d7   : > { %1691 = dma.vmem_to_hbm [thread:$0]  (%p2585_p10), %s2493_s7, 128, %s2491_s12, %s1373_s4  }
 0x3d8 PF: > { %s1399_s8 = sand.u32 1, %s2077_s24   ;;  %p2586_p11 = scmp.ne.s32.totalorder %s2572_s3, 0 }
 0x3d9   : > { %p2587_p12 = scmp.ge.s32.totalorder %s2097_s29, 2  ;;  %s1400_s10 = scalar_lea.sflag [#allocation5], %s1399_s8 }
 0x3db   : > { %p1717_p4 = pnand %p2587_p12, %p2586_p11 }
 0x3dd   : > { %2072 = dma.done.wait (!%p1717_p4), %s1400_s10, 128  }
 0x3de   : > { %2074 = vsyncadd (!%p1717_p4), %s1400_s10, 4294967168  ;;  %s28_s29 = sadd.s32 1, %s2097_s29   ;;  %s2588_s24 = smov %s2081_s25 }
 0x3df   : > { %p25_p7 = scmp.ge.s32.totalorder %s28_s29, 4   ;;  %s2589_s25 = smov %s2085_s26 }
 0x3e0   : > { %s2590_s26 = smov %s2341_s11  ;;  %s2591_s27 = smov %s2093_s28 }
 0x3e1   : > { %s2592_s28 = smov %s2594_s16  ;;  %27 = sbr.rel (!%p25_p7) target bundleno = 18 (0x12), region = 134 }
 0x3e8   :  { %1405 = vsyncpa [#allocation4], 1 }
 0x3e9   :  { %1407 = vsyncpa [#allocation4 + $0x1], 1 }
 0x3ea   :  { %1408 = vsyncpa [#allocation7], 1 }
 0x3eb   :  { %1410 = vsyncpa [#allocation7 + $0x1], 1 }
 0x3ec   :  { %1411 = vsyncpa [#allocation10], 1 }
 0x3ed   :  { %1412 = vsyncpa [#allocation13], 1 }
 0x3ee   :  { %1413 = vsyncpa [#allocation5], 1 }
 0x3ef   :  { %1415 = vsyncpa [#allocation5 + $0x1], 1 }

// kernel: pointnet_encoder_forward.7
= control target key start
LH: loop header
LB: loop body
LE: loop exit
PB: predicated region body
PF: predicated region fallthrough
CT: control target
= control target key end

     0   :  { %12 = vsyncpa [#allocation3], 0  ;;  %s2839_s0 = inlined_call_operand.hbm [shape: f32[2,1024], index: 0, kind: input, shape index: {}]   ;;  %s2840_s1 = inlined_call_operand.hbm [shape: f32[1024,512], index: 1, kind: input, shape index: {}]   ;;  %s2841_s2 = inlined_call_operand.hbm [shape: f32[1,512], index: 2, kind: input, shape index: {}]   ;;  %s2842_s3 = inlined_call_operand.hbm [shape: f32[512,256], index: 3, kind: input, shape index: {}]   ;;  %s2843_s4 = inlined_call_operand.hbm [shape: f32[1,256], index: 4, kind: input, shape index: {}]   ;;  %s2844_s5 = inlined_call_operand.hbm [shape: f32[256,8], index: 5, kind: input, shape index: {}]   ;;  %s2845_s6 = inlined_call_operand.hbm [shape: f32[1,8], index: 6, kind: input, shape index: {}]   ;;  %s2846_s7 = inlined_call_operand.hbm [shape: f32[2,8], index: 7, kind: output, shape index: {}]  }
   0x1   :  { %13 = vsyncpa [#allocation6], 0 }
   0x2   :  { %14 = vsyncpa [#allocation9], 0 }
   0x3   :  { %15 = vsyncpa [#allocation12], 0 }
   0x4   :  { %16 = vsyncpa [#allocation4], 0  ;;  %s2610_s24 = smov [#allocation5]   ;;  %s2424_s28 = scalar_lea.hbm %s2840_s1, 65536 }
   0x5   :  { %s32_s25 = sshll.u32 %s2610_s24, 4  ;;  %p2425_p0 = scmp.ne.s32.totalorder %s2840_s1, %s2424_s28  ;;  %s33_s25 = int_to_ptr.vmem [resolvable:$true] %s32_s25 }
   0x6   :  { %p2428_p1 = scmp.lt.u32.totalorder %s2424_s28, %s2840_s1 }
   0x8   :  { %p2430_p2 = pnand %p2428_p1, %p2425_p0 }
   0xa   :  { %2433 = shalt.err (!%p2430_p2)
}
   0xb   :  { %s2434_s10 = scalar_lea.vmem %s33_s25, 65536  ;;  %p2439_p4 = scmp.lt.s32.totalorder %s33_s25, %s33_s25 }
   0xc   :  { %p2435_p3 = scmp.ne.s32.totalorder %s33_s25, %s2434_s10  ;;  %p2440_p5 = scmp.lt.s32.totalorder %s2434_s10, %s2434_s10 }
   0xe   :  { %p2441_p6 = por %p2440_p5, %p2439_p4 }
  0x10   :  { %p2442_p7 = pnand %p2441_p6, %p2435_p3 }
  0x12   :  { %2445 = shalt.err (!%p2442_p7)
}
  0x13   :  { %s2611_s11 = smov 512   ;;  %s2612_s12 = smov 32  }
  0x14   :  { %38 = dma.hbm_to_vmem [thread:$0]  %s2840_s1, 65536, %s33_s25, [#allocation6], %s2611_s11, %s2611_s11, %s2612_s12  }
  0x15   :  { %s2613_s15 = smov [#allocation8]   ;;  %s2446_s19 = scalar_lea.hbm %s2842_s3, 16384 }
  0x16   :  { %s54_s16 = sshll.u32 %s2613_s15, 4  ;;  %p2447_p8 = scmp.ne.s32.totalorder %s2842_s3, %s2446_s19  ;;  %s55_s16 = int_to_ptr.vmem [resolvable:$true] %s54_s16 }
  0x17   :  { %p2450_p9 = scmp.lt.u32.totalorder %s2446_s19, %s2842_s3 }
  0x19   :  { %p2452_p10 = pnand %p2450_p9, %p2447_p8 }
  0x1b   :  { %2455 = shalt.err (!%p2452_p10)
}
  0x1c   :  { %s2456_s24 = scalar_lea.vmem %s55_s16, 16384  ;;  %p2461_p12 = scmp.lt.s32.totalorder %s55_s16, %s55_s16 }
  0x1d   :  { %p2457_p11 = scmp.ne.s32.totalorder %s55_s16, %s2456_s24  ;;  %p2462_p13 = scmp.lt.s32.totalorder %s2456_s24, %s2456_s24 }
  0x1f   :  { %p2463_p0 = por %p2462_p13, %p2461_p12 }
  0x21   :  { %p2464_p1 = pnand %p2463_p0, %p2457_p11 }
  0x23   :  { %2467 = shalt.err (!%p2464_p1)
}
  0x24   :  { %s2614_s1 = smov 256   ;;  %s2615_s25 = smov 16  }
  0x25   :  { %60 = dma.hbm_to_vmem [thread:$0]  %s2842_s3, 16384, %s55_s16, [#allocation9], %s2614_s1, %s2614_s1, %s2615_s25  }
  0x26   :  { %s2616_s28 = smov [#allocation11]   ;;  %s2468_s9 = scalar_lea.hbm %s2844_s5, 4096 }
  0x27   :  { %s76_s29 = sshll.u32 %s2616_s28, 4  ;;  %p2469_p2 = scmp.ne.s32.totalorder %s2844_s5, %s2468_s9  ;;  %s77_s29 = int_to_ptr.vmem [resolvable:$true] %s76_s29 }
  0x28   :  { %p2472_p3 = scmp.lt.u32.totalorder %s2468_s9, %s2844_s5 }
  0x2a   :  { %p2474_p4 = pnand %p2472_p3, %p2469_p2 }
  0x2c   :  { %2477 = shalt.err (!%p2474_p4)
}
  0x2d   :  { %s2478_s14 = scalar_lea.vmem %s77_s29, 4096  ;;  %p2483_p6 = scmp.lt.s32.totalorder %s77_s29, %s77_s29 }
  0x2e   :  { %p2479_p5 = scmp.ne.s32.totalorder %s77_s29, %s2478_s14  ;;  %p2484_p7 = scmp.lt.s32.totalorder %s2478_s14, %s2478_s14 }
  0x30   :  { %p2485_p8 = por %p2484_p7, %p2483_p6 }
  0x32   :  { %p2486_p9 = pnand %p2485_p8, %p2479_p5 }
  0x34   :  { %2489 = shalt.err (!%p2486_p9)
}
  0x35   :  { %s2617_s3 = smov 128   ;;  %s2618_s15 = smov 8  }
  0x36   :  { %82 = dma.hbm_to_vmem [thread:$0]  %s2844_s5, 4096, %s77_s29, [#allocation12], %s2617_s3, %s2617_s3, %s2618_s15  }
  0x37   :  { %s2619_s18 = smov [#allocation2]   ;;  %s2620_s20 = smov [#allocation7]  }
  0x38   :  { %s23_s19 = sshll.u32 %s2619_s18, 4  ;;  %s45_s21 = sshll.u32 %s2620_s20, 4  ;;  %s24_s19 = int_to_ptr.vmem [resolvable:$true] %s23_s19  ;;  %s46_s21 = int_to_ptr.vmem [resolvable:$true] %s45_s21 }
  0x39   :  { %s2490_s24 = scalar_lea.hbm %s2839_s0, 256 }
  0x3a   :  { %p2491_p10 = scmp.ne.s32.totalorder %s2839_s0, %s2490_s24  ;;  %p2494_p11 = scmp.lt.u32.totalorder %s2490_s24, %s2839_s0 }
  0x3c   :  { %p2496_p12 = pnand %p2494_p11, %p2491_p10 }
  0x3e   :  { %2499 = shalt.err (!%p2496_p12)
}
  0x3f   :  { %s2500_s5 = scalar_lea.vmem %s24_s19, 256  ;;  %p2505_p0 = scmp.lt.s32.totalorder %s24_s19, %s24_s19 }
  0x40   :  { %p2501_p13 = scmp.ne.s32.totalorder %s24_s19, %s2500_s5  ;;  %p2506_p1 = scmp.lt.s32.totalorder %s2500_s5, %s2500_s5 }
  0x42   :  { %p2507_p2 = por %p2506_p1, %p2505_p0 }
  0x44   :  { %p2508_p3 = pnand %p2507_p2, %p2501_p13 }
  0x46   :  { %2511 = shalt.err (!%p2508_p3)
}
  0x47   :  { %26 = dma.hbm_to_vmem [thread:$0]  %s2839_s0, 256, %s24_s19, [#allocation3]  }
  0x48   :  { %s2512_s9 = scalar_lea.hbm %s2841_s2, 64 }
  0x49   :  { %p2513_p4 = scmp.ne.s32.totalorder %s2841_s2, %s2512_s9  ;;  %p2516_p5 = scmp.lt.u32.totalorder %s2512_s9, %s2841_s2 }
  0x4b   :  { %p2518_p6 = pnand %p2516_p5, %p2513_p4 }
  0x4d   :  { %2521 = shalt.err (!%p2518_p6)
}
  0x4e   :  { %s2522_s14 = scalar_lea.vmem %s46_s21, 64  ;;  %p2527_p8 = scmp.lt.s32.totalorder %s46_s21, %s46_s21 }
  0x4f   :  { %p2523_p7 = scmp.ne.s32.totalorder %s46_s21, %s2522_s14  ;;  %p2528_p9 = scmp.lt.s32.totalorder %s2522_s14, %s2522_s14 }
  0x51   :  { %p2529_p10 = por %p2528_p9, %p2527_p8 }
  0x53   :  { %p2530_p11 = pnand %p2529_p10, %p2523_p7 }
  0x55   :  { %2533 = shalt.err (!%p2530_p11)
}
  0x56   :  { %48 = dma.hbm_to_vmem [thread:$0]  %s2841_s2, 64, %s46_s21, [#allocation6]  }
  0x57   :  { %s2621_s15 = smov [#allocation10]   ;;  %s2622_s17 = smov [#allocation13]  }
  0x58   :  { %s67_s16 = sshll.u32 %s2621_s15, 4  ;;  %s89_s18 = sshll.u32 %s2622_s17, 4  ;;  %s68_s16 = int_to_ptr.vmem [resolvable:$true] %s67_s16  ;;  %s90_s18 = int_to_ptr.vmem [resolvable:$true] %s89_s18 }
  0x59   :  { %s2534_s22 = scalar_lea.hbm %s2843_s4, 32 }
  0x5a   :  { %p2535_p12 = scmp.ne.s32.totalorder %s2843_s4, %s2534_s22  ;;  %p2538_p13 = scmp.lt.u32.totalorder %s2534_s22, %s2843_s4 }
  0x5c   :  { %p2540_p0 = pnand %p2538_p13, %p2535_p12 }
  0x5e   :  { %2543 = shalt.err (!%p2540_p0)
}
  0x5f   :  { %s2544_s2 = scalar_lea.vmem %s68_s16, 32  ;;  %p2549_p2 = scmp.lt.s32.totalorder %s68_s16, %s68_s16 }
  0x60   :  { %p2545_p1 = scmp.ne.s32.totalorder %s68_s16, %s2544_s2  ;;  %p2550_p3 = scmp.lt.s32.totalorder %s2544_s2, %s2544_s2 }
  0x62   :  { %p2551_p4 = por %p2550_p3, %p2549_p2 }
  0x64   :  { %p2552_p5 = pnand %p2551_p4, %p2545_p1 }
  0x66   :  { %2555 = shalt.err (!%p2552_p5)
}
  0x67   :  { %70 = dma.hbm_to_vmem [thread:$0]  %s2843_s4, 32, %s68_s16, [#allocation9]  }
  0x68   :  { %s2556_s28 = scalar_lea.hbm %s2845_s6, 16 }
  0x69   :  { %p2557_p6 = scmp.ne.s32.totalorder %s2845_s6, %s2556_s28  ;;  %p2560_p7 = scmp.lt.u32.totalorder %s2556_s28, %s2845_s6 }
  0x6b   :  { %p2562_p8 = pnand %p2560_p7, %p2557_p6 }
  0x6d   :  { %2565 = shalt.err (!%p2562_p8)
}
  0x6e   :  { %s2566_s10 = scalar_lea.vmem %s90_s18, 16  ;;  %s2570_s11 = scalar_lea.vmem %s90_s18, 32 }
  0x6f   :  { %p2567_p9 = scmp.ne.s32.totalorder %s90_s18, %s2566_s10  ;;  %p2571_p10 = scmp.lt.s32.totalorder %s90_s18, %s90_s18 }
  0x70   :  { %p2572_p11 = scmp.lt.s32.totalorder %s2570_s11, %s2566_s10 }
  0x72   :  { %p2573_p12 = por %p2572_p11, %p2571_p10 }
  0x74   :  { %p2574_p13 = pnand %p2573_p12, %p2567_p9 }
  0x76   :  { %2577 = shalt.err (!%p2574_p13)
}
  0x77   :  { %92 = dma.hbm_to_vmem [thread:$0]  %s2845_s6, 16, %s90_s18, [#allocation12]  }
  0x78   :  { %2600 = dma.done.wait [#allocation3], 256  }
  0x79   :  { %2601 = vsyncadd [#allocation3], 4294967040 }
  0x7a   :  { %2602 = dma.done.wait [#allocation6], 65600  }
  0x7b   :  { %2603 = vsyncadd [#allocation6], 4294901696 }
  0x7c   :  { %2604 = dma.done.wait [#allocation9], 16416  }
  0x7d   :  { %2605 = vsyncadd [#allocation9], 4294950880 }
  0x7e   :  { %2606 = dma.done.wait [#allocation12], 4112  }
  0x7f   :  { %2607 = vsyncadd [#allocation12], 4294963184  ;;  %v117_v0 = vld [vmem:[#allocation5 + $0x8] sm:$0xff]  ;;  %v116_v5 = vld [vmem:[#allocation5] sm:$0xff]  ;;  %s2624_s6 = smov [#allocation14]   ;;  %vm1659_vm0 = vcmask 58368  }
  0x80   :  { %v121_v1 = vld [vmem:[#allocation5 + $0x28] sm:$0xff]  ;;  %v120_v6 = vld [vmem:[#allocation5 + $0x20] sm:$0xff]  ;;  %s1667_s13 = sshll.u32 %s2624_s6, 4  ;;  %s1668_s13 = int_to_ptr.vmem [resolvable:$true] %s1667_s13 }
  0x81   :  { %v245_v2 = vld [vmem:[#allocation5 + $0x408] sm:$0xff]  ;;  %v1715_v3 = vpack.c.bf16 %v121_v1, %v117_v0  ;;  %v1717_v8 = vpack.c.bf16 %v120_v6, %v116_v5  ;;  %v244_v9 = vld [vmem:[#allocation5 + $0x400] sm:$0xff]  ;;  %s2578_s14 = scalar_lea.vmem %s1668_s13, 32  ;;  %p2583_p1 = scmp.lt.s32.totalorder %s1668_s13, %s1668_s13 }
  0x82   :  { %v249_v4 = vld [vmem:[#allocation5 + $0x428] sm:$0xff]  ;;  %v248_v10 = vld [vmem:[#allocation5 + $0x420] sm:$0xff]  ;;  %p2579_p0 = scmp.ne.s32.totalorder %s1668_s13, %s2578_s14  ;;  %p2584_p2 = scmp.lt.s32.totalorder %s2578_s14, %s2578_s14 }
  0x83   :  { %v1779_v7 = vpack.c.bf16 %v249_v4, %v245_v2  ;;  %v125_v11 = vld [vmem:[#allocation5 + $0x48] sm:$0xff]  ;;  %1716 = vmatprep.subr.bf16.mxu1 %v1715_v3  ;;  %v1781_v12 = vpack.c.bf16 %v248_v10, %v244_v9  ;;  %v124_v18 = vld [vmem:[#allocation5 + $0x40] sm:$0xff] }
  0x84   :  { %v129_v13 = vld [vmem:[#allocation5 + $0x68] sm:$0xff]  ;;  %1718 = vmatpush1.bf16.msra.mxu1 %v1717_v8  ;;  %v128_v19 = vld [vmem:[#allocation5 + $0x60] sm:$0xff]  ;;  %p2585_p3 = por %p2584_p2, %p2583_p1 }
  0x85   :  { %v253_v14 = vld [vmem:[#allocation5 + $0x448] sm:$0xff]  ;;  %1780 = vmatprep.subr.bf16.mxu0 %v1779_v7  ;;  %v1719_v16 = vpack.c.bf16 %v129_v13, %v125_v11  ;;  %v252_v20 = vld [vmem:[#allocation5 + $0x440] sm:$0xff]  ;;  %v1721_v21 = vpack.c.bf16 %v128_v19, %v124_v18 }
  0x86   :  { %v257_v15 = vld [vmem:[#allocation5 + $0x468] sm:$0xff]  ;;  %1782 = vmatpush1.bf16.msra.mxu0 %v1781_v12  ;;  %v256_v22 = vld [vmem:[#allocation5 + $0x460] sm:$0xff]  ;;  %p2586_p4 = pnand %p2585_p3, %p2579_p0 }
  0x87   :  { %v1783_v17 = vpack.c.bf16 %v257_v15, %v253_v14  ;;  %v133_v23 = vld [vmem:[#allocation5 + $0x88] sm:$0xff]  ;;  %1720 = vmatprep.subr.bf16.mxu1 %v1719_v16  ;;  %v1785_v25 = vpack.c.bf16 %v256_v22, %v252_v20  ;;  %v132_v29 = vld [vmem:[#allocation5 + $0x80] sm:$0xff] }
  0x88   :  { %v137_v24 = vld [vmem:[#allocation5 + $0xa8] sm:$0xff]  ;;  %v136_v31 = vld [vmem:[#allocation5 + $0xa0] sm:$0xff]  ;;  %1722 = vmatpush1.bf16.msra.mxu1 %v1721_v21 }
  0x89   :  { %1784 = vmatprep.subr.bf16.mxu0 %v1783_v17  ;;  %v1723_v26 = vpack.c.bf16 %v137_v24, %v133_v23  ;;  %v261_v27 = vld [vmem:[#allocation5 + $0x488] sm:$0xff]  ;;  %v260_v32 = vld [vmem:[#allocation5 + $0x480] sm:$0xff]  ;;  %v1725_v34 = vpack.c.bf16 %v136_v31, %v132_v29 }
  0x8a   :  { %v265_v28 = vld [vmem:[#allocation5 + $0x4a8] sm:$0xff]  ;;  %v264_v33 = vld [vmem:[#allocation5 + $0x4a0] sm:$0xff]  ;;  %1786 = vmatpush1.bf16.msra.mxu0 %v1785_v25 }
  0x8b   :  { %v1787_v30 = vpack.c.bf16 %v265_v28, %v261_v27  ;;  %v141_v35 = vld [vmem:[#allocation5 + $0xc8] sm:$0xff]  ;;  %1724 = vmatprep.subr.bf16.mxu1 %v1723_v26  ;;  %v1789_v38 = vpack.c.bf16 %v264_v33, %v260_v32  ;;  %v140_v41 = vld [vmem:[#allocation5 + $0xc0] sm:$0xff] }
  0x8c   :  { %v145_v36 = vld [vmem:[#allocation5 + $0xe8] sm:$0xff]  ;;  %v144_v42 = vld [vmem:[#allocation5 + $0xe0] sm:$0xff]  ;;  %1726 = vmatpush1.bf16.msra.mxu1 %v1725_v34 }
  0x8d   :  { %v269_v37 = vld [vmem:[#allocation5 + $0x4c8] sm:$0xff]  ;;  %v1727_v39 = vpack.c.bf16 %v145_v36, %v141_v35  ;;  %1788 = vmatprep.subr.bf16.mxu0 %v1787_v30  ;;  %v268_v44 = vld [vmem:[#allocation5 + $0x4c0] sm:$0xff]  ;;  %v1729_v50 = vpack.c.bf16 %v144_v42, %v140_v41 }
  0x8e   :  { %v273_v40 = vld [vmem:[#allocation5 + $0x4e8] sm:$0xff]  ;;  %v272_v45 = vld [vmem:[#allocation5 + $0x4e0] sm:$0xff]  ;;  %1790 = vmatpush1.bf16.msra.mxu0 %v1789_v38 }
  0x8f   :  { %v1791_v43 = vpack.c.bf16 %v273_v40, %v269_v37  ;;  %v149_v46 = vld [vmem:[#allocation5 + $0x108] sm:$0xff]  ;;  %1728 = vmatprep.subr.bf16.mxu1 %v1727_v39  ;;  %v1793_v51 = vpack.c.bf16 %v272_v45, %v268_v44  ;;  %v148_v53 = vld [vmem:[#allocation5 + $0x100] sm:$0xff] }
  0x90   :  { %v153_v47 = vld [vmem:[#allocation5 + $0x128] sm:$0xff]  ;;  %v152_v54 = vld [vmem:[#allocation5 + $0x120] sm:$0xff]  ;;  %1730 = vmatpush1.bf16.msra.mxu1 %v1729_v50 }
  0x91   :  { %v277_v48 = vld [vmem:[#allocation5 + $0x508] sm:$0xff]  ;;  %v1731_v52 = vpack.c.bf16 %v153_v47, %v149_v46  ;;  %v276_v55 = vld [vmem:[#allocation5 + $0x500] sm:$0xff]  ;;  %1792 = vmatprep.subr.bf16.mxu0 %v1791_v43  ;;  %v1733_v62 = vpack.c.bf16 %v152_v54, %v148_v53  ;;  %v630_v46 = vlaneseq  ;;  %v2623_v47 = vmov 1983009808  }
  0x92   :  { %v281_v49 = vld [vmem:[#allocation5 + $0x528] sm:$0xff]  ;;  %v280_v57 = vld [vmem:[#allocation5 + $0x520] sm:$0xff]  ;;  %1794 = vmatpush1.bf16.msra.mxu0 %v1793_v51 }
  0x93   :  { %v1795_v56 = vpack.c.bf16 %v281_v49, %v277_v48  ;;  %v157_v58 = vld [vmem:[#allocation5 + $0x148] sm:$0xff]  ;;  %1732 = vmatprep.subr.bf16.mxu1 %v1731_v52  ;;  %v1797_v63 = vpack.c.bf16 %v280_v57, %v276_v55  ;;  %v156_v1 = vld [vmem:[#allocation5 + $0x140] sm:$0xff]  ;;  %v654_v48 = vunpack.c.l.s4 %v2623_v47 }
  0x94   :  { %v161_v59 = vld [vmem:[#allocation5 + $0x168] sm:$0xff]  ;;  %v160_v2 = vld [vmem:[#allocation5 + $0x160] sm:$0xff]  ;;  %1734 = vmatpush1.bf16.msra.mxu1 %v1733_v62 }
  0x95   :  { %v285_v60 = vld [vmem:[#allocation5 + $0x548] sm:$0xff]  ;;  %v1735_v0 = vpack.c.bf16 %v161_v59, %v157_v58  ;;  %v284_v3 = vld [vmem:[#allocation5 + $0x540] sm:$0xff]  ;;  %1796 = vmatprep.subr.bf16.mxu0 %v1795_v56  ;;  %v1737_v10 = vpack.c.bf16 %v160_v2, %v156_v1  ;;  %v655_v62 = vunpack.c.0.s8 %v654_v48 }
  0x96   :  { %v289_v61 = vld [vmem:[#allocation5 + $0x568] sm:$0xff]  ;;  %v288_v5 = vld [vmem:[#allocation5 + $0x560] sm:$0xff]  ;;  %1798 = vmatpush1.bf16.msra.mxu0 %v1797_v63 }
  0x97   :  { %v1799_v4 = vpack.c.bf16 %v289_v61, %v285_v60  ;;  %v165_v6 = vld [vmem:[#allocation5 + $0x188] sm:$0xff]  ;;  %1736 = vmatprep.subr.bf16.mxu1 %v1735_v0  ;;  %v1801_v11 = vpack.c.bf16 %v288_v5, %v284_v3  ;;  %v164_v13 = vld [vmem:[#allocation5 + $0x180] sm:$0xff]  ;;  %v2749_v61 = vshrl.u32 %v630_v46, 7 }
  0x98   :  { %v169_v7 = vld [vmem:[#allocation5 + $0x1a8] sm:$0xff]  ;;  %v168_v14 = vld [vmem:[#allocation5 + $0x1a0] sm:$0xff]  ;;  %1738 = vmatpush1.bf16.msra.mxu1 %v1737_v10 }
  0x99   :  { %v293_v8 = vld [vmem:[#allocation5 + $0x588] sm:$0xff]  ;;  %v1739_v12 = vpack.c.bf16 %v169_v7, %v165_v6  ;;  %v292_v15 = vld [vmem:[#allocation5 + $0x580] sm:$0xff]  ;;  %1800 = vmatprep.subr.bf16.mxu0 %v1799_v4  ;;  %v1741_v22 = vpack.c.bf16 %v168_v14, %v164_v13 }
  0x9a   :  { %v297_v9 = vld [vmem:[#allocation5 + $0x5a8] sm:$0xff]  ;;  %v296_v17 = vld [vmem:[#allocation5 + $0x5a0] sm:$0xff]  ;;  %1802 = vmatpush1.bf16.msra.mxu0 %v1801_v11  ;;  %v2752_v11 = vsub.s32 %v655_v62, %v2749_v61 }
  0x9b   :  { %v1803_v16 = vpack.c.bf16 %v297_v9, %v293_v8  ;;  %v173_v18 = vld [vmem:[#allocation5 + $0x1c8] sm:$0xff]  ;;  %1740 = vmatprep.subr.bf16.mxu1 %v1739_v12  ;;  %v1805_v23 = vpack.c.bf16 %v296_v17, %v292_v15  ;;  %v172_v25 = vld [vmem:[#allocation5 + $0x1c0] sm:$0xff] }
  0x9c   :  { %v177_v19 = vld [vmem:[#allocation5 + $0x1e8] sm:$0xff]  ;;  %v176_v26 = vld [vmem:[#allocation5 + $0x1e0] sm:$0xff]  ;;  %1742 = vmatpush1.bf16.msra.mxu1 %v1741_v22  ;;  %v114_v22 = vld [vmem:[#allocation2] sm:$0xff] }
  0x9d   :  { %v301_v20 = vld [vmem:[#allocation5 + $0x5c8] sm:$0xff]  ;;  %v1743_v24 = vpack.c.bf16 %v177_v19, %v173_v18  ;;  %v300_v27 = vld [vmem:[#allocation5 + $0x5c0] sm:$0xff]  ;;  %1804 = vmatprep.subr.bf16.mxu0 %v1803_v16  ;;  %v1745_v34 = vpack.c.bf16 %v176_v26, %v172_v25  ;;  %v2755_v25 = vrot.slane %v114_v22, %v2752_v11  ;;  %v652_v26 = vcombine.high %v114_v22, %v114_v22 }
  0x9e   :  { %v305_v21 = vld [vmem:[#allocation5 + $0x5e8] sm:$0xff]  ;;  %v304_v29 = vld [vmem:[#allocation5 + $0x5e0] sm:$0xff]  ;;  %1806 = vmatpush1.bf16.msra.mxu0 %v1805_v23 }
  0x9f   :  { %v1807_v28 = vpack.c.bf16 %v305_v21, %v301_v20  ;;  %v181_v30 = vld [vmem:[#allocation5 + $0x208] sm:$0xff]  ;;  %1744 = vmatprep.subr.bf16.mxu1 %v1743_v24  ;;  %v1809_v35 = vpack.c.bf16 %v304_v29, %v300_v27  ;;  %v180_v37 = vld [vmem:[#allocation5 + $0x200] sm:$0xff] }
  0xa0   :  { %v185_v31 = vld [vmem:[#allocation5 + $0x228] sm:$0xff]  ;;  %v184_v38 = vld [vmem:[#allocation5 + $0x220] sm:$0xff]  ;;  %1746 = vmatpush1.bf16.msra.mxu1 %v1745_v34  ;;  %v2762_v34 = vrot.slane %v652_v26, %v2752_v11  ;;  %v131_v26 = vld [vmem:[#allocation5 + $0x78] sm:$0xff] }
  0xa1   :  { %v309_v32 = vld [vmem:[#allocation5 + $0x608] sm:$0xff]  ;;  %v1747_v36 = vpack.c.bf16 %v185_v31, %v181_v30  ;;  %v308_v39 = vld [vmem:[#allocation5 + $0x600] sm:$0xff]  ;;  %1808 = vmatprep.subr.bf16.mxu0 %v1807_v28  ;;  %v1749_v49 = vpack.c.bf16 %v184_v38, %v180_v37 }
  0xa2   :  { %v313_v33 = vld [vmem:[#allocation5 + $0x628] sm:$0xff]  ;;  %v312_v41 = vld [vmem:[#allocation5 + $0x620] sm:$0xff]  ;;  %1810 = vmatpush1.bf16.msra.mxu0 %v1809_v35 }
  0xa3   :  { %v1811_v40 = vpack.c.bf16 %v313_v33, %v309_v32  ;;  %v189_v42 = vld [vmem:[#allocation5 + $0x248] sm:$0xff]  ;;  %1748 = vmatprep.subr.bf16.mxu1 %v1747_v36  ;;  %v1813_v50 = vpack.c.bf16 %v312_v41, %v308_v39  ;;  %v188_v52 = vld [vmem:[#allocation5 + $0x240] sm:$0xff]  ;;  %v2759_v33 = vcombine.high %v2755_v25, %v2755_v25  ;;  %v2767_v41 = vcombine.high %v2762_v34, %v2762_v34 }
  0xa4   :  { %v193_v43 = vld [vmem:[#allocation5 + $0x268] sm:$0xff]  ;;  %v192_v53 = vld [vmem:[#allocation5 + $0x260] sm:$0xff]  ;;  %1750 = vmatpush1.bf16.msra.mxu1 %v1749_v49 }
  0xa5   :  { %v317_v44 = vld [vmem:[#allocation5 + $0x648] sm:$0xff]  ;;  %v1751_v51 = vpack.c.bf16 %v193_v43, %v189_v42  ;;  %v316_v54 = vld [vmem:[#allocation5 + $0x640] sm:$0xff]  ;;  %1812 = vmatprep.subr.bf16.mxu0 %v1811_v40  ;;  %v1753_v63 = vpack.c.bf16 %v192_v53, %v188_v52  ;;  %758 = vmatprep.mubr.f32.mxu1 %v2759_v33 }
  0xa6   :  { %v321_v45 = vld [vmem:[#allocation5 + $0x668] sm:$0xff]  ;;  %v320_v56 = vld [vmem:[#allocation5 + $0x660] sm:$0xff]  ;;  %1814 = vmatpush1.bf16.msra.mxu0 %v1813_v50  ;;  %829 = vmatprep.mubr.f32.mxu0 %v2767_v41 }
  0xa7   :  { %v1815_v55 = vpack.c.bf16 %v321_v45, %v317_v44  ;;  %v197_v57 = vld [vmem:[#allocation5 + $0x288] sm:$0xff]  ;;  %1752 = vmatprep.subr.bf16.mxu1 %v1751_v51  ;;  %v1817_v0 = vpack.c.bf16 %v320_v56, %v316_v54  ;;  %v196_v2 = vld [vmem:[#allocation5 + $0x280] sm:$0xff] }
  0xa8   :  { %v201_v58 = vld [vmem:[#allocation5 + $0x2a8] sm:$0xff]  ;;  %v200_v3 = vld [vmem:[#allocation5 + $0x2a0] sm:$0xff]  ;;  %1754 = vmatpush1.bf16.msra.mxu1 %v1753_v63 }
  0xa9   :  { %v325_v59 = vld [vmem:[#allocation5 + $0x688] sm:$0xff]  ;;  %v1755_v1 = vpack.c.bf16 %v201_v58, %v197_v57  ;;  %v324_v4 = vld [vmem:[#allocation5 + $0x680] sm:$0xff]  ;;  %1816 = vmatprep.subr.bf16.mxu0 %v1815_v55  ;;  %v1757_v12 = vpack.c.bf16 %v200_v3, %v196_v2 }
  0xaa   :  { %v329_v60 = vld [vmem:[#allocation5 + $0x6a8] sm:$0xff]  ;;  %v328_v6 = vld [vmem:[#allocation5 + $0x6a0] sm:$0xff]  ;;  %1818 = vmatpush1.bf16.msra.mxu0 %v1817_v0 }
  0xab   :  { %v1819_v5 = vpack.c.bf16 %v329_v60, %v325_v59  ;;  %v205_v7 = vld [vmem:[#allocation5 + $0x2c8] sm:$0xff]  ;;  %v204_v13 = vld [vmem:[#allocation5 + $0x2c0] sm:$0xff]  ;;  %1756 = vmatprep.subr.bf16.mxu1 %v1755_v1  ;;  %v1821_v14 = vpack.c.bf16 %v328_v6, %v324_v4 }
  0xac   :  { %v209_v8 = vld [vmem:[#allocation5 + $0x2e8] sm:$0xff]  ;;  %v208_v16 = vld [vmem:[#allocation5 + $0x2e0] sm:$0xff]  ;;  %1758 = vmatpush1.bf16.msra.mxu1 %v1757_v12  ;;  %v119_v12 = vld [vmem:[#allocation5 + $0x18] sm:$0xff] }
  0xad   :  { %v333_v9 = vld [vmem:[#allocation5 + $0x6c8] sm:$0xff]  ;;  %v1759_v15 = vpack.c.bf16 %v209_v8, %v205_v7  ;;  %v332_v17 = vld [vmem:[#allocation5 + $0x6c0] sm:$0xff]  ;;  %1820 = vmatprep.subr.bf16.mxu0 %v1819_v5  ;;  %v1761_v27 = vpack.c.bf16 %v208_v16, %v204_v13  ;;  %v123_v13 = vld [vmem:[#allocation5 + $0x38] sm:$0xff] }
  0xae   :  { %v337_v10 = vld [vmem:[#allocation5 + $0x6e8] sm:$0xff]  ;;  %v336_v18 = vld [vmem:[#allocation5 + $0x6e0] sm:$0xff]  ;;  %1822 = vmatpush1.bf16.msra.mxu0 %v1821_v14 }
  0xaf   :  { %v1823_v19 = vpack.c.bf16 %v337_v10, %v333_v9  ;;  %v213_v20 = vld [vmem:[#allocation5 + $0x308] sm:$0xff]  ;;  %v1825_v28 = vpack.c.bf16 %v336_v18, %v332_v17  ;;  %1760 = vmatprep.subr.bf16.mxu1 %v1759_v15  ;;  %v212_v30 = vld [vmem:[#allocation5 + $0x300] sm:$0xff]  ;;  %v1971_v18 = vpack.c.bf16 %v123_v13, %v119_v12  ;;  %v159_v13 = vld [vmem:[#allocation5 + $0x158] sm:$0xff] }
  0xb0   :  { %v217_v21 = vld [vmem:[#allocation5 + $0x328] sm:$0xff]  ;;  %v216_v31 = vld [vmem:[#allocation5 + $0x320] sm:$0xff]  ;;  %1762 = vmatpush1.bf16.msra.mxu1 %v1761_v27 }
  0xb1   :  { %v341_v23 = vld [vmem:[#allocation5 + $0x708] sm:$0xff]  ;;  %v1763_v29 = vpack.c.bf16 %v217_v21, %v213_v20  ;;  %v340_v32 = vld [vmem:[#allocation5 + $0x700] sm:$0xff]  ;;  %1824 = vmatprep.subr.bf16.mxu0 %v1823_v19  ;;  %v1765_v42 = vpack.c.bf16 %v216_v31, %v212_v30  ;;  %v118_v20 = vld [vmem:[#allocation5 + $0x10] sm:$0xff] }
  0xb2   :  { %v345_v24 = vld [vmem:[#allocation5 + $0x728] sm:$0xff]  ;;  %v344_v36 = vld [vmem:[#allocation5 + $0x720] sm:$0xff]  ;;  %1826 = vmatpush1.bf16.msra.mxu0 %v1825_v28  ;;  %v122_v21 = vld [vmem:[#allocation5 + $0x30] sm:$0xff] }
  0xb3   :  { %v1827_v35 = vpack.c.bf16 %v345_v24, %v341_v23  ;;  %v221_v37 = vld [vmem:[#allocation5 + $0x348] sm:$0xff]  ;;  %1764 = vmatprep.subr.bf16.mxu1 %v1763_v29  ;;  %v1829_v43 = vpack.c.bf16 %v344_v36, %v340_v32  ;;  %v220_v45 = vld [vmem:[#allocation5 + $0x340] sm:$0xff]  ;;  %v127_v24 = vld [vmem:[#allocation5 + $0x58] sm:$0xff]  ;;  %v1973_v29 = vpack.c.bf16 %v122_v21, %v118_v20 }
  0xb4   :  { %v225_v38 = vld [vmem:[#allocation5 + $0x368] sm:$0xff]  ;;  %v224_v46 = vld [vmem:[#allocation5 + $0x360] sm:$0xff]  ;;  %1766 = vmatpush1.bf16.msra.mxu1 %v1765_v42  ;;  %v1975_v31 = vpack.c.bf16 %v131_v26, %v127_v24  ;;  %v130_v36 = vld [vmem:[#allocation5 + $0x70] sm:$0xff] }
  0xb5   :  { %v349_v39 = vld [vmem:[#allocation5 + $0x748] sm:$0xff]  ;;  %v1767_v44 = vpack.c.bf16 %v225_v38, %v221_v37  ;;  %v348_v47 = vld [vmem:[#allocation5 + $0x740] sm:$0xff]  ;;  %1828 = vmatprep.subr.bf16.mxu0 %v1827_v35  ;;  %v1769_v54 = vpack.c.bf16 %v224_v46, %v220_v45  ;;  %v126_v35 = vld [vmem:[#allocation5 + $0x50] sm:$0xff] }
  0xb6   :  { %v353_v40 = vld [vmem:[#allocation5 + $0x768] sm:$0xff]  ;;  %v352_v49 = vld [vmem:[#allocation5 + $0x760] sm:$0xff]  ;;  %1830 = vmatpush1.bf16.msra.mxu0 %v1829_v43  ;;  %v158_v21 = vld [vmem:[#allocation5 + $0x150] sm:$0xff] }
  0xb7   :  { %v1831_v48 = vpack.c.bf16 %v353_v40, %v349_v39  ;;  %v229_v50 = vld [vmem:[#allocation5 + $0x388] sm:$0xff]  ;;  %1768 = vmatprep.subr.bf16.mxu1 %v1767_v44  ;;  %v1833_v55 = vpack.c.bf16 %v352_v49, %v348_v47  ;;  %v228_v57 = vld [vmem:[#allocation5 + $0x380] sm:$0xff]  ;;  %v135_v39 = vld [vmem:[#allocation5 + $0x98] sm:$0xff]  ;;  %v1977_v44 = vpack.c.bf16 %v130_v36, %v126_v35 }
  0xb8   :  { %v233_v51 = vld [vmem:[#allocation5 + $0x3a8] sm:$0xff]  ;;  %v232_v58 = vld [vmem:[#allocation5 + $0x3a0] sm:$0xff]  ;;  %1770 = vmatpush1.bf16.msra.mxu1 %v1769_v54  ;;  %v139_v40 = vld [vmem:[#allocation5 + $0xb8] sm:$0xff] }
  0xb9   :  { %v357_v52 = vld [vmem:[#allocation5 + $0x788] sm:$0xff]  ;;  %v1771_v56 = vpack.c.bf16 %v233_v51, %v229_v50  ;;  %v356_v59 = vld [vmem:[#allocation5 + $0x780] sm:$0xff]  ;;  %1832 = vmatprep.subr.bf16.mxu0 %v1831_v48  ;;  %v1773_v3 = vpack.c.bf16 %v232_v58, %v228_v57  ;;  %v1979_v46 = vpack.c.bf16 %v139_v40, %v135_v39  ;;  %v134_v48 = vld [vmem:[#allocation5 + $0x90] sm:$0xff] }
  0xba   :  { %v361_v53 = vld [vmem:[#allocation5 + $0x7a8] sm:$0xff]  ;;  %v360_v62 = vld [vmem:[#allocation5 + $0x7a0] sm:$0xff]  ;;  %1834 = vmatpush1.bf16.msra.mxu0 %v1833_v55  ;;  %v138_v49 = vld [vmem:[#allocation5 + $0xb0] sm:$0xff] }
  0xbb   :  { %v1835_v60 = vpack.c.bf16 %v361_v53, %v357_v52  ;;  %v237_v63 = vld [vmem:[#allocation5 + $0x3c8] sm:$0xff]  ;;  %1772 = vmatprep.subr.bf16.mxu1 %v1771_v56  ;;  %v1837_v4 = vpack.c.bf16 %v360_v62, %v356_v59  ;;  %v236_v6 = vld [vmem:[#allocation5 + $0x3c0] sm:$0xff]  ;;  %v143_v52 = vld [vmem:[#allocation5 + $0xd8] sm:$0xff]  ;;  %v1981_v56 = vpack.c.bf16 %v138_v49, %v134_v48 }
  0xbc   :  { %v241_v0 = vld [vmem:[#allocation5 + $0x3e8] sm:$0xff]  ;;  %v240_v7 = vld [vmem:[#allocation5 + $0x3e0] sm:$0xff]  ;;  %1774 = vmatpush1.bf16.msra.mxu1 %v1773_v3  ;;  %v147_v53 = vld [vmem:[#allocation5 + $0xf8] sm:$0xff] }
  0xbd   :  { %v365_v1 = vld [vmem:[#allocation5 + $0x7c8] sm:$0xff]  ;;  %v1775_v5 = vpack.c.bf16 %v241_v0, %v237_v63  ;;  %v364_v8 = vld [vmem:[#allocation5 + $0x7c0] sm:$0xff]  ;;  %1836 = vmatprep.subr.bf16.mxu0 %v1835_v60  ;;  %v1777_v16 = vpack.c.bf16 %v240_v7, %v236_v6  ;;  %v1983_v58 = vpack.c.bf16 %v147_v53, %v143_v52  ;;  %v142_v60 = vld [vmem:[#allocation5 + $0xd0] sm:$0xff] }
  0xbe   :  { %v369_v2 = vld [vmem:[#allocation5 + $0x7e8] sm:$0xff]  ;;  %v368_v10 = vld [vmem:[#allocation5 + $0x7e0] sm:$0xff]  ;;  %1838 = vmatpush1.bf16.msra.mxu0 %v1837_v4  ;;  %v146_v62 = vld [vmem:[#allocation5 + $0xf0] sm:$0xff] }
  0xbf   :  { %v1839_v9 = vpack.c.bf16 %v369_v2, %v365_v1  ;;  %v373_v14 = vld [vmem:[#allocation5 + $0x808] sm:$0xff]  ;;  %1776 = vmatprep.subr.bf16.mxu1 %v1775_v5  ;;  %v1841_v17 = vpack.c.bf16 %v368_v10, %v364_v8  ;;  %v372_v19 = vld [vmem:[#allocation5 + $0x800] sm:$0xff]  ;;  %v151_v1 = vld [vmem:[#allocation5 + $0x118] sm:$0xff] }
  0xc0   :  { %v377_v15 = vld [vmem:[#allocation5 + $0x828] sm:$0xff]  ;;  %v376_v23 = vld [vmem:[#allocation5 + $0x820] sm:$0xff]  ;;  %1778 = vmatpush1.bf16.msra.mxu1 %v1777_v16  ;;  %v155_v2 = vld [vmem:[#allocation5 + $0x138] sm:$0xff] }
  0xc1   :  { %1840 = vmatprep.subr.bf16.mxu0 %v1839_v9  ;;  %v1843_v22 = vpack.c.bf16 %v377_v15, %v373_v14  ;;  %v381_v27 = vld [vmem:[#allocation5 + $0x848] sm:$0xff]  ;;  %1972 = vmatprep.subr.bf16.mxu1 %v1971_v18  ;;  %v1845_v30 = vpack.c.bf16 %v376_v23, %v372_v19  ;;  %v380_v32 = vld [vmem:[#allocation5 + $0x840] sm:$0xff]  ;;  %v1987_v6 = vpack.c.bf16 %v155_v2, %v151_v1  ;;  %v150_v8 = vld [vmem:[#allocation5 + $0x110] sm:$0xff] }
  0xc2   :  { %v385_v28 = vld [vmem:[#allocation5 + $0x868] sm:$0xff]  ;;  %1842 = vmatpush1.bf16.msra.mxu0 %v1841_v17  ;;  %v384_v38 = vld [vmem:[#allocation5 + $0x860] sm:$0xff]  ;;  %v154_v9 = vld [vmem:[#allocation5 + $0x130] sm:$0xff] }
  0xc3   :  { %1844 = vmatprep.subr.bf16.mxu0 %v1843_v22  ;;  %v1847_v37 = vpack.c.bf16 %v385_v28, %v381_v27  ;;  %759 = vmatmul.mubr.f32.vlgmr.msra.gmra.mrb[0].mxu1 %v2755_v25  ;;  %v389_v42 = vld [vmem:[#allocation5 + $0x888] sm:$0xff]  ;;  %v1849_v45 = vpack.c.bf16 %v384_v38, %v380_v32  ;;  %v388_v47 = vld [vmem:[#allocation5 + $0x880] sm:$0xff]  ;;  %v163_v14 = vld [vmem:[#allocation5 + $0x178] sm:$0xff]  ;;  %v1989_v17 = vpack.c.bf16 %v154_v9, %v150_v8 }
  0xc4   :  { %v393_v43 = vld [vmem:[#allocation5 + $0x8a8] sm:$0xff]  ;;  %1974 = vmatpush1.bf16.msra.mxu1 %v1973_v29  ;;  %v392_v51 = vld [vmem:[#allocation5 + $0x8a0] sm:$0xff]  ;;  %1042 = vmatprep.mubr.f32.mxu1 %v2759_v33  ;;  %v1985_v33 = vpack.c.bf16 %v146_v62, %v142_v60  ;;  %v1991_v19 = vpack.c.bf16 %v163_v14, %v159_v13  ;;  %v162_v22 = vld [vmem:[#allocation5 + $0x170] sm:$0xff] }
  0xc5   :  { %830 = vmatmul.mubr.f32.vlgmr.msra.gmra.mrb[0].mxu0 %v2762_v34  ;;  %1976 = vmatprep.subr.bf16.mxu1 %v1975_v31  ;;  %v1851_v50 = vpack.c.bf16 %v393_v43, %v389_v42  ;;  %v397_v54 = vld [vmem:[#allocation5 + $0x8c8] sm:$0xff]  ;;  %v1853_v57 = vpack.c.bf16 %v392_v51, %v388_v47  ;;  %v396_v59 = vld [vmem:[#allocation5 + $0x8c0] sm:$0xff]  ;;  %v167_v26 = vld [vmem:[#allocation5 + $0x198] sm:$0xff] }
  0xc6   :  { %1846 = vmatpush1.bf16.msra.mxu0 %v1845_v30  ;;  %v401_v55 = vld [vmem:[#allocation5 + $0x8e8] sm:$0xff]  ;;  %v400_v0 = vld [vmem:[#allocation5 + $0x8e0] sm:$0xff]  ;;  %v171_v27 = vld [vmem:[#allocation5 + $0x1b8] sm:$0xff]  ;;  %v1993_v30 = vpack.c.bf16 %v162_v22, %v158_v21 }
  0xc7   :  { %1848 = vmatprep.subr.bf16.mxu0 %v1847_v37  ;;  %v1855_v63 = vpack.c.bf16 %v401_v55, %v397_v54  ;;  %v405_v3 = vld [vmem:[#allocation5 + $0x908] sm:$0xff]  ;;  %v1857_v5 = vpack.c.bf16 %v400_v0, %v396_v59  ;;  %v404_v7 = vld [vmem:[#allocation5 + $0x900] sm:$0xff]  ;;  %v1995_v35 = vpack.c.bf16 %v171_v27, %v167_v26  ;;  %v166_v36 = vld [vmem:[#allocation5 + $0x190] sm:$0xff] }
  0xc8   :  { %1978 = vmatpush1.bf16.msra.mxu1 %v1977_v44  ;;  %v409_v4 = vld [vmem:[#allocation5 + $0x928] sm:$0xff]  ;;  %v408_v12 = vld [vmem:[#allocation5 + $0x920] sm:$0xff]  ;;  %v170_v37 = vld [vmem:[#allocation5 + $0x1b0] sm:$0xff] }
  0xc9   :  { %1980 = vmatprep.subr.bf16.mxu1 %v1979_v46  ;;  %v1859_v10 = vpack.c.bf16 %v409_v4, %v405_v3  ;;  %v413_v15 = vld [vmem:[#allocation5 + $0x948] sm:$0xff]  ;;  %v1861_v18 = vpack.c.bf16 %v408_v12, %v404_v7  ;;  %v412_v20 = vld [vmem:[#allocation5 + $0x940] sm:$0xff]  ;;  %v2773_v38 = vld [vmem:[#allocation2 + $0x8] sm:$0xff]  ;;  %v1997_v47 = vpack.c.bf16 %v170_v37, %v166_v36 }
  0xca   :  { %1850 = vmatpush1.bf16.msra.mxu0 %v1849_v45  ;;  %v417_v16 = vld [vmem:[#allocation5 + $0x968] sm:$0xff]  ;;  %v416_v24 = vld [vmem:[#allocation5 + $0x960] sm:$0xff]  ;;  %v175_v42 = vld [vmem:[#allocation5 + $0x1d8] sm:$0xff]  ;;  %v2777_v44 = vrot.slane %v2773_v38, %v2752_v11 }
  0xcb   :  { %1852 = vmatprep.subr.bf16.mxu0 %v1851_v50  ;;  %v1863_v23 = vpack.c.bf16 %v417_v16, %v413_v15  ;;  %v421_v28 = vld [vmem:[#allocation5 + $0x988] sm:$0xff]  ;;  %v420_v31 = vld [vmem:[#allocation5 + $0x980] sm:$0xff]  ;;  %v1865_v32 = vpack.c.bf16 %v416_v24, %v412_v20  ;;  %v179_v43 = vld [vmem:[#allocation5 + $0x1f8] sm:$0xff] }
  0xcc   :  { %1982 = vmatpush1.bf16.msra.mxu1 %v1981_v56  ;;  %v425_v29 = vld [vmem:[#allocation5 + $0x9a8] sm:$0xff]  ;;  %v424_v40 = vld [vmem:[#allocation5 + $0x9a0] sm:$0xff]  ;;  %v2781_v48 = vcombine.high %v2777_v44, %v2777_v44  ;;  %v1999_v50 = vpack.c.bf16 %v179_v43, %v175_v42  ;;  %v174_v52 = vld [vmem:[#allocation5 + $0x1d0] sm:$0xff] }
  0xcd   :  { %1984 = vmatprep.subr.bf16.mxu1 %v1983_v58  ;;  %v1867_v39 = vpack.c.bf16 %v425_v29, %v421_v28  ;;  %v429_v45 = vld [vmem:[#allocation5 + $0x9c8] sm:$0xff]  ;;  %v1869_v49 = vpack.c.bf16 %v424_v40, %v420_v31  ;;  %v428_v51 = vld [vmem:[#allocation5 + $0x9c0] sm:$0xff]  ;;  %v178_v53 = vld [vmem:[#allocation5 + $0x1f0] sm:$0xff] }
  0xce   :  { %1854 = vmatpush1.bf16.msra.mxu0 %v1853_v57  ;;  %v433_v46 = vld [vmem:[#allocation5 + $0x9e8] sm:$0xff]  ;;  %v432_v55 = vld [vmem:[#allocation5 + $0x9e0] sm:$0xff]  ;;  %v183_v56 = vld [vmem:[#allocation5 + $0x218] sm:$0xff]  ;;  %900 = vmatprep.mubr.f32.mxu0 %v2781_v48  ;;  %v2001_v60 = vpack.c.bf16 %v178_v53, %v174_v52 }
  0xcf   :  { %1856 = vmatprep.subr.bf16.mxu0 %v1855_v63  ;;  %v1871_v54 = vpack.c.bf16 %v433_v46, %v429_v45  ;;  %v187_v57 = vld [vmem:[#allocation5 + $0x238] sm:$0xff]  ;;  %v437_v58 = vld [vmem:[#allocation5 + $0xa08] sm:$0xff]  ;;  %v1873_v62 = vpack.c.bf16 %v432_v55, %v428_v51  ;;  %v436_v0 = vld [vmem:[#allocation5 + $0xa00] sm:$0xff] }
  0xd0   :  { %1986 = vmatpush1.bf16.msra.mxu1 %v1985_v33  ;;  %v441_v59 = vld [vmem:[#allocation5 + $0xa28] sm:$0xff]  ;;  %v2003_v63 = vpack.c.bf16 %v187_v57, %v183_v56  ;;  %v182_v1 = vld [vmem:[#allocation5 + $0x210] sm:$0xff]  ;;  %v440_v4 = vld [vmem:[#allocation5 + $0xa20] sm:$0xff] }
  0xd1   :  { %1988 = vmatprep.subr.bf16.mxu1 %v1987_v6  ;;  %v186_v2 = vld [vmem:[#allocation5 + $0x230] sm:$0xff]  ;;  %v1875_v3 = vpack.c.bf16 %v441_v59, %v437_v58  ;;  %v191_v33 = vld [vmem:[#allocation5 + $0x258] sm:$0xff]  ;;  %v445_v6 = vld [vmem:[#allocation5 + $0xa48] sm:$0xff]  ;;  %v1877_v9 = vpack.c.bf16 %v440_v4, %v436_v0 }
  0xd2   :  { %1858 = vmatpush1.bf16.msra.mxu0 %v1857_v5  ;;  %v195_v5 = vld [vmem:[#allocation5 + $0x278] sm:$0xff]  ;;  %v449_v7 = vld [vmem:[#allocation5 + $0xa68] sm:$0xff]  ;;  %v2005_v8 = vpack.c.bf16 %v186_v2, %v182_v1  ;;  %v444_v12 = vld [vmem:[#allocation5 + $0xa40] sm:$0xff] }
  0xd3   :  { %1860 = vmatprep.subr.bf16.mxu0 %v1859_v10  ;;  %v2007_v10 = vpack.c.bf16 %v195_v5, %v191_v33  ;;  %v190_v13 = vld [vmem:[#allocation5 + $0x250] sm:$0xff]  ;;  %v1879_v15 = vpack.c.bf16 %v449_v7, %v445_v6  ;;  %v448_v16 = vld [vmem:[#allocation5 + $0xa60] sm:$0xff]  ;;  %v457_v20 = vld [vmem:[#allocation5 + $0xaa8] sm:$0xff] }
  0xd4   :  { %1990 = vmatpush1.bf16.msra.mxu1 %v1989_v17  ;;  %v194_v14 = vld [vmem:[#allocation5 + $0x270] sm:$0xff]  ;;  %v199_v17 = vld [vmem:[#allocation5 + $0x298] sm:$0xff]  ;;  %v1881_v22 = vpack.c.bf16 %v448_v16, %v444_v12  ;;  %v452_v24 = vld [vmem:[#allocation5 + $0xa80] sm:$0xff] }
  0xd5   :  { %1992 = vmatprep.subr.bf16.mxu1 %v1991_v19  ;;  %v453_v19 = vld [vmem:[#allocation5 + $0xa88] sm:$0xff]  ;;  %v2009_v21 = vpack.c.bf16 %v194_v14, %v190_v13  ;;  %v198_v26 = vld [vmem:[#allocation5 + $0x290] sm:$0xff]  ;;  %v456_v29 = vld [vmem:[#allocation5 + $0xaa0] sm:$0xff] }
  0xd6   :  { %1862 = vmatpush1.bf16.msra.mxu0 %v1861_v18  ;;  %v203_v18 = vld [vmem:[#allocation5 + $0x2b8] sm:$0xff]  ;;  %v202_v27 = vld [vmem:[#allocation5 + $0x2b0] sm:$0xff]  ;;  %v1883_v28 = vpack.c.bf16 %v457_v20, %v453_v19  ;;  %v1885_v37 = vpack.c.bf16 %v456_v29, %v452_v24  ;;  %v460_v40 = vld [vmem:[#allocation5 + $0xac0] sm:$0xff] }
  0xd7   :  { %1864 = vmatprep.subr.bf16.mxu0 %v1863_v23  ;;  %v2011_v23 = vpack.c.bf16 %v203_v18, %v199_v17  ;;  %v211_v31 = vld [vmem:[#allocation5 + $0x2f8] sm:$0xff]  ;;  %v2013_v36 = vpack.c.bf16 %v202_v27, %v198_v26  ;;  %v206_v42 = vld [vmem:[#allocation5 + $0x2d0] sm:$0xff]  ;;  %v464_v46 = vld [vmem:[#allocation5 + $0xae0] sm:$0xff] }
  0xd8   :  { %1994 = vmatpush1.bf16.msra.mxu1 %v1993_v30  ;;  %v207_v30 = vld [vmem:[#allocation5 + $0x2d8] sm:$0xff]  ;;  %v210_v43 = vld [vmem:[#allocation5 + $0x2f0] sm:$0xff]  ;;  %v473_v51 = vld [vmem:[#allocation5 + $0xb28] sm:$0xff]  ;;  %v1889_v53 = vpack.c.bf16 %v464_v46, %v460_v40 }
  0xd9   :  { %1996 = vmatprep.subr.bf16.mxu1 %v1995_v35  ;;  %v465_v35 = vld [vmem:[#allocation5 + $0xae8] sm:$0xff]  ;;  %v2017_v52 = vpack.c.bf16 %v210_v43, %v206_v42  ;;  %v468_v55 = vld [vmem:[#allocation5 + $0xb00] sm:$0xff]  ;;  %v214_v56 = vld [vmem:[#allocation5 + $0x310] sm:$0xff] }
  0xda   :  { %1866 = vmatpush1.bf16.msra.mxu0 %v1865_v32  ;;  %v461_v32 = vld [vmem:[#allocation5 + $0xac8] sm:$0xff]  ;;  %v218_v57 = vld [vmem:[#allocation5 + $0x330] sm:$0xff]  ;;  %v472_v59 = vld [vmem:[#allocation5 + $0xb20] sm:$0xff] }
  0xdb   :  { %1868 = vmatprep.subr.bf16.mxu0 %v1867_v39  ;;  %v2015_v39 = vpack.c.bf16 %v211_v31, %v207_v30  ;;  %v1887_v45 = vpack.c.bf16 %v465_v35, %v461_v32  ;;  %v481_v0 = vld [vmem:[#allocation5 + $0xb68] sm:$0xff]  ;;  %v2021_v1 = vpack.c.bf16 %v218_v57, %v214_v56  ;;  %v1893_v2 = vpack.c.bf16 %v472_v59, %v468_v55  ;;  %v476_v4 = vld [vmem:[#allocation5 + $0xb40] sm:$0xff]  ;;  %v222_v33 = vld [vmem:[#allocation5 + $0x350] sm:$0xff] }
  0xdc   :  { %1998 = vmatpush1.bf16.msra.mxu1 %v1997_v47  ;;  %v215_v47 = vld [vmem:[#allocation5 + $0x318] sm:$0xff]  ;;  %v226_v5 = vld [vmem:[#allocation5 + $0x370] sm:$0xff]  ;;  %v480_v7 = vld [vmem:[#allocation5 + $0xb60] sm:$0xff] }
  0xdd   :  { %2000 = vmatprep.subr.bf16.mxu1 %v1999_v50  ;;  %v469_v50 = vld [vmem:[#allocation5 + $0xb08] sm:$0xff]  ;;  %v2025_v13 = vpack.c.bf16 %v226_v5, %v222_v33  ;;  %v1897_v14 = vpack.c.bf16 %v480_v7, %v476_v4  ;;  %v484_v16 = vld [vmem:[#allocation5 + $0xb80] sm:$0xff]  ;;  %v230_v17 = vld [vmem:[#allocation5 + $0x390] sm:$0xff] }
  0xde   :  { %1870 = vmatpush1.bf16.msra.mxu0 %v1869_v49  ;;  %v219_v49 = vld [vmem:[#allocation5 + $0x338] sm:$0xff]  ;;  %v1891_v58 = vpack.c.bf16 %v473_v51, %v469_v50  ;;  %v489_v12 = vld [vmem:[#allocation5 + $0xba8] sm:$0xff]  ;;  %v234_v18 = vld [vmem:[#allocation5 + $0x3b0] sm:$0xff] }
  0xdf   :  { %1872 = vmatprep.subr.bf16.mxu0 %v1871_v54  ;;  %v2019_v54 = vpack.c.bf16 %v219_v49, %v215_v47  ;;  %v488_v20 = vld [vmem:[#allocation5 + $0xba0] sm:$0xff]  ;;  %v497_v24 = vld [vmem:[#allocation5 + $0xbe8] sm:$0xff]  ;;  %v2029_v26 = vpack.c.bf16 %v234_v18, %v230_v17  ;;  %v238_v30 = vld [vmem:[#allocation5 + $0x3d0] sm:$0xff] }
  0xe0   :  { %2002 = vmatpush1.bf16.msra.mxu1 %v2001_v60  ;;  %v223_v60 = vld [vmem:[#allocation5 + $0x358] sm:$0xff]  ;;  %v1901_v27 = vpack.c.bf16 %v488_v20, %v484_v16  ;;  %v492_v29 = vld [vmem:[#allocation5 + $0xbc0] sm:$0xff]  ;;  %v242_v31 = vld [vmem:[#allocation5 + $0x3f0] sm:$0xff] }
  0xe1   :  { %2004 = vmatprep.subr.bf16.mxu1 %v2003_v63  ;;  %v477_v63 = vld [vmem:[#allocation5 + $0xb48] sm:$0xff]  ;;  %v496_v35 = vld [vmem:[#allocation5 + $0xbe0] sm:$0xff]  ;;  %v2033_v43 = vpack.c.bf16 %v242_v31, %v238_v30  ;;  %v246_v49 = vld [vmem:[#allocation5 + $0x410] sm:$0xff] }
  0xe2   :  { %1874 = vmatpush1.bf16.msra.mxu0 %v1873_v62  ;;  %v227_v62 = vld [vmem:[#allocation5 + $0x378] sm:$0xff]  ;;  %v1895_v6 = vpack.c.bf16 %v481_v0, %v477_v63  ;;  %v501_v40 = vld [vmem:[#allocation5 + $0xc08] sm:$0xff]  ;;  %v500_v47 = vld [vmem:[#allocation5 + $0xc00] sm:$0xff] }
  0xe3   :  { %1876 = vmatprep.subr.bf16.mxu0 %v1875_v3  ;;  %v2023_v3 = vpack.c.bf16 %v227_v62, %v223_v60  ;;  %v505_v42 = vld [vmem:[#allocation5 + $0xc28] sm:$0xff]  ;;  %v250_v50 = vld [vmem:[#allocation5 + $0x430] sm:$0xff]  ;;  %v508_v60 = vld [vmem:[#allocation5 + $0xc40] sm:$0xff] }
  0xe4   :  { %2006 = vmatpush1.bf16.msra.mxu1 %v2005_v8  ;;  %v231_v8 = vld [vmem:[#allocation5 + $0x398] sm:$0xff]  ;;  %v1907_v51 = vpack.c.bf16 %v505_v42, %v501_v40  ;;  %v513_v56 = vld [vmem:[#allocation5 + $0xc68] sm:$0xff]  ;;  %v2037_v57 = vpack.c.bf16 %v250_v50, %v246_v49  ;;  %v254_v62 = vld [vmem:[#allocation5 + $0x450] sm:$0xff] }
  0xe5   :  { %2008 = vmatprep.subr.bf16.mxu1 %v2007_v10  ;;  %v485_v10 = vld [vmem:[#allocation5 + $0xb88] sm:$0xff]  ;;  %v258_v63 = vld [vmem:[#allocation5 + $0x470] sm:$0xff]  ;;  %v524_v20 = vld [vmem:[#allocation5 + $0xcc0] sm:$0xff] }
  0xe6   :  { %1878 = vmatpush1.bf16.msra.mxu0 %v1877_v9  ;;  %v235_v9 = vld [vmem:[#allocation5 + $0x3b8] sm:$0xff]  ;;  %v1899_v19 = vpack.c.bf16 %v489_v12, %v485_v10  ;;  %v517_v4 = vld [vmem:[#allocation5 + $0xc88] sm:$0xff]  ;;  %v2041_v5 = vpack.c.bf16 %v258_v63, %v254_v62  ;;  %v266_v10 = vld [vmem:[#allocation5 + $0x4b0] sm:$0xff] }
  0xe7   :  { %1880 = vmatprep.subr.bf16.mxu0 %v1879_v15  ;;  %v2027_v15 = vpack.c.bf16 %v235_v9, %v231_v8  ;;  %v521_v33 = vld [vmem:[#allocation5 + $0xca8] sm:$0xff]  ;;  %v516_v8 = vld [vmem:[#allocation5 + $0xc80] sm:$0xff]  ;;  %v262_v9 = vld [vmem:[#allocation5 + $0x490] sm:$0xff] }
  0xe8   :  { %2010 = vmatpush1.bf16.msra.mxu1 %v2009_v21  ;;  %v239_v21 = vld [vmem:[#allocation5 + $0x3d8] sm:$0xff]  ;;  %v1915_v12 = vpack.c.bf16 %v521_v33, %v517_v4  ;;  %v529_v16 = vld [vmem:[#allocation5 + $0xce8] sm:$0xff]  ;;  %v2045_v17 = vpack.c.bf16 %v266_v10, %v262_v9  ;;  %v540_v50 = vld [vmem:[#allocation5 + $0xd40] sm:$0xff] }
  0xe9   :  { %2012 = vmatprep.subr.bf16.mxu1 %v2011_v23  ;;  %v493_v23 = vld [vmem:[#allocation5 + $0xbc8] sm:$0xff]  ;;  %v287_v40 = vld [vmem:[#allocation5 + $0x558] sm:$0xff]  ;;  %v548_v63 = vld [vmem:[#allocation5 + $0xd80] sm:$0xff] }
  0xea   :  { %1882 = vmatpush1.bf16.msra.mxu0 %v1881_v22  ;;  %v243_v22 = vld [vmem:[#allocation5 + $0x3f8] sm:$0xff]  ;;  %v1903_v32 = vpack.c.bf16 %v497_v24, %v493_v23  ;;  %v528_v24 = vld [vmem:[#allocation5 + $0xce0] sm:$0xff] }
  0xeb   :  { %1884 = vmatprep.subr.bf16.mxu0 %v1883_v28  ;;  %v2031_v28 = vpack.c.bf16 %v243_v22, %v239_v21  ;;  %v270_v21 = vld [vmem:[#allocation5 + $0x4d0] sm:$0xff]  ;;  %v291_v42 = vld [vmem:[#allocation5 + $0x578] sm:$0xff]  ;;  %v556_v10 = vld [vmem:[#allocation5 + $0xdc0] sm:$0xff] }
  0xec   :  { %2014 = vmatpush1.bf16.msra.mxu1 %v2013_v36  ;;  %v247_v36 = vld [vmem:[#allocation5 + $0x418] sm:$0xff]  ;;  %v274_v22 = vld [vmem:[#allocation5 + $0x4f0] sm:$0xff]  ;;  %v2055_v49 = vpack.c.bf16 %v291_v42, %v287_v40  ;;  %v576_v42 = vld [vmem:[#allocation5 + $0xe60] sm:$0xff] }
  0xed   :  { %2016 = vmatprep.subr.bf16.mxu1 %v2015_v39  ;;  %v669_v39 = vcombine.high %v2773_v38, %v2773_v38  ;;  %v509_v38 = vld [vmem:[#allocation5 + $0xc48] sm:$0xff]  ;;  %v2049_v30 = vpack.c.bf16 %v274_v22, %v270_v21  ;;  %v303_v4 = vld [vmem:[#allocation5 + $0x5d8] sm:$0xff]  ;;  %v564_v22 = vld [vmem:[#allocation5 + $0xe00] sm:$0xff] }
  0xee   :  { %1886 = vmatpush1.bf16.msra.mxu0 %v1885_v37  ;;  %v251_v37 = vld [vmem:[#allocation5 + $0x438] sm:$0xff]  ;;  %v1911_v0 = vpack.c.bf16 %v513_v56, %v509_v38 }
  0xef   :  { %1888 = vmatprep.subr.bf16.mxu0 %v1887_v45  ;;  %v1905_v45 = vpack.c.bf16 %v496_v35, %v492_v29  ;;  %v2035_v46 = vpack.c.bf16 %v251_v37, %v247_v36  ;;  %v2787_v55 = vrot.slane %v669_v39, %v2752_v11  ;;  %v537_v29 = vld [vmem:[#allocation5 + $0xd28] sm:$0xff]  ;;  %v278_v35 = vld [vmem:[#allocation5 + $0x510] sm:$0xff]  ;;  %v536_v39 = vld [vmem:[#allocation5 + $0xd20] sm:$0xff] }
  0xf0   :  { %2018 = vmatpush1.bf16.msra.mxu1 %v2017_v52  ;;  %v504_v52 = vld [vmem:[#allocation5 + $0xc20] sm:$0xff]  ;;  %v282_v36 = vld [vmem:[#allocation5 + $0x530] sm:$0xff]  ;;  %v295_v38 = vld [vmem:[#allocation5 + $0x598] sm:$0xff] }
  0xf1   :  { %2020 = vmatprep.subr.bf16.mxu1 %v2019_v54  ;;  %v259_v54 = vld [vmem:[#allocation5 + $0x478] sm:$0xff]  ;;  %v2791_v11 = vcombine.high %v2787_v55, %v2787_v55 }
  0xf2   :  { %1890 = vmatpush1.bf16.msra.mxu0 %v1889_v53  ;;  %v255_v53 = vld [vmem:[#allocation5 + $0x458] sm:$0xff] }
  0xf3   :  { %1892 = vmatprep.subr.bf16.mxu0 %v1891_v58  ;;  %v1909_v58 = vpack.c.bf16 %v504_v52, %v500_v47  ;;  %v2039_v59 = vpack.c.bf16 %v259_v54, %v255_v53  ;;  %v290_v52 = vld [vmem:[#allocation5 + $0x570] sm:$0xff]  ;;  %v544_v54 = vld [vmem:[#allocation5 + $0xd60] sm:$0xff]  ;;  %v299_v56 = vld [vmem:[#allocation5 + $0x5b8] sm:$0xff] }
  0xf4   :  { %2022 = vmatpush1.bf16.msra.mxu1 %v2021_v1  ;;  %v512_v1 = vld [vmem:[#allocation5 + $0xc60] sm:$0xff]  ;;  %v2059_v62 = vpack.c.bf16 %v299_v56, %v295_v38  ;;  %v307_v33 = vld [vmem:[#allocation5 + $0x5f8] sm:$0xff] }
  0xf5   :  { %2024 = vmatprep.subr.bf16.mxu1 %v2023_v3  ;;  %v267_v3 = vld [vmem:[#allocation5 + $0x4b8] sm:$0xff]  ;;  %v2063_v9 = vpack.c.bf16 %v307_v33, %v303_v4  ;;  %v584_v56 = vld [vmem:[#allocation5 + $0xea0] sm:$0xff] }
  0xf6   :  { %1894 = vmatpush1.bf16.msra.mxu0 %v1893_v2  ;;  %v263_v2 = vld [vmem:[#allocation5 + $0x498] sm:$0xff]  ;;  %v592_v33 = vld [vmem:[#allocation5 + $0xee0] sm:$0xff] }
  0xf7   :  { %1896 = vmatprep.subr.bf16.mxu0 %v1895_v6  ;;  %v1913_v6 = vpack.c.bf16 %v512_v1, %v508_v60  ;;  %v2043_v7 = vpack.c.bf16 %v267_v3, %v263_v2  ;;  %v1929_v60 = vpack.c.bf16 %v544_v54, %v540_v50  ;;  %v298_v1 = vld [vmem:[#allocation5 + $0x5b0] sm:$0xff]  ;;  %v552_v3 = vld [vmem:[#allocation5 + $0xda0] sm:$0xff] }
  0xf8   :  { %2026 = vmatpush1.bf16.msra.mxu1 %v2025_v13  ;;  %v520_v13 = vld [vmem:[#allocation5 + $0xca0] sm:$0xff]  ;;  %v330_v54 = vld [vmem:[#allocation5 + $0x6b0] sm:$0xff] }
  0xf9   :  { %2028 = vmatprep.subr.bf16.mxu1 %v2027_v15  ;;  %v275_v15 = vld [vmem:[#allocation5 + $0x4f8] sm:$0xff]  ;;  %v1917_v18 = vpack.c.bf16 %v520_v13, %v516_v8  ;;  %v1933_v8 = vpack.c.bf16 %v552_v3, %v548_v63  ;;  %v306_v13 = vld [vmem:[#allocation5 + $0x5f0] sm:$0xff] }
  0xfa   :  { %1898 = vmatpush1.bf16.msra.mxu0 %v1897_v14  ;;  %v271_v14 = vld [vmem:[#allocation5 + $0x4d8] sm:$0xff]  ;;  %v338_v3 = vld [vmem:[#allocation5 + $0x6f0] sm:$0xff] }
  0xfb   :  { %1900 = vmatprep.subr.bf16.mxu0 %v1899_v19  ;;  %v2047_v19 = vpack.c.bf16 %v275_v15, %v271_v14  ;;  %v560_v15 = vld [vmem:[#allocation5 + $0xde0] sm:$0xff] }
  0xfc   :  { %2030 = vmatpush1.bf16.msra.mxu1 %v2029_v26  ;;  %v279_v26 = vld [vmem:[#allocation5 + $0x518] sm:$0xff] }
  0xfd   :  { %2032 = vmatprep.subr.bf16.mxu1 %v2031_v28  ;;  %v533_v28 = vld [vmem:[#allocation5 + $0xd08] sm:$0xff] }
  0xfe   :  { %1902 = vmatpush1.bf16.msra.mxu0 %v1901_v27  ;;  %v283_v27 = vld [vmem:[#allocation5 + $0x538] sm:$0xff]  ;;  %v1923_v37 = vpack.c.bf16 %v537_v29, %v533_v28 }
  0xff   :  { %1904 = vmatprep.subr.bf16.mxu0 %v1903_v32  ;;  %v2051_v31 = vpack.c.bf16 %v283_v27, %v279_v26  ;;  %v532_v32 = vld [vmem:[#allocation5 + $0xd00] sm:$0xff]  ;;  %v319_v28 = vld [vmem:[#allocation5 + $0x658] sm:$0xff] }
 0x100   :  { %2034 = vmatpush1.bf16.msra.mxu1 %v2033_v43  ;;  %v541_v43 = vld [vmem:[#allocation5 + $0xd48] sm:$0xff]  ;;  %v1925_v47 = vpack.c.bf16 %v536_v39, %v532_v32  ;;  %v568_v27 = vld [vmem:[#allocation5 + $0xe20] sm:$0xff]  ;;  %v323_v29 = vld [vmem:[#allocation5 + $0x678] sm:$0xff] }
 0x101   :  { %2036 = vmatprep.subr.bf16.mxu1 %v2035_v46  ;;  %v2053_v46 = vpack.c.bf16 %v282_v36, %v278_v35  ;;  %v1941_v32 = vpack.c.bf16 %v568_v27, %v564_v22  ;;  %v2071_v35 = vpack.c.bf16 %v323_v29, %v319_v28  ;;  %v572_v36 = vld [vmem:[#allocation5 + $0xe40] sm:$0xff]  ;;  %v322_v39 = vld [vmem:[#allocation5 + $0x670] sm:$0xff] }
 0x102   :  { %1906 = vmatpush1.bf16.msra.mxu0 %v1905_v45  ;;  %v545_v45 = vld [vmem:[#allocation5 + $0xd68] sm:$0xff]  ;;  %v1945_v50 = vpack.c.bf16 %v576_v42, %v572_v36  ;;  %v354_v27 = vld [vmem:[#allocation5 + $0x770] sm:$0xff]  ;;  %v608_v29 = vld [vmem:[#allocation5 + $0xf60] sm:$0xff] }
 0x103   :  { %1908 = vmatprep.subr.bf16.mxu0 %v1907_v51  ;;  %1043 = vmatmul.mubr.f32.vlgmr.msra.gmra.mrb[2].mxu1 %v2755_v25  ;;  %v525_v25 = vld [vmem:[#allocation5 + $0xcc8] sm:$0xff]  ;;  %v286_v51 = vld [vmem:[#allocation5 + $0x550] sm:$0xff]  ;;  %v1927_v53 = vpack.c.bf16 %v545_v45, %v541_v43  ;;  %v327_v43 = vld [vmem:[#allocation5 + $0x698] sm:$0xff] }
 0x104   :  { %2038 = vmatpush1.bf16.msra.mxu1 %v2037_v57  ;;  %1113 = vmatprep.mubr.f32.mxu1 %v2767_v41  ;;  %v1919_v23 = vpack.c.bf16 %v529_v16, %v525_v25  ;;  %v1921_v41 = vpack.c.bf16 %v528_v24, %v524_v20  ;;  %v549_v57 = vld [vmem:[#allocation5 + $0xd88] sm:$0xff]  ;;  %v311_v25 = vld [vmem:[#allocation5 + $0x618] sm:$0xff]  ;;  %v1937_v20 = vpack.c.bf16 %v560_v15, %v556_v10  ;;  %v314_v24 = vld [vmem:[#allocation5 + $0x630] sm:$0xff] }
 0x105   :  { %901 = vmatmul.mubr.f32.vlgmr.msra.gmra.mrb[0].mxu0 %v2777_v44  ;;  %2040 = vmatprep.subr.bf16.mxu1 %v2039_v59  ;;  %v2057_v59 = vpack.c.bf16 %v290_v52, %v286_v51  ;;  %v315_v16 = vld [vmem:[#allocation5 + $0x638] sm:$0xff]  ;;  %v580_v52 = vld [vmem:[#allocation5 + $0xe80] sm:$0xff]  ;;  %v346_v15 = vld [vmem:[#allocation5 + $0x730] sm:$0xff] }
 0x106   :  { %1910 = vmatpush1.bf16.msra.mxu0 %v1909_v58  ;;  %971 = vmatprep.mubr.f32.mxu0 %v2791_v11  ;;  %v553_v58 = vld [vmem:[#allocation5 + $0xda8] sm:$0xff]  ;;  %v2067_v21 = vpack.c.bf16 %v315_v16, %v311_v25  ;;  %v331_v45 = vld [vmem:[#allocation5 + $0x6b8] sm:$0xff]  ;;  %v1949_v63 = vpack.c.bf16 %v584_v56, %v580_v52  ;;  %v600_v16 = vld [vmem:[#allocation5 + $0xf20] sm:$0xff] }
 0x107   :  { %1912 = vmatprep.subr.bf16.mxu0 %v1911_v0  ;;  %v294_v0 = vld [vmem:[#allocation5 + $0x590] sm:$0xff]  ;;  %v1931_v2 = vpack.c.bf16 %v553_v58, %v549_v57  ;;  %v2075_v51 = vpack.c.bf16 %v331_v45, %v327_v43  ;;  %v335_v57 = vld [vmem:[#allocation5 + $0x6d8] sm:$0xff]  ;;  %v616_v45 = vld [vmem:[#allocation5 + $0xfa0] sm:$0xff] }
 0x108   :  { %2042 = vmatpush1.bf16.msra.mxu1 %v2041_v5  ;;  %v557_v5 = vld [vmem:[#allocation5 + $0xdc8] sm:$0xff]  ;;  %v339_v58 = vld [vmem:[#allocation5 + $0x6f8] sm:$0xff]  ;;  %v362_v42 = vld [vmem:[#allocation5 + $0x7b0] sm:$0xff] }
 0x109   :  { %2044 = vmatprep.subr.bf16.mxu1 %v2043_v7  ;;  %v2061_v7 = vpack.c.bf16 %v298_v1, %v294_v0  ;;  %v2079_v0 = vpack.c.bf16 %v339_v58, %v335_v57  ;;  %v588_v1 = vld [vmem:[#allocation5 + $0xec0] sm:$0xff]  ;;  %v370_v56 = vld [vmem:[#allocation5 + $0x7f0] sm:$0xff] }
 0x10a   :  { %1914 = vmatpush1.bf16.msra.mxu0 %v1913_v6  ;;  %v561_v6 = vld [vmem:[#allocation5 + $0xde8] sm:$0xff]  ;;  %v1953_v10 = vpack.c.bf16 %v592_v33, %v588_v1  ;;  %v624_v58 = vld [vmem:[#allocation5 + $0xfe0] sm:$0xff]  ;;  %v374_v1 = vld [vmem:[#allocation5 + $0x810] sm:$0xff] }
 0x10b   :  { %1916 = vmatprep.subr.bf16.mxu0 %v1915_v12  ;;  %v302_v12 = vld [vmem:[#allocation5 + $0x5d0] sm:$0xff]  ;;  %v1935_v14 = vpack.c.bf16 %v561_v6, %v557_v5  ;;  %v343_v5 = vld [vmem:[#allocation5 + $0x718] sm:$0xff] }
 0x10c   :  { %2046 = vmatpush1.bf16.msra.mxu1 %v2045_v17  ;;  %v565_v17 = vld [vmem:[#allocation5 + $0xe08] sm:$0xff]  ;;  %v347_v6 = vld [vmem:[#allocation5 + $0x738] sm:$0xff] }
 0x10d   :  { %2048 = vmatprep.subr.bf16.mxu1 %v2047_v19  ;;  %v2065_v19 = vpack.c.bf16 %v306_v13, %v302_v12  ;;  %v2083_v12 = vpack.c.bf16 %v347_v6, %v343_v5  ;;  %v596_v13 = vld [vmem:[#allocation5 + $0xf00] sm:$0xff]  ;;  %v382_v6 = vld [vmem:[#allocation5 + $0x850] sm:$0xff] }
 0x10e   :  { %1918 = vmatpush1.bf16.msra.mxu0 %v1917_v18  ;;  %v569_v18 = vld [vmem:[#allocation5 + $0xe28] sm:$0xff]  ;;  %v1957_v22 = vpack.c.bf16 %v600_v16, %v596_v13 }
 0x10f   :  { %1920 = vmatprep.subr.bf16.mxu0 %v1919_v23  ;;  %v310_v23 = vld [vmem:[#allocation5 + $0x610] sm:$0xff]  ;;  %v1939_v26 = vpack.c.bf16 %v569_v18, %v565_v17  ;;  %v351_v17 = vld [vmem:[#allocation5 + $0x758] sm:$0xff] }
 0x110   :  { %2050 = vmatpush1.bf16.msra.mxu1 %v2049_v30  ;;  %v573_v30 = vld [vmem:[#allocation5 + $0xe48] sm:$0xff]  ;;  %v355_v18 = vld [vmem:[#allocation5 + $0x778] sm:$0xff] }
 0x111   :  { %2052 = vmatprep.subr.bf16.mxu1 %v2051_v31  ;;  %v2069_v31 = vpack.c.bf16 %v314_v24, %v310_v23  ;;  %v2087_v23 = vpack.c.bf16 %v355_v18, %v351_v17  ;;  %v604_v24 = vld [vmem:[#allocation5 + $0xf40] sm:$0xff]  ;;  %v1267_v13 = vld [vmem:[#allocation8 + $0x8] sm:$0xff]  ;;  %v1268_v17 = vld [vmem:[#allocation8 + $0x10] sm:$0xff] }
 0x112   :  { %1922 = vmatpush1.bf16.msra.mxu0 %v1921_v41  ;;  %v577_v41 = vld [vmem:[#allocation5 + $0xe68] sm:$0xff]  ;;  %v1961_v36 = vpack.c.bf16 %v608_v29, %v604_v24 }
 0x113   :  { %1924 = vmatprep.subr.bf16.mxu0 %v1923_v37  ;;  %v318_v37 = vld [vmem:[#allocation5 + $0x650] sm:$0xff]  ;;  %v1943_v40 = vpack.c.bf16 %v577_v41, %v573_v30  ;;  %v359_v30 = vld [vmem:[#allocation5 + $0x798] sm:$0xff] }
 0x114   :  { %2054 = vmatpush1.bf16.msra.mxu1 %v2053_v46  ;;  %v581_v46 = vld [vmem:[#allocation5 + $0xe88] sm:$0xff]  ;;  %v363_v41 = vld [vmem:[#allocation5 + $0x7b8] sm:$0xff] }
 0x115   :  { %2056 = vmatprep.subr.bf16.mxu1 %v2055_v49  ;;  %v2073_v49 = vpack.c.bf16 %v322_v39, %v318_v37  ;;  %v2091_v37 = vpack.c.bf16 %v363_v41, %v359_v30  ;;  %v612_v39 = vld [vmem:[#allocation5 + $0xf80] sm:$0xff]  ;;  %v1271_v18 = vld [vmem:[#allocation8 + $0x28] sm:$0xff] }
 0x116   :  { %1926 = vmatpush1.bf16.msra.mxu0 %v1925_v47  ;;  %v585_v47 = vld [vmem:[#allocation5 + $0xea8] sm:$0xff]  ;;  %v1965_v52 = vpack.c.bf16 %v616_v45, %v612_v39  ;;  %v398_v41 = vld [vmem:[#allocation5 + $0x8d0] sm:$0xff]  ;;  %v1281_v39 = vld [vmem:[#allocation8 + $0x78] sm:$0xff] }
 0x117   :  { %1928 = vmatprep.subr.bf16.mxu0 %v1927_v53  ;;  %v326_v53 = vld [vmem:[#allocation5 + $0x690] sm:$0xff]  ;;  %v1947_v38 = vpack.c.bf16 %v585_v47, %v581_v46  ;;  %v367_v46 = vld [vmem:[#allocation5 + $0x7d8] sm:$0xff] }
 0x118   :  { %2058 = vmatpush1.bf16.msra.mxu1 %v2057_v59  ;;  %v589_v59 = vld [vmem:[#allocation5 + $0xec8] sm:$0xff]  ;;  %v371_v47 = vld [vmem:[#allocation5 + $0x7f8] sm:$0xff] }
 0x119   :  { %2060 = vmatprep.subr.bf16.mxu1 %v2059_v62  ;;  %v2077_v62 = vpack.c.bf16 %v330_v54, %v326_v53  ;;  %v2095_v53 = vpack.c.bf16 %v371_v47, %v367_v46  ;;  %v620_v54 = vld [vmem:[#allocation5 + $0xfc0] sm:$0xff]  ;;  %v1275_v24 = vld [vmem:[#allocation8 + $0x48] sm:$0xff] }
 0x11a   :  { %1930 = vmatpush1.bf16.msra.mxu0 %v1929_v60  ;;  %v593_v60 = vld [vmem:[#allocation5 + $0xee8] sm:$0xff]  ;;  %v406_v46 = vld [vmem:[#allocation5 + $0x910] sm:$0xff] }
 0x11b   :  { %1932 = vmatprep.subr.bf16.mxu0 %v1931_v2  ;;  %v334_v2 = vld [vmem:[#allocation5 + $0x6d0] sm:$0xff]  ;;  %v1951_v4 = vpack.c.bf16 %v593_v60, %v589_v59  ;;  %v375_v59 = vld [vmem:[#allocation5 + $0x818] sm:$0xff] }
 0x11c   :  { %2062 = vmatpush1.bf16.msra.mxu1 %v2061_v7  ;;  %v597_v7 = vld [vmem:[#allocation5 + $0xf08] sm:$0xff]  ;;  %v379_v60 = vld [vmem:[#allocation5 + $0x838] sm:$0xff] }
 0x11d   :  { %2064 = vmatprep.subr.bf16.mxu1 %v2063_v9  ;;  %v2081_v9 = vpack.c.bf16 %v338_v3, %v334_v2  ;;  %v378_v2 = vld [vmem:[#allocation5 + $0x830] sm:$0xff]  ;;  %v383_v3 = vld [vmem:[#allocation5 + $0x858] sm:$0xff] }
 0x11e   :  { %1934 = vmatpush1.bf16.msra.mxu0 %v1933_v8  ;;  %v601_v8 = vld [vmem:[#allocation5 + $0xf28] sm:$0xff]  ;;  %v2101_v33 = vpack.c.bf16 %v378_v2, %v374_v1  ;;  %v418_v1 = vld [vmem:[#allocation5 + $0x970] sm:$0xff] }
 0x11f   :  { %1936 = vmatprep.subr.bf16.mxu0 %v1935_v14  ;;  %v342_v14 = vld [vmem:[#allocation5 + $0x710] sm:$0xff]  ;;  %v1955_v25 = vpack.c.bf16 %v601_v8, %v597_v7  ;;  %v391_v8 = vld [vmem:[#allocation5 + $0x898] sm:$0xff] }
 0x120   :  { %2066 = vmatpush1.bf16.msra.mxu1 %v2065_v19  ;;  %v605_v19 = vld [vmem:[#allocation5 + $0xf48] sm:$0xff]  ;;  %v386_v7 = vld [vmem:[#allocation5 + $0x870] sm:$0xff] }
 0x121   :  { %2068 = vmatprep.subr.bf16.mxu1 %v2067_v21  ;;  %v2085_v21 = vpack.c.bf16 %v346_v15, %v342_v14  ;;  %v1269_v14 = vld [vmem:[#allocation8 + $0x18] sm:$0xff]  ;;  %v1266_v15 = vld [vmem:[#allocation8] sm:$0xff]  ;;  %v1287_v2 = vld [vmem:[#allocation8 + $0xa8] sm:$0xff] }
 0x122   :  { %1938 = vmatpush1.bf16.msra.mxu0 %v1937_v20  ;;  %v609_v20 = vld [vmem:[#allocation5 + $0xf68] sm:$0xff]  ;;  %v2227_v16 = vpack.c.bf16 %v1269_v14, %v1267_v13  ;;  %v426_v13 = vld [vmem:[#allocation5 + $0x9b0] sm:$0xff] }
 0x123   :  { %1940 = vmatprep.subr.bf16.mxu0 %v1939_v26  ;;  %v350_v26 = vld [vmem:[#allocation5 + $0x750] sm:$0xff]  ;;  %v1959_v28 = vpack.c.bf16 %v609_v20, %v605_v19  ;;  %v1273_v19 = vld [vmem:[#allocation8 + $0x38] sm:$0xff] }
 0x124   :  { %2070 = vmatpush1.bf16.msra.mxu1 %v2069_v31  ;;  %v613_v31 = vld [vmem:[#allocation5 + $0xf88] sm:$0xff] }
 0x125   :  { %2072 = vmatprep.subr.bf16.mxu1 %v2071_v35  ;;  %v2089_v35 = vpack.c.bf16 %v354_v27, %v350_v26  ;;  %v399_v26 = vld [vmem:[#allocation5 + $0x8d8] sm:$0xff]  ;;  %v1291_v14 = vld [vmem:[#allocation8 + $0xc8] sm:$0xff] }
 0x126   :  { %1942 = vmatpush1.bf16.msra.mxu0 %v1941_v32  ;;  %v617_v32 = vld [vmem:[#allocation5 + $0xfa8] sm:$0xff]  ;;  %v403_v27 = vld [vmem:[#allocation5 + $0x8f8] sm:$0xff] }
 0x127   :  { %1944 = vmatprep.subr.bf16.mxu0 %v1943_v40  ;;  %v358_v40 = vld [vmem:[#allocation5 + $0x790] sm:$0xff]  ;;  %v1963_v43 = vpack.c.bf16 %v617_v32, %v613_v31  ;;  %v1274_v32 = vld [vmem:[#allocation8 + $0x40] sm:$0xff] }
 0x128   :  { %2074 = vmatpush1.bf16.msra.mxu1 %v2073_v49  ;;  %v621_v49 = vld [vmem:[#allocation5 + $0xfc8] sm:$0xff] }
 0x129   :  { %2076 = vmatprep.subr.bf16.mxu1 %v2075_v51  ;;  %v2093_v51 = vpack.c.bf16 %v362_v42, %v358_v40  ;;  %v407_v40 = vld [vmem:[#allocation5 + $0x918] sm:$0xff] }
 0x12a   :  { %1946 = vmatpush1.bf16.msra.mxu0 %v1945_v50  ;;  %v625_v50 = vld [vmem:[#allocation5 + $0xfe8] sm:$0xff]  ;;  %v411_v42 = vld [vmem:[#allocation5 + $0x938] sm:$0xff] }
 0x12b   :  { %1948 = vmatprep.subr.bf16.mxu0 %v1947_v38  ;;  %v366_v38 = vld [vmem:[#allocation5 + $0x7d0] sm:$0xff]  ;;  %v1967_v57 = vpack.c.bf16 %v625_v50, %v621_v49  ;;  %v1278_v49 = vld [vmem:[#allocation8 + $0x60] sm:$0xff] }
 0x12c   :  { %2078 = vmatpush1.bf16.msra.mxu1 %v2077_v62  ;;  %v2097_v62 = vpack.c.bf16 %v370_v56, %v366_v38  ;;  %v1280_v50 = vld [vmem:[#allocation8 + $0x70] sm:$0xff] }
 0x12d   :  { %2080 = vmatprep.subr.bf16.mxu1 %v2079_v0  ;;  %v2099_v0 = vpack.c.bf16 %v379_v60, %v375_v59  ;;  %v415_v38 = vld [vmem:[#allocation5 + $0x958] sm:$0xff]  ;;  %v414_v59 = vld [vmem:[#allocation5 + $0x950] sm:$0xff] }
 0x12e   :  { %1950 = vmatpush1.bf16.msra.mxu0 %v1949_v63  ;;  %v1969_v63 = vpack.c.bf16 %v624_v58, %v620_v54  ;;  %v1285_v54 = vld [vmem:[#allocation8 + $0x98] sm:$0xff] }
 0x12f   :  { %1952 = vmatprep.subr.bf16.mxu0 %v1951_v4  ;;  %v387_v4 = vld [vmem:[#allocation5 + $0x878] sm:$0xff] }
 0x130   :  { %2082 = vmatpush1.bf16.msra.mxu1 %v2081_v9  ;;  %v2103_v5 = vpack.c.bf16 %v387_v4, %v383_v3  ;;  %v395_v9 = vld [vmem:[#allocation5 + $0x8b8] sm:$0xff] }
 0x131   :  { %2084 = vmatprep.subr.bf16.mxu1 %v2083_v12  ;;  %v394_v12 = vld [vmem:[#allocation5 + $0x8b0] sm:$0xff]  ;;  %v2107_v20 = vpack.c.bf16 %v395_v9, %v391_v8  ;;  %v419_v56 = vld [vmem:[#allocation5 + $0x978] sm:$0xff]  ;;  %v1286_v9 = vld [vmem:[#allocation8 + $0xa0] sm:$0xff] }
 0x132   :  { %1954 = vmatpush1.bf16.msra.mxu0 %v1953_v10  ;;  %v390_v10 = vld [vmem:[#allocation5 + $0x890] sm:$0xff]  ;;  %v1289_v3 = vld [vmem:[#allocation8 + $0xb8] sm:$0xff] }
 0x133   :  { %1956 = vmatprep.subr.bf16.mxu0 %v1955_v25  ;;  %v2105_v25 = vpack.c.bf16 %v386_v7, %v382_v6  ;;  %v2109_v30 = vpack.c.bf16 %v394_v12, %v390_v10  ;;  %v423_v4 = vld [vmem:[#allocation5 + $0x998] sm:$0xff]  ;;  %v2121_v6 = vpack.c.bf16 %v418_v1, %v414_v59  ;;  %v422_v7 = vld [vmem:[#allocation5 + $0x990] sm:$0xff]  ;;  %v2247_v8 = vpack.c.bf16 %v1289_v3, %v1287_v2 }
 0x134   :  { %2086 = vmatpush1.bf16.msra.mxu1 %v2085_v21  ;;  %v2229_v21 = vpack.c.bf16 %v1268_v17, %v1266_v15  ;;  %v1288_v10 = vld [vmem:[#allocation8 + $0xb0] sm:$0xff]  ;;  %v1293_v15 = vld [vmem:[#allocation8 + $0xd8] sm:$0xff]  ;;  %v1307_v2 = vld [vmem:[#allocation8 + $0x148] sm:$0xff] }
 0x135   :  { %2088 = vmatprep.subr.bf16.mxu1 %v2087_v23  ;;  %v1272_v23 = vld [vmem:[#allocation8 + $0x30] sm:$0xff]  ;;  %v2249_v17 = vpack.c.bf16 %v1288_v10, %v1286_v9  ;;  %v1309_v3 = vld [vmem:[#allocation8 + $0x158] sm:$0xff]  ;;  %v1306_v9 = vld [vmem:[#allocation8 + $0x140] sm:$0xff] }
 0x136   :  { %1958 = vmatpush1.bf16.msra.mxu0 %v1957_v22  ;;  %v2231_v22 = vpack.c.bf16 %v1273_v19, %v1271_v18  ;;  %v2125_v18 = vpack.c.bf16 %v426_v13, %v422_v7  ;;  %v430_v19 = vld [vmem:[#allocation5 + $0x9d0] sm:$0xff] }
 0x137   :  { %1960 = vmatprep.subr.bf16.mxu0 %v1959_v28  ;;  %v1277_v28 = vld [vmem:[#allocation8 + $0x58] sm:$0xff]  ;;  %v454_v59 = vld [vmem:[#allocation5 + $0xa90] sm:$0xff] }
 0x138   :  { %2090 = vmatpush1.bf16.msra.mxu1 %v2089_v35  ;;  %v2235_v31 = vpack.c.bf16 %v1277_v28, %v1275_v24  ;;  %v1276_v35 = vld [vmem:[#allocation8 + $0x50] sm:$0xff]  ;;  %v1295_v24 = vld [vmem:[#allocation8 + $0xe8] sm:$0xff] }
 0x139   :  { %2092 = vmatprep.subr.bf16.mxu1 %v2091_v37  ;;  %v1279_v37 = vld [vmem:[#allocation8 + $0x68] sm:$0xff]  ;;  %v443_v28 = vld [vmem:[#allocation5 + $0xa38] sm:$0xff] }
 0x13a   :  { %1962 = vmatpush1.bf16.msra.mxu0 %v1961_v36  ;;  %v402_v36 = vld [vmem:[#allocation5 + $0x8f0] sm:$0xff]  ;;  %v2239_v47 = vpack.c.bf16 %v1281_v39, %v1279_v37  ;;  %v1301_v39 = vld [vmem:[#allocation8 + $0x118] sm:$0xff] }
 0x13b   :  { %1964 = vmatprep.subr.bf16.mxu0 %v1963_v43  ;;  %v2237_v43 = vpack.c.bf16 %v1276_v35, %v1274_v32  ;;  %v2113_v45 = vpack.c.bf16 %v402_v36, %v398_v41  ;;  %v438_v41 = vld [vmem:[#allocation5 + $0xa10] sm:$0xff]  ;;  %v1294_v32 = vld [vmem:[#allocation8 + $0xe0] sm:$0xff] }
 0x13c   :  { %2094 = vmatpush1.bf16.msra.mxu1 %v2093_v51  ;;  %v2115_v51 = vpack.c.bf16 %v411_v42, %v407_v40  ;;  %v1296_v35 = vld [vmem:[#allocation8 + $0xf0] sm:$0xff]  ;;  %v1299_v37 = vld [vmem:[#allocation8 + $0x108] sm:$0xff] }
 0x13d   :  { %2096 = vmatprep.subr.bf16.mxu1 %v2095_v53  ;;  %v1283_v53 = vld [vmem:[#allocation8 + $0x88] sm:$0xff]  ;;  %v447_v40 = vld [vmem:[#allocation5 + $0xa58] sm:$0xff] }
 0x13e   :  { %1966 = vmatpush1.bf16.msra.mxu0 %v1965_v52  ;;  %v410_v52 = vld [vmem:[#allocation5 + $0x930] sm:$0xff]  ;;  %v2243_v60 = vpack.c.bf16 %v1285_v54, %v1283_v53  ;;  %v451_v42 = vld [vmem:[#allocation5 + $0xa78] sm:$0xff] }
 0x13f   :  { %1968 = vmatprep.subr.bf16.mxu0 %v1967_v57  ;;  %v2241_v57 = vpack.c.bf16 %v1280_v50, %v1278_v49  ;;  %v2117_v58 = vpack.c.bf16 %v410_v52, %v406_v46  ;;  %v442_v36 = vld [vmem:[#allocation5 + $0xa30] sm:$0xff]  ;;  %v1298_v49 = vld [vmem:[#allocation8 + $0x100] sm:$0xff]  ;;  %v1305_v54 = vld [vmem:[#allocation8 + $0x138] sm:$0xff] }
 0x140   :  { %2098 = vmatpush1.bf16.msra.mxu1 %v2097_v62  ;;  %v1282_v62 = vld [vmem:[#allocation8 + $0x80] sm:$0xff]  ;;  %v446_v46 = vld [vmem:[#allocation5 + $0xa50] sm:$0xff] }
 0x141   :  { %2100 = vmatprep.subr.bf16.mxu1 %v2099_v0  ;;  %v2119_v0 = vpack.c.bf16 %v419_v56, %v415_v38  ;;  %v1300_v50 = vld [vmem:[#allocation8 + $0x110] sm:$0xff]  ;;  %v1303_v53 = vld [vmem:[#allocation8 + $0x128] sm:$0xff] }
 0x142   :  { %1970 = vmatpush1.bf16.msra.mxu0 %v1969_v63  ;;  %v1284_v63 = vld [vmem:[#allocation8 + $0x90] sm:$0xff] }
 0x143   :  { %1114 = vmatmul.mubr.f32.vlgmr.msra.gmra.mrb[2].mxu1 %v2762_v34  ;;  %v1270_v34 = vld [vmem:[#allocation8 + $0x20] sm:$0xff]  ;;  %2228 = vmatprep.subr.bf16.mxu0 %v2227_v16  ;;  %v435_v16 = vld [vmem:[#allocation5 + $0x9f8] sm:$0xff]  ;;  %v450_v52 = vld [vmem:[#allocation5 + $0xa70] sm:$0xff] }
 0x144   :  { %2102 = vmatpush1.bf16.msra.mxu1 %v2101_v33  ;;  %1184 = vmatprep.mubr.f32.mxu1 %v2781_v48  ;;  %v2233_v29 = vpack.c.bf16 %v1272_v23, %v1270_v34  ;;  %v2111_v48 = vpack.c.bf16 %v403_v27, %v399_v26  ;;  %v427_v33 = vld [vmem:[#allocation5 + $0x9b8] sm:$0xff]  ;;  %v434_v23 = vld [vmem:[#allocation5 + $0x9f0] sm:$0xff] }
 0x145   :  { %972 = vmatmul.mubr.f32.vlgmr.msra.gmra.mrb[0].mxu0 %v2787_v55  ;;  %2104 = vmatprep.subr.bf16.mxu1 %v2103_v5  ;;  %v2245_v5 = vpack.c.bf16 %v1284_v63, %v1282_v62  ;;  %v2123_v12 = vpack.c.bf16 %v427_v33, %v423_v4  ;;  %v1297_v26 = vld [vmem:[#allocation8 + $0xf8] sm:$0xff]  ;;  %v1302_v62 = vld [vmem:[#allocation8 + $0x120] sm:$0xff]  ;;  %v1304_v63 = vld [vmem:[#allocation8 + $0x130] sm:$0xff] }
 0x146   :  { %2230 = vmatpush1.bf16.msra.mxu0 %v2229_v21  ;;  %v1290_v21 = vld [vmem:[#allocation8 + $0xc0] sm:$0xff]  ;;  %v439_v27 = vld [vmem:[#allocation5 + $0xa18] sm:$0xff]  ;;  %v458_v1 = vld [vmem:[#allocation5 + $0xab0] sm:$0xff] }
 0x147   :  { %2232 = vmatprep.subr.bf16.mxu0 %v2231_v22  ;;  %v1292_v22 = vld [vmem:[#allocation8 + $0xd0] sm:$0xff] }
 0x148   :  { %2106 = vmatpush1.bf16.msra.mxu1 %v2105_v25  ;;  %v431_v25 = vld [vmem:[#allocation5 + $0x9d8] sm:$0xff]  ;;  %v462_v7 = vld [vmem:[#allocation5 + $0xad0] sm:$0xff] }
 0x149   :  { %2108 = vmatprep.subr.bf16.mxu1 %v2107_v20  ;;  %v2251_v20 = vpack.c.bf16 %v1293_v15, %v1291_v14  ;;  %v2127_v34 = vpack.c.bf16 %v435_v16, %v431_v25  ;;  %v455_v38 = vld [vmem:[#allocation5 + $0xa98] sm:$0xff]  ;;  %v466_v13 = vld [vmem:[#allocation5 + $0xaf0] sm:$0xff] }
 0x14a   :  { %2234 = vmatpush1.bf16.msra.mxu0 %v2233_v29  ;;  %v2253_v29 = vpack.c.bf16 %v1292_v22, %v1290_v21  ;;  %v459_v56 = vld [vmem:[#allocation5 + $0xab8] sm:$0xff]  ;;  %v1311_v14 = vld [vmem:[#allocation8 + $0x168] sm:$0xff]  ;;  %v1310_v21 = vld [vmem:[#allocation8 + $0x160] sm:$0xff] }
 0x14b   :  { %2236 = vmatprep.subr.bf16.mxu0 %v2235_v31  ;;  %v2255_v31 = vpack.c.bf16 %v1297_v26, %v1295_v24  ;;  %v463_v4 = vld [vmem:[#allocation5 + $0xad8] sm:$0xff]  ;;  %v1315_v24 = vld [vmem:[#allocation8 + $0x188] sm:$0xff] }
 0x14c   :  { %2110 = vmatpush1.bf16.msra.mxu1 %v2109_v30  ;;  %v2129_v30 = vpack.c.bf16 %v434_v23, %v430_v19  ;;  %v467_v33 = vld [vmem:[#allocation5 + $0xaf8] sm:$0xff]  ;;  %v470_v19 = vld [vmem:[#allocation5 + $0xb10] sm:$0xff] }
 0x14d   :  { %2112 = vmatprep.subr.bf16.mxu1 %v2111_v48  ;;  %v2131_v48 = vpack.c.bf16 %v443_v28, %v439_v27  ;;  %v1308_v10 = vld [vmem:[#allocation8 + $0x150] sm:$0xff]  ;;  %v1313_v15 = vld [vmem:[#allocation8 + $0x178] sm:$0xff] }
 0x14e   :  { %2238 = vmatpush1.bf16.msra.mxu0 %v2237_v43  ;;  %v2257_v43 = vpack.c.bf16 %v1296_v35, %v1294_v32  ;;  %v471_v25 = vld [vmem:[#allocation5 + $0xb18] sm:$0xff]  ;;  %v474_v23 = vld [vmem:[#allocation5 + $0xb30] sm:$0xff]  ;;  %v1314_v32 = vld [vmem:[#allocation8 + $0x180] sm:$0xff] }
 0x14f   :  { %2240 = vmatprep.subr.bf16.mxu0 %v2239_v47  ;;  %v2259_v47 = vpack.c.bf16 %v1301_v39, %v1299_v37  ;;  %v475_v16 = vld [vmem:[#allocation5 + $0xb38] sm:$0xff]  ;;  %v1319_v37 = vld [vmem:[#allocation8 + $0x1a8] sm:$0xff] }
 0x150   :  { %2114 = vmatpush1.bf16.msra.mxu1 %v2113_v45  ;;  %v2133_v45 = vpack.c.bf16 %v442_v36, %v438_v41  ;;  %v1312_v22 = vld [vmem:[#allocation8 + $0x170] sm:$0xff]  ;;  %v1317_v26 = vld [vmem:[#allocation8 + $0x198] sm:$0xff] }
 0x151   :  { %2116 = vmatprep.subr.bf16.mxu1 %v2115_v51  ;;  %v2135_v51 = vpack.c.bf16 %v451_v42, %v447_v40  ;;  %v479_v27 = vld [vmem:[#allocation5 + $0xb58] sm:$0xff]  ;;  %v478_v41 = vld [vmem:[#allocation5 + $0xb50] sm:$0xff] }
 0x152   :  { %2242 = vmatpush1.bf16.msra.mxu0 %v2241_v57  ;;  %v2261_v57 = vpack.c.bf16 %v1300_v50, %v1298_v49  ;;  %v483_v28 = vld [vmem:[#allocation5 + $0xb78] sm:$0xff]  ;;  %v482_v36 = vld [vmem:[#allocation5 + $0xb70] sm:$0xff]  ;;  %v1318_v49 = vld [vmem:[#allocation8 + $0x1a0] sm:$0xff] }
 0x153   :  { %2244 = vmatprep.subr.bf16.mxu0 %v2243_v60  ;;  %v2263_v60 = vpack.c.bf16 %v1305_v54, %v1303_v53  ;;  %v1316_v35 = vld [vmem:[#allocation8 + $0x190] sm:$0xff]  ;;  %v1321_v39 = vld [vmem:[#allocation8 + $0x1b8] sm:$0xff]  ;;  %v1323_v53 = vld [vmem:[#allocation8 + $0x1c8] sm:$0xff] }
 0x154   :  { %2118 = vmatpush1.bf16.msra.mxu1 %v2117_v58  ;;  %v2137_v58 = vpack.c.bf16 %v450_v52, %v446_v46  ;;  %v487_v40 = vld [vmem:[#allocation5 + $0xb98] sm:$0xff]  ;;  %v486_v46 = vld [vmem:[#allocation5 + $0xb90] sm:$0xff] }
 0x155   :  { %2120 = vmatprep.subr.bf16.mxu1 %v2119_v0  ;;  %v2139_v0 = vpack.c.bf16 %v459_v56, %v455_v38  ;;  %v491_v42 = vld [vmem:[#allocation5 + $0xbb8] sm:$0xff]  ;;  %v490_v52 = vld [vmem:[#allocation5 + $0xbb0] sm:$0xff] }
 0x156   :  { %2246 = vmatpush1.bf16.msra.mxu0 %v2245_v5  ;;  %v2265_v5 = vpack.c.bf16 %v1304_v63, %v1302_v62  ;;  %v1320_v50 = vld [vmem:[#allocation8 + $0x1b0] sm:$0xff]  ;;  %v1325_v54 = vld [vmem:[#allocation8 + $0x1d8] sm:$0xff] }
 0x157   :  { %2248 = vmatprep.subr.bf16.mxu0 %v2247_v8  ;;  %v2267_v8 = vpack.c.bf16 %v1309_v3, %v1307_v2  ;;  %v495_v38 = vld [vmem:[#allocation5 + $0xbd8] sm:$0xff]  ;;  %v494_v62 = vld [vmem:[#allocation5 + $0xbd0] sm:$0xff] }
 0x158   :  { %2122 = vmatpush1.bf16.msra.mxu1 %v2121_v6  ;;  %v2141_v6 = vpack.c.bf16 %v458_v1, %v454_v59  ;;  %v499_v56 = vld [vmem:[#allocation5 + $0xbf8] sm:$0xff]  ;;  %v2283_v59 = vpack.c.bf16 %v1325_v54, %v1323_v53  ;;  %v498_v63 = vld [vmem:[#allocation5 + $0xbf0] sm:$0xff]  ;;  %v1326_v54 = vld [vmem:[#allocation8 + $0x1e0] sm:$0xff] }
 0x159   :  { %2124 = vmatprep.subr.bf16.mxu1 %v2123_v12  ;;  %v2143_v12 = vpack.c.bf16 %v467_v33, %v463_v4  ;;  %v507_v1 = vld [vmem:[#allocation5 + $0xc38] sm:$0xff]  ;;  %v2161_v2 = vpack.c.bf16 %v498_v63, %v494_v62  ;;  %v502_v4 = vld [vmem:[#allocation5 + $0xc10] sm:$0xff] }
 0x15a   :  { %2250 = vmatpush1.bf16.msra.mxu0 %v2249_v17  ;;  %v2269_v17 = vpack.c.bf16 %v1308_v10, %v1306_v9  ;;  %v506_v33 = vld [vmem:[#allocation5 + $0xc30] sm:$0xff]  ;;  %v571_v62 = vld [vmem:[#allocation5 + $0xe38] sm:$0xff] }
 0x15b   :  { %2252 = vmatprep.subr.bf16.mxu0 %v2251_v20  ;;  %v2271_v20 = vpack.c.bf16 %v1313_v15, %v1311_v14  ;;  %v510_v9 = vld [vmem:[#allocation5 + $0xc50] sm:$0xff] }
 0x15c   :  { %2126 = vmatpush1.bf16.msra.mxu1 %v2125_v18  ;;  %v2145_v18 = vpack.c.bf16 %v466_v13, %v462_v7  ;;  %v2165_v7 = vpack.c.bf16 %v506_v33, %v502_v4  ;;  %v514_v10 = vld [vmem:[#allocation5 + $0xc70] sm:$0xff]  ;;  %v523_v13 = vld [vmem:[#allocation5 + $0xcb8] sm:$0xff] }
 0x15d   :  { %2128 = vmatprep.subr.bf16.mxu1 %v2127_v34  ;;  %v2147_v34 = vpack.c.bf16 %v475_v16, %v471_v25  ;;  %v2169_v14 = vpack.c.bf16 %v514_v10, %v510_v9  ;;  %v518_v25 = vld [vmem:[#allocation5 + $0xc90] sm:$0xff]  ;;  %v579_v4 = vld [vmem:[#allocation5 + $0xe78] sm:$0xff] }
 0x15e   :  { %2254 = vmatpush1.bf16.msra.mxu0 %v2253_v29  ;;  %v2273_v29 = vpack.c.bf16 %v1312_v22, %v1310_v21  ;;  %v522_v16 = vld [vmem:[#allocation5 + $0xcb0] sm:$0xff] }
 0x15f   :  { %2256 = vmatprep.subr.bf16.mxu0 %v2255_v31  ;;  %v2275_v31 = vpack.c.bf16 %v1317_v26, %v1315_v24  ;;  %v526_v21 = vld [vmem:[#allocation5 + $0xcd0] sm:$0xff] }
 0x160   :  { %2130 = vmatpush1.bf16.msra.mxu1 %v2129_v30  ;;  %v2149_v30 = vpack.c.bf16 %v474_v23, %v470_v19  ;;  %v2173_v19 = vpack.c.bf16 %v522_v16, %v518_v25  ;;  %v530_v22 = vld [vmem:[#allocation5 + $0xcf0] sm:$0xff]  ;;  %v539_v23 = vld [vmem:[#allocation5 + $0xd38] sm:$0xff] }
 0x161   :  { %2132 = vmatprep.subr.bf16.mxu1 %v2131_v48  ;;  %v2151_v48 = vpack.c.bf16 %v483_v28, %v479_v27  ;;  %v534_v26 = vld [vmem:[#allocation5 + $0xd10] sm:$0xff]  ;;  %v543_v27 = vld [vmem:[#allocation5 + $0xd58] sm:$0xff] }
 0x162   :  { %2258 = vmatpush1.bf16.msra.mxu0 %v2257_v43  ;;  %v2277_v43 = vpack.c.bf16 %v1316_v35, %v1314_v32  ;;  %v547_v28 = vld [vmem:[#allocation5 + $0xd78] sm:$0xff]  ;;  %v1331_v33 = vld [vmem:[#allocation8 + $0x208] sm:$0xff] }
 0x163   :  { %2260 = vmatprep.subr.bf16.mxu0 %v2259_v47  ;;  %v2279_v47 = vpack.c.bf16 %v1321_v39, %v1319_v37  ;;  %v551_v32 = vld [vmem:[#allocation5 + $0xd98] sm:$0xff]  ;;  %v574_v9 = vld [vmem:[#allocation5 + $0xe50] sm:$0xff] }
 0x164   :  { %2134 = vmatpush1.bf16.msra.mxu1 %v2133_v45  ;;  %v2153_v45 = vpack.c.bf16 %v482_v36, %v478_v41  ;;  %v542_v41 = vld [vmem:[#allocation5 + $0xd50] sm:$0xff]  ;;  %v555_v35 = vld [vmem:[#allocation5 + $0xdb8] sm:$0xff]  ;;  %v1322_v36 = vld [vmem:[#allocation8 + $0x1c0] sm:$0xff] }
 0x165   :  { %2136 = vmatprep.subr.bf16.mxu1 %v2135_v51  ;;  %v2155_v51 = vpack.c.bf16 %v491_v42, %v487_v40  ;;  %v1324_v37 = vld [vmem:[#allocation8 + $0x1d0] sm:$0xff]  ;;  %v2187_v39 = vpack.c.bf16 %v555_v35, %v551_v32 }
 0x166   :  { %2262 = vmatpush1.bf16.msra.mxu0 %v2261_v57  ;;  %v2281_v57 = vpack.c.bf16 %v1320_v50, %v1318_v49  ;;  %v550_v40 = vld [vmem:[#allocation5 + $0xd90] sm:$0xff]  ;;  %v615_v32 = vld [vmem:[#allocation5 + $0xf98] sm:$0xff] }
 0x167   :  { %2264 = vmatprep.subr.bf16.mxu0 %v2263_v60  ;;  %v2159_v60 = vpack.c.bf16 %v499_v56, %v495_v38  ;;  %v554_v42 = vld [vmem:[#allocation5 + $0xdb0] sm:$0xff]  ;;  %v619_v35 = vld [vmem:[#allocation5 + $0xfb8] sm:$0xff] }
 0x168   :  { %2138 = vmatpush1.bf16.msra.mxu1 %v2137_v58  ;;  %v2157_v58 = vpack.c.bf16 %v490_v52, %v486_v46  ;;  %v559_v46 = vld [vmem:[#allocation5 + $0xdd8] sm:$0xff]  ;;  %v1327_v50 = vld [vmem:[#allocation8 + $0x1e8] sm:$0xff]  ;;  %v2189_v52 = vpack.c.bf16 %v554_v42, %v550_v40 }
 0x169   :  { %2140 = vmatprep.subr.bf16.mxu1 %v2139_v0  ;;  %v503_v0 = vld [vmem:[#allocation5 + $0xc18] sm:$0xff]  ;;  %v578_v10 = vld [vmem:[#allocation5 + $0xe70] sm:$0xff] }
 0x16a   :  { %2266 = vmatpush1.bf16.msra.mxu0 %v2265_v5  ;;  %v2163_v3 = vpack.c.bf16 %v507_v1, %v503_v0  ;;  %v511_v5 = vld [vmem:[#allocation5 + $0xc58] sm:$0xff]  ;;  %v566_v1 = vld [vmem:[#allocation5 + $0xe10] sm:$0xff] }
 0x16b   :  { %2268 = vmatprep.subr.bf16.mxu0 %v2267_v8  ;;  %v1328_v38 = vld [vmem:[#allocation8 + $0x1f0] sm:$0xff] }
 0x16c   :  { %2142 = vmatpush1.bf16.msra.mxu1 %v2141_v6  ;;  %v515_v6 = vld [vmem:[#allocation5 + $0xc78] sm:$0xff]  ;;  %v582_v25 = vld [vmem:[#allocation5 + $0xe90] sm:$0xff] }
 0x16d   :  { %2144 = vmatprep.subr.bf16.mxu1 %v2143_v12  ;;  %v2167_v8 = vpack.c.bf16 %v515_v6, %v511_v5  ;;  %v519_v12 = vld [vmem:[#allocation5 + $0xc98] sm:$0xff]  ;;  %v586_v16 = vld [vmem:[#allocation5 + $0xeb0] sm:$0xff] }
 0x16e   :  { %2270 = vmatpush1.bf16.msra.mxu0 %v2269_v17  ;;  %v2171_v15 = vpack.c.bf16 %v523_v13, %v519_v12  ;;  %v527_v17 = vld [vmem:[#allocation5 + $0xcd8] sm:$0xff] }
 0x16f   :  { %2272 = vmatprep.subr.bf16.mxu0 %v2271_v20  ;;  %v1333_v5 = vld [vmem:[#allocation8 + $0x218] sm:$0xff] }
 0x170   :  { %2146 = vmatpush1.bf16.msra.mxu1 %v2145_v18  ;;  %v531_v18 = vld [vmem:[#allocation5 + $0xcf8] sm:$0xff]  ;;  %v2291_v6 = vpack.c.bf16 %v1333_v5, %v1331_v33  ;;  %v1334_v33 = vld [vmem:[#allocation8 + $0x220] sm:$0xff] }
 0x171   :  { %2148 = vmatprep.subr.bf16.mxu1 %v2147_v34  ;;  %v2175_v20 = vpack.c.bf16 %v531_v18, %v527_v17  ;;  %v535_v34 = vld [vmem:[#allocation5 + $0xd18] sm:$0xff] }
 0x172   :  { %2274 = vmatpush1.bf16.msra.mxu0 %v2273_v29  ;;  %v2179_v24 = vpack.c.bf16 %v539_v23, %v535_v34  ;;  %v583_v12 = vld [vmem:[#allocation5 + $0xe98] sm:$0xff] }
 0x173   :  { %2276 = vmatprep.subr.bf16.mxu0 %v2275_v31  ;;  %v546_v31 = vld [vmem:[#allocation5 + $0xd70] sm:$0xff]  ;;  %v587_v13 = vld [vmem:[#allocation5 + $0xeb8] sm:$0xff] }
 0x174   :  { %2150 = vmatpush1.bf16.msra.mxu1 %v2149_v30  ;;  %v2183_v30 = vpack.c.bf16 %v547_v28, %v543_v27  ;;  %v591_v17 = vld [vmem:[#allocation5 + $0xed8] sm:$0xff] }
 0x175   :  { %2152 = vmatprep.subr.bf16.mxu1 %v2151_v48  ;;  %v2185_v48 = vpack.c.bf16 %v546_v31, %v542_v41  ;;  %v595_v18 = vld [vmem:[#allocation5 + $0xef8] sm:$0xff]  ;;  %v606_v41 = vld [vmem:[#allocation5 + $0xf50] sm:$0xff] }
 0x176   :  { %2278 = vmatpush1.bf16.msra.mxu0 %v2277_v43  ;;  %v2285_v43 = vpack.c.bf16 %v1324_v37, %v1322_v36  ;;  %v599_v34 = vld [vmem:[#allocation5 + $0xf18] sm:$0xff]  ;;  %v610_v31 = vld [vmem:[#allocation5 + $0xf70] sm:$0xff]  ;;  %v2219_v36 = vpack.c.bf16 %v619_v35, %v615_v32  ;;  %v1342_v32 = vld [vmem:[#allocation8 + $0x260] sm:$0xff] }
 0x177   :  { %2280 = vmatprep.subr.bf16.mxu0 %v2279_v47  ;;  %v563_v47 = vld [vmem:[#allocation5 + $0xdf8] sm:$0xff]  ;;  %v614_v37 = vld [vmem:[#allocation5 + $0xf90] sm:$0xff] }
 0x178   :  { %2154 = vmatpush1.bf16.msra.mxu1 %v2153_v45  ;;  %v2191_v56 = vpack.c.bf16 %v563_v47, %v559_v46  ;;  %v603_v23 = vld [vmem:[#allocation5 + $0xf38] sm:$0xff]  ;;  %v622_v47 = vld [vmem:[#allocation5 + $0xfd0] sm:$0xff] }
 0x179   :  { %2156 = vmatprep.subr.bf16.mxu1 %v2155_v51  ;;  %v1329_v51 = vld [vmem:[#allocation8 + $0x1f8] sm:$0xff]  ;;  %v1344_v35 = vld [vmem:[#allocation8 + $0x270] sm:$0xff] }
 0x17a   :  { %2282 = vmatpush1.bf16.msra.mxu0 %v2281_v57  ;;  %v2287_v53 = vpack.c.bf16 %v1329_v51, %v1327_v50  ;;  %v558_v57 = vld [vmem:[#allocation5 + $0xdd0] sm:$0xff]  ;;  %v607_v27 = vld [vmem:[#allocation5 + $0xf58] sm:$0xff] }
 0x17b   :  { %2284 = vmatprep.subr.bf16.mxu0 %v2283_v59  ;;  %v2289_v59 = vpack.c.bf16 %v1328_v38, %v1326_v54  ;;  %v611_v28 = vld [vmem:[#allocation5 + $0xf78] sm:$0xff]  ;;  %v626_v50 = vld [vmem:[#allocation5 + $0xff0] sm:$0xff]  ;;  %v636_v54 = vsub.s32 1, %v2749_v61 }
 0x17c   :  { %2158 = vmatpush1.bf16.msra.mxu1 %v2157_v58  ;;  %v562_v58 = vld [vmem:[#allocation5 + $0xdf0] sm:$0xff]  ;;  %v623_v40 = vld [vmem:[#allocation5 + $0xfd8] sm:$0xff]  ;;  %v2225_v51 = vpack.c.bf16 %v626_v50, %v622_v47 }
 0x17d   :  { %2160 = vmatprep.subr.bf16.mxu1 %v2159_v60  ;;  %v567_v60 = vld [vmem:[#allocation5 + $0xe18] sm:$0xff]  ;;  %v2193_v63 = vpack.c.bf16 %v562_v58, %v558_v57  ;;  %v1575_v47 = vld [vmem:[#allocation11 + $0xc8] sm:$0xff] }
 0x17e   :  { %2286 = vmatpush1.bf16.msra.mxu0 %v2285_v43  ;;  %v2195_v0 = vpack.c.bf16 %v571_v62, %v567_v60  ;;  %v627_v42 = vld [vmem:[#allocation5 + $0xff8] sm:$0xff]  ;;  %v1330_v62 = vld [vmem:[#allocation8 + $0x200] sm:$0xff] }
 0x17f   :  { %2288 = vmatprep.subr.bf16.mxu0 %v2287_v53  ;;  %v2223_v46 = vpack.c.bf16 %v627_v42, %v623_v40  ;;  %v2808_v53 = vld [vmem:[#allocation7] sm:$0xf]  ;;  %v1556_v40 = vld [vmem:[#allocation11 + $0x30] sm:$0xff] }
 0x180   :  { %2162 = vmatpush1.bf16.msra.mxu1 %v2161_v2  ;;  %v570_v2 = vld [vmem:[#allocation5 + $0xe30] sm:$0xff]  ;;  %v1557_v42 = vld [vmem:[#allocation11 + $0x38] sm:$0xff] }
 0x181   :  { %2164 = vmatprep.subr.bf16.mxu1 %v2163_v3  ;;  %v575_v3 = vld [vmem:[#allocation5 + $0xe58] sm:$0xff] }
 0x182   :  { %2290 = vmatpush1.bf16.msra.mxu0 %v2289_v59 }
 0x183   :  { %1185 = vmatmul.mubr.f32.vlgmr.msra.gmra.mrb[2].mxu1 %v2777_v44  ;;  %v2177_v44 = vpack.c.bf16 %v530_v22, %v526_v21  ;;  %2292 = vmatprep.subr.bf16.mxu0 %v2291_v6  ;;  %v590_v21 = vld [vmem:[#allocation5 + $0xed0] sm:$0xff] }
 0x184   :  { %2166 = vmatpush1.bf16.msra.mxu1 %v2165_v7  ;;  %1255 = vmatprep.mubr.f32.mxu1 %v2791_v11  ;;  %v538_v11 = vld [vmem:[#allocation5 + $0xd30] sm:$0xff]  ;;  %v2197_v7 = vpack.c.bf16 %v570_v2, %v566_v1  ;;  %v1337_v2 = vld [vmem:[#allocation8 + $0x238] sm:$0xff] }
 0x185   :  { %2168 = vmatprep.subr.bf16.mxu1 %v2167_v8  ;;  %v2181_v29 = vpack.c.bf16 %v538_v11, %v534_v26  ;;  %v2199_v8 = vpack.c.bf16 %v579_v4, %v575_v3  ;;  %v594_v22 = vld [vmem:[#allocation5 + $0xef0] sm:$0xff] }
 0x186   :  { %v598_v26 = vld [vmem:[#allocation5 + $0xf10] sm:$0xff] }
 0x187   :  { %v602_v11 = vld [vmem:[#allocation5 + $0xf30] sm:$0xff] }
 0x188   :  { %2170 = vmatpush1.bf16.msra.mxu1 %v2169_v14  ;;  %v2201_v14 = vpack.c.bf16 %v578_v10, %v574_v9  ;;  %v1335_v1 = vld [vmem:[#allocation8 + $0x228] sm:$0xff]  ;;  %v1341_v9 = vld [vmem:[#allocation8 + $0x258] sm:$0xff] }
 0x189   :  { %2172 = vmatprep.subr.bf16.mxu1 %v2171_v15  ;;  %v2203_v15 = vpack.c.bf16 %v587_v13, %v583_v12  ;;  %v2295_v6 = vpack.c.bf16 %v1337_v2, %v1335_v1  ;;  %v1567_v10 = vld [vmem:[#allocation11 + $0x88] sm:$0xff]  ;;  %v1350_v2 = vld [vmem:[#allocation8 + $0x2a0] sm:$0xff] }
 0x18a   :  { %v1551_v13 = vld [vmem:[#allocation11 + $0x8] sm:$0xff] }
 0x18c   :  { %2174 = vmatpush1.bf16.msra.mxu1 %v2173_v19  ;;  %v2205_v19 = vpack.c.bf16 %v586_v16, %v582_v25 }
 0x18d   :  { %2176 = vmatprep.subr.bf16.mxu1 %v2175_v20  ;;  %v2207_v20 = vpack.c.bf16 %v595_v18, %v591_v17  ;;  %v1552_v18 = vld [vmem:[#allocation11 + $0x10] sm:$0xff] }
 0x190   :  { %2178 = vmatpush1.bf16.msra.mxu1 %v2177_v44  ;;  %v2209_v44 = vpack.c.bf16 %v594_v22, %v590_v21  ;;  %v1338_v22 = vld [vmem:[#allocation8 + $0x240] sm:$0xff] }
 0x191   :  { %2180 = vmatprep.subr.bf16.mxu1 %v2179_v24  ;;  %v2211_v24 = vpack.c.bf16 %v603_v23, %v599_v34  ;;  %v1340_v34 = vld [vmem:[#allocation8 + $0x250] sm:$0xff] }
 0x192   :  { %v1571_v23 = vld [vmem:[#allocation11 + $0xa8] sm:$0xff] }
 0x194   :  { %2182 = vmatpush1.bf16.msra.mxu1 %v2181_v29  ;;  %v2213_v29 = vpack.c.bf16 %v602_v11, %v598_v26 }
 0x195   :  { %2184 = vmatprep.subr.bf16.mxu1 %v2183_v30  ;;  %v2215_v30 = vpack.c.bf16 %v611_v28, %v607_v27  ;;  %v1554_v27 = vld [vmem:[#allocation11 + $0x20] sm:$0xff]  ;;  %v1555_v28 = vld [vmem:[#allocation11 + $0x28] sm:$0xff] }
 0x196   :  { %v2802_v45 = vpop.f32.mrb[0].mxu1 }
 0x197   :  { %v2804_v49 = vpop.f32.mrb[1].mxu1 }
 0x198   :  { %2186 = vmatpush1.bf16.msra.mxu1 %v2185_v48  ;;  %v2217_v48 = vpack.c.bf16 %v610_v31, %v606_v41  ;;  %v1573_v41 = vld [vmem:[#allocation11 + $0xb8] sm:$0xff] }
 0x199   :  { %2188 = vmatprep.subr.bf16.mxu1 %v2187_v39  ;;  %v618_v39 = vld [vmem:[#allocation5 + $0xfb0] sm:$0xff] }
 0x19a   :  { %v2221_v43 = vpack.c.bf16 %v618_v39, %v614_v37  ;;  %v2365_v37 = vpack.c.bf16 %v1555_v28, %v1554_v27 }
 0x19c   :  { %2190 = vmatpush1.bf16.msra.mxu1 %v2189_v52  ;;  %v632_v52 = vsub.s32 0, %v2749_v61 }
 0x19d   :  { %2192 = vmatprep.subr.bf16.mxu1 %v2191_v56  ;;  %v637_v56 = vrot.slane %v2808_v53, %v636_v54 }
 0x19e   :  { %v633_v38 = vrot.slane %v2808_v53, %v632_v52 }
 0x19f   :  { %v763_v58 = vadd.f32 %v2804_v49, %v637_v56  ;;  %v1550_v49 = vld [vmem:[#allocation11] sm:$0xff] }
 0x1a0   :  { %2194 = vmatpush1.bf16.msra.mxu1 %v2193_v63  ;;  %v761_v57 = vadd.f32 %v2802_v45, %v633_v38  ;;  %v1332_v63 = vld [vmem:[#allocation8 + $0x210] sm:$0xff]  ;;  %v1566_v45 = vld [vmem:[#allocation11 + $0x80] sm:$0xff]  ;;  %v2357_v16 = vpack.c.bf16 %v1551_v13, %v1550_v49 }
 0x1a1   :  { %2196 = vmatprep.subr.bf16.mxu1 %v2195_v0  ;;  %v2293_v4 = vpack.c.bf16 %v1332_v63, %v1330_v62  ;;  %v2355_v12 = vpack.c.bf16 %v1567_v10, %v1566_v45  ;;  %v1348_v38 = vld [vmem:[#allocation8 + $0x290] sm:$0xff]  ;;  %v1351_v56 = vld [vmem:[#allocation8 + $0x2a8] sm:$0xff] }
 0x1a2   :  { %v1576_v63 = vld [vmem:[#allocation11 + $0xd0] sm:$0xff]  ;;  %v1578_v45 = vld [vmem:[#allocation11 + $0xe0] sm:$0xff]  ;;  %v1579_v10 = vld [vmem:[#allocation11 + $0xe8] sm:$0xff] }
 0x1a3   :  { %v1356_v13 = vld [vmem:[#allocation8 + $0x2d0] sm:$0xff] }
 0x1a4   :  { %2198 = vmatpush1.bf16.msra.mxu1 %v2197_v7  ;;  %v1336_v7 = vld [vmem:[#allocation8 + $0x230] sm:$0xff] }
 0x1a5   :  { %2200 = vmatprep.subr.bf16.mxu1 %v2199_v8  ;;  %v1339_v8 = vld [vmem:[#allocation8 + $0x248] sm:$0xff]  ;;  %v2297_v25 = vpack.c.bf16 %v1336_v7, %v1334_v33  ;;  %v1357_v33 = vld [vmem:[#allocation8 + $0x2d8] sm:$0xff] }
 0x1a6   :  { %v2299_v21 = vpack.c.bf16 %v1341_v9, %v1339_v8  ;;  %v1560_v7 = vld [vmem:[#allocation11 + $0x50] sm:$0xff]  ;;  %v1561_v8 = vld [vmem:[#allocation11 + $0x58] sm:$0xff] }
 0x1a8   :  { %2202 = vmatpush1.bf16.msra.mxu1 %v2201_v14  ;;  %v1568_v14 = vld [vmem:[#allocation11 + $0x90] sm:$0xff] }
 0x1a9   :  { %2204 = vmatprep.subr.bf16.mxu1 %v2203_v15  ;;  %v1569_v15 = vld [vmem:[#allocation11 + $0x98] sm:$0xff] }
 0x1aa   :  { %v2359_v17 = vpack.c.bf16 %v1569_v15, %v1568_v14  ;;  %v1359_v14 = vld [vmem:[#allocation8 + $0x2e8] sm:$0xff]  ;;  %v1361_v15 = vld [vmem:[#allocation8 + $0x2f8] sm:$0xff] }
 0x1ac   :  { %2206 = vmatpush1.bf16.msra.mxu1 %v2205_v19  ;;  %v1553_v19 = vld [vmem:[#allocation11 + $0x18] sm:$0xff] }
 0x1ad   :  { %2208 = vmatprep.subr.bf16.mxu1 %v2207_v20  ;;  %v1570_v20 = vld [vmem:[#allocation11 + $0xa0] sm:$0xff]  ;;  %v2361_v26 = vpack.c.bf16 %v1553_v19, %v1552_v18  ;;  %v2319_v18 = vpack.c.bf16 %v1361_v15, %v1359_v14 }
 0x1ae   :  { %v2363_v11 = vpack.c.bf16 %v1571_v23, %v1570_v20  ;;  %v1358_v19 = vld [vmem:[#allocation8 + $0x2e0] sm:$0xff]  ;;  %v1360_v20 = vld [vmem:[#allocation8 + $0x2f0] sm:$0xff] }
 0x1b0   :  { %2210 = vmatpush1.bf16.msra.mxu1 %v2209_v44  ;;  %v1343_v44 = vld [vmem:[#allocation8 + $0x268] sm:$0xff] }
 0x1b1   :  { %2212 = vmatprep.subr.bf16.mxu1 %v2211_v24  ;;  %v1345_v24 = vld [vmem:[#allocation8 + $0x278] sm:$0xff] }
 0x1b2   :  { %v2303_v31 = vpack.c.bf16 %v1345_v24, %v1343_v44  ;;  %v1362_v44 = vld [vmem:[#allocation8 + $0x300] sm:$0xff]  ;;  %v1364_v24 = vld [vmem:[#allocation8 + $0x310] sm:$0xff] }
 0x1b3   :  { %v2325_v27 = vpack.c.bf16 %v1364_v24, %v1362_v44  ;;  %v1564_v24 = vld [vmem:[#allocation11 + $0x70] sm:$0xff] }
 0x1b4   :  { %2214 = vmatpush1.bf16.msra.mxu1 %v2213_v29  ;;  %v2301_v29 = vpack.c.bf16 %v1340_v34, %v1338_v22  ;;  %v1365_v22 = vld [vmem:[#allocation8 + $0x318] sm:$0xff]  ;;  %v2321_v34 = vpack.c.bf16 %v1360_v20, %v1358_v19  ;;  %v1562_v20 = vld [vmem:[#allocation11 + $0x60] sm:$0xff] }
 0x1b5   :  { %2216 = vmatprep.subr.bf16.mxu1 %v2215_v30  ;;  %v1572_v30 = vld [vmem:[#allocation11 + $0xb0] sm:$0xff] }
 0x1b6   :  { %v2367_v39 = vpack.c.bf16 %v1573_v41, %v1572_v30  ;;  %v1368_v30 = vld [vmem:[#allocation8 + $0x330] sm:$0xff]  ;;  %v1371_v41 = vld [vmem:[#allocation8 + $0x348] sm:$0xff] }
 0x1b8   :  { %2218 = vmatpush1.bf16.msra.mxu1 %v2217_v48  ;;  %v1347_v48 = vld [vmem:[#allocation8 + $0x288] sm:$0xff] }
 0x1b9   :  { %2220 = vmatprep.subr.bf16.mxu1 %v2219_v36  ;;  %v1349_v36 = vld [vmem:[#allocation8 + $0x298] sm:$0xff] }
 0x1ba   :  { %v2307_v50 = vpack.c.bf16 %v1349_v36, %v1347_v48  ;;  %v1370_v48 = vld [vmem:[#allocation8 + $0x340] sm:$0xff]  ;;  %v1372_v36 = vld [vmem:[#allocation8 + $0x350] sm:$0xff] }
 0x1bc   :  { %2222 = vmatpush1.bf16.msra.mxu1 %v2221_v43  ;;  %v2305_v43 = vpack.c.bf16 %v1344_v35, %v1342_v32 }
 0x1bd   :  { %2224 = vmatprep.subr.bf16.mxu1 %v2223_v46  ;;  %v1574_v46 = vld [vmem:[#allocation11 + $0xc0] sm:$0xff] }
 0x1c0   :  { %2226 = vmatpush1.bf16.msra.mxu1 %v2225_v51  ;;  %v1346_v51 = vld [vmem:[#allocation8 + $0x280] sm:$0xff] }
 0x1c1   :  { %2356 = vmatprep.subr.bf16.mxu1 %v2355_v12  ;;  %v2309_v62 = vpack.c.bf16 %v1348_v38, %v1346_v51  ;;  %v1354_v12 = vld [vmem:[#allocation8 + $0x2c0] sm:$0xff] }
 0x1c3   :  { %1256 = vmatmul.mubr.f32.vlgmr.msra.gmra.mrb[2].mxu1 %v2787_v55 }
 0x1c4   :  { %2358 = vmatpush3.bf16.msra.mxu1 %v2357_v16  ;;  %v2379_v16 = vpack.c.bf16 %v1579_v10, %v1578_v45  ;;  %v1392_v45 = vld [vmem:[#allocation8 + $0x3f0] sm:$0xff] }
 0x1c5   :  { %2360 = vmatprep.subr.bf16.mxu1 %v2359_v17  ;;  %v2317_v17 = vpack.c.bf16 %v1356_v13, %v1354_v12  ;;  %v644_v12 = vsub.s32 3, %v2749_v61 }
 0x1c7   :  { %v645_v14 = vrot.slane %v2808_v53, %v644_v12 }
 0x1c8   :  { %2362 = vmatpush3.bf16.msra.mxu1 %v2361_v26  ;;  %v1367_v26 = vld [vmem:[#allocation8 + $0x328] sm:$0xff] }
 0x1c9   :  { %2364 = vmatprep.subr.bf16.mxu1 %v2363_v11  ;;  %v1369_v11 = vld [vmem:[#allocation8 + $0x338] sm:$0xff] }
 0x1ca   :  { %v2327_v28 = vpack.c.bf16 %v1369_v11, %v1367_v26  ;;  %v1565_v26 = vld [vmem:[#allocation11 + $0x78] sm:$0xff] }
 0x1cb   :  { %v2385_v11 = vpack.c.bf16 %v1565_v26, %v1564_v24 }
 0x1cc   :  { %2366 = vmatpush3.bf16.msra.mxu1 %v2365_v37  ;;  %v1375_v37 = vld [vmem:[#allocation8 + $0x368] sm:$0xff] }
 0x1cd   :  { %2368 = vmatprep.subr.bf16.mxu1 %v2367_v39  ;;  %v1377_v39 = vld [vmem:[#allocation8 + $0x378] sm:$0xff] }
 0x218   :  { %v973_v59 = vpop.f32.mrb[0].mxu0 }
 0x219   :  { %v2388_v55 = vadd.f32 %v973_v59, %v761_v57  ;;  %v975_v60 = vpop.f32.mrb[1].mxu0  ;;  %v1353_v57 = vld [vmem:[#allocation8 + $0x2b8] sm:$0xff]  ;;  %v2371_v59 = vpack.c.bf16 %v1575_v47, %v1574_v46  ;;  %v1376_v46 = vld [vmem:[#allocation8 + $0x370] sm:$0xff]  ;;  %v1379_v47 = vld [vmem:[#allocation8 + $0x388] sm:$0xff] }
 0x21a   :  { %v2390_v0 = vadd.f32 %v975_v60, %v763_v58  ;;  %v2369_v58 = vpack.c.bf16 %v1557_v42, %v1556_v40  ;;  %v1559_v60 = vld [vmem:[#allocation11 + $0x48] sm:$0xff]  ;;  %v2311_v1 = vpack.c.bf16 %v1353_v57, %v1351_v56  ;;  %v2333_v40 = vpack.c.bf16 %v1372_v36, %v1370_v48  ;;  %v1378_v56 = vld [vmem:[#allocation8 + $0x380] sm:$0xff] }
 0x21b   :  { %v1262_v5 = vmax.f32 %v2388_v55, 0.0  ;;  %v1558_v55 = vld [vmem:[#allocation11 + $0x40] sm:$0xff]  ;;  %v2335_v42 = vpack.c.bf16 %v1377_v39, %v1375_v37  ;;  %v1380_v57 = vld [vmem:[#allocation8 + $0x390] sm:$0xff] }
 0x21c   :  { %v1263_v3 = vmax.f32 %v2390_v0, 0.0  ;;  %v1577_v0 = vld [vmem:[#allocation11 + $0xd8] sm:$0xff]  ;;  %2370 = vmatpush3.bf16.msra.mxu1 %v2369_v58  ;;  %v1383_v58 = vld [vmem:[#allocation8 + $0x3a8] sm:$0xff]  ;;  %v1679_v36 = vld [vmem:[#allocation13] ss:$0 sm:$0xff] }
 0x21d   :  { %2372 = vmatprep.subr.bf16.mxu1 %v2371_v59  ;;  %v1385_v59 = vld [vmem:[#allocation8 + $0x3b8] sm:$0xff] }
 0x21e   :  { %1470 = vmatprep.mubr.f32.mxu0 %v1263_v3  ;;  %v1352_v3 = vld [vmem:[#allocation8 + $0x2b0] sm:$0xff] }
 0x21f   :  { %1471 = vmatmul.mubr.f32.vlgmr.msra.gmra.mrb[2].mxu0 %v1262_v5  ;;  %v2373_v5 = vpack.c.bf16 %v1559_v60, %v1558_v55  ;;  %v2313_v9 = vpack.c.bf16 %v1352_v3, %v1350_v2  ;;  %v2341_v55 = vpack.c.bf16 %v1380_v57, %v1378_v56  ;;  %v2343_v60 = vpack.c.bf16 %v1385_v59, %v1383_v58 }
 0x220   :  { %2294 = vmatpush1.bf16.msra.mxu0 %v2293_v4  ;;  %v1355_v4 = vld [vmem:[#allocation8 + $0x2c8] sm:$0xff] }
 0x221   :  { %2296 = vmatprep.subr.bf16.mxu0 %v2295_v6  ;;  %v2375_v6 = vpack.c.bf16 %v1577_v0, %v1576_v63  ;;  %v2315_v49 = vpack.c.bf16 %v1357_v33, %v1355_v4  ;;  %2374 = vmatpush3.bf16.msra.mxu1 %v2373_v5  ;;  %v1384_v63 = vld [vmem:[#allocation8 + $0x3b0] sm:$0xff]  ;;  %v1387_v0 = vld [vmem:[#allocation8 + $0x3c8] sm:$0xff]  ;;  %v1386_v4 = vld [vmem:[#allocation8 + $0x3c0] sm:$0xff] }
 0x222   :  { %v1388_v33 = vld [vmem:[#allocation8 + $0x3d0] sm:$0xff]  ;;  %v1391_v5 = vld [vmem:[#allocation8 + $0x3e8] sm:$0xff] }
 0x223   :  { %2376 = vmatprep.subr.bf16.mxu1 %v2375_v6  ;;  %v1393_v6 = vld [vmem:[#allocation8 + $0x3f8] sm:$0xff] }
 0x224   :  { %2298 = vmatpush1.bf16.msra.mxu0 %v2297_v25  ;;  %v2377_v25 = vpack.c.bf16 %v1561_v8, %v1560_v7  ;;  %v2349_v7 = vpack.c.bf16 %v1388_v33, %v1386_v4  ;;  %v2351_v8 = vpack.c.bf16 %v1393_v6, %v1391_v5 }
 0x225   :  { %2300 = vmatprep.subr.bf16.mxu0 %v2299_v21  ;;  %v1363_v21 = vld [vmem:[#allocation8 + $0x308] sm:$0xff] }
 0x226   :  { %2378 = vmatpush3.bf16.msra.mxu1 %v2377_v25  ;;  %v2323_v23 = vpack.c.bf16 %v1365_v22, %v1363_v21  ;;  %v1563_v21 = vld [vmem:[#allocation11 + $0x68] sm:$0xff] }
 0x227   :  { %2380 = vmatprep.subr.bf16.mxu1 %v2379_v16  ;;  %v2381_v22 = vpack.c.bf16 %v1563_v21, %v1562_v20 }
 0x228   :  { %2302 = vmatpush1.bf16.msra.mxu0 %v2301_v29  ;;  %v1366_v29 = vld [vmem:[#allocation8 + $0x320] sm:$0xff] }
 0x229   :  { %2304 = vmatprep.subr.bf16.mxu0 %v2303_v31  ;;  %v1373_v31 = vld [vmem:[#allocation8 + $0x358] sm:$0xff]  ;;  %v2329_v32 = vpack.c.bf16 %v1368_v30, %v1366_v29 }
 0x22a   :  { %v2331_v35 = vpack.c.bf16 %v1373_v31, %v1371_v41  ;;  %2382 = vmatpush3.bf16.msra.mxu1 %v2381_v22 }
 0x22c   :  { %2306 = vmatpush1.bf16.msra.mxu0 %v2305_v43  ;;  %v1374_v43 = vld [vmem:[#allocation8 + $0x360] sm:$0xff] }
 0x22d   :  { %2308 = vmatprep.subr.bf16.mxu0 %v2307_v50  ;;  %v1381_v50 = vld [vmem:[#allocation8 + $0x398] sm:$0xff]  ;;  %v2337_v51 = vpack.c.bf16 %v1376_v46, %v1374_v43 }
 0x22e   :  { %v2339_v38 = vpack.c.bf16 %v1381_v50, %v1379_v47 }
 0x230   :  { %2310 = vmatpush1.bf16.msra.mxu0 %v2309_v62  ;;  %v1382_v62 = vld [vmem:[#allocation8 + $0x3a0] sm:$0xff] }
 0x231   :  { %2312 = vmatprep.subr.bf16.mxu0 %v2311_v1  ;;  %v1389_v1 = vld [vmem:[#allocation8 + $0x3d8] sm:$0xff]  ;;  %v2345_v2 = vpack.c.bf16 %v1384_v63, %v1382_v62 }
 0x232   :  { %v2347_v3 = vpack.c.bf16 %v1389_v1, %v1387_v0 }
 0x234   :  { %2314 = vmatpush1.bf16.msra.mxu0 %v2313_v9  ;;  %v1390_v9 = vld [vmem:[#allocation8 + $0x3e0] sm:$0xff] }
 0x235   :  { %2316 = vmatprep.subr.bf16.mxu0 %v2315_v49  ;;  %v2353_v10 = vpack.c.bf16 %v1392_v45, %v1390_v9  ;;  %v640_v49 = vsub.s32 2, %v2749_v61 }
 0x237   :  { %v641_v13 = vrot.slane %v2808_v53, %v640_v49  ;;  %v1394_v53 = vld [vmem:[#allocation10] sm:$0x3] }
 0x238   :  { %2318 = vmatpush1.bf16.msra.mxu0 %v2317_v17 }
 0x239   :  { %2320 = vmatprep.subr.bf16.mxu0 %v2319_v18 }
 0x23c   :  { %2322 = vmatpush1.bf16.msra.mxu0 %v2321_v34  ;;  %v1580_v34 = vld [vmem:[#allocation11 + $0xf0] sm:$0xff] }
 0x23d   :  { %2324 = vmatprep.subr.bf16.mxu0 %v2323_v23  ;;  %v1581_v23 = vld [vmem:[#allocation11 + $0xf8] sm:$0xff] }
 0x23e   :  { %v2383_v44 = vpack.c.bf16 %v1581_v23, %v1580_v34 }
 0x240   :  { %2326 = vmatpush1.bf16.msra.mxu0 %v2325_v27  ;;  %2384 = vmatprep.subr.bf16.mxu1 %v2383_v44  ;;  %v1399_v27 = vrot.slane %v1394_v53, %v632_v52 }
 0x241   :  { %2328 = vmatprep.subr.bf16.mxu0 %v2327_v28  ;;  %2386 = vmatpush3.bf16.msra.mxu1 %v2385_v11  ;;  %v1403_v28 = vrot.slane %v1394_v53, %v636_v54 }
 0x244   :  { %2330 = vmatpush1.bf16.msra.mxu0 %v2329_v32 }
 0x245   :  { %2332 = vmatprep.subr.bf16.mxu0 %v2331_v35 }
 0x248   :  { %2334 = vmatpush1.bf16.msra.mxu0 %v2333_v40 }
 0x249   :  { %2336 = vmatprep.subr.bf16.mxu0 %v2335_v42 }
 0x24c   :  { %2338 = vmatpush1.bf16.msra.mxu0 %v2337_v51 }
 0x24d   :  { %2340 = vmatprep.subr.bf16.mxu0 %v2339_v38 }
 0x250   :  { %2342 = vmatpush1.bf16.msra.mxu0 %v2341_v55 }
 0x251   :  { %2344 = vmatprep.subr.bf16.mxu0 %v2343_v60 }
 0x254   :  { %2346 = vmatpush1.bf16.msra.mxu0 %v2345_v2 }
 0x255   :  { %2348 = vmatprep.subr.bf16.mxu0 %v2347_v3 }
 0x258   :  { %2350 = vmatpush1.bf16.msra.mxu0 %v2349_v7 }
 0x259   :  { %2352 = vmatprep.subr.bf16.mxu0 %v2351_v8 }
 0x25c   :  { %2354 = vmatpush1.bf16.msra.mxu0 %v2353_v10 }
 0x296   :  { %v1257_v15 = vpop.f32.mrb[2].mxu1 }
 0x297   :  { %v2391_v25 = vadd.f32 %v1257_v15, %v641_v13  ;;  %v1259_v16 = vpop.f32.mrb[3].mxu1 }
 0x298   :  { %v2392_v17 = vadd.f32 %v1259_v16, %v645_v14 }
 0x299   :  { %v1264_v19 = vmax.f32 %v2391_v25, 0.0 }
 0x29a   :  { %v1265_v18 = vmax.f32 %v2392_v17, 0.0 }
 0x29c   :  { %1541 = vmatprep.mubr.f32.mxu0 %v1265_v18 }
 0x29d   :  { %1542 = vmatmul.mubr.f32.vlgmr.msra.gmra.mrb[2].mxu0 %v1264_v19 }
 0x370   :  { %v1543_v29 = vpop.f32.mrb[2].mxu0 }
 0x371   :  { %v2393_v30 = vadd.f32 %v1543_v29, %v1399_v27  ;;  %v1545_v41 = vpop.f32.mrb[3].mxu0 }
 0x372   :  { %v2394_v31 = vadd.f32 %v1545_v41, %v1403_v28 }
 0x373   :  { %v1548_v35 = vmax.f32 %v2393_v30, 0.0 }
 0x374   :  { %v1549_v32 = vmax.f32 %v2394_v31, 0.0 }
 0x376   :  { %1653 = vmatprep.mubr.f32.mxu1 %v1549_v32 }
 0x377   :  { %1654 = vmatmul.mubr.f32.vlgmr.msra.gmra.mrb[4].mxu1 %v1548_v35 }
 0x44a   :  { %v1712_v48 = vpop.f32.mrb[4].mxu1 }
 0x44b   :  { %v1713_v37 = vpop.f32.mrb[5].mxu1 }
 0x44c   :  { %v1714_v39 = vadd.f32 %v1713_v37, %v1712_v48 }
 0x44e   :  { %v1656_v40 = vadd.f32 %v1714_v39, %v1679_v36 }
 0x450   :  { %1660 = vst.msk [vmem:[#allocation14] sm:$0x3] %vm1659_vm0, %v1656_v40 }
 0x451   :  { %2589 = shalt.err (!%p2586_p4)
}
 0x452   :  { %s2590_s15 = scalar_lea.hbm %s2846_s7, 32 }
 0x453   :  { %p2591_p5 = scmp.ne.s32.totalorder %s2846_s7, %s2590_s15  ;;  %p2594_p6 = scmp.lt.u32.totalorder %s2590_s15, %s2846_s7 }
 0x455   :  { %p2596_p7 = pnand %p2594_p6, %p2591_p5 }
 0x457   :  { %2599 = shalt.err (!%p2596_p7)
}
 0x458   :  { %1670 = dma.vmem_to_hbm [thread:$0]  %s1668_s13, 32, %s2846_s7, [#allocation4]  }
 0x459   :  { %2608 = dma.done.wait [#allocation4], 32  }
 0x45a   :  { %2609 = vsyncadd [#allocation4], 4294967264 }
 0x45b   :  { %1674 = vsyncpa [#allocation3], 1 }
 0x45c   :  { %1675 = vsyncpa [#allocation6], 1 }
 0x45d   :  { %1676 = vsyncpa [#allocation9], 1 }
 0x45e   :  { %1677 = vsyncpa [#allocation12], 1 }
 0x45f   :  { %1678 = vsyncpa [#allocation4], 1 }

// kernel: pointnet_encoder_forward.5
= control target key start
LH: loop header
LB: loop body
LE: loop exit
PB: predicated region body
PF: predicated region fallthrough
CT: control target
= control target key end

     0   :  { %12 = vsyncpa [#allocation3], 0  ;;  %s2839_s0 = inlined_call_operand.hbm [shape: f32[2,1024], index: 0, kind: input, shape index: {}]   ;;  %s2840_s1 = inlined_call_operand.hbm [shape: f32[1024,512], index: 1, kind: input, shape index: {}]   ;;  %s2841_s2 = inlined_call_operand.hbm [shape: f32[1,512], index: 2, kind: input, shape index: {}]   ;;  %s2842_s3 = inlined_call_operand.hbm [shape: f32[512,256], index: 3, kind: input, shape index: {}]   ;;  %s2843_s4 = inlined_call_operand.hbm [shape: f32[1,256], index: 4, kind: input, shape index: {}]   ;;  %s2844_s5 = inlined_call_operand.hbm [shape: f32[256,9], index: 5, kind: input, shape index: {}]   ;;  %s2845_s6 = inlined_call_operand.hbm [shape: f32[1,9], index: 6, kind: input, shape index: {}]   ;;  %s2846_s7 = inlined_call_operand.hbm [shape: f32[2,9], index: 7, kind: output, shape index: {}]  }
   0x1   :  { %13 = vsyncpa [#allocation6], 0 }
   0x2   :  { %14 = vsyncpa [#allocation9], 0 }
   0x3   :  { %15 = vsyncpa [#allocation12], 0 }
   0x4   :  { %16 = vsyncpa [#allocation4], 0  ;;  %s2610_s24 = smov [#allocation5]   ;;  %s2424_s28 = scalar_lea.hbm %s2840_s1, 65536 }
   0x5   :  { %s32_s25 = sshll.u32 %s2610_s24, 4  ;;  %p2425_p0 = scmp.ne.s32.totalorder %s2840_s1, %s2424_s28  ;;  %s33_s25 = int_to_ptr.vmem [resolvable:$true] %s32_s25 }
   0x6   :  { %p2428_p1 = scmp.lt.u32.totalorder %s2424_s28, %s2840_s1 }
   0x8   :  { %p2430_p2 = pnand %p2428_p1, %p2425_p0 }
   0xa   :  { %2433 = shalt.err (!%p2430_p2)
}
   0xb   :  { %s2434_s10 = scalar_lea.vmem %s33_s25, 65536  ;;  %p2439_p4 = scmp.lt.s32.totalorder %s33_s25, %s33_s25 }
   0xc   :  { %p2435_p3 = scmp.ne.s32.totalorder %s33_s25, %s2434_s10  ;;  %p2440_p5 = scmp.lt.s32.totalorder %s2434_s10, %s2434_s10 }
   0xe   :  { %p2441_p6 = por %p2440_p5, %p2439_p4 }
  0x10   :  { %p2442_p7 = pnand %p2441_p6, %p2435_p3 }
  0x12   :  { %2445 = shalt.err (!%p2442_p7)
}
  0x13   :  { %s2611_s11 = smov 512   ;;  %s2612_s12 = smov 32  }
  0x14   :  { %38 = dma.hbm_to_vmem [thread:$0]  %s2840_s1, 65536, %s33_s25, [#allocation6], %s2611_s11, %s2611_s11, %s2612_s12  }
  0x15   :  { %s2613_s15 = smov [#allocation8]   ;;  %s2446_s19 = scalar_lea.hbm %s2842_s3, 16384 }
  0x16   :  { %s54_s16 = sshll.u32 %s2613_s15, 4  ;;  %p2447_p8 = scmp.ne.s32.totalorder %s2842_s3, %s2446_s19  ;;  %s55_s16 = int_to_ptr.vmem [resolvable:$true] %s54_s16 }
  0x17   :  { %p2450_p9 = scmp.lt.u32.totalorder %s2446_s19, %s2842_s3 }
  0x19   :  { %p2452_p10 = pnand %p2450_p9, %p2447_p8 }
  0x1b   :  { %2455 = shalt.err (!%p2452_p10)
}
  0x1c   :  { %s2456_s24 = scalar_lea.vmem %s55_s16, 16384  ;;  %p2461_p12 = scmp.lt.s32.totalorder %s55_s16, %s55_s16 }
  0x1d   :  { %p2457_p11 = scmp.ne.s32.totalorder %s55_s16, %s2456_s24  ;;  %p2462_p13 = scmp.lt.s32.totalorder %s2456_s24, %s2456_s24 }
  0x1f   :  { %p2463_p0 = por %p2462_p13, %p2461_p12 }
  0x21   :  { %p2464_p1 = pnand %p2463_p0, %p2457_p11 }
  0x23   :  { %2467 = shalt.err (!%p2464_p1)
}
  0x24   :  { %s2614_s1 = smov 256   ;;  %s2615_s25 = smov 16  }
  0x25   :  { %60 = dma.hbm_to_vmem [thread:$0]  %s2842_s3, 16384, %s55_s16, [#allocation9], %s2614_s1, %s2614_s1, %s2615_s25  }
  0x26   :  { %s2616_s28 = smov [#allocation11]   ;;  %s2468_s9 = scalar_lea.hbm %s2844_s5, 4096 }
  0x27   :  { %s76_s29 = sshll.u32 %s2616_s28, 4  ;;  %p2469_p2 = scmp.ne.s32.totalorder %s2844_s5, %s2468_s9  ;;  %s77_s29 = int_to_ptr.vmem [resolvable:$true] %s76_s29 }
  0x28   :  { %p2472_p3 = scmp.lt.u32.totalorder %s2468_s9, %s2844_s5 }
  0x2a   :  { %p2474_p4 = pnand %p2472_p3, %p2469_p2 }
  0x2c   :  { %2477 = shalt.err (!%p2474_p4)
}
  0x2d   :  { %s2478_s14 = scalar_lea.vmem %s77_s29, 4096  ;;  %p2483_p6 = scmp.lt.s32.totalorder %s77_s29, %s77_s29 }
  0x2e   :  { %p2479_p5 = scmp.ne.s32.totalorder %s77_s29, %s2478_s14  ;;  %p2484_p7 = scmp.lt.s32.totalorder %s2478_s14, %s2478_s14 }
  0x30   :  { %p2485_p8 = por %p2484_p7, %p2483_p6 }
  0x32   :  { %p2486_p9 = pnand %p2485_p8, %p2479_p5 }
  0x34   :  { %2489 = shalt.err (!%p2486_p9)
}
  0x35   :  { %s2617_s3 = smov 128   ;;  %s2618_s15 = smov 8  }
  0x36   :  { %82 = dma.hbm_to_vmem [thread:$0]  %s2844_s5, 4096, %s77_s29, [#allocation12], %s2617_s3, %s2617_s3, %s2618_s15  }
  0x37   :  { %s2619_s18 = smov [#allocation2]   ;;  %s2620_s20 = smov [#allocation7]  }
  0x38   :  { %s23_s19 = sshll.u32 %s2619_s18, 4  ;;  %s45_s21 = sshll.u32 %s2620_s20, 4  ;;  %s24_s19 = int_to_ptr.vmem [resolvable:$true] %s23_s19  ;;  %s46_s21 = int_to_ptr.vmem [resolvable:$true] %s45_s21 }
  0x39   :  { %s2490_s24 = scalar_lea.hbm %s2839_s0, 256 }
  0x3a   :  { %p2491_p10 = scmp.ne.s32.totalorder %s2839_s0, %s2490_s24  ;;  %p2494_p11 = scmp.lt.u32.totalorder %s2490_s24, %s2839_s0 }
  0x3c   :  { %p2496_p12 = pnand %p2494_p11, %p2491_p10 }
  0x3e   :  { %2499 = shalt.err (!%p2496_p12)
}
  0x3f   :  { %s2500_s5 = scalar_lea.vmem %s24_s19, 256  ;;  %p2505_p0 = scmp.lt.s32.totalorder %s24_s19, %s24_s19 }
  0x40   :  { %p2501_p13 = scmp.ne.s32.totalorder %s24_s19, %s2500_s5  ;;  %p2506_p1 = scmp.lt.s32.totalorder %s2500_s5, %s2500_s5 }
  0x42   :  { %p2507_p2 = por %p2506_p1, %p2505_p0 }
  0x44   :  { %p2508_p3 = pnand %p2507_p2, %p2501_p13 }
  0x46   :  { %2511 = shalt.err (!%p2508_p3)
}
  0x47   :  { %26 = dma.hbm_to_vmem [thread:$0]  %s2839_s0, 256, %s24_s19, [#allocation3]  }
  0x48   :  { %s2512_s9 = scalar_lea.hbm %s2841_s2, 64 }
  0x49   :  { %p2513_p4 = scmp.ne.s32.totalorder %s2841_s2, %s2512_s9  ;;  %p2516_p5 = scmp.lt.u32.totalorder %s2512_s9, %s2841_s2 }
  0x4b   :  { %p2518_p6 = pnand %p2516_p5, %p2513_p4 }
  0x4d   :  { %2521 = shalt.err (!%p2518_p6)
}
  0x4e   :  { %s2522_s14 = scalar_lea.vmem %s46_s21, 64  ;;  %p2527_p8 = scmp.lt.s32.totalorder %s46_s21, %s46_s21 }
  0x4f   :  { %p2523_p7 = scmp.ne.s32.totalorder %s46_s21, %s2522_s14  ;;  %p2528_p9 = scmp.lt.s32.totalorder %s2522_s14, %s2522_s14 }
  0x51   :  { %p2529_p10 = por %p2528_p9, %p2527_p8 }
  0x53   :  { %p2530_p11 = pnand %p2529_p10, %p2523_p7 }
  0x55   :  { %2533 = shalt.err (!%p2530_p11)
}
  0x56   :  { %48 = dma.hbm_to_vmem [thread:$0]  %s2841_s2, 64, %s46_s21, [#allocation6]  }
  0x57   :  { %s2621_s15 = smov [#allocation10]   ;;  %s2622_s17 = smov [#allocation13]  }
  0x58   :  { %s67_s16 = sshll.u32 %s2621_s15, 4  ;;  %s89_s18 = sshll.u32 %s2622_s17, 4  ;;  %s68_s16 = int_to_ptr.vmem [resolvable:$true] %s67_s16  ;;  %s90_s18 = int_to_ptr.vmem [resolvable:$true] %s89_s18 }
  0x59   :  { %s2534_s22 = scalar_lea.hbm %s2843_s4, 32 }
  0x5a   :  { %p2535_p12 = scmp.ne.s32.totalorder %s2843_s4, %s2534_s22  ;;  %p2538_p13 = scmp.lt.u32.totalorder %s2534_s22, %s2843_s4 }
  0x5c   :  { %p2540_p0 = pnand %p2538_p13, %p2535_p12 }
  0x5e   :  { %2543 = shalt.err (!%p2540_p0)
}
  0x5f   :  { %s2544_s2 = scalar_lea.vmem %s68_s16, 32  ;;  %p2549_p2 = scmp.lt.s32.totalorder %s68_s16, %s68_s16 }
  0x60   :  { %p2545_p1 = scmp.ne.s32.totalorder %s68_s16, %s2544_s2  ;;  %p2550_p3 = scmp.lt.s32.totalorder %s2544_s2, %s2544_s2 }
  0x62   :  { %p2551_p4 = por %p2550_p3, %p2549_p2 }
  0x64   :  { %p2552_p5 = pnand %p2551_p4, %p2545_p1 }
  0x66   :  { %2555 = shalt.err (!%p2552_p5)
}
  0x67   :  { %70 = dma.hbm_to_vmem [thread:$0]  %s2843_s4, 32, %s68_s16, [#allocation9]  }
  0x68   :  { %s2556_s28 = scalar_lea.hbm %s2845_s6, 16 }
  0x69   :  { %p2557_p6 = scmp.ne.s32.totalorder %s2845_s6, %s2556_s28  ;;  %p2560_p7 = scmp.lt.u32.totalorder %s2556_s28, %s2845_s6 }
  0x6b   :  { %p2562_p8 = pnand %p2560_p7, %p2557_p6 }
  0x6d   :  { %2565 = shalt.err (!%p2562_p8)
}
  0x6e   :  { %s2566_s10 = scalar_lea.vmem %s90_s18, 16  ;;  %s2570_s11 = scalar_lea.vmem %s90_s18, 32 }
  0x6f   :  { %p2567_p9 = scmp.ne.s32.totalorder %s90_s18, %s2566_s10  ;;  %p2571_p10 = scmp.lt.s32.totalorder %s90_s18, %s90_s18 }
  0x70   :  { %p2572_p11 = scmp.lt.s32.totalorder %s2570_s11, %s2566_s10 }
  0x72   :  { %p2573_p12 = por %p2572_p11, %p2571_p10 }
  0x74   :  { %p2574_p13 = pnand %p2573_p12, %p2567_p9 }
  0x76   :  { %2577 = shalt.err (!%p2574_p13)
}
  0x77   :  { %92 = dma.hbm_to_vmem [thread:$0]  %s2845_s6, 16, %s90_s18, [#allocation12]  }
  0x78   :  { %2600 = dma.done.wait [#allocation3], 256  }
  0x79   :  { %2601 = vsyncadd [#allocation3], 4294967040 }
  0x7a   :  { %2602 = dma.done.wait [#allocation6], 65600  }
  0x7b   :  { %2603 = vsyncadd [#allocation6], 4294901696 }
  0x7c   :  { %2604 = dma.done.wait [#allocation9], 16416  }
  0x7d   :  { %2605 = vsyncadd [#allocation9], 4294950880 }
  0x7e   :  { %2606 = dma.done.wait [#allocation12], 4112  }
  0x7f   :  { %2607 = vsyncadd [#allocation12], 4294963184  ;;  %v117_v0 = vld [vmem:[#allocation5 + $0x8] sm:$0xff]  ;;  %v116_v5 = vld [vmem:[#allocation5] sm:$0xff]  ;;  %s2624_s6 = smov [#allocation14]   ;;  %vm1659_vm0 = vcmask 66560  }
  0x80   :  { %v121_v1 = vld [vmem:[#allocation5 + $0x28] sm:$0xff]  ;;  %v120_v6 = vld [vmem:[#allocation5 + $0x20] sm:$0xff]  ;;  %s1667_s13 = sshll.u32 %s2624_s6, 4  ;;  %s1668_s13 = int_to_ptr.vmem [resolvable:$true] %s1667_s13 }
  0x81   :  { %v245_v2 = vld [vmem:[#allocation5 + $0x408] sm:$0xff]  ;;  %v1715_v3 = vpack.c.bf16 %v121_v1, %v117_v0  ;;  %v1717_v8 = vpack.c.bf16 %v120_v6, %v116_v5  ;;  %v244_v9 = vld [vmem:[#allocation5 + $0x400] sm:$0xff]  ;;  %s2578_s14 = scalar_lea.vmem %s1668_s13, 32  ;;  %p2583_p1 = scmp.lt.s32.totalorder %s1668_s13, %s1668_s13 }
  0x82   :  { %v249_v4 = vld [vmem:[#allocation5 + $0x428] sm:$0xff]  ;;  %v248_v10 = vld [vmem:[#allocation5 + $0x420] sm:$0xff]  ;;  %p2579_p0 = scmp.ne.s32.totalorder %s1668_s13, %s2578_s14  ;;  %p2584_p2 = scmp.lt.s32.totalorder %s2578_s14, %s2578_s14 }
  0x83   :  { %v1779_v7 = vpack.c.bf16 %v249_v4, %v245_v2  ;;  %v125_v11 = vld [vmem:[#allocation5 + $0x48] sm:$0xff]  ;;  %1716 = vmatprep.subr.bf16.mxu1 %v1715_v3  ;;  %v1781_v12 = vpack.c.bf16 %v248_v10, %v244_v9  ;;  %v124_v18 = vld [vmem:[#allocation5 + $0x40] sm:$0xff] }
  0x84   :  { %v129_v13 = vld [vmem:[#allocation5 + $0x68] sm:$0xff]  ;;  %1718 = vmatpush1.bf16.msra.mxu1 %v1717_v8  ;;  %v128_v19 = vld [vmem:[#allocation5 + $0x60] sm:$0xff]  ;;  %p2585_p3 = por %p2584_p2, %p2583_p1 }
  0x85   :  { %v253_v14 = vld [vmem:[#allocation5 + $0x448] sm:$0xff]  ;;  %1780 = vmatprep.subr.bf16.mxu0 %v1779_v7  ;;  %v1719_v16 = vpack.c.bf16 %v129_v13, %v125_v11  ;;  %v252_v20 = vld [vmem:[#allocation5 + $0x440] sm:$0xff]  ;;  %v1721_v21 = vpack.c.bf16 %v128_v19, %v124_v18 }
  0x86   :  { %v257_v15 = vld [vmem:[#allocation5 + $0x468] sm:$0xff]  ;;  %1782 = vmatpush1.bf16.msra.mxu0 %v1781_v12  ;;  %v256_v22 = vld [vmem:[#allocation5 + $0x460] sm:$0xff]  ;;  %p2586_p4 = pnand %p2585_p3, %p2579_p0 }
  0x87   :  { %v1783_v17 = vpack.c.bf16 %v257_v15, %v253_v14  ;;  %v133_v23 = vld [vmem:[#allocation5 + $0x88] sm:$0xff]  ;;  %1720 = vmatprep.subr.bf16.mxu1 %v1719_v16  ;;  %v1785_v25 = vpack.c.bf16 %v256_v22, %v252_v20  ;;  %v132_v29 = vld [vmem:[#allocation5 + $0x80] sm:$0xff] }
  0x88   :  { %v137_v24 = vld [vmem:[#allocation5 + $0xa8] sm:$0xff]  ;;  %v136_v31 = vld [vmem:[#allocation5 + $0xa0] sm:$0xff]  ;;  %1722 = vmatpush1.bf16.msra.mxu1 %v1721_v21 }
  0x89   :  { %1784 = vmatprep.subr.bf16.mxu0 %v1783_v17  ;;  %v1723_v26 = vpack.c.bf16 %v137_v24, %v133_v23  ;;  %v261_v27 = vld [vmem:[#allocation5 + $0x488] sm:$0xff]  ;;  %v260_v32 = vld [vmem:[#allocation5 + $0x480] sm:$0xff]  ;;  %v1725_v34 = vpack.c.bf16 %v136_v31, %v132_v29 }
  0x8a   :  { %v265_v28 = vld [vmem:[#allocation5 + $0x4a8] sm:$0xff]  ;;  %v264_v33 = vld [vmem:[#allocation5 + $0x4a0] sm:$0xff]  ;;  %1786 = vmatpush1.bf16.msra.mxu0 %v1785_v25 }
  0x8b   :  { %v1787_v30 = vpack.c.bf16 %v265_v28, %v261_v27  ;;  %v141_v35 = vld [vmem:[#allocation5 + $0xc8] sm:$0xff]  ;;  %1724 = vmatprep.subr.bf16.mxu1 %v1723_v26  ;;  %v1789_v38 = vpack.c.bf16 %v264_v33, %v260_v32  ;;  %v140_v41 = vld [vmem:[#allocation5 + $0xc0] sm:$0xff] }
  0x8c   :  { %v145_v36 = vld [vmem:[#allocation5 + $0xe8] sm:$0xff]  ;;  %v144_v42 = vld [vmem:[#allocation5 + $0xe0] sm:$0xff]  ;;  %1726 = vmatpush1.bf16.msra.mxu1 %v1725_v34 }
  0x8d   :  { %v269_v37 = vld [vmem:[#allocation5 + $0x4c8] sm:$0xff]  ;;  %v1727_v39 = vpack.c.bf16 %v145_v36, %v141_v35  ;;  %1788 = vmatprep.subr.bf16.mxu0 %v1787_v30  ;;  %v268_v44 = vld [vmem:[#allocation5 + $0x4c0] sm:$0xff]  ;;  %v1729_v50 = vpack.c.bf16 %v144_v42, %v140_v41 }
  0x8e   :  { %v273_v40 = vld [vmem:[#allocation5 + $0x4e8] sm:$0xff]  ;;  %v272_v45 = vld [vmem:[#allocation5 + $0x4e0] sm:$0xff]  ;;  %1790 = vmatpush1.bf16.msra.mxu0 %v1789_v38 }
  0x8f   :  { %v1791_v43 = vpack.c.bf16 %v273_v40, %v269_v37  ;;  %v149_v46 = vld [vmem:[#allocation5 + $0x108] sm:$0xff]  ;;  %1728 = vmatprep.subr.bf16.mxu1 %v1727_v39  ;;  %v1793_v51 = vpack.c.bf16 %v272_v45, %v268_v44  ;;  %v148_v53 = vld [vmem:[#allocation5 + $0x100] sm:$0xff] }
  0x90   :  { %v153_v47 = vld [vmem:[#allocation5 + $0x128] sm:$0xff]  ;;  %v152_v54 = vld [vmem:[#allocation5 + $0x120] sm:$0xff]  ;;  %1730 = vmatpush1.bf16.msra.mxu1 %v1729_v50 }
  0x91   :  { %v277_v48 = vld [vmem:[#allocation5 + $0x508] sm:$0xff]  ;;  %v1731_v52 = vpack.c.bf16 %v153_v47, %v149_v46  ;;  %v276_v55 = vld [vmem:[#allocation5 + $0x500] sm:$0xff]  ;;  %1792 = vmatprep.subr.bf16.mxu0 %v1791_v43  ;;  %v1733_v62 = vpack.c.bf16 %v152_v54, %v148_v53  ;;  %v630_v46 = vlaneseq  ;;  %v2623_v47 = vmov 1983009808  }
  0x92   :  { %v281_v49 = vld [vmem:[#allocation5 + $0x528] sm:$0xff]  ;;  %v280_v57 = vld [vmem:[#allocation5 + $0x520] sm:$0xff]  ;;  %1794 = vmatpush1.bf16.msra.mxu0 %v1793_v51 }
  0x93   :  { %v1795_v56 = vpack.c.bf16 %v281_v49, %v277_v48  ;;  %v157_v58 = vld [vmem:[#allocation5 + $0x148] sm:$0xff]  ;;  %1732 = vmatprep.subr.bf16.mxu1 %v1731_v52  ;;  %v1797_v63 = vpack.c.bf16 %v280_v57, %v276_v55  ;;  %v156_v1 = vld [vmem:[#allocation5 + $0x140] sm:$0xff]  ;;  %v654_v48 = vunpack.c.l.s4 %v2623_v47 }
  0x94   :  { %v161_v59 = vld [vmem:[#allocation5 + $0x168] sm:$0xff]  ;;  %v160_v2 = vld [vmem:[#allocation5 + $0x160] sm:$0xff]  ;;  %1734 = vmatpush1.bf16.msra.mxu1 %v1733_v62 }
  0x95   :  { %v285_v60 = vld [vmem:[#allocation5 + $0x548] sm:$0xff]  ;;  %v1735_v0 = vpack.c.bf16 %v161_v59, %v157_v58  ;;  %v284_v3 = vld [vmem:[#allocation5 + $0x540] sm:$0xff]  ;;  %1796 = vmatprep.subr.bf16.mxu0 %v1795_v56  ;;  %v1737_v10 = vpack.c.bf16 %v160_v2, %v156_v1  ;;  %v655_v62 = vunpack.c.0.s8 %v654_v48 }
  0x96   :  { %v289_v61 = vld [vmem:[#allocation5 + $0x568] sm:$0xff]  ;;  %v288_v5 = vld [vmem:[#allocation5 + $0x560] sm:$0xff]  ;;  %1798 = vmatpush1.bf16.msra.mxu0 %v1797_v63 }
  0x97   :  { %v1799_v4 = vpack.c.bf16 %v289_v61, %v285_v60  ;;  %v165_v6 = vld [vmem:[#allocation5 + $0x188] sm:$0xff]  ;;  %1736 = vmatprep.subr.bf16.mxu1 %v1735_v0  ;;  %v1801_v11 = vpack.c.bf16 %v288_v5, %v284_v3  ;;  %v164_v13 = vld [vmem:[#allocation5 + $0x180] sm:$0xff]  ;;  %v2749_v61 = vshrl.u32 %v630_v46, 7 }
  0x98   :  { %v169_v7 = vld [vmem:[#allocation5 + $0x1a8] sm:$0xff]  ;;  %v168_v14 = vld [vmem:[#allocation5 + $0x1a0] sm:$0xff]  ;;  %1738 = vmatpush1.bf16.msra.mxu1 %v1737_v10 }
  0x99   :  { %v293_v8 = vld [vmem:[#allocation5 + $0x588] sm:$0xff]  ;;  %v1739_v12 = vpack.c.bf16 %v169_v7, %v165_v6  ;;  %v292_v15 = vld [vmem:[#allocation5 + $0x580] sm:$0xff]  ;;  %1800 = vmatprep.subr.bf16.mxu0 %v1799_v4  ;;  %v1741_v22 = vpack.c.bf16 %v168_v14, %v164_v13 }
  0x9a   :  { %v297_v9 = vld [vmem:[#allocation5 + $0x5a8] sm:$0xff]  ;;  %v296_v17 = vld [vmem:[#allocation5 + $0x5a0] sm:$0xff]  ;;  %1802 = vmatpush1.bf16.msra.mxu0 %v1801_v11  ;;  %v2752_v11 = vsub.s32 %v655_v62, %v2749_v61 }
  0x9b   :  { %v1803_v16 = vpack.c.bf16 %v297_v9, %v293_v8  ;;  %v173_v18 = vld [vmem:[#allocation5 + $0x1c8] sm:$0xff]  ;;  %1740 = vmatprep.subr.bf16.mxu1 %v1739_v12  ;;  %v1805_v23 = vpack.c.bf16 %v296_v17, %v292_v15  ;;  %v172_v25 = vld [vmem:[#allocation5 + $0x1c0] sm:$0xff] }
  0x9c   :  { %v177_v19 = vld [vmem:[#allocation5 + $0x1e8] sm:$0xff]  ;;  %v176_v26 = vld [vmem:[#allocation5 + $0x1e0] sm:$0xff]  ;;  %1742 = vmatpush1.bf16.msra.mxu1 %v1741_v22  ;;  %v114_v22 = vld [vmem:[#allocation2] sm:$0xff] }
  0x9d   :  { %v301_v20 = vld [vmem:[#allocation5 + $0x5c8] sm:$0xff]  ;;  %v1743_v24 = vpack.c.bf16 %v177_v19, %v173_v18  ;;  %v300_v27 = vld [vmem:[#allocation5 + $0x5c0] sm:$0xff]  ;;  %1804 = vmatprep.subr.bf16.mxu0 %v1803_v16  ;;  %v1745_v34 = vpack.c.bf16 %v176_v26, %v172_v25  ;;  %v2755_v25 = vrot.slane %v114_v22, %v2752_v11  ;;  %v652_v26 = vcombine.high %v114_v22, %v114_v22 }
  0x9e   :  { %v305_v21 = vld [vmem:[#allocation5 + $0x5e8] sm:$0xff]  ;;  %v304_v29 = vld [vmem:[#allocation5 + $0x5e0] sm:$0xff]  ;;  %1806 = vmatpush1.bf16.msra.mxu0 %v1805_v23 }
  0x9f   :  { %v1807_v28 = vpack.c.bf16 %v305_v21, %v301_v20  ;;  %v181_v30 = vld [vmem:[#allocation5 + $0x208] sm:$0xff]  ;;  %1744 = vmatprep.subr.bf16.mxu1 %v1743_v24  ;;  %v1809_v35 = vpack.c.bf16 %v304_v29, %v300_v27  ;;  %v180_v37 = vld [vmem:[#allocation5 + $0x200] sm:$0xff] }
  0xa0   :  { %v185_v31 = vld [vmem:[#allocation5 + $0x228] sm:$0xff]  ;;  %v184_v38 = vld [vmem:[#allocation5 + $0x220] sm:$0xff]  ;;  %1746 = vmatpush1.bf16.msra.mxu1 %v1745_v34  ;;  %v2762_v34 = vrot.slane %v652_v26, %v2752_v11  ;;  %v131_v26 = vld [vmem:[#allocation5 + $0x78] sm:$0xff] }
  0xa1   :  { %v309_v32 = vld [vmem:[#allocation5 + $0x608] sm:$0xff]  ;;  %v1747_v36 = vpack.c.bf16 %v185_v31, %v181_v30  ;;  %v308_v39 = vld [vmem:[#allocation5 + $0x600] sm:$0xff]  ;;  %1808 = vmatprep.subr.bf16.mxu0 %v1807_v28  ;;  %v1749_v49 = vpack.c.bf16 %v184_v38, %v180_v37 }
  0xa2   :  { %v313_v33 = vld [vmem:[#allocation5 + $0x628] sm:$0xff]  ;;  %v312_v41 = vld [vmem:[#allocation5 + $0x620] sm:$0xff]  ;;  %1810 = vmatpush1.bf16.msra.mxu0 %v1809_v35 }
  0xa3   :  { %v1811_v40 = vpack.c.bf16 %v313_v33, %v309_v32  ;;  %v189_v42 = vld [vmem:[#allocation5 + $0x248] sm:$0xff]  ;;  %1748 = vmatprep.subr.bf16.mxu1 %v1747_v36  ;;  %v1813_v50 = vpack.c.bf16 %v312_v41, %v308_v39  ;;  %v188_v52 = vld [vmem:[#allocation5 + $0x240] sm:$0xff]  ;;  %v2759_v33 = vcombine.high %v2755_v25, %v2755_v25  ;;  %v2767_v41 = vcombine.high %v2762_v34, %v2762_v34 }
  0xa4   :  { %v193_v43 = vld [vmem:[#allocation5 + $0x268] sm:$0xff]  ;;  %v192_v53 = vld [vmem:[#allocation5 + $0x260] sm:$0xff]  ;;  %1750 = vmatpush1.bf16.msra.mxu1 %v1749_v49 }
  0xa5   :  { %v317_v44 = vld [vmem:[#allocation5 + $0x648] sm:$0xff]  ;;  %v1751_v51 = vpack.c.bf16 %v193_v43, %v189_v42  ;;  %v316_v54 = vld [vmem:[#allocation5 + $0x640] sm:$0xff]  ;;  %1812 = vmatprep.subr.bf16.mxu0 %v1811_v40  ;;  %v1753_v63 = vpack.c.bf16 %v192_v53, %v188_v52  ;;  %758 = vmatprep.mubr.f32.mxu1 %v2759_v33 }
  0xa6   :  { %v321_v45 = vld [vmem:[#allocation5 + $0x668] sm:$0xff]  ;;  %v320_v56 = vld [vmem:[#allocation5 + $0x660] sm:$0xff]  ;;  %1814 = vmatpush1.bf16.msra.mxu0 %v1813_v50  ;;  %829 = vmatprep.mubr.f32.mxu0 %v2767_v41 }
  0xa7   :  { %v1815_v55 = vpack.c.bf16 %v321_v45, %v317_v44  ;;  %v197_v57 = vld [vmem:[#allocation5 + $0x288] sm:$0xff]  ;;  %1752 = vmatprep.subr.bf16.mxu1 %v1751_v51  ;;  %v1817_v0 = vpack.c.bf16 %v320_v56, %v316_v54  ;;  %v196_v2 = vld [vmem:[#allocation5 + $0x280] sm:$0xff] }
  0xa8   :  { %v201_v58 = vld [vmem:[#allocation5 + $0x2a8] sm:$0xff]  ;;  %v200_v3 = vld [vmem:[#allocation5 + $0x2a0] sm:$0xff]  ;;  %1754 = vmatpush1.bf16.msra.mxu1 %v1753_v63 }
  0xa9   :  { %v325_v59 = vld [vmem:[#allocation5 + $0x688] sm:$0xff]  ;;  %v1755_v1 = vpack.c.bf16 %v201_v58, %v197_v57  ;;  %v324_v4 = vld [vmem:[#allocation5 + $0x680] sm:$0xff]  ;;  %1816 = vmatprep.subr.bf16.mxu0 %v1815_v55  ;;  %v1757_v12 = vpack.c.bf16 %v200_v3, %v196_v2 }
  0xaa   :  { %v329_v60 = vld [vmem:[#allocation5 + $0x6a8] sm:$0xff]  ;;  %v328_v6 = vld [vmem:[#allocation5 + $0x6a0] sm:$0xff]  ;;  %1818 = vmatpush1.bf16.msra.mxu0 %v1817_v0 }
  0xab   :  { %v1819_v5 = vpack.c.bf16 %v329_v60, %v325_v59  ;;  %v205_v7 = vld [vmem:[#allocation5 + $0x2c8] sm:$0xff]  ;;  %v204_v13 = vld [vmem:[#allocation5 + $0x2c0] sm:$0xff]  ;;  %1756 = vmatprep.subr.bf16.mxu1 %v1755_v1  ;;  %v1821_v14 = vpack.c.bf16 %v328_v6, %v324_v4 }
  0xac   :  { %v209_v8 = vld [vmem:[#allocation5 + $0x2e8] sm:$0xff]  ;;  %v208_v16 = vld [vmem:[#allocation5 + $0x2e0] sm:$0xff]  ;;  %1758 = vmatpush1.bf16.msra.mxu1 %v1757_v12  ;;  %v119_v12 = vld [vmem:[#allocation5 + $0x18] sm:$0xff] }
  0xad   :  { %v333_v9 = vld [vmem:[#allocation5 + $0x6c8] sm:$0xff]  ;;  %v1759_v15 = vpack.c.bf16 %v209_v8, %v205_v7  ;;  %v332_v17 = vld [vmem:[#allocation5 + $0x6c0] sm:$0xff]  ;;  %1820 = vmatprep.subr.bf16.mxu0 %v1819_v5  ;;  %v1761_v27 = vpack.c.bf16 %v208_v16, %v204_v13  ;;  %v123_v13 = vld [vmem:[#allocation5 + $0x38] sm:$0xff] }
  0xae   :  { %v337_v10 = vld [vmem:[#allocation5 + $0x6e8] sm:$0xff]  ;;  %v336_v18 = vld [vmem:[#allocation5 + $0x6e0] sm:$0xff]  ;;  %1822 = vmatpush1.bf16.msra.mxu0 %v1821_v14 }
  0xaf   :  { %v1823_v19 = vpack.c.bf16 %v337_v10, %v333_v9  ;;  %v213_v20 = vld [vmem:[#allocation5 + $0x308] sm:$0xff]  ;;  %v1825_v28 = vpack.c.bf16 %v336_v18, %v332_v17  ;;  %1760 = vmatprep.subr.bf16.mxu1 %v1759_v15  ;;  %v212_v30 = vld [vmem:[#allocation5 + $0x300] sm:$0xff]  ;;  %v1971_v18 = vpack.c.bf16 %v123_v13, %v119_v12  ;;  %v159_v13 = vld [vmem:[#allocation5 + $0x158] sm:$0xff] }
  0xb0   :  { %v217_v21 = vld [vmem:[#allocation5 + $0x328] sm:$0xff]  ;;  %v216_v31 = vld [vmem:[#allocation5 + $0x320] sm:$0xff]  ;;  %1762 = vmatpush1.bf16.msra.mxu1 %v1761_v27 }
  0xb1   :  { %v341_v23 = vld [vmem:[#allocation5 + $0x708] sm:$0xff]  ;;  %v1763_v29 = vpack.c.bf16 %v217_v21, %v213_v20  ;;  %v340_v32 = vld [vmem:[#allocation5 + $0x700] sm:$0xff]  ;;  %1824 = vmatprep.subr.bf16.mxu0 %v1823_v19  ;;  %v1765_v42 = vpack.c.bf16 %v216_v31, %v212_v30  ;;  %v118_v20 = vld [vmem:[#allocation5 + $0x10] sm:$0xff] }
  0xb2   :  { %v345_v24 = vld [vmem:[#allocation5 + $0x728] sm:$0xff]  ;;  %v344_v36 = vld [vmem:[#allocation5 + $0x720] sm:$0xff]  ;;  %1826 = vmatpush1.bf16.msra.mxu0 %v1825_v28  ;;  %v122_v21 = vld [vmem:[#allocation5 + $0x30] sm:$0xff] }
  0xb3   :  { %v1827_v35 = vpack.c.bf16 %v345_v24, %v341_v23  ;;  %v221_v37 = vld [vmem:[#allocation5 + $0x348] sm:$0xff]  ;;  %1764 = vmatprep.subr.bf16.mxu1 %v1763_v29  ;;  %v1829_v43 = vpack.c.bf16 %v344_v36, %v340_v32  ;;  %v220_v45 = vld [vmem:[#allocation5 + $0x340] sm:$0xff]  ;;  %v127_v24 = vld [vmem:[#allocation5 + $0x58] sm:$0xff]  ;;  %v1973_v29 = vpack.c.bf16 %v122_v21, %v118_v20 }
  0xb4   :  { %v225_v38 = vld [vmem:[#allocation5 + $0x368] sm:$0xff]  ;;  %v224_v46 = vld [vmem:[#allocation5 + $0x360] sm:$0xff]  ;;  %1766 = vmatpush1.bf16.msra.mxu1 %v1765_v42  ;;  %v1975_v31 = vpack.c.bf16 %v131_v26, %v127_v24  ;;  %v130_v36 = vld [vmem:[#allocation5 + $0x70] sm:$0xff] }
  0xb5   :  { %v349_v39 = vld [vmem:[#allocation5 + $0x748] sm:$0xff]  ;;  %v1767_v44 = vpack.c.bf16 %v225_v38, %v221_v37  ;;  %v348_v47 = vld [vmem:[#allocation5 + $0x740] sm:$0xff]  ;;  %1828 = vmatprep.subr.bf16.mxu0 %v1827_v35  ;;  %v1769_v54 = vpack.c.bf16 %v224_v46, %v220_v45  ;;  %v126_v35 = vld [vmem:[#allocation5 + $0x50] sm:$0xff] }
  0xb6   :  { %v353_v40 = vld [vmem:[#allocation5 + $0x768] sm:$0xff]  ;;  %v352_v49 = vld [vmem:[#allocation5 + $0x760] sm:$0xff]  ;;  %1830 = vmatpush1.bf16.msra.mxu0 %v1829_v43  ;;  %v158_v21 = vld [vmem:[#allocation5 + $0x150] sm:$0xff] }
  0xb7   :  { %v1831_v48 = vpack.c.bf16 %v353_v40, %v349_v39  ;;  %v229_v50 = vld [vmem:[#allocation5 + $0x388] sm:$0xff]  ;;  %1768 = vmatprep.subr.bf16.mxu1 %v1767_v44  ;;  %v1833_v55 = vpack.c.bf16 %v352_v49, %v348_v47  ;;  %v228_v57 = vld [vmem:[#allocation5 + $0x380] sm:$0xff]  ;;  %v135_v39 = vld [vmem:[#allocation5 + $0x98] sm:$0xff]  ;;  %v1977_v44 = vpack.c.bf16 %v130_v36, %v126_v35 }
  0xb8   :  { %v233_v51 = vld [vmem:[#allocation5 + $0x3a8] sm:$0xff]  ;;  %v232_v58 = vld [vmem:[#allocation5 + $0x3a0] sm:$0xff]  ;;  %1770 = vmatpush1.bf16.msra.mxu1 %v1769_v54  ;;  %v139_v40 = vld [vmem:[#allocation5 + $0xb8] sm:$0xff] }
  0xb9   :  { %v357_v52 = vld [vmem:[#allocation5 + $0x788] sm:$0xff]  ;;  %v1771_v56 = vpack.c.bf16 %v233_v51, %v229_v50  ;;  %v356_v59 = vld [vmem:[#allocation5 + $0x780] sm:$0xff]  ;;  %1832 = vmatprep.subr.bf16.mxu0 %v1831_v48  ;;  %v1773_v3 = vpack.c.bf16 %v232_v58, %v228_v57  ;;  %v1979_v46 = vpack.c.bf16 %v139_v40, %v135_v39  ;;  %v134_v48 = vld [vmem:[#allocation5 + $0x90] sm:$0xff] }
  0xba   :  { %v361_v53 = vld [vmem:[#allocation5 + $0x7a8] sm:$0xff]  ;;  %v360_v62 = vld [vmem:[#allocation5 + $0x7a0] sm:$0xff]  ;;  %1834 = vmatpush1.bf16.msra.mxu0 %v1833_v55  ;;  %v138_v49 = vld [vmem:[#allocation5 + $0xb0] sm:$0xff] }
  0xbb   :  { %v1835_v60 = vpack.c.bf16 %v361_v53, %v357_v52  ;;  %v237_v63 = vld [vmem:[#allocation5 + $0x3c8] sm:$0xff]  ;;  %1772 = vmatprep.subr.bf16.mxu1 %v1771_v56  ;;  %v1837_v4 = vpack.c.bf16 %v360_v62, %v356_v59  ;;  %v236_v6 = vld [vmem:[#allocation5 + $0x3c0] sm:$0xff]  ;;  %v143_v52 = vld [vmem:[#allocation5 + $0xd8] sm:$0xff]  ;;  %v1981_v56 = vpack.c.bf16 %v138_v49, %v134_v48 }
  0xbc   :  { %v241_v0 = vld [vmem:[#allocation5 + $0x3e8] sm:$0xff]  ;;  %v240_v7 = vld [vmem:[#allocation5 + $0x3e0] sm:$0xff]  ;;  %1774 = vmatpush1.bf16.msra.mxu1 %v1773_v3  ;;  %v147_v53 = vld [vmem:[#allocation5 + $0xf8] sm:$0xff] }
  0xbd   :  { %v365_v1 = vld [vmem:[#allocation5 + $0x7c8] sm:$0xff]  ;;  %v1775_v5 = vpack.c.bf16 %v241_v0, %v237_v63  ;;  %v364_v8 = vld [vmem:[#allocation5 + $0x7c0] sm:$0xff]  ;;  %1836 = vmatprep.subr.bf16.mxu0 %v1835_v60  ;;  %v1777_v16 = vpack.c.bf16 %v240_v7, %v236_v6  ;;  %v1983_v58 = vpack.c.bf16 %v147_v53, %v143_v52  ;;  %v142_v60 = vld [vmem:[#allocation5 + $0xd0] sm:$0xff] }
  0xbe   :  { %v369_v2 = vld [vmem:[#allocation5 + $0x7e8] sm:$0xff]  ;;  %v368_v10 = vld [vmem:[#allocation5 + $0x7e0] sm:$0xff]  ;;  %1838 = vmatpush1.bf16.msra.mxu0 %v1837_v4  ;;  %v146_v62 = vld [vmem:[#allocation5 + $0xf0] sm:$0xff] }
  0xbf   :  { %v1839_v9 = vpack.c.bf16 %v369_v2, %v365_v1  ;;  %v373_v14 = vld [vmem:[#allocation5 + $0x808] sm:$0xff]  ;;  %1776 = vmatprep.subr.bf16.mxu1 %v1775_v5  ;;  %v1841_v17 = vpack.c.bf16 %v368_v10, %v364_v8  ;;  %v372_v19 = vld [vmem:[#allocation5 + $0x800] sm:$0xff]  ;;  %v151_v1 = vld [vmem:[#allocation5 + $0x118] sm:$0xff] }
  0xc0   :  { %v377_v15 = vld [vmem:[#allocation5 + $0x828] sm:$0xff]  ;;  %v376_v23 = vld [vmem:[#allocation5 + $0x820] sm:$0xff]  ;;  %1778 = vmatpush1.bf16.msra.mxu1 %v1777_v16  ;;  %v155_v2 = vld [vmem:[#allocation5 + $0x138] sm:$0xff] }
  0xc1   :  { %1840 = vmatprep.subr.bf16.mxu0 %v1839_v9  ;;  %v1843_v22 = vpack.c.bf16 %v377_v15, %v373_v14  ;;  %v381_v27 = vld [vmem:[#allocation5 + $0x848] sm:$0xff]  ;;  %1972 = vmatprep.subr.bf16.mxu1 %v1971_v18  ;;  %v1845_v30 = vpack.c.bf16 %v376_v23, %v372_v19  ;;  %v380_v32 = vld [vmem:[#allocation5 + $0x840] sm:$0xff]  ;;  %v1987_v6 = vpack.c.bf16 %v155_v2, %v151_v1  ;;  %v150_v8 = vld [vmem:[#allocation5 + $0x110] sm:$0xff] }
  0xc2   :  { %v385_v28 = vld [vmem:[#allocation5 + $0x868] sm:$0xff]  ;;  %1842 = vmatpush1.bf16.msra.mxu0 %v1841_v17  ;;  %v384_v38 = vld [vmem:[#allocation5 + $0x860] sm:$0xff]  ;;  %v154_v9 = vld [vmem:[#allocation5 + $0x130] sm:$0xff] }
  0xc3   :  { %1844 = vmatprep.subr.bf16.mxu0 %v1843_v22  ;;  %v1847_v37 = vpack.c.bf16 %v385_v28, %v381_v27  ;;  %759 = vmatmul.mubr.f32.vlgmr.msra.gmra.mrb[0].mxu1 %v2755_v25  ;;  %v389_v42 = vld [vmem:[#allocation5 + $0x888] sm:$0xff]  ;;  %v1849_v45 = vpack.c.bf16 %v384_v38, %v380_v32  ;;  %v388_v47 = vld [vmem:[#allocation5 + $0x880] sm:$0xff]  ;;  %v163_v14 = vld [vmem:[#allocation5 + $0x178] sm:$0xff]  ;;  %v1989_v17 = vpack.c.bf16 %v154_v9, %v150_v8 }
  0xc4   :  { %v393_v43 = vld [vmem:[#allocation5 + $0x8a8] sm:$0xff]  ;;  %1974 = vmatpush1.bf16.msra.mxu1 %v1973_v29  ;;  %v392_v51 = vld [vmem:[#allocation5 + $0x8a0] sm:$0xff]  ;;  %1042 = vmatprep.mubr.f32.mxu1 %v2759_v33  ;;  %v1985_v33 = vpack.c.bf16 %v146_v62, %v142_v60  ;;  %v1991_v19 = vpack.c.bf16 %v163_v14, %v159_v13  ;;  %v162_v22 = vld [vmem:[#allocation5 + $0x170] sm:$0xff] }
  0xc5   :  { %830 = vmatmul.mubr.f32.vlgmr.msra.gmra.mrb[0].mxu0 %v2762_v34  ;;  %1976 = vmatprep.subr.bf16.mxu1 %v1975_v31  ;;  %v1851_v50 = vpack.c.bf16 %v393_v43, %v389_v42  ;;  %v397_v54 = vld [vmem:[#allocation5 + $0x8c8] sm:$0xff]  ;;  %v1853_v57 = vpack.c.bf16 %v392_v51, %v388_v47  ;;  %v396_v59 = vld [vmem:[#allocation5 + $0x8c0] sm:$0xff]  ;;  %v167_v26 = vld [vmem:[#allocation5 + $0x198] sm:$0xff] }
  0xc6   :  { %1846 = vmatpush1.bf16.msra.mxu0 %v1845_v30  ;;  %v401_v55 = vld [vmem:[#allocation5 + $0x8e8] sm:$0xff]  ;;  %v400_v0 = vld [vmem:[#allocation5 + $0x8e0] sm:$0xff]  ;;  %v171_v27 = vld [vmem:[#allocation5 + $0x1b8] sm:$0xff]  ;;  %v1993_v30 = vpack.c.bf16 %v162_v22, %v158_v21 }
  0xc7   :  { %1848 = vmatprep.subr.bf16.mxu0 %v1847_v37  ;;  %v1855_v63 = vpack.c.bf16 %v401_v55, %v397_v54  ;;  %v405_v3 = vld [vmem:[#allocation5 + $0x908] sm:$0xff]  ;;  %v1857_v5 = vpack.c.bf16 %v400_v0, %v396_v59  ;;  %v404_v7 = vld [vmem:[#allocation5 + $0x900] sm:$0xff]  ;;  %v1995_v35 = vpack.c.bf16 %v171_v27, %v167_v26  ;;  %v166_v36 = vld [vmem:[#allocation5 + $0x190] sm:$0xff] }
  0xc8   :  { %1978 = vmatpush1.bf16.msra.mxu1 %v1977_v44  ;;  %v409_v4 = vld [vmem:[#allocation5 + $0x928] sm:$0xff]  ;;  %v408_v12 = vld [vmem:[#allocation5 + $0x920] sm:$0xff]  ;;  %v170_v37 = vld [vmem:[#allocation5 + $0x1b0] sm:$0xff] }
  0xc9   :  { %1980 = vmatprep.subr.bf16.mxu1 %v1979_v46  ;;  %v1859_v10 = vpack.c.bf16 %v409_v4, %v405_v3  ;;  %v413_v15 = vld [vmem:[#allocation5 + $0x948] sm:$0xff]  ;;  %v1861_v18 = vpack.c.bf16 %v408_v12, %v404_v7  ;;  %v412_v20 = vld [vmem:[#allocation5 + $0x940] sm:$0xff]  ;;  %v2773_v38 = vld [vmem:[#allocation2 + $0x8] sm:$0xff]  ;;  %v1997_v47 = vpack.c.bf16 %v170_v37, %v166_v36 }
  0xca   :  { %1850 = vmatpush1.bf16.msra.mxu0 %v1849_v45  ;;  %v417_v16 = vld [vmem:[#allocation5 + $0x968] sm:$0xff]  ;;  %v416_v24 = vld [vmem:[#allocation5 + $0x960] sm:$0xff]  ;;  %v175_v42 = vld [vmem:[#allocation5 + $0x1d8] sm:$0xff]  ;;  %v2777_v44 = vrot.slane %v2773_v38, %v2752_v11 }
  0xcb   :  { %1852 = vmatprep.subr.bf16.mxu0 %v1851_v50  ;;  %v1863_v23 = vpack.c.bf16 %v417_v16, %v413_v15  ;;  %v421_v28 = vld [vmem:[#allocation5 + $0x988] sm:$0xff]  ;;  %v420_v31 = vld [vmem:[#allocation5 + $0x980] sm:$0xff]  ;;  %v1865_v32 = vpack.c.bf16 %v416_v24, %v412_v20  ;;  %v179_v43 = vld [vmem:[#allocation5 + $0x1f8] sm:$0xff] }
  0xcc   :  { %1982 = vmatpush1.bf16.msra.mxu1 %v1981_v56  ;;  %v425_v29 = vld [vmem:[#allocation5 + $0x9a8] sm:$0xff]  ;;  %v424_v40 = vld [vmem:[#allocation5 + $0x9a0] sm:$0xff]  ;;  %v2781_v48 = vcombine.high %v2777_v44, %v2777_v44  ;;  %v1999_v50 = vpack.c.bf16 %v179_v43, %v175_v42  ;;  %v174_v52 = vld [vmem:[#allocation5 + $0x1d0] sm:$0xff] }
  0xcd   :  { %1984 = vmatprep.subr.bf16.mxu1 %v1983_v58  ;;  %v1867_v39 = vpack.c.bf16 %v425_v29, %v421_v28  ;;  %v429_v45 = vld [vmem:[#allocation5 + $0x9c8] sm:$0xff]  ;;  %v1869_v49 = vpack.c.bf16 %v424_v40, %v420_v31  ;;  %v428_v51 = vld [vmem:[#allocation5 + $0x9c0] sm:$0xff]  ;;  %v178_v53 = vld [vmem:[#allocation5 + $0x1f0] sm:$0xff] }
  0xce   :  { %1854 = vmatpush1.bf16.msra.mxu0 %v1853_v57  ;;  %v433_v46 = vld [vmem:[#allocation5 + $0x9e8] sm:$0xff]  ;;  %v432_v55 = vld [vmem:[#allocation5 + $0x9e0] sm:$0xff]  ;;  %v183_v56 = vld [vmem:[#allocation5 + $0x218] sm:$0xff]  ;;  %900 = vmatprep.mubr.f32.mxu0 %v2781_v48  ;;  %v2001_v60 = vpack.c.bf16 %v178_v53, %v174_v52 }
  0xcf   :  { %1856 = vmatprep.subr.bf16.mxu0 %v1855_v63  ;;  %v1871_v54 = vpack.c.bf16 %v433_v46, %v429_v45  ;;  %v187_v57 = vld [vmem:[#allocation5 + $0x238] sm:$0xff]  ;;  %v437_v58 = vld [vmem:[#allocation5 + $0xa08] sm:$0xff]  ;;  %v1873_v62 = vpack.c.bf16 %v432_v55, %v428_v51  ;;  %v436_v0 = vld [vmem:[#allocation5 + $0xa00] sm:$0xff] }
  0xd0   :  { %1986 = vmatpush1.bf16.msra.mxu1 %v1985_v33  ;;  %v441_v59 = vld [vmem:[#allocation5 + $0xa28] sm:$0xff]  ;;  %v2003_v63 = vpack.c.bf16 %v187_v57, %v183_v56  ;;  %v182_v1 = vld [vmem:[#allocation5 + $0x210] sm:$0xff]  ;;  %v440_v4 = vld [vmem:[#allocation5 + $0xa20] sm:$0xff] }
  0xd1   :  { %1988 = vmatprep.subr.bf16.mxu1 %v1987_v6  ;;  %v186_v2 = vld [vmem:[#allocation5 + $0x230] sm:$0xff]  ;;  %v1875_v3 = vpack.c.bf16 %v441_v59, %v437_v58  ;;  %v191_v33 = vld [vmem:[#allocation5 + $0x258] sm:$0xff]  ;;  %v445_v6 = vld [vmem:[#allocation5 + $0xa48] sm:$0xff]  ;;  %v1877_v9 = vpack.c.bf16 %v440_v4, %v436_v0 }
  0xd2   :  { %1858 = vmatpush1.bf16.msra.mxu0 %v1857_v5  ;;  %v195_v5 = vld [vmem:[#allocation5 + $0x278] sm:$0xff]  ;;  %v449_v7 = vld [vmem:[#allocation5 + $0xa68] sm:$0xff]  ;;  %v2005_v8 = vpack.c.bf16 %v186_v2, %v182_v1  ;;  %v444_v12 = vld [vmem:[#allocation5 + $0xa40] sm:$0xff] }
  0xd3   :  { %1860 = vmatprep.subr.bf16.mxu0 %v1859_v10  ;;  %v2007_v10 = vpack.c.bf16 %v195_v5, %v191_v33  ;;  %v190_v13 = vld [vmem:[#allocation5 + $0x250] sm:$0xff]  ;;  %v1879_v15 = vpack.c.bf16 %v449_v7, %v445_v6  ;;  %v448_v16 = vld [vmem:[#allocation5 + $0xa60] sm:$0xff]  ;;  %v457_v20 = vld [vmem:[#allocation5 + $0xaa8] sm:$0xff] }
  0xd4   :  { %1990 = vmatpush1.bf16.msra.mxu1 %v1989_v17  ;;  %v194_v14 = vld [vmem:[#allocation5 + $0x270] sm:$0xff]  ;;  %v199_v17 = vld [vmem:[#allocation5 + $0x298] sm:$0xff]  ;;  %v1881_v22 = vpack.c.bf16 %v448_v16, %v444_v12  ;;  %v452_v24 = vld [vmem:[#allocation5 + $0xa80] sm:$0xff] }
  0xd5   :  { %1992 = vmatprep.subr.bf16.mxu1 %v1991_v19  ;;  %v453_v19 = vld [vmem:[#allocation5 + $0xa88] sm:$0xff]  ;;  %v2009_v21 = vpack.c.bf16 %v194_v14, %v190_v13  ;;  %v198_v26 = vld [vmem:[#allocation5 + $0x290] sm:$0xff]  ;;  %v456_v29 = vld [vmem:[#allocation5 + $0xaa0] sm:$0xff] }
  0xd6   :  { %1862 = vmatpush1.bf16.msra.mxu0 %v1861_v18  ;;  %v203_v18 = vld [vmem:[#allocation5 + $0x2b8] sm:$0xff]  ;;  %v202_v27 = vld [vmem:[#allocation5 + $0x2b0] sm:$0xff]  ;;  %v1883_v28 = vpack.c.bf16 %v457_v20, %v453_v19  ;;  %v1885_v37 = vpack.c.bf16 %v456_v29, %v452_v24  ;;  %v460_v40 = vld [vmem:[#allocation5 + $0xac0] sm:$0xff] }
  0xd7   :  { %1864 = vmatprep.subr.bf16.mxu0 %v1863_v23  ;;  %v2011_v23 = vpack.c.bf16 %v203_v18, %v199_v17  ;;  %v211_v31 = vld [vmem:[#allocation5 + $0x2f8] sm:$0xff]  ;;  %v2013_v36 = vpack.c.bf16 %v202_v27, %v198_v26  ;;  %v206_v42 = vld [vmem:[#allocation5 + $0x2d0] sm:$0xff]  ;;  %v464_v46 = vld [vmem:[#allocation5 + $0xae0] sm:$0xff] }
  0xd8   :  { %1994 = vmatpush1.bf16.msra.mxu1 %v1993_v30  ;;  %v207_v30 = vld [vmem:[#allocation5 + $0x2d8] sm:$0xff]  ;;  %v210_v43 = vld [vmem:[#allocation5 + $0x2f0] sm:$0xff]  ;;  %v473_v51 = vld [vmem:[#allocation5 + $0xb28] sm:$0xff]  ;;  %v1889_v53 = vpack.c.bf16 %v464_v46, %v460_v40 }
  0xd9   :  { %1996 = vmatprep.subr.bf16.mxu1 %v1995_v35  ;;  %v465_v35 = vld [vmem:[#allocation5 + $0xae8] sm:$0xff]  ;;  %v2017_v52 = vpack.c.bf16 %v210_v43, %v206_v42  ;;  %v468_v55 = vld [vmem:[#allocation5 + $0xb00] sm:$0xff]  ;;  %v214_v56 = vld [vmem:[#allocation5 + $0x310] sm:$0xff] }
  0xda   :  { %1866 = vmatpush1.bf16.msra.mxu0 %v1865_v32  ;;  %v461_v32 = vld [vmem:[#allocation5 + $0xac8] sm:$0xff]  ;;  %v218_v57 = vld [vmem:[#allocation5 + $0x330] sm:$0xff]  ;;  %v472_v59 = vld [vmem:[#allocation5 + $0xb20] sm:$0xff] }
  0xdb   :  { %1868 = vmatprep.subr.bf16.mxu0 %v1867_v39  ;;  %v2015_v39 = vpack.c.bf16 %v211_v31, %v207_v30  ;;  %v1887_v45 = vpack.c.bf16 %v465_v35, %v461_v32  ;;  %v481_v0 = vld [vmem:[#allocation5 + $0xb68] sm:$0xff]  ;;  %v2021_v1 = vpack.c.bf16 %v218_v57, %v214_v56  ;;  %v1893_v2 = vpack.c.bf16 %v472_v59, %v468_v55  ;;  %v476_v4 = vld [vmem:[#allocation5 + $0xb40] sm:$0xff]  ;;  %v222_v33 = vld [vmem:[#allocation5 + $0x350] sm:$0xff] }
  0xdc   :  { %1998 = vmatpush1.bf16.msra.mxu1 %v1997_v47  ;;  %v215_v47 = vld [vmem:[#allocation5 + $0x318] sm:$0xff]  ;;  %v226_v5 = vld [vmem:[#allocation5 + $0x370] sm:$0xff]  ;;  %v480_v7 = vld [vmem:[#allocation5 + $0xb60] sm:$0xff] }
  0xdd   :  { %2000 = vmatprep.subr.bf16.mxu1 %v1999_v50  ;;  %v469_v50 = vld [vmem:[#allocation5 + $0xb08] sm:$0xff]  ;;  %v2025_v13 = vpack.c.bf16 %v226_v5, %v222_v33  ;;  %v1897_v14 = vpack.c.bf16 %v480_v7, %v476_v4  ;;  %v484_v16 = vld [vmem:[#allocation5 + $0xb80] sm:$0xff]  ;;  %v230_v17 = vld [vmem:[#allocation5 + $0x390] sm:$0xff] }
  0xde   :  { %1870 = vmatpush1.bf16.msra.mxu0 %v1869_v49  ;;  %v219_v49 = vld [vmem:[#allocation5 + $0x338] sm:$0xff]  ;;  %v1891_v58 = vpack.c.bf16 %v473_v51, %v469_v50  ;;  %v489_v12 = vld [vmem:[#allocation5 + $0xba8] sm:$0xff]  ;;  %v234_v18 = vld [vmem:[#allocation5 + $0x3b0] sm:$0xff] }
  0xdf   :  { %1872 = vmatprep.subr.bf16.mxu0 %v1871_v54  ;;  %v2019_v54 = vpack.c.bf16 %v219_v49, %v215_v47  ;;  %v488_v20 = vld [vmem:[#allocation5 + $0xba0] sm:$0xff]  ;;  %v497_v24 = vld [vmem:[#allocation5 + $0xbe8] sm:$0xff]  ;;  %v2029_v26 = vpack.c.bf16 %v234_v18, %v230_v17  ;;  %v238_v30 = vld [vmem:[#allocation5 + $0x3d0] sm:$0xff] }
  0xe0   :  { %2002 = vmatpush1.bf16.msra.mxu1 %v2001_v60  ;;  %v223_v60 = vld [vmem:[#allocation5 + $0x358] sm:$0xff]  ;;  %v1901_v27 = vpack.c.bf16 %v488_v20, %v484_v16  ;;  %v492_v29 = vld [vmem:[#allocation5 + $0xbc0] sm:$0xff]  ;;  %v242_v31 = vld [vmem:[#allocation5 + $0x3f0] sm:$0xff] }
  0xe1   :  { %2004 = vmatprep.subr.bf16.mxu1 %v2003_v63  ;;  %v477_v63 = vld [vmem:[#allocation5 + $0xb48] sm:$0xff]  ;;  %v496_v35 = vld [vmem:[#allocation5 + $0xbe0] sm:$0xff]  ;;  %v2033_v43 = vpack.c.bf16 %v242_v31, %v238_v30  ;;  %v246_v49 = vld [vmem:[#allocation5 + $0x410] sm:$0xff] }
  0xe2   :  { %1874 = vmatpush1.bf16.msra.mxu0 %v1873_v62  ;;  %v227_v62 = vld [vmem:[#allocation5 + $0x378] sm:$0xff]  ;;  %v1895_v6 = vpack.c.bf16 %v481_v0, %v477_v63  ;;  %v501_v40 = vld [vmem:[#allocation5 + $0xc08] sm:$0xff]  ;;  %v500_v47 = vld [vmem:[#allocation5 + $0xc00] sm:$0xff] }
  0xe3   :  { %1876 = vmatprep.subr.bf16.mxu0 %v1875_v3  ;;  %v2023_v3 = vpack.c.bf16 %v227_v62, %v223_v60  ;;  %v505_v42 = vld [vmem:[#allocation5 + $0xc28] sm:$0xff]  ;;  %v250_v50 = vld [vmem:[#allocation5 + $0x430] sm:$0xff]  ;;  %v508_v60 = vld [vmem:[#allocation5 + $0xc40] sm:$0xff] }
  0xe4   :  { %2006 = vmatpush1.bf16.msra.mxu1 %v2005_v8  ;;  %v231_v8 = vld [vmem:[#allocation5 + $0x398] sm:$0xff]  ;;  %v1907_v51 = vpack.c.bf16 %v505_v42, %v501_v40  ;;  %v513_v56 = vld [vmem:[#allocation5 + $0xc68] sm:$0xff]  ;;  %v2037_v57 = vpack.c.bf16 %v250_v50, %v246_v49  ;;  %v254_v62 = vld [vmem:[#allocation5 + $0x450] sm:$0xff] }
  0xe5   :  { %2008 = vmatprep.subr.bf16.mxu1 %v2007_v10  ;;  %v485_v10 = vld [vmem:[#allocation5 + $0xb88] sm:$0xff]  ;;  %v258_v63 = vld [vmem:[#allocation5 + $0x470] sm:$0xff]  ;;  %v524_v20 = vld [vmem:[#allocation5 + $0xcc0] sm:$0xff] }
  0xe6   :  { %1878 = vmatpush1.bf16.msra.mxu0 %v1877_v9  ;;  %v235_v9 = vld [vmem:[#allocation5 + $0x3b8] sm:$0xff]  ;;  %v1899_v19 = vpack.c.bf16 %v489_v12, %v485_v10  ;;  %v517_v4 = vld [vmem:[#allocation5 + $0xc88] sm:$0xff]  ;;  %v2041_v5 = vpack.c.bf16 %v258_v63, %v254_v62  ;;  %v266_v10 = vld [vmem:[#allocation5 + $0x4b0] sm:$0xff] }
  0xe7   :  { %1880 = vmatprep.subr.bf16.mxu0 %v1879_v15  ;;  %v2027_v15 = vpack.c.bf16 %v235_v9, %v231_v8  ;;  %v521_v33 = vld [vmem:[#allocation5 + $0xca8] sm:$0xff]  ;;  %v516_v8 = vld [vmem:[#allocation5 + $0xc80] sm:$0xff]  ;;  %v262_v9 = vld [vmem:[#allocation5 + $0x490] sm:$0xff] }
  0xe8   :  { %2010 = vmatpush1.bf16.msra.mxu1 %v2009_v21  ;;  %v239_v21 = vld [vmem:[#allocation5 + $0x3d8] sm:$0xff]  ;;  %v1915_v12 = vpack.c.bf16 %v521_v33, %v517_v4  ;;  %v529_v16 = vld [vmem:[#allocation5 + $0xce8] sm:$0xff]  ;;  %v2045_v17 = vpack.c.bf16 %v266_v10, %v262_v9  ;;  %v540_v50 = vld [vmem:[#allocation5 + $0xd40] sm:$0xff] }
  0xe9   :  { %2012 = vmatprep.subr.bf16.mxu1 %v2011_v23  ;;  %v493_v23 = vld [vmem:[#allocation5 + $0xbc8] sm:$0xff]  ;;  %v287_v40 = vld [vmem:[#allocation5 + $0x558] sm:$0xff]  ;;  %v548_v63 = vld [vmem:[#allocation5 + $0xd80] sm:$0xff] }
  0xea   :  { %1882 = vmatpush1.bf16.msra.mxu0 %v1881_v22  ;;  %v243_v22 = vld [vmem:[#allocation5 + $0x3f8] sm:$0xff]  ;;  %v1903_v32 = vpack.c.bf16 %v497_v24, %v493_v23  ;;  %v528_v24 = vld [vmem:[#allocation5 + $0xce0] sm:$0xff] }
  0xeb   :  { %1884 = vmatprep.subr.bf16.mxu0 %v1883_v28  ;;  %v2031_v28 = vpack.c.bf16 %v243_v22, %v239_v21  ;;  %v270_v21 = vld [vmem:[#allocation5 + $0x4d0] sm:$0xff]  ;;  %v291_v42 = vld [vmem:[#allocation5 + $0x578] sm:$0xff]  ;;  %v556_v10 = vld [vmem:[#allocation5 + $0xdc0] sm:$0xff] }
  0xec   :  { %2014 = vmatpush1.bf16.msra.mxu1 %v2013_v36  ;;  %v247_v36 = vld [vmem:[#allocation5 + $0x418] sm:$0xff]  ;;  %v274_v22 = vld [vmem:[#allocation5 + $0x4f0] sm:$0xff]  ;;  %v2055_v49 = vpack.c.bf16 %v291_v42, %v287_v40  ;;  %v576_v42 = vld [vmem:[#allocation5 + $0xe60] sm:$0xff] }
  0xed   :  { %2016 = vmatprep.subr.bf16.mxu1 %v2015_v39  ;;  %v669_v39 = vcombine.high %v2773_v38, %v2773_v38  ;;  %v509_v38 = vld [vmem:[#allocation5 + $0xc48] sm:$0xff]  ;;  %v2049_v30 = vpack.c.bf16 %v274_v22, %v270_v21  ;;  %v303_v4 = vld [vmem:[#allocation5 + $0x5d8] sm:$0xff]  ;;  %v564_v22 = vld [vmem:[#allocation5 + $0xe00] sm:$0xff] }
  0xee   :  { %1886 = vmatpush1.bf16.msra.mxu0 %v1885_v37  ;;  %v251_v37 = vld [vmem:[#allocation5 + $0x438] sm:$0xff]  ;;  %v1911_v0 = vpack.c.bf16 %v513_v56, %v509_v38 }
  0xef   :  { %1888 = vmatprep.subr.bf16.mxu0 %v1887_v45  ;;  %v1905_v45 = vpack.c.bf16 %v496_v35, %v492_v29  ;;  %v2035_v46 = vpack.c.bf16 %v251_v37, %v247_v36  ;;  %v2787_v55 = vrot.slane %v669_v39, %v2752_v11  ;;  %v537_v29 = vld [vmem:[#allocation5 + $0xd28] sm:$0xff]  ;;  %v278_v35 = vld [vmem:[#allocation5 + $0x510] sm:$0xff]  ;;  %v536_v39 = vld [vmem:[#allocation5 + $0xd20] sm:$0xff] }
  0xf0   :  { %2018 = vmatpush1.bf16.msra.mxu1 %v2017_v52  ;;  %v504_v52 = vld [vmem:[#allocation5 + $0xc20] sm:$0xff]  ;;  %v282_v36 = vld [vmem:[#allocation5 + $0x530] sm:$0xff]  ;;  %v295_v38 = vld [vmem:[#allocation5 + $0x598] sm:$0xff] }
  0xf1   :  { %2020 = vmatprep.subr.bf16.mxu1 %v2019_v54  ;;  %v259_v54 = vld [vmem:[#allocation5 + $0x478] sm:$0xff]  ;;  %v2791_v11 = vcombine.high %v2787_v55, %v2787_v55 }
  0xf2   :  { %1890 = vmatpush1.bf16.msra.mxu0 %v1889_v53  ;;  %v255_v53 = vld [vmem:[#allocation5 + $0x458] sm:$0xff] }
  0xf3   :  { %1892 = vmatprep.subr.bf16.mxu0 %v1891_v58  ;;  %v1909_v58 = vpack.c.bf16 %v504_v52, %v500_v47  ;;  %v2039_v59 = vpack.c.bf16 %v259_v54, %v255_v53  ;;  %v290_v52 = vld [vmem:[#allocation5 + $0x570] sm:$0xff]  ;;  %v544_v54 = vld [vmem:[#allocation5 + $0xd60] sm:$0xff]  ;;  %v299_v56 = vld [vmem:[#allocation5 + $0x5b8] sm:$0xff] }
  0xf4   :  { %2022 = vmatpush1.bf16.msra.mxu1 %v2021_v1  ;;  %v512_v1 = vld [vmem:[#allocation5 + $0xc60] sm:$0xff]  ;;  %v2059_v62 = vpack.c.bf16 %v299_v56, %v295_v38  ;;  %v307_v33 = vld [vmem:[#allocation5 + $0x5f8] sm:$0xff] }
  0xf5   :  { %2024 = vmatprep.subr.bf16.mxu1 %v2023_v3  ;;  %v267_v3 = vld [vmem:[#allocation5 + $0x4b8] sm:$0xff]  ;;  %v2063_v9 = vpack.c.bf16 %v307_v33, %v303_v4  ;;  %v584_v56 = vld [vmem:[#allocation5 + $0xea0] sm:$0xff] }
  0xf6   :  { %1894 = vmatpush1.bf16.msra.mxu0 %v1893_v2  ;;  %v263_v2 = vld [vmem:[#allocation5 + $0x498] sm:$0xff]  ;;  %v592_v33 = vld [vmem:[#allocation5 + $0xee0] sm:$0xff] }
  0xf7   :  { %1896 = vmatprep.subr.bf16.mxu0 %v1895_v6  ;;  %v1913_v6 = vpack.c.bf16 %v512_v1, %v508_v60  ;;  %v2043_v7 = vpack.c.bf16 %v267_v3, %v263_v2  ;;  %v1929_v60 = vpack.c.bf16 %v544_v54, %v540_v50  ;;  %v298_v1 = vld [vmem:[#allocation5 + $0x5b0] sm:$0xff]  ;;  %v552_v3 = vld [vmem:[#allocation5 + $0xda0] sm:$0xff] }
  0xf8   :  { %2026 = vmatpush1.bf16.msra.mxu1 %v2025_v13  ;;  %v520_v13 = vld [vmem:[#allocation5 + $0xca0] sm:$0xff]  ;;  %v330_v54 = vld [vmem:[#allocation5 + $0x6b0] sm:$0xff] }
  0xf9   :  { %2028 = vmatprep.subr.bf16.mxu1 %v2027_v15  ;;  %v275_v15 = vld [vmem:[#allocation5 + $0x4f8] sm:$0xff]  ;;  %v1917_v18 = vpack.c.bf16 %v520_v13, %v516_v8  ;;  %v1933_v8 = vpack.c.bf16 %v552_v3, %v548_v63  ;;  %v306_v13 = vld [vmem:[#allocation5 + $0x5f0] sm:$0xff] }
  0xfa   :  { %1898 = vmatpush1.bf16.msra.mxu0 %v1897_v14  ;;  %v271_v14 = vld [vmem:[#allocation5 + $0x4d8] sm:$0xff]  ;;  %v338_v3 = vld [vmem:[#allocation5 + $0x6f0] sm:$0xff] }
  0xfb   :  { %1900 = vmatprep.subr.bf16.mxu0 %v1899_v19  ;;  %v2047_v19 = vpack.c.bf16 %v275_v15, %v271_v14  ;;  %v560_v15 = vld [vmem:[#allocation5 + $0xde0] sm:$0xff] }
  0xfc   :  { %2030 = vmatpush1.bf16.msra.mxu1 %v2029_v26  ;;  %v279_v26 = vld [vmem:[#allocation5 + $0x518] sm:$0xff] }
  0xfd   :  { %2032 = vmatprep.subr.bf16.mxu1 %v2031_v28  ;;  %v533_v28 = vld [vmem:[#allocation5 + $0xd08] sm:$0xff] }
  0xfe   :  { %1902 = vmatpush1.bf16.msra.mxu0 %v1901_v27  ;;  %v283_v27 = vld [vmem:[#allocation5 + $0x538] sm:$0xff]  ;;  %v1923_v37 = vpack.c.bf16 %v537_v29, %v533_v28 }
  0xff   :  { %1904 = vmatprep.subr.bf16.mxu0 %v1903_v32  ;;  %v2051_v31 = vpack.c.bf16 %v283_v27, %v279_v26  ;;  %v532_v32 = vld [vmem:[#allocation5 + $0xd00] sm:$0xff]  ;;  %v319_v28 = vld [vmem:[#allocation5 + $0x658] sm:$0xff] }
 0x100   :  { %2034 = vmatpush1.bf16.msra.mxu1 %v2033_v43  ;;  %v541_v43 = vld [vmem:[#allocation5 + $0xd48] sm:$0xff]  ;;  %v1925_v47 = vpack.c.bf16 %v536_v39, %v532_v32  ;;  %v568_v27 = vld [vmem:[#allocation5 + $0xe20] sm:$0xff]  ;;  %v323_v29 = vld [vmem:[#allocation5 + $0x678] sm:$0xff] }
 0x101   :  { %2036 = vmatprep.subr.bf16.mxu1 %v2035_v46  ;;  %v2053_v46 = vpack.c.bf16 %v282_v36, %v278_v35  ;;  %v1941_v32 = vpack.c.bf16 %v568_v27, %v564_v22  ;;  %v2071_v35 = vpack.c.bf16 %v323_v29, %v319_v28  ;;  %v572_v36 = vld [vmem:[#allocation5 + $0xe40] sm:$0xff]  ;;  %v322_v39 = vld [vmem:[#allocation5 + $0x670] sm:$0xff] }
 0x102   :  { %1906 = vmatpush1.bf16.msra.mxu0 %v1905_v45  ;;  %v545_v45 = vld [vmem:[#allocation5 + $0xd68] sm:$0xff]  ;;  %v1945_v50 = vpack.c.bf16 %v576_v42, %v572_v36  ;;  %v354_v27 = vld [vmem:[#allocation5 + $0x770] sm:$0xff]  ;;  %v608_v29 = vld [vmem:[#allocation5 + $0xf60] sm:$0xff] }
 0x103   :  { %1908 = vmatprep.subr.bf16.mxu0 %v1907_v51  ;;  %1043 = vmatmul.mubr.f32.vlgmr.msra.gmra.mrb[2].mxu1 %v2755_v25  ;;  %v525_v25 = vld [vmem:[#allocation5 + $0xcc8] sm:$0xff]  ;;  %v286_v51 = vld [vmem:[#allocation5 + $0x550] sm:$0xff]  ;;  %v1927_v53 = vpack.c.bf16 %v545_v45, %v541_v43  ;;  %v327_v43 = vld [vmem:[#allocation5 + $0x698] sm:$0xff] }
 0x104   :  { %2038 = vmatpush1.bf16.msra.mxu1 %v2037_v57  ;;  %1113 = vmatprep.mubr.f32.mxu1 %v2767_v41  ;;  %v1919_v23 = vpack.c.bf16 %v529_v16, %v525_v25  ;;  %v1921_v41 = vpack.c.bf16 %v528_v24, %v524_v20  ;;  %v549_v57 = vld [vmem:[#allocation5 + $0xd88] sm:$0xff]  ;;  %v311_v25 = vld [vmem:[#allocation5 + $0x618] sm:$0xff]  ;;  %v1937_v20 = vpack.c.bf16 %v560_v15, %v556_v10  ;;  %v314_v24 = vld [vmem:[#allocation5 + $0x630] sm:$0xff] }
 0x105   :  { %901 = vmatmul.mubr.f32.vlgmr.msra.gmra.mrb[0].mxu0 %v2777_v44  ;;  %2040 = vmatprep.subr.bf16.mxu1 %v2039_v59  ;;  %v2057_v59 = vpack.c.bf16 %v290_v52, %v286_v51  ;;  %v315_v16 = vld [vmem:[#allocation5 + $0x638] sm:$0xff]  ;;  %v580_v52 = vld [vmem:[#allocation5 + $0xe80] sm:$0xff]  ;;  %v346_v15 = vld [vmem:[#allocation5 + $0x730] sm:$0xff] }
 0x106   :  { %1910 = vmatpush1.bf16.msra.mxu0 %v1909_v58  ;;  %971 = vmatprep.mubr.f32.mxu0 %v2791_v11  ;;  %v553_v58 = vld [vmem:[#allocation5 + $0xda8] sm:$0xff]  ;;  %v2067_v21 = vpack.c.bf16 %v315_v16, %v311_v25  ;;  %v331_v45 = vld [vmem:[#allocation5 + $0x6b8] sm:$0xff]  ;;  %v1949_v63 = vpack.c.bf16 %v584_v56, %v580_v52  ;;  %v600_v16 = vld [vmem:[#allocation5 + $0xf20] sm:$0xff] }
 0x107   :  { %1912 = vmatprep.subr.bf16.mxu0 %v1911_v0  ;;  %v294_v0 = vld [vmem:[#allocation5 + $0x590] sm:$0xff]  ;;  %v1931_v2 = vpack.c.bf16 %v553_v58, %v549_v57  ;;  %v2075_v51 = vpack.c.bf16 %v331_v45, %v327_v43  ;;  %v335_v57 = vld [vmem:[#allocation5 + $0x6d8] sm:$0xff]  ;;  %v616_v45 = vld [vmem:[#allocation5 + $0xfa0] sm:$0xff] }
 0x108   :  { %2042 = vmatpush1.bf16.msra.mxu1 %v2041_v5  ;;  %v557_v5 = vld [vmem:[#allocation5 + $0xdc8] sm:$0xff]  ;;  %v339_v58 = vld [vmem:[#allocation5 + $0x6f8] sm:$0xff]  ;;  %v362_v42 = vld [vmem:[#allocation5 + $0x7b0] sm:$0xff] }
 0x109   :  { %2044 = vmatprep.subr.bf16.mxu1 %v2043_v7  ;;  %v2061_v7 = vpack.c.bf16 %v298_v1, %v294_v0  ;;  %v2079_v0 = vpack.c.bf16 %v339_v58, %v335_v57  ;;  %v588_v1 = vld [vmem:[#allocation5 + $0xec0] sm:$0xff]  ;;  %v370_v56 = vld [vmem:[#allocation5 + $0x7f0] sm:$0xff] }
 0x10a   :  { %1914 = vmatpush1.bf16.msra.mxu0 %v1913_v6  ;;  %v561_v6 = vld [vmem:[#allocation5 + $0xde8] sm:$0xff]  ;;  %v1953_v10 = vpack.c.bf16 %v592_v33, %v588_v1  ;;  %v624_v58 = vld [vmem:[#allocation5 + $0xfe0] sm:$0xff]  ;;  %v374_v1 = vld [vmem:[#allocation5 + $0x810] sm:$0xff] }
 0x10b   :  { %1916 = vmatprep.subr.bf16.mxu0 %v1915_v12  ;;  %v302_v12 = vld [vmem:[#allocation5 + $0x5d0] sm:$0xff]  ;;  %v1935_v14 = vpack.c.bf16 %v561_v6, %v557_v5  ;;  %v343_v5 = vld [vmem:[#allocation5 + $0x718] sm:$0xff] }
 0x10c   :  { %2046 = vmatpush1.bf16.msra.mxu1 %v2045_v17  ;;  %v565_v17 = vld [vmem:[#allocation5 + $0xe08] sm:$0xff]  ;;  %v347_v6 = vld [vmem:[#allocation5 + $0x738] sm:$0xff] }
 0x10d   :  { %2048 = vmatprep.subr.bf16.mxu1 %v2047_v19  ;;  %v2065_v19 = vpack.c.bf16 %v306_v13, %v302_v12  ;;  %v2083_v12 = vpack.c.bf16 %v347_v6, %v343_v5  ;;  %v596_v13 = vld [vmem:[#allocation5 + $0xf00] sm:$0xff]  ;;  %v382_v6 = vld [vmem:[#allocation5 + $0x850] sm:$0xff] }
 0x10e   :  { %1918 = vmatpush1.bf16.msra.mxu0 %v1917_v18  ;;  %v569_v18 = vld [vmem:[#allocation5 + $0xe28] sm:$0xff]  ;;  %v1957_v22 = vpack.c.bf16 %v600_v16, %v596_v13 }
 0x10f   :  { %1920 = vmatprep.subr.bf16.mxu0 %v1919_v23  ;;  %v310_v23 = vld [vmem:[#allocation5 + $0x610] sm:$0xff]  ;;  %v1939_v26 = vpack.c.bf16 %v569_v18, %v565_v17  ;;  %v351_v17 = vld [vmem:[#allocation5 + $0x758] sm:$0xff] }
 0x110   :  { %2050 = vmatpush1.bf16.msra.mxu1 %v2049_v30  ;;  %v573_v30 = vld [vmem:[#allocation5 + $0xe48] sm:$0xff]  ;;  %v355_v18 = vld [vmem:[#allocation5 + $0x778] sm:$0xff] }
 0x111   :  { %2052 = vmatprep.subr.bf16.mxu1 %v2051_v31  ;;  %v2069_v31 = vpack.c.bf16 %v314_v24, %v310_v23  ;;  %v2087_v23 = vpack.c.bf16 %v355_v18, %v351_v17  ;;  %v604_v24 = vld [vmem:[#allocation5 + $0xf40] sm:$0xff]  ;;  %v1267_v13 = vld [vmem:[#allocation8 + $0x8] sm:$0xff]  ;;  %v1268_v17 = vld [vmem:[#allocation8 + $0x10] sm:$0xff] }
 0x112   :  { %1922 = vmatpush1.bf16.msra.mxu0 %v1921_v41  ;;  %v577_v41 = vld [vmem:[#allocation5 + $0xe68] sm:$0xff]  ;;  %v1961_v36 = vpack.c.bf16 %v608_v29, %v604_v24 }
 0x113   :  { %1924 = vmatprep.subr.bf16.mxu0 %v1923_v37  ;;  %v318_v37 = vld [vmem:[#allocation5 + $0x650] sm:$0xff]  ;;  %v1943_v40 = vpack.c.bf16 %v577_v41, %v573_v30  ;;  %v359_v30 = vld [vmem:[#allocation5 + $0x798] sm:$0xff] }
 0x114   :  { %2054 = vmatpush1.bf16.msra.mxu1 %v2053_v46  ;;  %v581_v46 = vld [vmem:[#allocation5 + $0xe88] sm:$0xff]  ;;  %v363_v41 = vld [vmem:[#allocation5 + $0x7b8] sm:$0xff] }
 0x115   :  { %2056 = vmatprep.subr.bf16.mxu1 %v2055_v49  ;;  %v2073_v49 = vpack.c.bf16 %v322_v39, %v318_v37  ;;  %v2091_v37 = vpack.c.bf16 %v363_v41, %v359_v30  ;;  %v612_v39 = vld [vmem:[#allocation5 + $0xf80] sm:$0xff]  ;;  %v1271_v18 = vld [vmem:[#allocation8 + $0x28] sm:$0xff] }
 0x116   :  { %1926 = vmatpush1.bf16.msra.mxu0 %v1925_v47  ;;  %v585_v47 = vld [vmem:[#allocation5 + $0xea8] sm:$0xff]  ;;  %v1965_v52 = vpack.c.bf16 %v616_v45, %v612_v39  ;;  %v398_v41 = vld [vmem:[#allocation5 + $0x8d0] sm:$0xff]  ;;  %v1281_v39 = vld [vmem:[#allocation8 + $0x78] sm:$0xff] }
 0x117   :  { %1928 = vmatprep.subr.bf16.mxu0 %v1927_v53  ;;  %v326_v53 = vld [vmem:[#allocation5 + $0x690] sm:$0xff]  ;;  %v1947_v38 = vpack.c.bf16 %v585_v47, %v581_v46  ;;  %v367_v46 = vld [vmem:[#allocation5 + $0x7d8] sm:$0xff] }
 0x118   :  { %2058 = vmatpush1.bf16.msra.mxu1 %v2057_v59  ;;  %v589_v59 = vld [vmem:[#allocation5 + $0xec8] sm:$0xff]  ;;  %v371_v47 = vld [vmem:[#allocation5 + $0x7f8] sm:$0xff] }
 0x119   :  { %2060 = vmatprep.subr.bf16.mxu1 %v2059_v62  ;;  %v2077_v62 = vpack.c.bf16 %v330_v54, %v326_v53  ;;  %v2095_v53 = vpack.c.bf16 %v371_v47, %v367_v46  ;;  %v620_v54 = vld [vmem:[#allocation5 + $0xfc0] sm:$0xff]  ;;  %v1275_v24 = vld [vmem:[#allocation8 + $0x48] sm:$0xff] }
 0x11a   :  { %1930 = vmatpush1.bf16.msra.mxu0 %v1929_v60  ;;  %v593_v60 = vld [vmem:[#allocation5 + $0xee8] sm:$0xff]  ;;  %v406_v46 = vld [vmem:[#allocation5 + $0x910] sm:$0xff] }
 0x11b   :  { %1932 = vmatprep.subr.bf16.mxu0 %v1931_v2  ;;  %v334_v2 = vld [vmem:[#allocation5 + $0x6d0] sm:$0xff]  ;;  %v1951_v4 = vpack.c.bf16 %v593_v60, %v589_v59  ;;  %v375_v59 = vld [vmem:[#allocation5 + $0x818] sm:$0xff] }
 0x11c   :  { %2062 = vmatpush1.bf16.msra.mxu1 %v2061_v7  ;;  %v597_v7 = vld [vmem:[#allocation5 + $0xf08] sm:$0xff]  ;;  %v379_v60 = vld [vmem:[#allocation5 + $0x838] sm:$0xff] }
 0x11d   :  { %2064 = vmatprep.subr.bf16.mxu1 %v2063_v9  ;;  %v2081_v9 = vpack.c.bf16 %v338_v3, %v334_v2  ;;  %v378_v2 = vld [vmem:[#allocation5 + $0x830] sm:$0xff]  ;;  %v383_v3 = vld [vmem:[#allocation5 + $0x858] sm:$0xff] }
 0x11e   :  { %1934 = vmatpush1.bf16.msra.mxu0 %v1933_v8  ;;  %v601_v8 = vld [vmem:[#allocation5 + $0xf28] sm:$0xff]  ;;  %v2101_v33 = vpack.c.bf16 %v378_v2, %v374_v1  ;;  %v418_v1 = vld [vmem:[#allocation5 + $0x970] sm:$0xff] }
 0x11f   :  { %1936 = vmatprep.subr.bf16.mxu0 %v1935_v14  ;;  %v342_v14 = vld [vmem:[#allocation5 + $0x710] sm:$0xff]  ;;  %v1955_v25 = vpack.c.bf16 %v601_v8, %v597_v7  ;;  %v391_v8 = vld [vmem:[#allocation5 + $0x898] sm:$0xff] }
 0x120   :  { %2066 = vmatpush1.bf16.msra.mxu1 %v2065_v19  ;;  %v605_v19 = vld [vmem:[#allocation5 + $0xf48] sm:$0xff]  ;;  %v386_v7 = vld [vmem:[#allocation5 + $0x870] sm:$0xff] }
 0x121   :  { %2068 = vmatprep.subr.bf16.mxu1 %v2067_v21  ;;  %v2085_v21 = vpack.c.bf16 %v346_v15, %v342_v14  ;;  %v1269_v14 = vld [vmem:[#allocation8 + $0x18] sm:$0xff]  ;;  %v1266_v15 = vld [vmem:[#allocation8] sm:$0xff]  ;;  %v1287_v2 = vld [vmem:[#allocation8 + $0xa8] sm:$0xff] }
 0x122   :  { %1938 = vmatpush1.bf16.msra.mxu0 %v1937_v20  ;;  %v609_v20 = vld [vmem:[#allocation5 + $0xf68] sm:$0xff]  ;;  %v2227_v16 = vpack.c.bf16 %v1269_v14, %v1267_v13  ;;  %v426_v13 = vld [vmem:[#allocation5 + $0x9b0] sm:$0xff] }
 0x123   :  { %1940 = vmatprep.subr.bf16.mxu0 %v1939_v26  ;;  %v350_v26 = vld [vmem:[#allocation5 + $0x750] sm:$0xff]  ;;  %v1959_v28 = vpack.c.bf16 %v609_v20, %v605_v19  ;;  %v1273_v19 = vld [vmem:[#allocation8 + $0x38] sm:$0xff] }
 0x124   :  { %2070 = vmatpush1.bf16.msra.mxu1 %v2069_v31  ;;  %v613_v31 = vld [vmem:[#allocation5 + $0xf88] sm:$0xff] }
 0x125   :  { %2072 = vmatprep.subr.bf16.mxu1 %v2071_v35  ;;  %v2089_v35 = vpack.c.bf16 %v354_v27, %v350_v26  ;;  %v399_v26 = vld [vmem:[#allocation5 + $0x8d8] sm:$0xff]  ;;  %v1291_v14 = vld [vmem:[#allocation8 + $0xc8] sm:$0xff] }
 0x126   :  { %1942 = vmatpush1.bf16.msra.mxu0 %v1941_v32  ;;  %v617_v32 = vld [vmem:[#allocation5 + $0xfa8] sm:$0xff]  ;;  %v403_v27 = vld [vmem:[#allocation5 + $0x8f8] sm:$0xff] }
 0x127   :  { %1944 = vmatprep.subr.bf16.mxu0 %v1943_v40  ;;  %v358_v40 = vld [vmem:[#allocation5 + $0x790] sm:$0xff]  ;;  %v1963_v43 = vpack.c.bf16 %v617_v32, %v613_v31  ;;  %v1274_v32 = vld [vmem:[#allocation8 + $0x40] sm:$0xff] }
 0x128   :  { %2074 = vmatpush1.bf16.msra.mxu1 %v2073_v49  ;;  %v621_v49 = vld [vmem:[#allocation5 + $0xfc8] sm:$0xff] }
 0x129   :  { %2076 = vmatprep.subr.bf16.mxu1 %v2075_v51  ;;  %v2093_v51 = vpack.c.bf16 %v362_v42, %v358_v40  ;;  %v407_v40 = vld [vmem:[#allocation5 + $0x918] sm:$0xff] }
 0x12a   :  { %1946 = vmatpush1.bf16.msra.mxu0 %v1945_v50  ;;  %v625_v50 = vld [vmem:[#allocation5 + $0xfe8] sm:$0xff]  ;;  %v411_v42 = vld [vmem:[#allocation5 + $0x938] sm:$0xff] }
 0x12b   :  { %1948 = vmatprep.subr.bf16.mxu0 %v1947_v38  ;;  %v366_v38 = vld [vmem:[#allocation5 + $0x7d0] sm:$0xff]  ;;  %v1967_v57 = vpack.c.bf16 %v625_v50, %v621_v49  ;;  %v1278_v49 = vld [vmem:[#allocation8 + $0x60] sm:$0xff] }
 0x12c   :  { %2078 = vmatpush1.bf16.msra.mxu1 %v2077_v62  ;;  %v2097_v62 = vpack.c.bf16 %v370_v56, %v366_v38  ;;  %v1280_v50 = vld [vmem:[#allocation8 + $0x70] sm:$0xff] }
 0x12d   :  { %2080 = vmatprep.subr.bf16.mxu1 %v2079_v0  ;;  %v2099_v0 = vpack.c.bf16 %v379_v60, %v375_v59  ;;  %v415_v38 = vld [vmem:[#allocation5 + $0x958] sm:$0xff]  ;;  %v414_v59 = vld [vmem:[#allocation5 + $0x950] sm:$0xff] }
 0x12e   :  { %1950 = vmatpush1.bf16.msra.mxu0 %v1949_v63  ;;  %v1969_v63 = vpack.c.bf16 %v624_v58, %v620_v54  ;;  %v1285_v54 = vld [vmem:[#allocation8 + $0x98] sm:$0xff] }
 0x12f   :  { %1952 = vmatprep.subr.bf16.mxu0 %v1951_v4  ;;  %v387_v4 = vld [vmem:[#allocation5 + $0x878] sm:$0xff] }
 0x130   :  { %2082 = vmatpush1.bf16.msra.mxu1 %v2081_v9  ;;  %v2103_v5 = vpack.c.bf16 %v387_v4, %v383_v3  ;;  %v395_v9 = vld [vmem:[#allocation5 + $0x8b8] sm:$0xff] }
 0x131   :  { %2084 = vmatprep.subr.bf16.mxu1 %v2083_v12  ;;  %v394_v12 = vld [vmem:[#allocation5 + $0x8b0] sm:$0xff]  ;;  %v2107_v20 = vpack.c.bf16 %v395_v9, %v391_v8  ;;  %v419_v56 = vld [vmem:[#allocation5 + $0x978] sm:$0xff]  ;;  %v1286_v9 = vld [vmem:[#allocation8 + $0xa0] sm:$0xff] }
 0x132   :  { %1954 = vmatpush1.bf16.msra.mxu0 %v1953_v10  ;;  %v390_v10 = vld [vmem:[#allocation5 + $0x890] sm:$0xff]  ;;  %v1289_v3 = vld [vmem:[#allocation8 + $0xb8] sm:$0xff] }
 0x133   :  { %1956 = vmatprep.subr.bf16.mxu0 %v1955_v25  ;;  %v2105_v25 = vpack.c.bf16 %v386_v7, %v382_v6  ;;  %v2109_v30 = vpack.c.bf16 %v394_v12, %v390_v10  ;;  %v423_v4 = vld [vmem:[#allocation5 + $0x998] sm:$0xff]  ;;  %v2121_v6 = vpack.c.bf16 %v418_v1, %v414_v59  ;;  %v422_v7 = vld [vmem:[#allocation5 + $0x990] sm:$0xff]  ;;  %v2247_v8 = vpack.c.bf16 %v1289_v3, %v1287_v2 }
 0x134   :  { %2086 = vmatpush1.bf16.msra.mxu1 %v2085_v21  ;;  %v2229_v21 = vpack.c.bf16 %v1268_v17, %v1266_v15  ;;  %v1288_v10 = vld [vmem:[#allocation8 + $0xb0] sm:$0xff]  ;;  %v1293_v15 = vld [vmem:[#allocation8 + $0xd8] sm:$0xff]  ;;  %v1307_v2 = vld [vmem:[#allocation8 + $0x148] sm:$0xff] }
 0x135   :  { %2088 = vmatprep.subr.bf16.mxu1 %v2087_v23  ;;  %v1272_v23 = vld [vmem:[#allocation8 + $0x30] sm:$0xff]  ;;  %v2249_v17 = vpack.c.bf16 %v1288_v10, %v1286_v9  ;;  %v1309_v3 = vld [vmem:[#allocation8 + $0x158] sm:$0xff]  ;;  %v1306_v9 = vld [vmem:[#allocation8 + $0x140] sm:$0xff] }
 0x136   :  { %1958 = vmatpush1.bf16.msra.mxu0 %v1957_v22  ;;  %v2231_v22 = vpack.c.bf16 %v1273_v19, %v1271_v18  ;;  %v2125_v18 = vpack.c.bf16 %v426_v13, %v422_v7  ;;  %v430_v19 = vld [vmem:[#allocation5 + $0x9d0] sm:$0xff] }
 0x137   :  { %1960 = vmatprep.subr.bf16.mxu0 %v1959_v28  ;;  %v1277_v28 = vld [vmem:[#allocation8 + $0x58] sm:$0xff]  ;;  %v454_v59 = vld [vmem:[#allocation5 + $0xa90] sm:$0xff] }
 0x138   :  { %2090 = vmatpush1.bf16.msra.mxu1 %v2089_v35  ;;  %v2235_v31 = vpack.c.bf16 %v1277_v28, %v1275_v24  ;;  %v1276_v35 = vld [vmem:[#allocation8 + $0x50] sm:$0xff]  ;;  %v1295_v24 = vld [vmem:[#allocation8 + $0xe8] sm:$0xff] }
 0x139   :  { %2092 = vmatprep.subr.bf16.mxu1 %v2091_v37  ;;  %v1279_v37 = vld [vmem:[#allocation8 + $0x68] sm:$0xff]  ;;  %v443_v28 = vld [vmem:[#allocation5 + $0xa38] sm:$0xff] }
 0x13a   :  { %1962 = vmatpush1.bf16.msra.mxu0 %v1961_v36  ;;  %v402_v36 = vld [vmem:[#allocation5 + $0x8f0] sm:$0xff]  ;;  %v2239_v47 = vpack.c.bf16 %v1281_v39, %v1279_v37  ;;  %v1301_v39 = vld [vmem:[#allocation8 + $0x118] sm:$0xff] }
 0x13b   :  { %1964 = vmatprep.subr.bf16.mxu0 %v1963_v43  ;;  %v2237_v43 = vpack.c.bf16 %v1276_v35, %v1274_v32  ;;  %v2113_v45 = vpack.c.bf16 %v402_v36, %v398_v41  ;;  %v438_v41 = vld [vmem:[#allocation5 + $0xa10] sm:$0xff]  ;;  %v1294_v32 = vld [vmem:[#allocation8 + $0xe0] sm:$0xff] }
 0x13c   :  { %2094 = vmatpush1.bf16.msra.mxu1 %v2093_v51  ;;  %v2115_v51 = vpack.c.bf16 %v411_v42, %v407_v40  ;;  %v1296_v35 = vld [vmem:[#allocation8 + $0xf0] sm:$0xff]  ;;  %v1299_v37 = vld [vmem:[#allocation8 + $0x108] sm:$0xff] }
 0x13d   :  { %2096 = vmatprep.subr.bf16.mxu1 %v2095_v53  ;;  %v1283_v53 = vld [vmem:[#allocation8 + $0x88] sm:$0xff]  ;;  %v447_v40 = vld [vmem:[#allocation5 + $0xa58] sm:$0xff] }
 0x13e   :  { %1966 = vmatpush1.bf16.msra.mxu0 %v1965_v52  ;;  %v410_v52 = vld [vmem:[#allocation5 + $0x930] sm:$0xff]  ;;  %v2243_v60 = vpack.c.bf16 %v1285_v54, %v1283_v53  ;;  %v451_v42 = vld [vmem:[#allocation5 + $0xa78] sm:$0xff] }
 0x13f   :  { %1968 = vmatprep.subr.bf16.mxu0 %v1967_v57  ;;  %v2241_v57 = vpack.c.bf16 %v1280_v50, %v1278_v49  ;;  %v2117_v58 = vpack.c.bf16 %v410_v52, %v406_v46  ;;  %v442_v36 = vld [vmem:[#allocation5 + $0xa30] sm:$0xff]  ;;  %v1298_v49 = vld [vmem:[#allocation8 + $0x100] sm:$0xff]  ;;  %v1305_v54 = vld [vmem:[#allocation8 + $0x138] sm:$0xff] }
 0x140   :  { %2098 = vmatpush1.bf16.msra.mxu1 %v2097_v62  ;;  %v1282_v62 = vld [vmem:[#allocation8 + $0x80] sm:$0xff]  ;;  %v446_v46 = vld [vmem:[#allocation5 + $0xa50] sm:$0xff] }
 0x141   :  { %2100 = vmatprep.subr.bf16.mxu1 %v2099_v0  ;;  %v2119_v0 = vpack.c.bf16 %v419_v56, %v415_v38  ;;  %v1300_v50 = vld [vmem:[#allocation8 + $0x110] sm:$0xff]  ;;  %v1303_v53 = vld [vmem:[#allocation8 + $0x128] sm:$0xff] }
 0x142   :  { %1970 = vmatpush1.bf16.msra.mxu0 %v1969_v63  ;;  %v1284_v63 = vld [vmem:[#allocation8 + $0x90] sm:$0xff] }
 0x143   :  { %1114 = vmatmul.mubr.f32.vlgmr.msra.gmra.mrb[2].mxu1 %v2762_v34  ;;  %v1270_v34 = vld [vmem:[#allocation8 + $0x20] sm:$0xff]  ;;  %2228 = vmatprep.subr.bf16.mxu0 %v2227_v16  ;;  %v435_v16 = vld [vmem:[#allocation5 + $0x9f8] sm:$0xff]  ;;  %v450_v52 = vld [vmem:[#allocation5 + $0xa70] sm:$0xff] }
 0x144   :  { %2102 = vmatpush1.bf16.msra.mxu1 %v2101_v33  ;;  %1184 = vmatprep.mubr.f32.mxu1 %v2781_v48  ;;  %v2233_v29 = vpack.c.bf16 %v1272_v23, %v1270_v34  ;;  %v2111_v48 = vpack.c.bf16 %v403_v27, %v399_v26  ;;  %v427_v33 = vld [vmem:[#allocation5 + $0x9b8] sm:$0xff]  ;;  %v434_v23 = vld [vmem:[#allocation5 + $0x9f0] sm:$0xff] }
 0x145   :  { %972 = vmatmul.mubr.f32.vlgmr.msra.gmra.mrb[0].mxu0 %v2787_v55  ;;  %2104 = vmatprep.subr.bf16.mxu1 %v2103_v5  ;;  %v2245_v5 = vpack.c.bf16 %v1284_v63, %v1282_v62  ;;  %v2123_v12 = vpack.c.bf16 %v427_v33, %v423_v4  ;;  %v1297_v26 = vld [vmem:[#allocation8 + $0xf8] sm:$0xff]  ;;  %v1302_v62 = vld [vmem:[#allocation8 + $0x120] sm:$0xff]  ;;  %v1304_v63 = vld [vmem:[#allocation8 + $0x130] sm:$0xff] }
 0x146   :  { %2230 = vmatpush1.bf16.msra.mxu0 %v2229_v21  ;;  %v1290_v21 = vld [vmem:[#allocation8 + $0xc0] sm:$0xff]  ;;  %v439_v27 = vld [vmem:[#allocation5 + $0xa18] sm:$0xff]  ;;  %v458_v1 = vld [vmem:[#allocation5 + $0xab0] sm:$0xff] }
 0x147   :  { %2232 = vmatprep.subr.bf16.mxu0 %v2231_v22  ;;  %v1292_v22 = vld [vmem:[#allocation8 + $0xd0] sm:$0xff] }
 0x148   :  { %2106 = vmatpush1.bf16.msra.mxu1 %v2105_v25  ;;  %v431_v25 = vld [vmem:[#allocation5 + $0x9d8] sm:$0xff]  ;;  %v462_v7 = vld [vmem:[#allocation5 + $0xad0] sm:$0xff] }
 0x149   :  { %2108 = vmatprep.subr.bf16.mxu1 %v2107_v20  ;;  %v2251_v20 = vpack.c.bf16 %v1293_v15, %v1291_v14  ;;  %v2127_v34 = vpack.c.bf16 %v435_v16, %v431_v25  ;;  %v455_v38 = vld [vmem:[#allocation5 + $0xa98] sm:$0xff]  ;;  %v466_v13 = vld [vmem:[#allocation5 + $0xaf0] sm:$0xff] }
 0x14a   :  { %2234 = vmatpush1.bf16.msra.mxu0 %v2233_v29  ;;  %v2253_v29 = vpack.c.bf16 %v1292_v22, %v1290_v21  ;;  %v459_v56 = vld [vmem:[#allocation5 + $0xab8] sm:$0xff]  ;;  %v1311_v14 = vld [vmem:[#allocation8 + $0x168] sm:$0xff]  ;;  %v1310_v21 = vld [vmem:[#allocation8 + $0x160] sm:$0xff] }
 0x14b   :  { %2236 = vmatprep.subr.bf16.mxu0 %v2235_v31  ;;  %v2255_v31 = vpack.c.bf16 %v1297_v26, %v1295_v24  ;;  %v463_v4 = vld [vmem:[#allocation5 + $0xad8] sm:$0xff]  ;;  %v1315_v24 = vld [vmem:[#allocation8 + $0x188] sm:$0xff] }
 0x14c   :  { %2110 = vmatpush1.bf16.msra.mxu1 %v2109_v30  ;;  %v2129_v30 = vpack.c.bf16 %v434_v23, %v430_v19  ;;  %v467_v33 = vld [vmem:[#allocation5 + $0xaf8] sm:$0xff]  ;;  %v470_v19 = vld [vmem:[#allocation5 + $0xb10] sm:$0xff] }
 0x14d   :  { %2112 = vmatprep.subr.bf16.mxu1 %v2111_v48  ;;  %v2131_v48 = vpack.c.bf16 %v443_v28, %v439_v27  ;;  %v1308_v10 = vld [vmem:[#allocation8 + $0x150] sm:$0xff]  ;;  %v1313_v15 = vld [vmem:[#allocation8 + $0x178] sm:$0xff] }
 0x14e   :  { %2238 = vmatpush1.bf16.msra.mxu0 %v2237_v43  ;;  %v2257_v43 = vpack.c.bf16 %v1296_v35, %v1294_v32  ;;  %v471_v25 = vld [vmem:[#allocation5 + $0xb18] sm:$0xff]  ;;  %v474_v23 = vld [vmem:[#allocation5 + $0xb30] sm:$0xff]  ;;  %v1314_v32 = vld [vmem:[#allocation8 + $0x180] sm:$0xff] }
 0x14f   :  { %2240 = vmatprep.subr.bf16.mxu0 %v2239_v47  ;;  %v2259_v47 = vpack.c.bf16 %v1301_v39, %v1299_v37  ;;  %v475_v16 = vld [vmem:[#allocation5 + $0xb38] sm:$0xff]  ;;  %v1319_v37 = vld [vmem:[#allocation8 + $0x1a8] sm:$0xff] }
 0x150   :  { %2114 = vmatpush1.bf16.msra.mxu1 %v2113_v45  ;;  %v2133_v45 = vpack.c.bf16 %v442_v36, %v438_v41  ;;  %v1312_v22 = vld [vmem:[#allocation8 + $0x170] sm:$0xff]  ;;  %v1317_v26 = vld [vmem:[#allocation8 + $0x198] sm:$0xff] }
 0x151   :  { %2116 = vmatprep.subr.bf16.mxu1 %v2115_v51  ;;  %v2135_v51 = vpack.c.bf16 %v451_v42, %v447_v40  ;;  %v479_v27 = vld [vmem:[#allocation5 + $0xb58] sm:$0xff]  ;;  %v478_v41 = vld [vmem:[#allocation5 + $0xb50] sm:$0xff] }
 0x152   :  { %2242 = vmatpush1.bf16.msra.mxu0 %v2241_v57  ;;  %v2261_v57 = vpack.c.bf16 %v1300_v50, %v1298_v49  ;;  %v483_v28 = vld [vmem:[#allocation5 + $0xb78] sm:$0xff]  ;;  %v482_v36 = vld [vmem:[#allocation5 + $0xb70] sm:$0xff]  ;;  %v1318_v49 = vld [vmem:[#allocation8 + $0x1a0] sm:$0xff] }
 0x153   :  { %2244 = vmatprep.subr.bf16.mxu0 %v2243_v60  ;;  %v2263_v60 = vpack.c.bf16 %v1305_v54, %v1303_v53  ;;  %v1316_v35 = vld [vmem:[#allocation8 + $0x190] sm:$0xff]  ;;  %v1321_v39 = vld [vmem:[#allocation8 + $0x1b8] sm:$0xff]  ;;  %v1323_v53 = vld [vmem:[#allocation8 + $0x1c8] sm:$0xff] }
 0x154   :  { %2118 = vmatpush1.bf16.msra.mxu1 %v2117_v58  ;;  %v2137_v58 = vpack.c.bf16 %v450_v52, %v446_v46  ;;  %v487_v40 = vld [vmem:[#allocation5 + $0xb98] sm:$0xff]  ;;  %v486_v46 = vld [vmem:[#allocation5 + $0xb90] sm:$0xff] }
 0x155   :  { %2120 = vmatprep.subr.bf16.mxu1 %v2119_v0  ;;  %v2139_v0 = vpack.c.bf16 %v459_v56, %v455_v38  ;;  %v491_v42 = vld [vmem:[#allocation5 + $0xbb8] sm:$0xff]  ;;  %v490_v52 = vld [vmem:[#allocation5 + $0xbb0] sm:$0xff] }
 0x156   :  { %2246 = vmatpush1.bf16.msra.mxu0 %v2245_v5  ;;  %v2265_v5 = vpack.c.bf16 %v1304_v63, %v1302_v62  ;;  %v1320_v50 = vld [vmem:[#allocation8 + $0x1b0] sm:$0xff]  ;;  %v1325_v54 = vld [vmem:[#allocation8 + $0x1d8] sm:$0xff] }
 0x157   :  { %2248 = vmatprep.subr.bf16.mxu0 %v2247_v8  ;;  %v2267_v8 = vpack.c.bf16 %v1309_v3, %v1307_v2  ;;  %v495_v38 = vld [vmem:[#allocation5 + $0xbd8] sm:$0xff]  ;;  %v494_v62 = vld [vmem:[#allocation5 + $0xbd0] sm:$0xff] }
 0x158   :  { %2122 = vmatpush1.bf16.msra.mxu1 %v2121_v6  ;;  %v2141_v6 = vpack.c.bf16 %v458_v1, %v454_v59  ;;  %v499_v56 = vld [vmem:[#allocation5 + $0xbf8] sm:$0xff]  ;;  %v2283_v59 = vpack.c.bf16 %v1325_v54, %v1323_v53  ;;  %v498_v63 = vld [vmem:[#allocation5 + $0xbf0] sm:$0xff]  ;;  %v1326_v54 = vld [vmem:[#allocation8 + $0x1e0] sm:$0xff] }
 0x159   :  { %2124 = vmatprep.subr.bf16.mxu1 %v2123_v12  ;;  %v2143_v12 = vpack.c.bf16 %v467_v33, %v463_v4  ;;  %v507_v1 = vld [vmem:[#allocation5 + $0xc38] sm:$0xff]  ;;  %v2161_v2 = vpack.c.bf16 %v498_v63, %v494_v62  ;;  %v502_v4 = vld [vmem:[#allocation5 + $0xc10] sm:$0xff] }
 0x15a   :  { %2250 = vmatpush1.bf16.msra.mxu0 %v2249_v17  ;;  %v2269_v17 = vpack.c.bf16 %v1308_v10, %v1306_v9  ;;  %v506_v33 = vld [vmem:[#allocation5 + $0xc30] sm:$0xff]  ;;  %v571_v62 = vld [vmem:[#allocation5 + $0xe38] sm:$0xff] }
 0x15b   :  { %2252 = vmatprep.subr.bf16.mxu0 %v2251_v20  ;;  %v2271_v20 = vpack.c.bf16 %v1313_v15, %v1311_v14  ;;  %v510_v9 = vld [vmem:[#allocation5 + $0xc50] sm:$0xff] }
 0x15c   :  { %2126 = vmatpush1.bf16.msra.mxu1 %v2125_v18  ;;  %v2145_v18 = vpack.c.bf16 %v466_v13, %v462_v7  ;;  %v2165_v7 = vpack.c.bf16 %v506_v33, %v502_v4  ;;  %v514_v10 = vld [vmem:[#allocation5 + $0xc70] sm:$0xff]  ;;  %v523_v13 = vld [vmem:[#allocation5 + $0xcb8] sm:$0xff] }
 0x15d   :  { %2128 = vmatprep.subr.bf16.mxu1 %v2127_v34  ;;  %v2147_v34 = vpack.c.bf16 %v475_v16, %v471_v25  ;;  %v2169_v14 = vpack.c.bf16 %v514_v10, %v510_v9  ;;  %v518_v25 = vld [vmem:[#allocation5 + $0xc90] sm:$0xff]  ;;  %v579_v4 = vld [vmem:[#allocation5 + $0xe78] sm:$0xff] }
 0x15e   :  { %2254 = vmatpush1.bf16.msra.mxu0 %v2253_v29  ;;  %v2273_v29 = vpack.c.bf16 %v1312_v22, %v1310_v21  ;;  %v522_v16 = vld [vmem:[#allocation5 + $0xcb0] sm:$0xff] }
 0x15f   :  { %2256 = vmatprep.subr.bf16.mxu0 %v2255_v31  ;;  %v2275_v31 = vpack.c.bf16 %v1317_v26, %v1315_v24  ;;  %v526_v21 = vld [vmem:[#allocation5 + $0xcd0] sm:$0xff] }
 0x160   :  { %2130 = vmatpush1.bf16.msra.mxu1 %v2129_v30  ;;  %v2149_v30 = vpack.c.bf16 %v474_v23, %v470_v19  ;;  %v2173_v19 = vpack.c.bf16 %v522_v16, %v518_v25  ;;  %v530_v22 = vld [vmem:[#allocation5 + $0xcf0] sm:$0xff]  ;;  %v539_v23 = vld [vmem:[#allocation5 + $0xd38] sm:$0xff] }
 0x161   :  { %2132 = vmatprep.subr.bf16.mxu1 %v2131_v48  ;;  %v2151_v48 = vpack.c.bf16 %v483_v28, %v479_v27  ;;  %v534_v26 = vld [vmem:[#allocation5 + $0xd10] sm:$0xff]  ;;  %v543_v27 = vld [vmem:[#allocation5 + $0xd58] sm:$0xff] }
 0x162   :  { %2258 = vmatpush1.bf16.msra.mxu0 %v2257_v43  ;;  %v2277_v43 = vpack.c.bf16 %v1316_v35, %v1314_v32  ;;  %v547_v28 = vld [vmem:[#allocation5 + $0xd78] sm:$0xff]  ;;  %v1331_v33 = vld [vmem:[#allocation8 + $0x208] sm:$0xff] }
 0x163   :  { %2260 = vmatprep.subr.bf16.mxu0 %v2259_v47  ;;  %v2279_v47 = vpack.c.bf16 %v1321_v39, %v1319_v37  ;;  %v551_v32 = vld [vmem:[#allocation5 + $0xd98] sm:$0xff]  ;;  %v574_v9 = vld [vmem:[#allocation5 + $0xe50] sm:$0xff] }
 0x164   :  { %2134 = vmatpush1.bf16.msra.mxu1 %v2133_v45  ;;  %v2153_v45 = vpack.c.bf16 %v482_v36, %v478_v41  ;;  %v542_v41 = vld [vmem:[#allocation5 + $0xd50] sm:$0xff]  ;;  %v555_v35 = vld [vmem:[#allocation5 + $0xdb8] sm:$0xff]  ;;  %v1322_v36 = vld [vmem:[#allocation8 + $0x1c0] sm:$0xff] }
 0x165   :  { %2136 = vmatprep.subr.bf16.mxu1 %v2135_v51  ;;  %v2155_v51 = vpack.c.bf16 %v491_v42, %v487_v40  ;;  %v1324_v37 = vld [vmem:[#allocation8 + $0x1d0] sm:$0xff]  ;;  %v2187_v39 = vpack.c.bf16 %v555_v35, %v551_v32 }
 0x166   :  { %2262 = vmatpush1.bf16.msra.mxu0 %v2261_v57  ;;  %v2281_v57 = vpack.c.bf16 %v1320_v50, %v1318_v49  ;;  %v550_v40 = vld [vmem:[#allocation5 + $0xd90] sm:$0xff]  ;;  %v615_v32 = vld [vmem:[#allocation5 + $0xf98] sm:$0xff] }
 0x167   :  { %2264 = vmatprep.subr.bf16.mxu0 %v2263_v60  ;;  %v2159_v60 = vpack.c.bf16 %v499_v56, %v495_v38  ;;  %v554_v42 = vld [vmem:[#allocation5 + $0xdb0] sm:$0xff]  ;;  %v619_v35 = vld [vmem:[#allocation5 + $0xfb8] sm:$0xff] }
 0x168   :  { %2138 = vmatpush1.bf16.msra.mxu1 %v2137_v58  ;;  %v2157_v58 = vpack.c.bf16 %v490_v52, %v486_v46  ;;  %v559_v46 = vld [vmem:[#allocation5 + $0xdd8] sm:$0xff]  ;;  %v1327_v50 = vld [vmem:[#allocation8 + $0x1e8] sm:$0xff]  ;;  %v2189_v52 = vpack.c.bf16 %v554_v42, %v550_v40 }
 0x169   :  { %2140 = vmatprep.subr.bf16.mxu1 %v2139_v0  ;;  %v503_v0 = vld [vmem:[#allocation5 + $0xc18] sm:$0xff]  ;;  %v578_v10 = vld [vmem:[#allocation5 + $0xe70] sm:$0xff] }
 0x16a   :  { %2266 = vmatpush1.bf16.msra.mxu0 %v2265_v5  ;;  %v2163_v3 = vpack.c.bf16 %v507_v1, %v503_v0  ;;  %v511_v5 = vld [vmem:[#allocation5 + $0xc58] sm:$0xff]  ;;  %v566_v1 = vld [vmem:[#allocation5 + $0xe10] sm:$0xff] }
 0x16b   :  { %2268 = vmatprep.subr.bf16.mxu0 %v2267_v8  ;;  %v1328_v38 = vld [vmem:[#allocation8 + $0x1f0] sm:$0xff] }
 0x16c   :  { %2142 = vmatpush1.bf16.msra.mxu1 %v2141_v6  ;;  %v515_v6 = vld [vmem:[#allocation5 + $0xc78] sm:$0xff]  ;;  %v582_v25 = vld [vmem:[#allocation5 + $0xe90] sm:$0xff] }
 0x16d   :  { %2144 = vmatprep.subr.bf16.mxu1 %v2143_v12  ;;  %v2167_v8 = vpack.c.bf16 %v515_v6, %v511_v5  ;;  %v519_v12 = vld [vmem:[#allocation5 + $0xc98] sm:$0xff]  ;;  %v586_v16 = vld [vmem:[#allocation5 + $0xeb0] sm:$0xff] }
 0x16e   :  { %2270 = vmatpush1.bf16.msra.mxu0 %v2269_v17  ;;  %v2171_v15 = vpack.c.bf16 %v523_v13, %v519_v12  ;;  %v527_v17 = vld [vmem:[#allocation5 + $0xcd8] sm:$0xff] }
 0x16f   :  { %2272 = vmatprep.subr.bf16.mxu0 %v2271_v20  ;;  %v1333_v5 = vld [vmem:[#allocation8 + $0x218] sm:$0xff] }
 0x170   :  { %2146 = vmatpush1.bf16.msra.mxu1 %v2145_v18  ;;  %v531_v18 = vld [vmem:[#allocation5 + $0xcf8] sm:$0xff]  ;;  %v2291_v6 = vpack.c.bf16 %v1333_v5, %v1331_v33  ;;  %v1334_v33 = vld [vmem:[#allocation8 + $0x220] sm:$0xff] }
 0x171   :  { %2148 = vmatprep.subr.bf16.mxu1 %v2147_v34  ;;  %v2175_v20 = vpack.c.bf16 %v531_v18, %v527_v17  ;;  %v535_v34 = vld [vmem:[#allocation5 + $0xd18] sm:$0xff] }
 0x172   :  { %2274 = vmatpush1.bf16.msra.mxu0 %v2273_v29  ;;  %v2179_v24 = vpack.c.bf16 %v539_v23, %v535_v34  ;;  %v583_v12 = vld [vmem:[#allocation5 + $0xe98] sm:$0xff] }
 0x173   :  { %2276 = vmatprep.subr.bf16.mxu0 %v2275_v31  ;;  %v546_v31 = vld [vmem:[#allocation5 + $0xd70] sm:$0xff]  ;;  %v587_v13 = vld [vmem:[#allocation5 + $0xeb8] sm:$0xff] }
 0x174   :  { %2150 = vmatpush1.bf16.msra.mxu1 %v2149_v30  ;;  %v2183_v30 = vpack.c.bf16 %v547_v28, %v543_v27  ;;  %v591_v17 = vld [vmem:[#allocation5 + $0xed8] sm:$0xff] }
 0x175   :  { %2152 = vmatprep.subr.bf16.mxu1 %v2151_v48  ;;  %v2185_v48 = vpack.c.bf16 %v546_v31, %v542_v41  ;;  %v595_v18 = vld [vmem:[#allocation5 + $0xef8] sm:$0xff]  ;;  %v606_v41 = vld [vmem:[#allocation5 + $0xf50] sm:$0xff] }
 0x176   :  { %2278 = vmatpush1.bf16.msra.mxu0 %v2277_v43  ;;  %v2285_v43 = vpack.c.bf16 %v1324_v37, %v1322_v36  ;;  %v599_v34 = vld [vmem:[#allocation5 + $0xf18] sm:$0xff]  ;;  %v610_v31 = vld [vmem:[#allocation5 + $0xf70] sm:$0xff]  ;;  %v2219_v36 = vpack.c.bf16 %v619_v35, %v615_v32  ;;  %v1342_v32 = vld [vmem:[#allocation8 + $0x260] sm:$0xff] }
 0x177   :  { %2280 = vmatprep.subr.bf16.mxu0 %v2279_v47  ;;  %v563_v47 = vld [vmem:[#allocation5 + $0xdf8] sm:$0xff]  ;;  %v614_v37 = vld [vmem:[#allocation5 + $0xf90] sm:$0xff] }
 0x178   :  { %2154 = vmatpush1.bf16.msra.mxu1 %v2153_v45  ;;  %v2191_v56 = vpack.c.bf16 %v563_v47, %v559_v46  ;;  %v603_v23 = vld [vmem:[#allocation5 + $0xf38] sm:$0xff]  ;;  %v622_v47 = vld [vmem:[#allocation5 + $0xfd0] sm:$0xff] }
 0x179   :  { %2156 = vmatprep.subr.bf16.mxu1 %v2155_v51  ;;  %v1329_v51 = vld [vmem:[#allocation8 + $0x1f8] sm:$0xff]  ;;  %v1344_v35 = vld [vmem:[#allocation8 + $0x270] sm:$0xff] }
 0x17a   :  { %2282 = vmatpush1.bf16.msra.mxu0 %v2281_v57  ;;  %v2287_v53 = vpack.c.bf16 %v1329_v51, %v1327_v50  ;;  %v558_v57 = vld [vmem:[#allocation5 + $0xdd0] sm:$0xff]  ;;  %v607_v27 = vld [vmem:[#allocation5 + $0xf58] sm:$0xff] }
 0x17b   :  { %2284 = vmatprep.subr.bf16.mxu0 %v2283_v59  ;;  %v2289_v59 = vpack.c.bf16 %v1328_v38, %v1326_v54  ;;  %v611_v28 = vld [vmem:[#allocation5 + $0xf78] sm:$0xff]  ;;  %v626_v50 = vld [vmem:[#allocation5 + $0xff0] sm:$0xff]  ;;  %v636_v54 = vsub.s32 1, %v2749_v61 }
 0x17c   :  { %2158 = vmatpush1.bf16.msra.mxu1 %v2157_v58  ;;  %v562_v58 = vld [vmem:[#allocation5 + $0xdf0] sm:$0xff]  ;;  %v623_v40 = vld [vmem:[#allocation5 + $0xfd8] sm:$0xff]  ;;  %v2225_v51 = vpack.c.bf16 %v626_v50, %v622_v47 }
 0x17d   :  { %2160 = vmatprep.subr.bf16.mxu1 %v2159_v60  ;;  %v567_v60 = vld [vmem:[#allocation5 + $0xe18] sm:$0xff]  ;;  %v2193_v63 = vpack.c.bf16 %v562_v58, %v558_v57  ;;  %v1575_v47 = vld [vmem:[#allocation11 + $0xc8] sm:$0xff] }
 0x17e   :  { %2286 = vmatpush1.bf16.msra.mxu0 %v2285_v43  ;;  %v2195_v0 = vpack.c.bf16 %v571_v62, %v567_v60  ;;  %v627_v42 = vld [vmem:[#allocation5 + $0xff8] sm:$0xff]  ;;  %v1330_v62 = vld [vmem:[#allocation8 + $0x200] sm:$0xff] }
 0x17f   :  { %2288 = vmatprep.subr.bf16.mxu0 %v2287_v53  ;;  %v2223_v46 = vpack.c.bf16 %v627_v42, %v623_v40  ;;  %v2808_v53 = vld [vmem:[#allocation7] sm:$0xf]  ;;  %v1556_v40 = vld [vmem:[#allocation11 + $0x30] sm:$0xff] }
 0x180   :  { %2162 = vmatpush1.bf16.msra.mxu1 %v2161_v2  ;;  %v570_v2 = vld [vmem:[#allocation5 + $0xe30] sm:$0xff]  ;;  %v1557_v42 = vld [vmem:[#allocation11 + $0x38] sm:$0xff] }
 0x181   :  { %2164 = vmatprep.subr.bf16.mxu1 %v2163_v3  ;;  %v575_v3 = vld [vmem:[#allocation5 + $0xe58] sm:$0xff] }
 0x182   :  { %2290 = vmatpush1.bf16.msra.mxu0 %v2289_v59 }
 0x183   :  { %1185 = vmatmul.mubr.f32.vlgmr.msra.gmra.mrb[2].mxu1 %v2777_v44  ;;  %v2177_v44 = vpack.c.bf16 %v530_v22, %v526_v21  ;;  %2292 = vmatprep.subr.bf16.mxu0 %v2291_v6  ;;  %v590_v21 = vld [vmem:[#allocation5 + $0xed0] sm:$0xff] }
 0x184   :  { %2166 = vmatpush1.bf16.msra.mxu1 %v2165_v7  ;;  %1255 = vmatprep.mubr.f32.mxu1 %v2791_v11  ;;  %v538_v11 = vld [vmem:[#allocation5 + $0xd30] sm:$0xff]  ;;  %v2197_v7 = vpack.c.bf16 %v570_v2, %v566_v1  ;;  %v1337_v2 = vld [vmem:[#allocation8 + $0x238] sm:$0xff] }
 0x185   :  { %2168 = vmatprep.subr.bf16.mxu1 %v2167_v8  ;;  %v2181_v29 = vpack.c.bf16 %v538_v11, %v534_v26  ;;  %v2199_v8 = vpack.c.bf16 %v579_v4, %v575_v3  ;;  %v594_v22 = vld [vmem:[#allocation5 + $0xef0] sm:$0xff] }
 0x186   :  { %v598_v26 = vld [vmem:[#allocation5 + $0xf10] sm:$0xff] }
 0x187   :  { %v602_v11 = vld [vmem:[#allocation5 + $0xf30] sm:$0xff] }
 0x188   :  { %2170 = vmatpush1.bf16.msra.mxu1 %v2169_v14  ;;  %v2201_v14 = vpack.c.bf16 %v578_v10, %v574_v9  ;;  %v1335_v1 = vld [vmem:[#allocation8 + $0x228] sm:$0xff]  ;;  %v1341_v9 = vld [vmem:[#allocation8 + $0x258] sm:$0xff] }
 0x189   :  { %2172 = vmatprep.subr.bf16.mxu1 %v2171_v15  ;;  %v2203_v15 = vpack.c.bf16 %v587_v13, %v583_v12  ;;  %v2295_v6 = vpack.c.bf16 %v1337_v2, %v1335_v1  ;;  %v1567_v10 = vld [vmem:[#allocation11 + $0x88] sm:$0xff]  ;;  %v1350_v2 = vld [vmem:[#allocation8 + $0x2a0] sm:$0xff] }
 0x18a   :  { %v1551_v13 = vld [vmem:[#allocation11 + $0x8] sm:$0xff] }
 0x18c   :  { %2174 = vmatpush1.bf16.msra.mxu1 %v2173_v19  ;;  %v2205_v19 = vpack.c.bf16 %v586_v16, %v582_v25 }
 0x18d   :  { %2176 = vmatprep.subr.bf16.mxu1 %v2175_v20  ;;  %v2207_v20 = vpack.c.bf16 %v595_v18, %v591_v17  ;;  %v1552_v18 = vld [vmem:[#allocation11 + $0x10] sm:$0xff] }
 0x190   :  { %2178 = vmatpush1.bf16.msra.mxu1 %v2177_v44  ;;  %v2209_v44 = vpack.c.bf16 %v594_v22, %v590_v21  ;;  %v1338_v22 = vld [vmem:[#allocation8 + $0x240] sm:$0xff] }
 0x191   :  { %2180 = vmatprep.subr.bf16.mxu1 %v2179_v24  ;;  %v2211_v24 = vpack.c.bf16 %v603_v23, %v599_v34  ;;  %v1340_v34 = vld [vmem:[#allocation8 + $0x250] sm:$0xff] }
 0x192   :  { %v1571_v23 = vld [vmem:[#allocation11 + $0xa8] sm:$0xff] }
 0x194   :  { %2182 = vmatpush1.bf16.msra.mxu1 %v2181_v29  ;;  %v2213_v29 = vpack.c.bf16 %v602_v11, %v598_v26 }
 0x195   :  { %2184 = vmatprep.subr.bf16.mxu1 %v2183_v30  ;;  %v2215_v30 = vpack.c.bf16 %v611_v28, %v607_v27  ;;  %v1554_v27 = vld [vmem:[#allocation11 + $0x20] sm:$0xff]  ;;  %v1555_v28 = vld [vmem:[#allocation11 + $0x28] sm:$0xff] }
 0x196   :  { %v2802_v45 = vpop.f32.mrb[0].mxu1 }
 0x197   :  { %v2804_v49 = vpop.f32.mrb[1].mxu1 }
 0x198   :  { %2186 = vmatpush1.bf16.msra.mxu1 %v2185_v48  ;;  %v2217_v48 = vpack.c.bf16 %v610_v31, %v606_v41  ;;  %v1573_v41 = vld [vmem:[#allocation11 + $0xb8] sm:$0xff] }
 0x199   :  { %2188 = vmatprep.subr.bf16.mxu1 %v2187_v39  ;;  %v618_v39 = vld [vmem:[#allocation5 + $0xfb0] sm:$0xff] }
 0x19a   :  { %v2221_v43 = vpack.c.bf16 %v618_v39, %v614_v37  ;;  %v2365_v37 = vpack.c.bf16 %v1555_v28, %v1554_v27 }
 0x19c   :  { %2190 = vmatpush1.bf16.msra.mxu1 %v2189_v52  ;;  %v632_v52 = vsub.s32 0, %v2749_v61 }
 0x19d   :  { %2192 = vmatprep.subr.bf16.mxu1 %v2191_v56  ;;  %v637_v56 = vrot.slane %v2808_v53, %v636_v54 }
 0x19e   :  { %v633_v38 = vrot.slane %v2808_v53, %v632_v52 }
 0x19f   :  { %v763_v58 = vadd.f32 %v2804_v49, %v637_v56  ;;  %v1550_v49 = vld [vmem:[#allocation11] sm:$0xff] }
 0x1a0   :  { %2194 = vmatpush1.bf16.msra.mxu1 %v2193_v63  ;;  %v761_v57 = vadd.f32 %v2802_v45, %v633_v38  ;;  %v1332_v63 = vld [vmem:[#allocation8 + $0x210] sm:$0xff]  ;;  %v1566_v45 = vld [vmem:[#allocation11 + $0x80] sm:$0xff]  ;;  %v2357_v16 = vpack.c.bf16 %v1551_v13, %v1550_v49 }
 0x1a1   :  { %2196 = vmatprep.subr.bf16.mxu1 %v2195_v0  ;;  %v2293_v4 = vpack.c.bf16 %v1332_v63, %v1330_v62  ;;  %v2355_v12 = vpack.c.bf16 %v1567_v10, %v1566_v45  ;;  %v1348_v38 = vld [vmem:[#allocation8 + $0x290] sm:$0xff]  ;;  %v1351_v56 = vld [vmem:[#allocation8 + $0x2a8] sm:$0xff] }
 0x1a2   :  { %v1576_v63 = vld [vmem:[#allocation11 + $0xd0] sm:$0xff]  ;;  %v1578_v45 = vld [vmem:[#allocation11 + $0xe0] sm:$0xff]  ;;  %v1579_v10 = vld [vmem:[#allocation11 + $0xe8] sm:$0xff] }
 0x1a3   :  { %v1356_v13 = vld [vmem:[#allocation8 + $0x2d0] sm:$0xff] }
 0x1a4   :  { %2198 = vmatpush1.bf16.msra.mxu1 %v2197_v7  ;;  %v1336_v7 = vld [vmem:[#allocation8 + $0x230] sm:$0xff] }
 0x1a5   :  { %2200 = vmatprep.subr.bf16.mxu1 %v2199_v8  ;;  %v1339_v8 = vld [vmem:[#allocation8 + $0x248] sm:$0xff]  ;;  %v2297_v25 = vpack.c.bf16 %v1336_v7, %v1334_v33  ;;  %v1357_v33 = vld [vmem:[#allocation8 + $0x2d8] sm:$0xff] }
 0x1a6   :  { %v2299_v21 = vpack.c.bf16 %v1341_v9, %v1339_v8  ;;  %v1560_v7 = vld [vmem:[#allocation11 + $0x50] sm:$0xff]  ;;  %v1561_v8 = vld [vmem:[#allocation11 + $0x58] sm:$0xff] }
 0x1a8   :  { %2202 = vmatpush1.bf16.msra.mxu1 %v2201_v14  ;;  %v1568_v14 = vld [vmem:[#allocation11 + $0x90] sm:$0xff] }
 0x1a9   :  { %2204 = vmatprep.subr.bf16.mxu1 %v2203_v15  ;;  %v1569_v15 = vld [vmem:[#allocation11 + $0x98] sm:$0xff] }
 0x1aa   :  { %v2359_v17 = vpack.c.bf16 %v1569_v15, %v1568_v14  ;;  %v1359_v14 = vld [vmem:[#allocation8 + $0x2e8] sm:$0xff]  ;;  %v1361_v15 = vld [vmem:[#allocation8 + $0x2f8] sm:$0xff] }
 0x1ac   :  { %2206 = vmatpush1.bf16.msra.mxu1 %v2205_v19  ;;  %v1553_v19 = vld [vmem:[#allocation11 + $0x18] sm:$0xff] }
 0x1ad   :  { %2208 = vmatprep.subr.bf16.mxu1 %v2207_v20  ;;  %v1570_v20 = vld [vmem:[#allocation11 + $0xa0] sm:$0xff]  ;;  %v2361_v26 = vpack.c.bf16 %v1553_v19, %v1552_v18  ;;  %v2319_v18 = vpack.c.bf16 %v1361_v15, %v1359_v14 }
 0x1ae   :  { %v2363_v11 = vpack.c.bf16 %v1571_v23, %v1570_v20  ;;  %v1358_v19 = vld [vmem:[#allocation8 + $0x2e0] sm:$0xff]  ;;  %v1360_v20 = vld [vmem:[#allocation8 + $0x2f0] sm:$0xff] }
 0x1b0   :  { %2210 = vmatpush1.bf16.msra.mxu1 %v2209_v44  ;;  %v1343_v44 = vld [vmem:[#allocation8 + $0x268] sm:$0xff] }
 0x1b1   :  { %2212 = vmatprep.subr.bf16.mxu1 %v2211_v24  ;;  %v1345_v24 = vld [vmem:[#allocation8 + $0x278] sm:$0xff] }
 0x1b2   :  { %v2303_v31 = vpack.c.bf16 %v1345_v24, %v1343_v44  ;;  %v1362_v44 = vld [vmem:[#allocation8 + $0x300] sm:$0xff]  ;;  %v1364_v24 = vld [vmem:[#allocation8 + $0x310] sm:$0xff] }
 0x1b3   :  { %v2325_v27 = vpack.c.bf16 %v1364_v24, %v1362_v44  ;;  %v1564_v24 = vld [vmem:[#allocation11 + $0x70] sm:$0xff] }
 0x1b4   :  { %2214 = vmatpush1.bf16.msra.mxu1 %v2213_v29  ;;  %v2301_v29 = vpack.c.bf16 %v1340_v34, %v1338_v22  ;;  %v1365_v22 = vld [vmem:[#allocation8 + $0x318] sm:$0xff]  ;;  %v2321_v34 = vpack.c.bf16 %v1360_v20, %v1358_v19  ;;  %v1562_v20 = vld [vmem:[#allocation11 + $0x60] sm:$0xff] }
 0x1b5   :  { %2216 = vmatprep.subr.bf16.mxu1 %v2215_v30  ;;  %v1572_v30 = vld [vmem:[#allocation11 + $0xb0] sm:$0xff] }
 0x1b6   :  { %v2367_v39 = vpack.c.bf16 %v1573_v41, %v1572_v30  ;;  %v1368_v30 = vld [vmem:[#allocation8 + $0x330] sm:$0xff]  ;;  %v1371_v41 = vld [vmem:[#allocation8 + $0x348] sm:$0xff] }
 0x1b8   :  { %2218 = vmatpush1.bf16.msra.mxu1 %v2217_v48  ;;  %v1347_v48 = vld [vmem:[#allocation8 + $0x288] sm:$0xff] }
 0x1b9   :  { %2220 = vmatprep.subr.bf16.mxu1 %v2219_v36  ;;  %v1349_v36 = vld [vmem:[#allocation8 + $0x298] sm:$0xff] }
 0x1ba   :  { %v2307_v50 = vpack.c.bf16 %v1349_v36, %v1347_v48  ;;  %v1370_v48 = vld [vmem:[#allocation8 + $0x340] sm:$0xff]  ;;  %v1372_v36 = vld [vmem:[#allocation8 + $0x350] sm:$0xff] }
 0x1bc   :  { %2222 = vmatpush1.bf16.msra.mxu1 %v2221_v43  ;;  %v2305_v43 = vpack.c.bf16 %v1344_v35, %v1342_v32 }
 0x1bd   :  { %2224 = vmatprep.subr.bf16.mxu1 %v2223_v46  ;;  %v1574_v46 = vld [vmem:[#allocation11 + $0xc0] sm:$0xff] }
 0x1c0   :  { %2226 = vmatpush1.bf16.msra.mxu1 %v2225_v51  ;;  %v1346_v51 = vld [vmem:[#allocation8 + $0x280] sm:$0xff] }
 0x1c1   :  { %2356 = vmatprep.subr.bf16.mxu1 %v2355_v12  ;;  %v2309_v62 = vpack.c.bf16 %v1348_v38, %v1346_v51  ;;  %v1354_v12 = vld [vmem:[#allocation8 + $0x2c0] sm:$0xff] }
 0x1c3   :  { %1256 = vmatmul.mubr.f32.vlgmr.msra.gmra.mrb[2].mxu1 %v2787_v55 }
 0x1c4   :  { %2358 = vmatpush3.bf16.msra.mxu1 %v2357_v16  ;;  %v2379_v16 = vpack.c.bf16 %v1579_v10, %v1578_v45  ;;  %v1392_v45 = vld [vmem:[#allocation8 + $0x3f0] sm:$0xff] }
 0x1c5   :  { %2360 = vmatprep.subr.bf16.mxu1 %v2359_v17  ;;  %v2317_v17 = vpack.c.bf16 %v1356_v13, %v1354_v12  ;;  %v644_v12 = vsub.s32 3, %v2749_v61 }
 0x1c7   :  { %v645_v14 = vrot.slane %v2808_v53, %v644_v12 }
 0x1c8   :  { %2362 = vmatpush3.bf16.msra.mxu1 %v2361_v26  ;;  %v1367_v26 = vld [vmem:[#allocation8 + $0x328] sm:$0xff] }
 0x1c9   :  { %2364 = vmatprep.subr.bf16.mxu1 %v2363_v11  ;;  %v1369_v11 = vld [vmem:[#allocation8 + $0x338] sm:$0xff] }
 0x1ca   :  { %v2327_v28 = vpack.c.bf16 %v1369_v11, %v1367_v26  ;;  %v1565_v26 = vld [vmem:[#allocation11 + $0x78] sm:$0xff] }
 0x1cb   :  { %v2385_v11 = vpack.c.bf16 %v1565_v26, %v1564_v24 }
 0x1cc   :  { %2366 = vmatpush3.bf16.msra.mxu1 %v2365_v37  ;;  %v1375_v37 = vld [vmem:[#allocation8 + $0x368] sm:$0xff] }
 0x1cd   :  { %2368 = vmatprep.subr.bf16.mxu1 %v2367_v39  ;;  %v1377_v39 = vld [vmem:[#allocation8 + $0x378] sm:$0xff] }
 0x218   :  { %v973_v59 = vpop.f32.mrb[0].mxu0 }
 0x219   :  { %v2388_v55 = vadd.f32 %v973_v59, %v761_v57  ;;  %v975_v60 = vpop.f32.mrb[1].mxu0  ;;  %v1353_v57 = vld [vmem:[#allocation8 + $0x2b8] sm:$0xff]  ;;  %v2371_v59 = vpack.c.bf16 %v1575_v47, %v1574_v46  ;;  %v1376_v46 = vld [vmem:[#allocation8 + $0x370] sm:$0xff]  ;;  %v1379_v47 = vld [vmem:[#allocation8 + $0x388] sm:$0xff] }
 0x21a   :  { %v2390_v0 = vadd.f32 %v975_v60, %v763_v58  ;;  %v2369_v58 = vpack.c.bf16 %v1557_v42, %v1556_v40  ;;  %v1559_v60 = vld [vmem:[#allocation11 + $0x48] sm:$0xff]  ;;  %v2311_v1 = vpack.c.bf16 %v1353_v57, %v1351_v56  ;;  %v2333_v40 = vpack.c.bf16 %v1372_v36, %v1370_v48  ;;  %v1378_v56 = vld [vmem:[#allocation8 + $0x380] sm:$0xff] }
 0x21b   :  { %v1262_v5 = vmax.f32 %v2388_v55, 0.0  ;;  %v1558_v55 = vld [vmem:[#allocation11 + $0x40] sm:$0xff]  ;;  %v2335_v42 = vpack.c.bf16 %v1377_v39, %v1375_v37  ;;  %v1380_v57 = vld [vmem:[#allocation8 + $0x390] sm:$0xff] }
 0x21c   :  { %v1263_v3 = vmax.f32 %v2390_v0, 0.0  ;;  %v1577_v0 = vld [vmem:[#allocation11 + $0xd8] sm:$0xff]  ;;  %2370 = vmatpush3.bf16.msra.mxu1 %v2369_v58  ;;  %v1383_v58 = vld [vmem:[#allocation8 + $0x3a8] sm:$0xff]  ;;  %v1679_v36 = vld [vmem:[#allocation13] ss:$0 sm:$0xff] }
 0x21d   :  { %2372 = vmatprep.subr.bf16.mxu1 %v2371_v59  ;;  %v1385_v59 = vld [vmem:[#allocation8 + $0x3b8] sm:$0xff] }
 0x21e   :  { %1470 = vmatprep.mubr.f32.mxu0 %v1263_v3  ;;  %v1352_v3 = vld [vmem:[#allocation8 + $0x2b0] sm:$0xff] }
 0x21f   :  { %1471 = vmatmul.mubr.f32.vlgmr.msra.gmra.mrb[2].mxu0 %v1262_v5  ;;  %v2373_v5 = vpack.c.bf16 %v1559_v60, %v1558_v55  ;;  %v2313_v9 = vpack.c.bf16 %v1352_v3, %v1350_v2  ;;  %v2341_v55 = vpack.c.bf16 %v1380_v57, %v1378_v56  ;;  %v2343_v60 = vpack.c.bf16 %v1385_v59, %v1383_v58 }
 0x220   :  { %2294 = vmatpush1.bf16.msra.mxu0 %v2293_v4  ;;  %v1355_v4 = vld [vmem:[#allocation8 + $0x2c8] sm:$0xff] }
 0x221   :  { %2296 = vmatprep.subr.bf16.mxu0 %v2295_v6  ;;  %v2375_v6 = vpack.c.bf16 %v1577_v0, %v1576_v63  ;;  %v2315_v49 = vpack.c.bf16 %v1357_v33, %v1355_v4  ;;  %2374 = vmatpush3.bf16.msra.mxu1 %v2373_v5  ;;  %v1384_v63 = vld [vmem:[#allocation8 + $0x3b0] sm:$0xff]  ;;  %v1387_v0 = vld [vmem:[#allocation8 + $0x3c8] sm:$0xff]  ;;  %v1386_v4 = vld [vmem:[#allocation8 + $0x3c0] sm:$0xff] }
 0x222   :  { %v1388_v33 = vld [vmem:[#allocation8 + $0x3d0] sm:$0xff]  ;;  %v1391_v5 = vld [vmem:[#allocation8 + $0x3e8] sm:$0xff] }
 0x223   :  { %2376 = vmatprep.subr.bf16.mxu1 %v2375_v6  ;;  %v1393_v6 = vld [vmem:[#allocation8 + $0x3f8] sm:$0xff] }
 0x224   :  { %2298 = vmatpush1.bf16.msra.mxu0 %v2297_v25  ;;  %v2377_v25 = vpack.c.bf16 %v1561_v8, %v1560_v7  ;;  %v2349_v7 = vpack.c.bf16 %v1388_v33, %v1386_v4  ;;  %v2351_v8 = vpack.c.bf16 %v1393_v6, %v1391_v5 }
 0x225   :  { %2300 = vmatprep.subr.bf16.mxu0 %v2299_v21  ;;  %v1363_v21 = vld [vmem:[#allocation8 + $0x308] sm:$0xff] }
 0x226   :  { %2378 = vmatpush3.bf16.msra.mxu1 %v2377_v25  ;;  %v2323_v23 = vpack.c.bf16 %v1365_v22, %v1363_v21  ;;  %v1563_v21 = vld [vmem:[#allocation11 + $0x68] sm:$0xff] }
 0x227   :  { %2380 = vmatprep.subr.bf16.mxu1 %v2379_v16  ;;  %v2381_v22 = vpack.c.bf16 %v1563_v21, %v1562_v20 }
 0x228   :  { %2302 = vmatpush1.bf16.msra.mxu0 %v2301_v29  ;;  %v1366_v29 = vld [vmem:[#allocation8 + $0x320] sm:$0xff] }
 0x229   :  { %2304 = vmatprep.subr.bf16.mxu0 %v2303_v31  ;;  %v1373_v31 = vld [vmem:[#allocation8 + $0x358] sm:$0xff]  ;;  %v2329_v32 = vpack.c.bf16 %v1368_v30, %v1366_v29 }
 0x22a   :  { %v2331_v35 = vpack.c.bf16 %v1373_v31, %v1371_v41  ;;  %2382 = vmatpush3.bf16.msra.mxu1 %v2381_v22 }
 0x22c   :  { %2306 = vmatpush1.bf16.msra.mxu0 %v2305_v43  ;;  %v1374_v43 = vld [vmem:[#allocation8 + $0x360] sm:$0xff] }
 0x22d   :  { %2308 = vmatprep.subr.bf16.mxu0 %v2307_v50  ;;  %v1381_v50 = vld [vmem:[#allocation8 + $0x398] sm:$0xff]  ;;  %v2337_v51 = vpack.c.bf16 %v1376_v46, %v1374_v43 }
 0x22e   :  { %v2339_v38 = vpack.c.bf16 %v1381_v50, %v1379_v47 }
 0x230   :  { %2310 = vmatpush1.bf16.msra.mxu0 %v2309_v62  ;;  %v1382_v62 = vld [vmem:[#allocation8 + $0x3a0] sm:$0xff] }
 0x231   :  { %2312 = vmatprep.subr.bf16.mxu0 %v2311_v1  ;;  %v1389_v1 = vld [vmem:[#allocation8 + $0x3d8] sm:$0xff]  ;;  %v2345_v2 = vpack.c.bf16 %v1384_v63, %v1382_v62 }
 0x232   :  { %v2347_v3 = vpack.c.bf16 %v1389_v1, %v1387_v0 }
 0x234   :  { %2314 = vmatpush1.bf16.msra.mxu0 %v2313_v9  ;;  %v1390_v9 = vld [vmem:[#allocation8 + $0x3e0] sm:$0xff] }
 0x235   :  { %2316 = vmatprep.subr.bf16.mxu0 %v2315_v49  ;;  %v2353_v10 = vpack.c.bf16 %v1392_v45, %v1390_v9  ;;  %v640_v49 = vsub.s32 2, %v2749_v61 }
 0x237   :  { %v641_v13 = vrot.slane %v2808_v53, %v640_v49  ;;  %v1394_v53 = vld [vmem:[#allocation10] sm:$0x3] }
 0x238   :  { %2318 = vmatpush1.bf16.msra.mxu0 %v2317_v17 }
 0x239   :  { %2320 = vmatprep.subr.bf16.mxu0 %v2319_v18 }
 0x23c   :  { %2322 = vmatpush1.bf16.msra.mxu0 %v2321_v34  ;;  %v1580_v34 = vld [vmem:[#allocation11 + $0xf0] sm:$0xff] }
 0x23d   :  { %2324 = vmatprep.subr.bf16.mxu0 %v2323_v23  ;;  %v1581_v23 = vld [vmem:[#allocation11 + $0xf8] sm:$0xff] }
 0x23e   :  { %v2383_v44 = vpack.c.bf16 %v1581_v23, %v1580_v34 }
 0x240   :  { %2326 = vmatpush1.bf16.msra.mxu0 %v2325_v27  ;;  %2384 = vmatprep.subr.bf16.mxu1 %v2383_v44  ;;  %v1399_v27 = vrot.slane %v1394_v53, %v632_v52 }
 0x241   :  { %2328 = vmatprep.subr.bf16.mxu0 %v2327_v28  ;;  %2386 = vmatpush3.bf16.msra.mxu1 %v2385_v11  ;;  %v1403_v28 = vrot.slane %v1394_v53, %v636_v54 }
 0x244   :  { %2330 = vmatpush1.bf16.msra.mxu0 %v2329_v32 }
 0x245   :  { %2332 = vmatprep.subr.bf16.mxu0 %v2331_v35 }
 0x248   :  { %2334 = vmatpush1.bf16.msra.mxu0 %v2333_v40 }
 0x249   :  { %2336 = vmatprep.subr.bf16.mxu0 %v2335_v42 }
 0x24c   :  { %2338 = vmatpush1.bf16.msra.mxu0 %v2337_v51 }
 0x24d   :  { %2340 = vmatprep.subr.bf16.mxu0 %v2339_v38 }
 0x250   :  { %2342 = vmatpush1.bf16.msra.mxu0 %v2341_v55 }
 0x251   :  { %2344 = vmatprep.subr.bf16.mxu0 %v2343_v60 }
 0x254   :  { %2346 = vmatpush1.bf16.msra.mxu0 %v2345_v2 }
 0x255   :  { %2348 = vmatprep.subr.bf16.mxu0 %v2347_v3 }
 0x258   :  { %2350 = vmatpush1.bf16.msra.mxu0 %v2349_v7 }
 0x259   :  { %2352 = vmatprep.subr.bf16.mxu0 %v2351_v8 }
 0x25c   :  { %2354 = vmatpush1.bf16.msra.mxu0 %v2353_v10 }
 0x296   :  { %v1257_v15 = vpop.f32.mrb[2].mxu1 }
 0x297   :  { %v2391_v25 = vadd.f32 %v1257_v15, %v641_v13  ;;  %v1259_v16 = vpop.f32.mrb[3].mxu1 }
 0x298   :  { %v2392_v17 = vadd.f32 %v1259_v16, %v645_v14 }
 0x299   :  { %v1264_v19 = vmax.f32 %v2391_v25, 0.0 }
 0x29a   :  { %v1265_v18 = vmax.f32 %v2392_v17, 0.0 }
 0x29c   :  { %1541 = vmatprep.mubr.f32.mxu0 %v1265_v18 }
 0x29d   :  { %1542 = vmatmul.mubr.f32.vlgmr.msra.gmra.mrb[2].mxu0 %v1264_v19 }
 0x370   :  { %v1543_v29 = vpop.f32.mrb[2].mxu0 }
 0x371   :  { %v2393_v30 = vadd.f32 %v1543_v29, %v1399_v27  ;;  %v1545_v41 = vpop.f32.mrb[3].mxu0 }
 0x372   :  { %v2394_v31 = vadd.f32 %v1545_v41, %v1403_v28 }
 0x373   :  { %v1548_v35 = vmax.f32 %v2393_v30, 0.0 }
 0x374   :  { %v1549_v32 = vmax.f32 %v2394_v31, 0.0 }
 0x376   :  { %1653 = vmatprep.mubr.f32.mxu1 %v1549_v32 }
 0x377   :  { %1654 = vmatmul.mubr.f32.vlgmr.msra.gmra.mrb[4].mxu1 %v1548_v35 }
 0x44a   :  { %v1712_v48 = vpop.f32.mrb[4].mxu1 }
 0x44b   :  { %v1713_v37 = vpop.f32.mrb[5].mxu1 }
 0x44c   :  { %v1714_v39 = vadd.f32 %v1713_v37, %v1712_v48 }
 0x44e   :  { %v1656_v40 = vadd.f32 %v1714_v39, %v1679_v36 }
 0x450   :  { %1660 = vst.msk [vmem:[#allocation14] sm:$0x3] %vm1659_vm0, %v1656_v40 }
 0x451   :  { %2589 = shalt.err (!%p2586_p4)
}
 0x452   :  { %s2590_s15 = scalar_lea.hbm %s2846_s7, 32 }
 0x453   :  { %p2591_p5 = scmp.ne.s32.totalorder %s2846_s7, %s2590_s15  ;;  %p2594_p6 = scmp.lt.u32.totalorder %s2590_s15, %s2846_s7 }
 0x455   :  { %p2596_p7 = pnand %p2594_p6, %p2591_p5 }
 0x457   :  { %2599 = shalt.err (!%p2596_p7)
}
 0x458   :  { %1670 = dma.vmem_to_hbm [thread:$0]  %s1668_s13, 32, %s2846_s7, [#allocation4]  }
 0x459   :  { %2608 = dma.done.wait [#allocation4], 32  }
 0x45a   :  { %2609 = vsyncadd [#allocation4], 4294967264 }
 0x45b   :  { %1674 = vsyncpa [#allocation3], 1 }
 0x45c   :  { %1675 = vsyncpa [#allocation6], 1 }
 0x45d   :  { %1676 = vsyncpa [#allocation9], 1 }
 0x45e   :  { %1677 = vsyncpa [#allocation12], 1 }
 0x45f   :  { %1678 = vsyncpa [#allocation4], 1 }

</bundles_post_ra>
